<compile_context>
chip_gen: v6e
topology: v6e:2x2x1
jax: 0.10.0
libtpu: 0.0.40
codegen_flags: <defaults>
</compile_context>

<pallas_src>
import functools

import numpy as np
import jax
import jax.numpy as jnp
from jax.experimental import pallas as pl
from jax.experimental.pallas import tpu as pltpu

LANE = 128
_LAYER_KEYS = ("c1", "p1", "c2", "p2", "c3", "c4", "rec")


# ---------------------------------------------------------------------------
# Host-side operand construction (layout plumbing only — runs outside the kernel).
# Activation layout per sample:  X2[h, w*C + c] = x[c, h, w], lanes padded to 128k.
# ---------------------------------------------------------------------------
def _round_up(n, m):
    return ((n + m - 1) // m) * m


def _pad2d(m, rows, cols):
    return jnp.pad(m, ((0, rows - m.shape[0]), (0, cols - m.shape[1])))


def _conv_B_stack(weight, W_in, W_out, pad, k_in_pad, n_out_pad):
    """nn.Conv2d (stride 1) width/channel mixing, one (k_in_pad, n_out_pad) block per
    height tap di, stacked vertically (matches the kernel's im2row lane-concat order).
    weight: (Co, Ci, kh, kw)."""
    Co, Ci, kh, kw = weight.shape
    w_in, wo = np.arange(W_in), np.arange(W_out)
    dj = w_in[:, None] - wo[None, :] + pad                       # (Win, Wout)
    valid = (dj >= 0) & (dj < kw)
    djc = np.clip(dj, 0, kw - 1)
    mask = jnp.asarray(valid[:, :, None, None], jnp.float32)
    blocks = []
    for di in range(kh):
        wtap = jnp.transpose(weight[:, :, di, :], (2, 1, 0))     # (kw, Ci, Co)
        b4 = wtap[djc] * mask                                    # (Win, Wout, Ci, Co)
        B = jnp.transpose(b4, (0, 2, 1, 3)).reshape(W_in * Ci, W_out * Co)
        blocks.append(_pad2d(B, k_in_pad, n_out_pad))
    return jnp.concatenate(blocks, axis=0)                       # (kh*k_in_pad, n_out_pad)


def _convT_B_stack(weight, W_in, W_out, stride, pad, k_in_pad, n_out_pad):
    """nn.ConvTranspose2d width/channel mixing, stacked per height tap.
    weight: (Ci, Co, kh, kw)."""
    Ci, Co, kh, kw = weight.shape
    j, wo = np.arange(W_in), np.arange(W_out)
    dj = wo[None, :] - j[:, None] * stride + pad                 # (Win, Wout)
    valid = (dj >= 0) & (dj < kw)
    djc = np.clip(dj, 0, kw - 1)
    mask = jnp.asarray(valid[:, :, None, None], jnp.float32)
    blocks = []
    for di in range(kh):
        wtap = jnp.transpose(weight[:, :, di, :], (2, 0, 1))     # (kw, Ci, Co)
        b4 = wtap[djc] * mask
        B = jnp.transpose(b4, (0, 2, 1, 3)).reshape(W_in * Ci, W_out * Co)
        blocks.append(_pad2d(B, k_in_pad, n_out_pad))
    return jnp.concatenate(blocks, axis=0)


def _convT_A_taps(H_in, H_out, kh, stride, pad, row_ofs, rows_total):
    """Row up-sampling scatter of a stride-s ConvTranspose, one (rows_total, H_in)
    0/1 matrix per height tap (kept on the MXU only for the stride-2 decoders)."""
    taps = []
    for di in range(kh):
        A = np.zeros((rows_total, H_in), np.float32)
        for i in range(H_in):
            ho = i * stride + di - pad
            if 0 <= ho < H_out:
                A[row_ofs + ho, i] = 1.0
        taps.append(jnp.asarray(A))
    return taps


def _pool_A(H_in):
    Ho = H_in // 2
    A = np.zeros((Ho, H_in), np.float32)
    A[np.arange(Ho), 2 * np.arange(Ho)] = 0.5
    A[np.arange(Ho), 2 * np.arange(Ho) + 1] = 0.5
    return jnp.asarray(A)


def _pool_B(W_in, C, k_in_pad, n_out_pad):
    Wo = W_in // 2
    B = np.zeros((k_in_pad, n_out_pad), np.float32)
    w, c = np.arange(Wo)[:, None], np.arange(C)[None, :]
    for d in (0, 1):
        B[((2 * w + d) * C + c).ravel(), (w * C + c).ravel()] = 0.5
    return jnp.asarray(B)


def _bias_row(b, W_out, n_out_pad):
    return _pad2d(jnp.tile(b.astype(jnp.float32), W_out)[None, :], 1, n_out_pad)


def _bias_slab(b, W_out, n_out_pad, rows_total, row_ofs, n_rows):
    """2-D bias whose padding rows are exactly zero (so ReLU keeps them zero and the
    following shift-based ConvT reads zeros outside the real rows)."""
    row = _bias_row(b, W_out, n_out_pad)
    slab = jnp.zeros((rows_total, n_out_pad), jnp.float32)
    return slab.at[row_ofs:row_ofs + n_rows, :].set(
        jnp.broadcast_to(row, (n_rows, n_out_pad)))


def _pack_consts(mats, packw=256):
    """Pack all constants into one bf16 (R, 256) array; each block row-padded to a
    multiple of 8 so every in-kernel slice starts sublane-aligned."""
    pieces, offs, r = [], [], 0
    for m in mats:
        rows, cols = m.shape
        rpad = _round_up(rows, 8)
        pieces.append(_pad2d(m.astype(jnp.float32), rpad, packw))
        offs.append((r, rows, cols))
        r += rpad
    return jnp.concatenate(pieces, axis=0).astype(jnp.bfloat16), tuple(offs)


# ---------------------------------------------------------------------------
# Fused forward: one pallas_call, whole network VMEM-resident, TB samples / step.
# ---------------------------------------------------------------------------
def le_ae_forward(params, x_nchw, tb=4):
    N, Ci, H, W = x_nchw.shape
    assert Ci == 1, "LeAE expects single-channel input"

    # Static layer geometry (matches the PyTorch module, MNIST-style 28x28).
    H1, W1 = H, W                      # conv1: Conv2d(1,6,5,p=2)     -> 28x28x6
    H2, W2 = H1 // 2, W1 // 2          # pool1: AvgPool2d(2,2)        -> 14x14x6
    H3, W3 = H2 - 4, W2 - 4            # conv2: Conv2d(6,16,5)        -> 10x10x16
    H4, W4 = H3 // 2, W3 // 2          # pool2: AvgPool2d(2,2)        ->  5x5x16
    H5, W5 = 2 * H4, 2 * W4            # conv3: ConvT(16,16,2,s=2)    -> 10x10x16
    H6, W6 = H5 + 4, W5 + 4            # conv4: ConvT(16,6,5)         -> 14x14x6
    H7, W7 = 2 * H6, 2 * W6            # conv5: ConvT(6,1,4,s=2,p=1)  -> 28x28x1

    P0 = _round_up(W * Ci, LANE)       # 128   (input lanes)
    P1 = _round_up(W1 * 6, LANE)       # 256
    Pp1 = _round_up(W2 * 6, LANE)      # 128
    P2 = _round_up(W3 * 16, LANE)      # 256
    Pp2 = _round_up(W4 * 16, LANE)     # 128
    P3 = _round_up(W5 * 16, LANE)      # 256
    P4 = _round_up(W6 * 6, LANE)       # 128
    P5 = _round_up(W7 * 1, LANE)       # 128
    RP3 = 4                            # conv3 emits 4 zero rows top/bottom for conv4's shifts
    H5p = H5 + 2 * RP3

    # ---- packed, lane/row-padded constants (bf16, ~2 MiB, VMEM-resident) ----
    consts = [
        _conv_B_stack(params["w1"], W1, W1, 2, P0, P1),          # 0  B1 stack (5*128, 256)
        _bias_row(params["b1"], W1, P1),                         # 1
        _pool_B(W1, 6, P1, Pp1),                                 # 2
        _pool_A(H1),                                             # 3
        _conv_B_stack(params["w2"], W2, W3, 0, Pp1, P2),         # 4  B2 stack (5*128, 256)
        _bias_row(params["b2"], W3, P2),                         # 5
        _pool_B(W3, 16, P2, Pp2),                                # 6
        _pool_A(H3),                                             # 7
        *_convT_A_taps(H4, H5, 2, 2, 0, RP3, H5p),               # 8,9   conv3 row scatter
        _convT_B_stack(params["w3"], W4, W5, 2, 0, Pp2, P3),     # 10 B3 stack (2*128, 256)
        _bias_slab(params["b3"], W5, P3, H5p, RP3, H5),          # 11 (zero on pad rows)
        _convT_B_stack(params["w4"], W5, W6, 1, 0, P3, P4),      # 12 B4 stack (5*256, 128)
        _bias_row(params["b4"], W6, P4),                         # 13
        *_convT_A_taps(H6, H7, 4, 2, 1, 0, H7),                  # 14..17 conv5 row scatter
        _convT_B_stack(params["w5"], W6, W7, 2, 1, P4, P5),      # 18 B5 stack (4*128, 128)
        _bias_row(params["b5"], W7, P5),                         # 19
    ]
    cmat, offs = _pack_consts(consts)

    # ---- input prep: NCHW -> (N, H+4, 128) slabs (rows pre-padded by conv1's pad=2) ----
    x2 = jnp.transpose(x_nchw.astype(jnp.float32), (0, 2, 3, 1)).reshape(N, H, W * Ci)
    pad_n = (-N) % tb
    x2 = jnp.pad(x2, ((0, pad_n), (2, 2), (0, P0 - W * Ci)))
    NB = N + pad_n

    # ---- the kernel: everything static is closed over (tb, dims, offs) ----
    def kernel(x_ref, c_ref, o_c1, o_p1, o_c2, o_p2, o_c3, o_c4, o_rec):
        def cst(i):                      # bf16 matmul operand (static slice of packed consts)
            r0, rows, cols = offs[i]
            return c_ref[r0:r0 + rows, :cols]

        def cstf(i):                     # f32 for elementwise (bias) use
            return cst(i).astype(jnp.float32)

        def mm(a, b):                    # bf16 x bf16 MXU dot, f32 accumulate
            return jnp.dot(a.astype(jnp.bfloat16), b, preferred_element_type=jnp.float32)

        B1, b1 = cst(0), cstf(1)
        Bp1, Ap1 = cst(2), cst(3)
        B2, b2 = cst(4), cstf(5)
        Bp2, Ap2 = cst(6), cst(7)
        A3 = [cst(8), cst(9)]
        B3, b3 = cst(10), cstf(11)
        B4, b4 = cst(12), cstf(13)
        A5 = [cst(14 + d) for d in range(4)]
        B5, b5 = cst(18), cstf(19)

        for t in range(tb):              # static unroll over the samples of this block
            x = x_ref[t]                                                     # (H+4, 128)

            # conv1 (k5, pad2): row taps = static shifts of the pre-padded slab,
            # all 5 taps fused into ONE matmul via lane-concat (im2row).
            im = jnp.concatenate([x[d:d + H1, :] for d in range(5)], axis=1)  # (28, 640)
            c1 = jnp.maximum(mm(im, B1) + b1, 0.0)                            # (28, 256)
            o_c1[t] = c1

            # pool1: contract the wide (256) side first, then the tiny row-average.
            p1 = mm(Ap1, mm(c1, Bp1))                                         # (14, 128)
            o_p1[t] = p1

            # conv2 (k5, pad0): pure shifts, fused taps.
            im = jnp.concatenate([p1[d:d + H3, :] for d in range(5)], axis=1)  # (10, 640)
            c2 = jnp.maximum(mm(im, B2) + b2, 0.0)                             # (10, 256)
            o_c2[t] = c2

            # pool2
            p2 = mm(Ap2, mm(c2, Bp2))                                         # (5, 128)
            o_p2[t] = p2

            # conv3 (ConvT k2, s2): row upsampling via tiny A taps, fused B; emits a
            # row-padded slab (4 zero rows top/bottom) so conv4 is shift-only.
            u = jnp.concatenate([mm(A3[d], p2) for d in range(2)], axis=1)     # (18, 256)
            c3p = jnp.maximum(mm(u, B3) + b3, 0.0)                             # (18, 256)
            o_c3[t] = c3p[RP3:RP3 + H5, :]

            # conv4 (ConvT k5, s1): pure row shifts of the padded slab, fused taps.
            im = jnp.concatenate([c3p[RP3 - d:RP3 - d + H6, :] for d in range(5)],
                                 axis=1)                                       # (14, 1280)
            c4 = jnp.maximum(mm(im, B4) + b4, 0.0)                             # (14, 128)
            o_c4[t] = c4

            # conv5 (ConvT k4, s2, p1): row upsampling via A taps, fused B, tanh.
            u = jnp.concatenate([mm(A5[d], c4) for d in range(4)], axis=1)     # (28, 512)
            o_rec[t] = jnp.tanh(mm(u, B5) + b5)                                # (28, 128)

    out_dims = ((H1, P1), (H2, Pp1), (H3, P2), (H4, Pp2), (H5, P3), (H6, P4), (H7, P5))
    out_shape = tuple(jax.ShapeDtypeStruct((NB, h, p), jnp.float32) for h, p in out_dims)
    out_specs = tuple(pl.BlockSpec((tb, h, p), lambda n: (n, 0, 0)) for h, p in out_dims)
    in_specs = [
        pl.BlockSpec((tb, H + 4, P0), lambda n: (n, 0, 0)),
        pl.BlockSpec(cmat.shape, lambda n: (0, 0)),      # constants: same block every step
    ]

    outs = pl.pallas_call(
        kernel,
        grid=(NB // tb,),
        out_shape=out_shape,
        in_specs=in_specs,
        out_specs=out_specs,
        compiler_params=pltpu.CompilerParams(
            dimension_semantics=("parallel",)),          # batch blocks across TCs (v7x)
    )(x2, cmat)

    # Final dict in PyTorch NCHW layout (drop batch padding + lane padding).
    chans = (6, 6, 16, 16, 16, 6, 1)
    widths = (W1, W2, W3, W4, W5, W6, W7)
    res = {}
    for name, o, c, w in zip(_LAYER_KEYS, outs, chans, widths):
        o = o[:N, :, :w * c]
        res[name] = jnp.transpose(o.reshape(N, o.shape[1], w, c), (0, 3, 1, 2))
    return res


# ---------------------------------------------------------------------------
# Pure-JAX reference (PyTorch semantics) for the self-check.
# ---------------------------------------------------------------------------
def _convT_ref(x, w, b, stride, pad):
    _, _, kh, kw = w.shape
    w_conv = jnp.flip(w, axis=(2, 3)).transpose(1, 0, 2, 3)
    y = jax.lax.conv_general_dilated(
        x, w_conv, window_strides=(1, 1),
        padding=[(kh - 1 - pad, kh - 1 - pad), (kw - 1 - pad, kw - 1 - pad)],
        lhs_dilation=(stride, stride),
        dimension_numbers=("NCHW", "OIHW", "NCHW"),
        precision=jax.lax.Precision.HIGHEST)
    return y + b[None, :, None, None]


def _avgpool_ref(x):
    n, c, h, w = x.shape
    return x.reshape(n, c, h // 2, 2, w // 2, 2).mean(axis=(3, 5))


def reference_forward(params, x):
    dn = ("NCHW", "OIHW", "NCHW")
    hp = jax.lax.Precision.HIGHEST
    res = {}
    c1 = jax.lax.conv_general_dilated(x, params["w1"], (1, 1), [(2, 2), (2, 2)],
                                      dimension_numbers=dn, precision=hp)
    res["c1"] = jax.nn.relu(c1 + params["b1"][None, :, None, None])
    res["p1"] = _avgpool_ref(res["c1"])
    c2 = jax.lax.conv_general_dilated(res["p1"], params["w2"], (1, 1), [(0, 0), (0, 0)],
                                      dimension_numbers=dn, precision=hp)
    res["c2"] = jax.nn.relu(c2 + params["b2"][None, :, None, None])
    res["p2"] = _avgpool_ref(res["c2"])
    res["c3"] = jax.nn.relu(_convT_ref(res["p2"], params["w3"], params["b3"], 2, 0))
    res["c4"] = jax.nn.relu(_convT_ref(res["c3"], params["w4"], params["b4"], 1, 0))
    res["rec"] = jnp.tanh(_convT_ref(res["c4"], params["w5"], params["b5"], 2, 1))
    return res


# ---------------------------------------------------------------------------
# Parameters (deterministic synthetic init; shapes from the module's __init__)
# ---------------------------------------------------------------------------
def init_params(key):
    shapes = {
        "w1": (6, 1, 5, 5),   "b1": (6,),     # Conv2d(1, 6, 5, p=2)
        "w2": (16, 6, 5, 5),  "b2": (16,),    # Conv2d(6, 16, 5)
        "w3": (16, 16, 2, 2), "b3": (16,),    # ConvTranspose2d(16, 16, 2, s=2)
        "w4": (16, 6, 5, 5),  "b4": (6,),     # ConvTranspose2d(16, 6, 5)
        "w5": (6, 1, 4, 4),   "b5": (1,),     # ConvTranspose2d(6, 1, 4, s=2, p=1)
    }
    params = {}
    names = sorted(shapes)
    keys = jax.random.split(key, len(names))
    for k_rng, name in zip(keys, names):
        shape = shapes[name]
        scale = 0.05 if name.startswith("b") else 1.0 / float(np.sqrt(np.prod(shape[1:])))
        params[name] = scale * jax.random.normal(k_rng, shape, dtype=jnp.float32)
    return params


if __name__ == "__main__":
    key = jax.random.PRNGKey(0)
    pkey, xkey = jax.random.split(key)
    params = init_params(pkey)

    # MNIST-like input: (N=8, C=1, 28, 28); TB=4 -> grid of 2 steps (both v7x TCs busy).
    x = jax.random.normal(xkey, (8, 1, 28, 28), dtype=jnp.float32)

    fwd = jax.jit(functools.partial(le_ae_forward, tb=4))
    res = jax.block_until_ready(fwd(params, x))
    ref = jax.block_until_ready(jax.jit(reference_forward)(params, x))

    expected = {
        "c1": (8, 6, 28, 28), "p1": (8, 6, 14, 14),
        "c2": (8, 16, 10, 10), "p2": (8, 16, 5, 5),
        "c3": (8, 16, 10, 10), "c4": (8, 6, 14, 14),
        "rec": (8, 1, 28, 28),
    }
    for name, shape in expected.items():
        out = res[name]
        assert out.shape == shape, (name, out.shape, shape)
        assert bool(jnp.all(jnp.isfinite(out))), f"non-finite output in {name}"
        diff = float(jnp.max(jnp.abs(out - ref[name])))
        rel = float(jnp.linalg.norm(out - ref[name]) /
                    (jnp.linalg.norm(ref[name]) + 1e-6))
        # The MXU dots run with bf16 operands (same as the TPU default bf16-pass for f32
        # matmuls); allow small drift vs the HIGHEST-precision XLA reference.
        assert diff < 0.12 and rel < 0.04, (name, diff, rel)

    print("KERNEL_OK")
</pallas_src>

<mosaic_0001>
module attributes {stable_mosaic.version = 11 : i64} {
  func.func @kernel(%arg0: i32, %arg1: memref<4x32x128xf32, #tpu.memory_space<vmem>>, %arg2: memref<4096x256xbf16, #tpu.memory_space<vmem>>, %arg3: memref<4x28x256xf32, #tpu.memory_space<vmem>>, %arg4: memref<4x14x128xf32, #tpu.memory_space<vmem>>, %arg5: memref<4x10x256xf32, #tpu.memory_space<vmem>>, %arg6: memref<4x5x128xf32, #tpu.memory_space<vmem>>, %arg7: memref<4x10x256xf32, #tpu.memory_space<vmem>>, %arg8: memref<4x14x128xf32, #tpu.memory_space<vmem>>, %arg9: memref<4x28x128xf32, #tpu.memory_space<vmem>>) attributes {dimension_semantics = [#tpu.dimension_semantics<parallel>], iteration_bounds = array<i64: 2>, scalar_prefetch = 0 : i64, scratch_operands = 0 : i64, tpu.core_type = #tpu.core_type<tc>, window_params = [{transform_indices = @transform_0, window_bounds = array<i64: 4, 32, 128>}, {pipeline_mode = #tpu.pipeline_mode<synchronous>, transform_indices = @transform_1, window_bounds = array<i64: 4096, 256>}, {transform_indices = @transform_2, window_bounds = array<i64: 4, 28, 256>}, {transform_indices = @transform_3, window_bounds = array<i64: 4, 14, 128>}, {transform_indices = @transform_4, window_bounds = array<i64: 4, 10, 256>}, {transform_indices = @transform_5, window_bounds = array<i64: 4, 5, 128>}, {transform_indices = @transform_6, window_bounds = array<i64: 4, 10, 256>}, {transform_indices = @transform_7, window_bounds = array<i64: 4, 14, 128>}, {transform_indices = @transform_8, window_bounds = array<i64: 4, 28, 128>}]} {
    %c0 = arith.constant 0 : index
    %c0_0 = arith.constant 0 : index
    %0 = vector.load %arg2[%c0, %c0_0] : memref<4096x256xbf16, #tpu.memory_space<vmem>>, vector<640x256xbf16>
    %c640 = arith.constant 640 : index
    %c0_1 = arith.constant 0 : index
    %1 = vector.load %arg2[%c640, %c0_1] : memref<4096x256xbf16, #tpu.memory_space<vmem>>, vector<1x256xbf16>
    %2 = arith.extf %1 : vector<1x256xbf16> to vector<1x256xf32>
    %c648 = arith.constant 648 : index
    %c0_2 = arith.constant 0 : index
    %3 = vector.load %arg2[%c648, %c0_2] : memref<4096x256xbf16, #tpu.memory_space<vmem>>, vector<256x128xbf16>
    %c904 = arith.constant 904 : index
    %c0_3 = arith.constant 0 : index
    %4 = vector.load %arg2[%c904, %c0_3] : memref<4096x256xbf16, #tpu.memory_space<vmem>>, vector<14x28xbf16>
    %c920 = arith.constant 920 : index
    %c0_4 = arith.constant 0 : index
    %5 = vector.load %arg2[%c920, %c0_4] : memref<4096x256xbf16, #tpu.memory_space<vmem>>, vector<640x256xbf16>
    %c1560 = arith.constant 1560 : index
    %c0_5 = arith.constant 0 : index
    %6 = vector.load %arg2[%c1560, %c0_5] : memref<4096x256xbf16, #tpu.memory_space<vmem>>, vector<1x256xbf16>
    %7 = arith.extf %6 : vector<1x256xbf16> to vector<1x256xf32>
    %c1568 = arith.constant 1568 : index
    %c0_6 = arith.constant 0 : index
    %8 = vector.load %arg2[%c1568, %c0_6] : memref<4096x256xbf16, #tpu.memory_space<vmem>>, vector<256x128xbf16>
    %c1824 = arith.constant 1824 : index
    %c0_7 = arith.constant 0 : index
    %9 = vector.load %arg2[%c1824, %c0_7] : memref<4096x256xbf16, #tpu.memory_space<vmem>>, vector<5x10xbf16>
    %c1832 = arith.constant 1832 : index
    %c0_8 = arith.constant 0 : index
    %10 = vector.load %arg2[%c1832, %c0_8] : memref<4096x256xbf16, #tpu.memory_space<vmem>>, vector<18x5xbf16>
    %c1856 = arith.constant 1856 : index
    %c0_9 = arith.constant 0 : index
    %11 = vector.load %arg2[%c1856, %c0_9] : memref<4096x256xbf16, #tpu.memory_space<vmem>>, vector<18x5xbf16>
    %c1880 = arith.constant 1880 : index
    %c0_10 = arith.constant 0 : index
    %12 = vector.load %arg2[%c1880, %c0_10] : memref<4096x256xbf16, #tpu.memory_space<vmem>>, vector<256x256xbf16>
    %c2136 = arith.constant 2136 : index
    %c0_11 = arith.constant 0 : index
    %13 = vector.load %arg2[%c2136, %c0_11] : memref<4096x256xbf16, #tpu.memory_space<vmem>>, vector<18x256xbf16>
    %14 = arith.extf %13 : vector<18x256xbf16> to vector<18x256xf32>
    %c2160 = arith.constant 2160 : index
    %c0_12 = arith.constant 0 : index
    %15 = vector.load %arg2[%c2160, %c0_12] : memref<4096x256xbf16, #tpu.memory_space<vmem>>, vector<1280x128xbf16>
    %c3440 = arith.constant 3440 : index
    %c0_13 = arith.constant 0 : index
    %16 = vector.load %arg2[%c3440, %c0_13] : memref<4096x256xbf16, #tpu.memory_space<vmem>>, vector<1x128xbf16>
    %17 = arith.extf %16 : vector<1x128xbf16> to vector<1x128xf32>
    %c3448 = arith.constant 3448 : index
    %c0_14 = arith.constant 0 : index
    %18 = vector.load %arg2[%c3448, %c0_14] : memref<4096x256xbf16, #tpu.memory_space<vmem>>, vector<28x14xbf16>
    %c3480 = arith.constant 3480 : index
    %c0_15 = arith.constant 0 : index
    %19 = vector.load %arg2[%c3480, %c0_15] : memref<4096x256xbf16, #tpu.memory_space<vmem>>, vector<28x14xbf16>
    %c3512 = arith.constant 3512 : index
    %c0_16 = arith.constant 0 : index
    %20 = vector.load %arg2[%c3512, %c0_16] : memref<4096x256xbf16, #tpu.memory_space<vmem>>, vector<28x14xbf16>
    %c3544 = arith.constant 3544 : index
    %c0_17 = arith.constant 0 : index
    %21 = vector.load %arg2[%c3544, %c0_17] : memref<4096x256xbf16, #tpu.memory_space<vmem>>, vector<28x14xbf16>
    %c3576 = arith.constant 3576 : index
    %c0_18 = arith.constant 0 : index
    %22 = vector.load %arg2[%c3576, %c0_18] : memref<4096x256xbf16, #tpu.memory_space<vmem>>, vector<512x128xbf16>
    %c4088 = arith.constant 4088 : index
    %c0_19 = arith.constant 0 : index
    %23 = vector.load %arg2[%c4088, %c0_19] : memref<4096x256xbf16, #tpu.memory_space<vmem>>, vector<1x128xbf16>
    %24 = arith.extf %23 : vector<1x128xbf16> to vector<1x128xf32>
    %c0_20 = arith.constant 0 : index
    %c0_21 = arith.constant 0 : index
    %c0_22 = arith.constant 0 : index
    %25 = vector.load %arg1[%c0_20, %c0_21, %c0_22] : memref<4x32x128xf32, #tpu.memory_space<vmem>>, vector<1x32x128xf32>
    %26 = vector.shape_cast %25 : vector<1x32x128xf32> to vector<32x128xf32>
    %27 = vector.extract_strided_slice %26 {offsets = [0, 0], sizes = [28, 128], strides = [1, 1]} : vector<32x128xf32> to vector<28x128xf32>
    %28 = vector.extract_strided_slice %26 {offsets = [1, 0], sizes = [28, 128], strides = [1, 1]} : vector<32x128xf32> to vector<28x128xf32>
    %29 = vector.extract_strided_slice %26 {offsets = [2, 0], sizes = [28, 128], strides = [1, 1]} : vector<32x128xf32> to vector<28x128xf32>
    %30 = vector.extract_strided_slice %26 {offsets = [3, 0], sizes = [28, 128], strides = [1, 1]} : vector<32x128xf32> to vector<28x128xf32>
    %31 = vector.extract_strided_slice %26 {offsets = [4, 0], sizes = [28, 128], strides = [1, 1]} : vector<32x128xf32> to vector<28x128xf32>
    %32 = tpu.concatenate %27, %28, %29, %30, %31 in 1 : vector<28x128xf32>, vector<28x128xf32>, vector<28x128xf32>, vector<28x128xf32>, vector<28x128xf32> -> vector<28x640xf32>
    %33 = arith.truncf %32 : vector<28x640xf32> to vector<28x640xbf16>
    %cst = arith.constant dense<0.000000e+00> : vector<28x256xf32>
    %34 = tpu.matmul %33, %0, %cst {dimension_numbers = #tpu.dot_dimension_numbers<[1], [0], [0], [1], [0, 0, 1, 1], [], []>} : vector<28x640xbf16>, vector<640x256xbf16>, vector<28x256xf32> -> vector<28x256xf32>
    %35 = vector.broadcast %2 : vector<1x256xf32> to vector<28x256xf32>
    %36 = arith.addf %34, %35 : vector<28x256xf32>
    %cst_23 = arith.constant 0.000000e+00 : f32
    %37 = vector.broadcast %cst_23 : f32 to vector<28x256xf32>
    %38 = arith.maximumf %36, %37 : vector<28x256xf32>
    %c0_24 = arith.constant 0 : index
    %c0_25 = arith.constant 0 : index
    %c0_26 = arith.constant 0 : index
    %39 = vector.load %arg3[%c0_24, %c0_25, %c0_26] : memref<4x28x256xf32, #tpu.memory_space<vmem>>, vector<1x28x256xf32>
    %40 = vector.shape_cast %39 : vector<1x28x256xf32> to vector<28x256xf32>
    %41 = vector.shape_cast %38 : vector<28x256xf32> to vector<1x28x256xf32>
    tpu.vector_store %arg3[%c0_24, %c0_25, %c0_26], %41 {strides = array<i32>} : memref<4x28x256xf32, #tpu.memory_space<vmem>>, vector<1x28x256xf32>,
    %42 = arith.truncf %38 : vector<28x256xf32> to vector<28x256xbf16>
    %cst_27 = arith.constant dense<0.000000e+00> : vector<28x128xf32>
    %43 = tpu.matmul %42, %3, %cst_27 {dimension_numbers = #tpu.dot_dimension_numbers<[1], [0], [0], [1], [0, 0, 1, 1], [], []>} : vector<28x256xbf16>, vector<256x128xbf16>, vector<28x128xf32> -> vector<28x128xf32>
    %cst_28 = arith.constant dense<0.000000e+00> : vector<14x128xf32>
    %44 = tpu.matmul %4, %43, %cst_28 {dimension_numbers = #tpu.dot_dimension_numbers<[1], [0], [0], [1], [0, 0, 1, 1], [], []>} : vector<14x28xbf16>, vector<28x128xf32>, vector<14x128xf32> -> vector<14x128xf32>
    %c0_29 = arith.constant 0 : index
    %c0_30 = arith.constant 0 : index
    %c0_31 = arith.constant 0 : index
    %45 = vector.load %arg4[%c0_29, %c0_30, %c0_31] : memref<4x14x128xf32, #tpu.memory_space<vmem>>, vector<1x14x128xf32>
    %46 = vector.shape_cast %45 : vector<1x14x128xf32> to vector<14x128xf32>
    %47 = vector.shape_cast %44 : vector<14x128xf32> to vector<1x14x128xf32>
    tpu.vector_store %arg4[%c0_29, %c0_30, %c0_31], %47 {strides = array<i32>} : memref<4x14x128xf32, #tpu.memory_space<vmem>>, vector<1x14x128xf32>,
    %48 = vector.extract_strided_slice %44 {offsets = [0, 0], sizes = [10, 128], strides = [1, 1]} : vector<14x128xf32> to vector<10x128xf32>
    %49 = vector.extract_strided_slice %44 {offsets = [1, 0], sizes = [10, 128], strides = [1, 1]} : vector<14x128xf32> to vector<10x128xf32>
    %50 = vector.extract_strided_slice %44 {offsets = [2, 0], sizes = [10, 128], strides = [1, 1]} : vector<14x128xf32> to vector<10x128xf32>
    %51 = vector.extract_strided_slice %44 {offsets = [3, 0], sizes = [10, 128], strides = [1, 1]} : vector<14x128xf32> to vector<10x128xf32>
    %52 = vector.extract_strided_slice %44 {offsets = [4, 0], sizes = [10, 128], strides = [1, 1]} : vector<14x128xf32> to vector<10x128xf32>
    %53 = tpu.concatenate %48, %49, %50, %51, %52 in 1 : vector<10x128xf32>, vector<10x128xf32>, vector<10x128xf32>, vector<10x128xf32>, vector<10x128xf32> -> vector<10x640xf32>
    %54 = arith.truncf %53 : vector<10x640xf32> to vector<10x640xbf16>
    %cst_32 = arith.constant dense<0.000000e+00> : vector<10x256xf32>
    %55 = tpu.matmul %54, %5, %cst_32 {dimension_numbers = #tpu.dot_dimension_numbers<[1], [0], [0], [1], [0, 0, 1, 1], [], []>} : vector<10x640xbf16>, vector<640x256xbf16>, vector<10x256xf32> -> vector<10x256xf32>
    %56 = vector.broadcast %7 : vector<1x256xf32> to vector<10x256xf32>
    %57 = arith.addf %55, %56 : vector<10x256xf32>
    %cst_33 = arith.constant 0.000000e+00 : f32
    %58 = vector.broadcast %cst_33 : f32 to vector<10x256xf32>
    %59 = arith.maximumf %57, %58 : vector<10x256xf32>
    %c0_34 = arith.constant 0 : index
    %c0_35 = arith.constant 0 : index
    %c0_36 = arith.constant 0 : index
    %60 = vector.load %arg5[%c0_34, %c0_35, %c0_36] : memref<4x10x256xf32, #tpu.memory_space<vmem>>, vector<1x10x256xf32>
    %61 = vector.shape_cast %60 : vector<1x10x256xf32> to vector<10x256xf32>
    %62 = vector.shape_cast %59 : vector<10x256xf32> to vector<1x10x256xf32>
    tpu.vector_store %arg5[%c0_34, %c0_35, %c0_36], %62 {strides = array<i32>} : memref<4x10x256xf32, #tpu.memory_space<vmem>>, vector<1x10x256xf32>,
    %63 = arith.truncf %59 : vector<10x256xf32> to vector<10x256xbf16>
    %cst_37 = arith.constant dense<0.000000e+00> : vector<10x128xf32>
    %64 = tpu.matmul %63, %8, %cst_37 {dimension_numbers = #tpu.dot_dimension_numbers<[1], [0], [0], [1], [0, 0, 1, 1], [], []>} : vector<10x256xbf16>, vector<256x128xbf16>, vector<10x128xf32> -> vector<10x128xf32>
    %cst_38 = arith.constant dense<0.000000e+00> : vector<5x128xf32>
    %65 = tpu.matmul %9, %64, %cst_38 {dimension_numbers = #tpu.dot_dimension_numbers<[1], [0], [0], [1], [0, 0, 1, 1], [], []>} : vector<5x10xbf16>, vector<10x128xf32>, vector<5x128xf32> -> vector<5x128xf32>
    %c0_39 = arith.constant 0 : index
    %c0_40 = arith.constant 0 : index
    %c0_41 = arith.constant 0 : index
    %66 = vector.load %arg6[%c0_39, %c0_40, %c0_41] : memref<4x5x128xf32, #tpu.memory_space<vmem>>, vector<1x5x128xf32>
    %67 = vector.shape_cast %66 : vector<1x5x128xf32> to vector<5x128xf32>
    %68 = vector.shape_cast %65 : vector<5x128xf32> to vector<1x5x128xf32>
    tpu.vector_store %arg6[%c0_39, %c0_40, %c0_41], %68 {strides = array<i32>} : memref<4x5x128xf32, #tpu.memory_space<vmem>>, vector<1x5x128xf32>,
    %cst_42 = arith.constant dense<0.000000e+00> : vector<18x128xf32>
    %69 = tpu.matmul %10, %65, %cst_42 {dimension_numbers = #tpu.dot_dimension_numbers<[1], [0], [0], [1], [0, 0, 1, 1], [], []>} : vector<18x5xbf16>, vector<5x128xf32>, vector<18x128xf32> -> vector<18x128xf32>
    %cst_43 = arith.constant dense<0.000000e+00> : vector<18x128xf32>
    %70 = tpu.matmul %11, %65, %cst_43 {dimension_numbers = #tpu.dot_dimension_numbers<[1], [0], [0], [1], [0, 0, 1, 1], [], []>} : vector<18x5xbf16>, vector<5x128xf32>, vector<18x128xf32> -> vector<18x128xf32>
    %71 = tpu.concatenate %69, %70 in 1 : vector<18x128xf32>, vector<18x128xf32> -> vector<18x256xf32>
    %72 = arith.truncf %71 : vector<18x256xf32> to vector<18x256xbf16>
    %cst_44 = arith.constant dense<0.000000e+00> : vector<18x256xf32>
    %73 = tpu.matmul %72, %12, %cst_44 {dimension_numbers = #tpu.dot_dimension_numbers<[1], [0], [0], [1], [0, 0, 1, 1], [], []>} : vector<18x256xbf16>, vector<256x256xbf16>, vector<18x256xf32> -> vector<18x256xf32>
    %74 = arith.addf %73, %14 : vector<18x256xf32>
    %cst_45 = arith.constant 0.000000e+00 : f32
    %75 = vector.broadcast %cst_45 : f32 to vector<18x256xf32>
    %76 = arith.maximumf %74, %75 : vector<18x256xf32>
    %77 = vector.extract_strided_slice %76 {offsets = [4, 0], sizes = [10, 256], strides = [1, 1]} : vector<18x256xf32> to vector<10x256xf32>
    %c0_46 = arith.constant 0 : index
    %c0_47 = arith.constant 0 : index
    %c0_48 = arith.constant 0 : index
    %78 = vector.load %arg7[%c0_46, %c0_47, %c0_48] : memref<4x10x256xf32, #tpu.memory_space<vmem>>, vector<1x10x256xf32>
    %79 = vector.shape_cast %78 : vector<1x10x256xf32> to vector<10x256xf32>
    %80 = vector.shape_cast %77 : vector<10x256xf32> to vector<1x10x256xf32>
    tpu.vector_store %arg7[%c0_46, %c0_47, %c0_48], %80 {strides = array<i32>} : memref<4x10x256xf32, #tpu.memory_space<vmem>>, vector<1x10x256xf32>,
    %81 = vector.extract_strided_slice %76 {offsets = [4, 0], sizes = [14, 256], strides = [1, 1]} : vector<18x256xf32> to vector<14x256xf32>
    %82 = vector.extract_strided_slice %76 {offsets = [3, 0], sizes = [14, 256], strides = [1, 1]} : vector<18x256xf32> to vector<14x256xf32>
    %83 = vector.extract_strided_slice %76 {offsets = [2, 0], sizes = [14, 256], strides = [1, 1]} : vector<18x256xf32> to vector<14x256xf32>
    %84 = vector.extract_strided_slice %76 {offsets = [1, 0], sizes = [14, 256], strides = [1, 1]} : vector<18x256xf32> to vector<14x256xf32>
    %85 = vector.extract_strided_slice %76 {offsets = [0, 0], sizes = [14, 256], strides = [1, 1]} : vector<18x256xf32> to vector<14x256xf32>
    %86 = tpu.concatenate %81, %82, %83, %84, %85 in 1 : vector<14x256xf32>, vector<14x256xf32>, vector<14x256xf32>, vector<14x256xf32>, vector<14x256xf32> -> vector<14x1280xf32>
    %87 = arith.truncf %86 : vector<14x1280xf32> to vector<14x1280xbf16>
    %cst_49 = arith.constant dense<0.000000e+00> : vector<14x128xf32>
    %88 = tpu.matmul %87, %15, %cst_49 {dimension_numbers = #tpu.dot_dimension_numbers<[1], [0], [0], [1], [0, 0, 1, 1], [], []>} : vector<14x1280xbf16>, vector<1280x128xbf16>, vector<14x128xf32> -> vector<14x128xf32>
    %89 = vector.broadcast %17 : vector<1x128xf32> to vector<14x128xf32>
    %90 = arith.addf %88, %89 : vector<14x128xf32>
    %cst_50 = arith.constant 0.000000e+00 : f32
    %91 = vector.broadcast %cst_50 : f32 to vector<14x128xf32>
    %92 = arith.maximumf %90, %91 : vector<14x128xf32>
    %c0_51 = arith.constant 0 : index
    %c0_52 = arith.constant 0 : index
    %c0_53 = arith.constant 0 : index
    %93 = vector.load %arg8[%c0_51, %c0_52, %c0_53] : memref<4x14x128xf32, #tpu.memory_space<vmem>>, vector<1x14x128xf32>
    %94 = vector.shape_cast %93 : vector<1x14x128xf32> to vector<14x128xf32>
    %95 = vector.shape_cast %92 : vector<14x128xf32> to vector<1x14x128xf32>
    tpu.vector_store %arg8[%c0_51, %c0_52, %c0_53], %95 {strides = array<i32>} : memref<4x14x128xf32, #tpu.memory_space<vmem>>, vector<1x14x128xf32>,
    %cst_54 = arith.constant dense<0.000000e+00> : vector<28x128xf32>
    %96 = tpu.matmul %18, %92, %cst_54 {dimension_numbers = #tpu.dot_dimension_numbers<[1], [0], [0], [1], [0, 0, 1, 1], [], []>} : vector<28x14xbf16>, vector<14x128xf32>, vector<28x128xf32> -> vector<28x128xf32>
    %cst_55 = arith.constant dense<0.000000e+00> : vector<28x128xf32>
    %97 = tpu.matmul %19, %92, %cst_55 {dimension_numbers = #tpu.dot_dimension_numbers<[1], [0], [0], [1], [0, 0, 1, 1], [], []>} : vector<28x14xbf16>, vector<14x128xf32>, vector<28x128xf32> -> vector<28x128xf32>
    %cst_56 = arith.constant dense<0.000000e+00> : vector<28x128xf32>
    %98 = tpu.matmul %20, %92, %cst_56 {dimension_numbers = #tpu.dot_dimension_numbers<[1], [0], [0], [1], [0, 0, 1, 1], [], []>} : vector<28x14xbf16>, vector<14x128xf32>, vector<28x128xf32> -> vector<28x128xf32>
    %cst_57 = arith.constant dense<0.000000e+00> : vector<28x128xf32>
    %99 = tpu.matmul %21, %92, %cst_57 {dimension_numbers = #tpu.dot_dimension_numbers<[1], [0], [0], [1], [0, 0, 1, 1], [], []>} : vector<28x14xbf16>, vector<14x128xf32>, vector<28x128xf32> -> vector<28x128xf32>
    %100 = tpu.concatenate %96, %97, %98, %99 in 1 : vector<28x128xf32>, vector<28x128xf32>, vector<28x128xf32>, vector<28x128xf32> -> vector<28x512xf32>
    %101 = arith.truncf %100 : vector<28x512xf32> to vector<28x512xbf16>
    %cst_58 = arith.constant dense<0.000000e+00> : vector<28x128xf32>
    %102 = tpu.matmul %101, %22, %cst_58 {dimension_numbers = #tpu.dot_dimension_numbers<[1], [0], [0], [1], [0, 0, 1, 1], [], []>} : vector<28x512xbf16>, vector<512x128xbf16>, vector<28x128xf32> -> vector<28x128xf32>
    %103 = vector.broadcast %24 : vector<1x128xf32> to vector<28x128xf32>
    %104 = arith.addf %102, %103 : vector<28x128xf32>
    %105 = math.tanh %104 : vector<28x128xf32>
    %c0_59 = arith.constant 0 : index
    %c0_60 = arith.constant 0 : index
    %c0_61 = arith.constant 0 : index
    %106 = vector.load %arg9[%c0_59, %c0_60, %c0_61] : memref<4x28x128xf32, #tpu.memory_space<vmem>>, vector<1x28x128xf32>
    %107 = vector.shape_cast %106 : vector<1x28x128xf32> to vector<28x128xf32>
    %108 = vector.shape_cast %105 : vector<28x128xf32> to vector<1x28x128xf32>
    tpu.vector_store %arg9[%c0_59, %c0_60, %c0_61], %108 {strides = array<i32>} : memref<4x28x128xf32, #tpu.memory_space<vmem>>, vector<1x28x128xf32>,
    %c1 = arith.constant 1 : index
    %c0_62 = arith.constant 0 : index
    %c0_63 = arith.constant 0 : index
    %109 = vector.load %arg1[%c1, %c0_62, %c0_63] : memref<4x32x128xf32, #tpu.memory_space<vmem>>, vector<1x32x128xf32>
    %110 = vector.shape_cast %109 : vector<1x32x128xf32> to vector<32x128xf32>
    %111 = vector.extract_strided_slice %110 {offsets = [0, 0], sizes = [28, 128], strides = [1, 1]} : vector<32x128xf32> to vector<28x128xf32>
    %112 = vector.extract_strided_slice %110 {offsets = [1, 0], sizes = [28, 128], strides = [1, 1]} : vector<32x128xf32> to vector<28x128xf32>
    %113 = vector.extract_strided_slice %110 {offsets = [2, 0], sizes = [28, 128], strides = [1, 1]} : vector<32x128xf32> to vector<28x128xf32>
    %114 = vector.extract_strided_slice %110 {offsets = [3, 0], sizes = [28, 128], strides = [1, 1]} : vector<32x128xf32> to vector<28x128xf32>
    %115 = vector.extract_strided_slice %110 {offsets = [4, 0], sizes = [28, 128], strides = [1, 1]} : vector<32x128xf32> to vector<28x128xf32>
    %116 = tpu.concatenate %111, %112, %113, %114, %115 in 1 : vector<28x128xf32>, vector<28x128xf32>, vector<28x128xf32>, vector<28x128xf32>, vector<28x128xf32> -> vector<28x640xf32>
    %117 = arith.truncf %116 : vector<28x640xf32> to vector<28x640xbf16>
    %cst_64 = arith.constant dense<0.000000e+00> : vector<28x256xf32>
    %118 = tpu.matmul %117, %0, %cst_64 {dimension_numbers = #tpu.dot_dimension_numbers<[1], [0], [0], [1], [0, 0, 1, 1], [], []>} : vector<28x640xbf16>, vector<640x256xbf16>, vector<28x256xf32> -> vector<28x256xf32>
    %119 = vector.broadcast %2 : vector<1x256xf32> to vector<28x256xf32>
    %120 = arith.addf %118, %119 : vector<28x256xf32>
    %cst_65 = arith.constant 0.000000e+00 : f32
    %121 = vector.broadcast %cst_65 : f32 to vector<28x256xf32>
    %122 = arith.maximumf %120, %121 : vector<28x256xf32>
    %c1_66 = arith.constant 1 : index
    %c0_67 = arith.constant 0 : index
    %c0_68 = arith.constant 0 : index
    %123 = vector.load %arg3[%c1_66, %c0_67, %c0_68] : memref<4x28x256xf32, #tpu.memory_space<vmem>>, vector<1x28x256xf32>
    %124 = vector.shape_cast %123 : vector<1x28x256xf32> to vector<28x256xf32>
    %125 = vector.shape_cast %122 : vector<28x256xf32> to vector<1x28x256xf32>
    tpu.vector_store %arg3[%c1_66, %c0_67, %c0_68], %125 {strides = array<i32>} : memref<4x28x256xf32, #tpu.memory_space<vmem>>, vector<1x28x256xf32>,
    %126 = arith.truncf %122 : vector<28x256xf32> to vector<28x256xbf16>
    %cst_69 = arith.constant dense<0.000000e+00> : vector<28x128xf32>
    %127 = tpu.matmul %126, %3, %cst_69 {dimension_numbers = #tpu.dot_dimension_numbers<[1], [0], [0], [1], [0, 0, 1, 1], [], []>} : vector<28x256xbf16>, vector<256x128xbf16>, vector<28x128xf32> -> vector<28x128xf32>
    %cst_70 = arith.constant dense<0.000000e+00> : vector<14x128xf32>
    %128 = tpu.matmul %4, %127, %cst_70 {dimension_numbers = #tpu.dot_dimension_numbers<[1], [0], [0], [1], [0, 0, 1, 1], [], []>} : vector<14x28xbf16>, vector<28x128xf32>, vector<14x128xf32> -> vector<14x128xf32>
    %c1_71 = arith.constant 1 : index
    %c0_72 = arith.constant 0 : index
    %c0_73 = arith.constant 0 : index
    %129 = vector.load %arg4[%c1_71, %c0_72, %c0_73] : memref<4x14x128xf32, #tpu.memory_space<vmem>>, vector<1x14x128xf32>
    %130 = vector.shape_cast %129 : vector<1x14x128xf32> to vector<14x128xf32>
    %131 = vector.shape_cast %128 : vector<14x128xf32> to vector<1x14x128xf32>
    tpu.vector_store %arg4[%c1_71, %c0_72, %c0_73], %131 {strides = array<i32>} : memref<4x14x128xf32, #tpu.memory_space<vmem>>, vector<1x14x128xf32>,
    %132 = vector.extract_strided_slice %128 {offsets = [0, 0], sizes = [10, 128], strides = [1, 1]} : vector<14x128xf32> to vector<10x128xf32>
    %133 = vector.extract_strided_slice %128 {offsets = [1, 0], sizes = [10, 128], strides = [1, 1]} : vector<14x128xf32> to vector<10x128xf32>
    %134 = vector.extract_strided_slice %128 {offsets = [2, 0], sizes = [10, 128], strides = [1, 1]} : vector<14x128xf32> to vector<10x128xf32>
    %135 = vector.extract_strided_slice %128 {offsets = [3, 0], sizes = [10, 128], strides = [1, 1]} : vector<14x128xf32> to vector<10x128xf32>
    %136 = vector.extract_strided_slice %128 {offsets = [4, 0], sizes = [10, 128], strides = [1, 1]} : vector<14x128xf32> to vector<10x128xf32>
    %137 = tpu.concatenate %132, %133, %134, %135, %136 in 1 : vector<10x128xf32>, vector<10x128xf32>, vector<10x128xf32>, vector<10x128xf32>, vector<10x128xf32> -> vector<10x640xf32>
    %138 = arith.truncf %137 : vector<10x640xf32> to vector<10x640xbf16>
    %cst_74 = arith.constant dense<0.000000e+00> : vector<10x256xf32>
    %139 = tpu.matmul %138, %5, %cst_74 {dimension_numbers = #tpu.dot_dimension_numbers<[1], [0], [0], [1], [0, 0, 1, 1], [], []>} : vector<10x640xbf16>, vector<640x256xbf16>, vector<10x256xf32> -> vector<10x256xf32>
    %140 = vector.broadcast %7 : vector<1x256xf32> to vector<10x256xf32>
    %141 = arith.addf %139, %140 : vector<10x256xf32>
    %cst_75 = arith.constant 0.000000e+00 : f32
    %142 = vector.broadcast %cst_75 : f32 to vector<10x256xf32>
    %143 = arith.maximumf %141, %142 : vector<10x256xf32>
    %c1_76 = arith.constant 1 : index
    %c0_77 = arith.constant 0 : index
    %c0_78 = arith.constant 0 : index
    %144 = vector.load %arg5[%c1_76, %c0_77, %c0_78] : memref<4x10x256xf32, #tpu.memory_space<vmem>>, vector<1x10x256xf32>
    %145 = vector.shape_cast %144 : vector<1x10x256xf32> to vector<10x256xf32>
    %146 = vector.shape_cast %143 : vector<10x256xf32> to vector<1x10x256xf32>
    tpu.vector_store %arg5[%c1_76, %c0_77, %c0_78], %146 {strides = array<i32>} : memref<4x10x256xf32, #tpu.memory_space<vmem>>, vector<1x10x256xf32>,
    %147 = arith.truncf %143 : vector<10x256xf32> to vector<10x256xbf16>
    %cst_79 = arith.constant dense<0.000000e+00> : vector<10x128xf32>
    %148 = tpu.matmul %147, %8, %cst_79 {dimension_numbers = #tpu.dot_dimension_numbers<[1], [0], [0], [1], [0, 0, 1, 1], [], []>} : vector<10x256xbf16>, vector<256x128xbf16>, vector<10x128xf32> -> vector<10x128xf32>
    %cst_80 = arith.constant dense<0.000000e+00> : vector<5x128xf32>
    %149 = tpu.matmul %9, %148, %cst_80 {dimension_numbers = #tpu.dot_dimension_numbers<[1], [0], [0], [1], [0, 0, 1, 1], [], []>} : vector<5x10xbf16>, vector<10x128xf32>, vector<5x128xf32> -> vector<5x128xf32>
    %c1_81 = arith.constant 1 : index
    %c0_82 = arith.constant 0 : index
    %c0_83 = arith.constant 0 : index
    %150 = vector.load %arg6[%c1_81, %c0_82, %c0_83] : memref<4x5x128xf32, #tpu.memory_space<vmem>>, vector<1x5x128xf32>
    %151 = vector.shape_cast %150 : vector<1x5x128xf32> to vector<5x128xf32>
    %152 = vector.shape_cast %149 : vector<5x128xf32> to vector<1x5x128xf32>
    tpu.vector_store %arg6[%c1_81, %c0_82, %c0_83], %152 {strides = array<i32>} : memref<4x5x128xf32, #tpu.memory_space<vmem>>, vector<1x5x128xf32>,
    %cst_84 = arith.constant dense<0.000000e+00> : vector<18x128xf32>
    %153 = tpu.matmul %10, %149, %cst_84 {dimension_numbers = #tpu.dot_dimension_numbers<[1], [0], [0], [1], [0, 0, 1, 1], [], []>} : vector<18x5xbf16>, vector<5x128xf32>, vector<18x128xf32> -> vector<18x128xf32>
    %cst_85 = arith.constant dense<0.000000e+00> : vector<18x128xf32>
    %154 = tpu.matmul %11, %149, %cst_85 {dimension_numbers = #tpu.dot_dimension_numbers<[1], [0], [0], [1], [0, 0, 1, 1], [], []>} : vector<18x5xbf16>, vector<5x128xf32>, vector<18x128xf32> -> vector<18x128xf32>
    %155 = tpu.concatenate %153, %154 in 1 : vector<18x128xf32>, vector<18x128xf32> -> vector<18x256xf32>
    %156 = arith.truncf %155 : vector<18x256xf32> to vector<18x256xbf16>
    %cst_86 = arith.constant dense<0.000000e+00> : vector<18x256xf32>
    %157 = tpu.matmul %156, %12, %cst_86 {dimension_numbers = #tpu.dot_dimension_numbers<[1], [0], [0], [1], [0, 0, 1, 1], [], []>} : vector<18x256xbf16>, vector<256x256xbf16>, vector<18x256xf32> -> vector<18x256xf32>
    %158 = arith.addf %157, %14 : vector<18x256xf32>
    %cst_87 = arith.constant 0.000000e+00 : f32
    %159 = vector.broadcast %cst_87 : f32 to vector<18x256xf32>
    %160 = arith.maximumf %158, %159 : vector<18x256xf32>
    %161 = vector.extract_strided_slice %160 {offsets = [4, 0], sizes = [10, 256], strides = [1, 1]} : vector<18x256xf32> to vector<10x256xf32>
    %c1_88 = arith.constant 1 : index
    %c0_89 = arith.constant 0 : index
    %c0_90 = arith.constant 0 : index
    %162 = vector.load %arg7[%c1_88, %c0_89, %c0_90] : memref<4x10x256xf32, #tpu.memory_space<vmem>>, vector<1x10x256xf32>
    %163 = vector.shape_cast %162 : vector<1x10x256xf32> to vector<10x256xf32>
    %164 = vector.shape_cast %161 : vector<10x256xf32> to vector<1x10x256xf32>
    tpu.vector_store %arg7[%c1_88, %c0_89, %c0_90], %164 {strides = array<i32>} : memref<4x10x256xf32, #tpu.memory_space<vmem>>, vector<1x10x256xf32>,
    %165 = vector.extract_strided_slice %160 {offsets = [4, 0], sizes = [14, 256], strides = [1, 1]} : vector<18x256xf32> to vector<14x256xf32>
    %166 = vector.extract_strided_slice %160 {offsets = [3, 0], sizes = [14, 256], strides = [1, 1]} : vector<18x256xf32> to vector<14x256xf32>
    %167 = vector.extract_strided_slice %160 {offsets = [2, 0], sizes = [14, 256], strides = [1, 1]} : vector<18x256xf32> to vector<14x256xf32>
    %168 = vector.extract_strided_slice %160 {offsets = [1, 0], sizes = [14, 256], strides = [1, 1]} : vector<18x256xf32> to vector<14x256xf32>
    %169 = vector.extract_strided_slice %160 {offsets = [0, 0], sizes = [14, 256], strides = [1, 1]} : vector<18x256xf32> to vector<14x256xf32>
    %170 = tpu.concatenate %165, %166, %167, %168, %169 in 1 : vector<14x256xf32>, vector<14x256xf32>, vector<14x256xf32>, vector<14x256xf32>, vector<14x256xf32> -> vector<14x1280xf32>
    %171 = arith.truncf %170 : vector<14x1280xf32> to vector<14x1280xbf16>
    %cst_91 = arith.constant dense<0.000000e+00> : vector<14x128xf32>
    %172 = tpu.matmul %171, %15, %cst_91 {dimension_numbers = #tpu.dot_dimension_numbers<[1], [0], [0], [1], [0, 0, 1, 1], [], []>} : vector<14x1280xbf16>, vector<1280x128xbf16>, vector<14x128xf32> -> vector<14x128xf32>
    %173 = vector.broadcast %17 : vector<1x128xf32> to vector<14x128xf32>
    %174 = arith.addf %172, %173 : vector<14x128xf32>
    %cst_92 = arith.constant 0.000000e+00 : f32
    %175 = vector.broadcast %cst_92 : f32 to vector<14x128xf32>
    %176 = arith.maximumf %174, %175 : vector<14x128xf32>
    %c1_93 = arith.constant 1 : index
    %c0_94 = arith.constant 0 : index
    %c0_95 = arith.constant 0 : index
    %177 = vector.load %arg8[%c1_93, %c0_94, %c0_95] : memref<4x14x128xf32, #tpu.memory_space<vmem>>, vector<1x14x128xf32>
    %178 = vector.shape_cast %177 : vector<1x14x128xf32> to vector<14x128xf32>
    %179 = vector.shape_cast %176 : vector<14x128xf32> to vector<1x14x128xf32>
    tpu.vector_store %arg8[%c1_93, %c0_94, %c0_95], %179 {strides = array<i32>} : memref<4x14x128xf32, #tpu.memory_space<vmem>>, vector<1x14x128xf32>,
    %cst_96 = arith.constant dense<0.000000e+00> : vector<28x128xf32>
    %180 = tpu.matmul %18, %176, %cst_96 {dimension_numbers = #tpu.dot_dimension_numbers<[1], [0], [0], [1], [0, 0, 1, 1], [], []>} : vector<28x14xbf16>, vector<14x128xf32>, vector<28x128xf32> -> vector<28x128xf32>
    %cst_97 = arith.constant dense<0.000000e+00> : vector<28x128xf32>
    %181 = tpu.matmul %19, %176, %cst_97 {dimension_numbers = #tpu.dot_dimension_numbers<[1], [0], [0], [1], [0, 0, 1, 1], [], []>} : vector<28x14xbf16>, vector<14x128xf32>, vector<28x128xf32> -> vector<28x128xf32>
    %cst_98 = arith.constant dense<0.000000e+00> : vector<28x128xf32>
    %182 = tpu.matmul %20, %176, %cst_98 {dimension_numbers = #tpu.dot_dimension_numbers<[1], [0], [0], [1], [0, 0, 1, 1], [], []>} : vector<28x14xbf16>, vector<14x128xf32>, vector<28x128xf32> -> vector<28x128xf32>
    %cst_99 = arith.constant dense<0.000000e+00> : vector<28x128xf32>
    %183 = tpu.matmul %21, %176, %cst_99 {dimension_numbers = #tpu.dot_dimension_numbers<[1], [0], [0], [1], [0, 0, 1, 1], [], []>} : vector<28x14xbf16>, vector<14x128xf32>, vector<28x128xf32> -> vector<28x128xf32>
    %184 = tpu.concatenate %180, %181, %182, %183 in 1 : vector<28x128xf32>, vector<28x128xf32>, vector<28x128xf32>, vector<28x128xf32> -> vector<28x512xf32>
    %185 = arith.truncf %184 : vector<28x512xf32> to vector<28x512xbf16>
    %cst_100 = arith.constant dense<0.000000e+00> : vector<28x128xf32>
    %186 = tpu.matmul %185, %22, %cst_100 {dimension_numbers = #tpu.dot_dimension_numbers<[1], [0], [0], [1], [0, 0, 1, 1], [], []>} : vector<28x512xbf16>, vector<512x128xbf16>, vector<28x128xf32> -> vector<28x128xf32>
    %187 = vector.broadcast %24 : vector<1x128xf32> to vector<28x128xf32>
    %188 = arith.addf %186, %187 : vector<28x128xf32>
    %189 = math.tanh %188 : vector<28x128xf32>
    %c1_101 = arith.constant 1 : index
    %c0_102 = arith.constant 0 : index
    %c0_103 = arith.constant 0 : index
    %190 = vector.load %arg9[%c1_101, %c0_102, %c0_103] : memref<4x28x128xf32, #tpu.memory_space<vmem>>, vector<1x28x128xf32>
    %191 = vector.shape_cast %190 : vector<1x28x128xf32> to vector<28x128xf32>
    %192 = vector.shape_cast %189 : vector<28x128xf32> to vector<1x28x128xf32>
    tpu.vector_store %arg9[%c1_101, %c0_102, %c0_103], %192 {strides = array<i32>} : memref<4x28x128xf32, #tpu.memory_space<vmem>>, vector<1x28x128xf32>,
    %c2 = arith.constant 2 : index
    %c0_104 = arith.constant 0 : index
    %c0_105 = arith.constant 0 : index
    %193 = vector.load %arg1[%c2, %c0_104, %c0_105] : memref<4x32x128xf32, #tpu.memory_space<vmem>>, vector<1x32x128xf32>
    %194 = vector.shape_cast %193 : vector<1x32x128xf32> to vector<32x128xf32>
    %195 = vector.extract_strided_slice %194 {offsets = [0, 0], sizes = [28, 128], strides = [1, 1]} : vector<32x128xf32> to vector<28x128xf32>
    %196 = vector.extract_strided_slice %194 {offsets = [1, 0], sizes = [28, 128], strides = [1, 1]} : vector<32x128xf32> to vector<28x128xf32>
    %197 = vector.extract_strided_slice %194 {offsets = [2, 0], sizes = [28, 128], strides = [1, 1]} : vector<32x128xf32> to vector<28x128xf32>
    %198 = vector.extract_strided_slice %194 {offsets = [3, 0], sizes = [28, 128], strides = [1, 1]} : vector<32x128xf32> to vector<28x128xf32>
    %199 = vector.extract_strided_slice %194 {offsets = [4, 0], sizes = [28, 128], strides = [1, 1]} : vector<32x128xf32> to vector<28x128xf32>
    %200 = tpu.concatenate %195, %196, %197, %198, %199 in 1 : vector<28x128xf32>, vector<28x128xf32>, vector<28x128xf32>, vector<28x128xf32>, vector<28x128xf32> -> vector<28x640xf32>
    %201 = arith.truncf %200 : vector<28x640xf32> to vector<28x640xbf16>
    %cst_106 = arith.constant dense<0.000000e+00> : vector<28x256xf32>
    %202 = tpu.matmul %201, %0, %cst_106 {dimension_numbers = #tpu.dot_dimension_numbers<[1], [0], [0], [1], [0, 0, 1, 1], [], []>} : vector<28x640xbf16>, vector<640x256xbf16>, vector<28x256xf32> -> vector<28x256xf32>
    %203 = vector.broadcast %2 : vector<1x256xf32> to vector<28x256xf32>
    %204 = arith.addf %202, %203 : vector<28x256xf32>
    %cst_107 = arith.constant 0.000000e+00 : f32
    %205 = vector.broadcast %cst_107 : f32 to vector<28x256xf32>
    %206 = arith.maximumf %204, %205 : vector<28x256xf32>
    %c2_108 = arith.constant 2 : index
    %c0_109 = arith.constant 0 : index
    %c0_110 = arith.constant 0 : index
    %207 = vector.load %arg3[%c2_108, %c0_109, %c0_110] : memref<4x28x256xf32, #tpu.memory_space<vmem>>, vector<1x28x256xf32>
    %208 = vector.shape_cast %207 : vector<1x28x256xf32> to vector<28x256xf32>
    %209 = vector.shape_cast %206 : vector<28x256xf32> to vector<1x28x256xf32>
    tpu.vector_store %arg3[%c2_108, %c0_109, %c0_110], %209 {strides = array<i32>} : memref<4x28x256xf32, #tpu.memory_space<vmem>>, vector<1x28x256xf32>,
    %210 = arith.truncf %206 : vector<28x256xf32> to vector<28x256xbf16>
    %cst_111 = arith.constant dense<0.000000e+00> : vector<28x128xf32>
    %211 = tpu.matmul %210, %3, %cst_111 {dimension_numbers = #tpu.dot_dimension_numbers<[1], [0], [0], [1], [0, 0, 1, 1], [], []>} : vector<28x256xbf16>, vector<256x128xbf16>, vector<28x128xf32> -> vector<28x128xf32>
    %cst_112 = arith.constant dense<0.000000e+00> : vector<14x128xf32>
    %212 = tpu.matmul %4, %211, %cst_112 {dimension_numbers = #tpu.dot_dimension_numbers<[1], [0], [0], [1], [0, 0, 1, 1], [], []>} : vector<14x28xbf16>, vector<28x128xf32>, vector<14x128xf32> -> vector<14x128xf32>
    %c2_113 = arith.constant 2 : index
    %c0_114 = arith.constant 0 : index
    %c0_115 = arith.constant 0 : index
    %213 = vector.load %arg4[%c2_113, %c0_114, %c0_115] : memref<4x14x128xf32, #tpu.memory_space<vmem>>, vector<1x14x128xf32>
    %214 = vector.shape_cast %213 : vector<1x14x128xf32> to vector<14x128xf32>
    %215 = vector.shape_cast %212 : vector<14x128xf32> to vector<1x14x128xf32>
    tpu.vector_store %arg4[%c2_113, %c0_114, %c0_115], %215 {strides = array<i32>} : memref<4x14x128xf32, #tpu.memory_space<vmem>>, vector<1x14x128xf32>,
    %216 = vector.extract_strided_slice %212 {offsets = [0, 0], sizes = [10, 128], strides = [1, 1]} : vector<14x128xf32> to vector<10x128xf32>
    %217 = vector.extract_strided_slice %212 {offsets = [1, 0], sizes = [10, 128], strides = [1, 1]} : vector<14x128xf32> to vector<10x128xf32>
    %218 = vector.extract_strided_slice %212 {offsets = [2, 0], sizes = [10, 128], strides = [1, 1]} : vector<14x128xf32> to vector<10x128xf32>
    %219 = vector.extract_strided_slice %212 {offsets = [3, 0], sizes = [10, 128], strides = [1, 1]} : vector<14x128xf32> to vector<10x128xf32>
    %220 = vector.extract_strided_slice %212 {offsets = [4, 0], sizes = [10, 128], strides = [1, 1]} : vector<14x128xf32> to vector<10x128xf32>
    %221 = tpu.concatenate %216, %217, %218, %219, %220 in 1 : vector<10x128xf32>, vector<10x128xf32>, vector<10x128xf32>, vector<10x128xf32>, vector<10x128xf32> -> vector<10x640xf32>
    %222 = arith.truncf %221 : vector<10x640xf32> to vector<10x640xbf16>
    %cst_116 = arith.constant dense<0.000000e+00> : vector<10x256xf32>
    %223 = tpu.matmul %222, %5, %cst_116 {dimension_numbers = #tpu.dot_dimension_numbers<[1], [0], [0], [1], [0, 0, 1, 1], [], []>} : vector<10x640xbf16>, vector<640x256xbf16>, vector<10x256xf32> -> vector<10x256xf32>
    %224 = vector.broadcast %7 : vector<1x256xf32> to vector<10x256xf32>
    %225 = arith.addf %223, %224 : vector<10x256xf32>
    %cst_117 = arith.constant 0.000000e+00 : f32
    %226 = vector.broadcast %cst_117 : f32 to vector<10x256xf32>
    %227 = arith.maximumf %225, %226 : vector<10x256xf32>
    %c2_118 = arith.constant 2 : index
    %c0_119 = arith.constant 0 : index
    %c0_120 = arith.constant 0 : index
    %228 = vector.load %arg5[%c2_118, %c0_119, %c0_120] : memref<4x10x256xf32, #tpu.memory_space<vmem>>, vector<1x10x256xf32>
    %229 = vector.shape_cast %228 : vector<1x10x256xf32> to vector<10x256xf32>
    %230 = vector.shape_cast %227 : vector<10x256xf32> to vector<1x10x256xf32>
    tpu.vector_store %arg5[%c2_118, %c0_119, %c0_120], %230 {strides = array<i32>} : memref<4x10x256xf32, #tpu.memory_space<vmem>>, vector<1x10x256xf32>,
    %231 = arith.truncf %227 : vector<10x256xf32> to vector<10x256xbf16>
    %cst_121 = arith.constant dense<0.000000e+00> : vector<10x128xf32>
    %232 = tpu.matmul %231, %8, %cst_121 {dimension_numbers = #tpu.dot_dimension_numbers<[1], [0], [0], [1], [0, 0, 1, 1], [], []>} : vector<10x256xbf16>, vector<256x128xbf16>, vector<10x128xf32> -> vector<10x128xf32>
    %cst_122 = arith.constant dense<0.000000e+00> : vector<5x128xf32>
    %233 = tpu.matmul %9, %232, %cst_122 {dimension_numbers = #tpu.dot_dimension_numbers<[1], [0], [0], [1], [0, 0, 1, 1], [], []>} : vector<5x10xbf16>, vector<10x128xf32>, vector<5x128xf32> -> vector<5x128xf32>
    %c2_123 = arith.constant 2 : index
    %c0_124 = arith.constant 0 : index
    %c0_125 = arith.constant 0 : index
    %234 = vector.load %arg6[%c2_123, %c0_124, %c0_125] : memref<4x5x128xf32, #tpu.memory_space<vmem>>, vector<1x5x128xf32>
    %235 = vector.shape_cast %234 : vector<1x5x128xf32> to vector<5x128xf32>
    %236 = vector.shape_cast %233 : vector<5x128xf32> to vector<1x5x128xf32>
    tpu.vector_store %arg6[%c2_123, %c0_124, %c0_125], %236 {strides = array<i32>} : memref<4x5x128xf32, #tpu.memory_space<vmem>>, vector<1x5x128xf32>,
    %cst_126 = arith.constant dense<0.000000e+00> : vector<18x128xf32>
    %237 = tpu.matmul %10, %233, %cst_126 {dimension_numbers = #tpu.dot_dimension_numbers<[1], [0], [0], [1], [0, 0, 1, 1], [], []>} : vector<18x5xbf16>, vector<5x128xf32>, vector<18x128xf32> -> vector<18x128xf32>
    %cst_127 = arith.constant dense<0.000000e+00> : vector<18x128xf32>
    %238 = tpu.matmul %11, %233, %cst_127 {dimension_numbers = #tpu.dot_dimension_numbers<[1], [0], [0], [1], [0, 0, 1, 1], [], []>} : vector<18x5xbf16>, vector<5x128xf32>, vector<18x128xf32> -> vector<18x128xf32>
    %239 = tpu.concatenate %237, %238 in 1 : vector<18x128xf32>, vector<18x128xf32> -> vector<18x256xf32>
    %240 = arith.truncf %239 : vector<18x256xf32> to vector<18x256xbf16>
    %cst_128 = arith.constant dense<0.000000e+00> : vector<18x256xf32>
    %241 = tpu.matmul %240, %12, %cst_128 {dimension_numbers = #tpu.dot_dimension_numbers<[1], [0], [0], [1], [0, 0, 1, 1], [], []>} : vector<18x256xbf16>, vector<256x256xbf16>, vector<18x256xf32> -> vector<18x256xf32>
    %242 = arith.addf %241, %14 : vector<18x256xf32>
    %cst_129 = arith.constant 0.000000e+00 : f32
    %243 = vector.broadcast %cst_129 : f32 to vector<18x256xf32>
    %244 = arith.maximumf %242, %243 : vector<18x256xf32>
    %245 = vector.extract_strided_slice %244 {offsets = [4, 0], sizes = [10, 256], strides = [1, 1]} : vector<18x256xf32> to vector<10x256xf32>
    %c2_130 = arith.constant 2 : index
    %c0_131 = arith.constant 0 : index
    %c0_132 = arith.constant 0 : index
    %246 = vector.load %arg7[%c2_130, %c0_131, %c0_132] : memref<4x10x256xf32, #tpu.memory_space<vmem>>, vector<1x10x256xf32>
    %247 = vector.shape_cast %246 : vector<1x10x256xf32> to vector<10x256xf32>
    %248 = vector.shape_cast %245 : vector<10x256xf32> to vector<1x10x256xf32>
    tpu.vector_store %arg7[%c2_130, %c0_131, %c0_132], %248 {strides = array<i32>} : memref<4x10x256xf32, #tpu.memory_space<vmem>>, vector<1x10x256xf32>,
    %249 = vector.extract_strided_slice %244 {offsets = [4, 0], sizes = [14, 256], strides = [1, 1]} : vector<18x256xf32> to vector<14x256xf32>
    %250 = vector.extract_strided_slice %244 {offsets = [3, 0], sizes = [14, 256], strides = [1, 1]} : vector<18x256xf32> to vector<14x256xf32>
    %251 = vector.extract_strided_slice %244 {offsets = [2, 0], sizes = [14, 256], strides = [1, 1]} : vector<18x256xf32> to vector<14x256xf32>
    %252 = vector.extract_strided_slice %244 {offsets = [1, 0], sizes = [14, 256], strides = [1, 1]} : vector<18x256xf32> to vector<14x256xf32>
    %253 = vector.extract_strided_slice %244 {offsets = [0, 0], sizes = [14, 256], strides = [1, 1]} : vector<18x256xf32> to vector<14x256xf32>
    %254 = tpu.concatenate %249, %250, %251, %252, %253 in 1 : vector<14x256xf32>, vector<14x256xf32>, vector<14x256xf32>, vector<14x256xf32>, vector<14x256xf32> -> vector<14x1280xf32>
    %255 = arith.truncf %254 : vector<14x1280xf32> to vector<14x1280xbf16>
    %cst_133 = arith.constant dense<0.000000e+00> : vector<14x128xf32>
    %256 = tpu.matmul %255, %15, %cst_133 {dimension_numbers = #tpu.dot_dimension_numbers<[1], [0], [0], [1], [0, 0, 1, 1], [], []>} : vector<14x1280xbf16>, vector<1280x128xbf16>, vector<14x128xf32> -> vector<14x128xf32>
    %257 = vector.broadcast %17 : vector<1x128xf32> to vector<14x128xf32>
    %258 = arith.addf %256, %257 : vector<14x128xf32>
    %cst_134 = arith.constant 0.000000e+00 : f32
    %259 = vector.broadcast %cst_134 : f32 to vector<14x128xf32>
    %260 = arith.maximumf %258, %259 : vector<14x128xf32>
    %c2_135 = arith.constant 2 : index
    %c0_136 = arith.constant 0 : index
    %c0_137 = arith.constant 0 : index
    %261 = vector.load %arg8[%c2_135, %c0_136, %c0_137] : memref<4x14x128xf32, #tpu.memory_space<vmem>>, vector<1x14x128xf32>
    %262 = vector.shape_cast %261 : vector<1x14x128xf32> to vector<14x128xf32>
    %263 = vector.shape_cast %260 : vector<14x128xf32> to vector<1x14x128xf32>
    tpu.vector_store %arg8[%c2_135, %c0_136, %c0_137], %263 {strides = array<i32>} : memref<4x14x128xf32, #tpu.memory_space<vmem>>, vector<1x14x128xf32>,
    %cst_138 = arith.constant dense<0.000000e+00> : vector<28x128xf32>
    %264 = tpu.matmul %18, %260, %cst_138 {dimension_numbers = #tpu.dot_dimension_numbers<[1], [0], [0], [1], [0, 0, 1, 1], [], []>} : vector<28x14xbf16>, vector<14x128xf32>, vector<28x128xf32> -> vector<28x128xf32>
    %cst_139 = arith.constant dense<0.000000e+00> : vector<28x128xf32>
    %265 = tpu.matmul %19, %260, %cst_139 {dimension_numbers = #tpu.dot_dimension_numbers<[1], [0], [0], [1], [0, 0, 1, 1], [], []>} : vector<28x14xbf16>, vector<14x128xf32>, vector<28x128xf32> -> vector<28x128xf32>
    %cst_140 = arith.constant dense<0.000000e+00> : vector<28x128xf32>
    %266 = tpu.matmul %20, %260, %cst_140 {dimension_numbers = #tpu.dot_dimension_numbers<[1], [0], [0], [1], [0, 0, 1, 1], [], []>} : vector<28x14xbf16>, vector<14x128xf32>, vector<28x128xf32> -> vector<28x128xf32>
    %cst_141 = arith.constant dense<0.000000e+00> : vector<28x128xf32>
    %267 = tpu.matmul %21, %260, %cst_141 {dimension_numbers = #tpu.dot_dimension_numbers<[1], [0], [0], [1], [0, 0, 1, 1], [], []>} : vector<28x14xbf16>, vector<14x128xf32>, vector<28x128xf32> -> vector<28x128xf32>
    %268 = tpu.concatenate %264, %265, %266, %267 in 1 : vector<28x128xf32>, vector<28x128xf32>, vector<28x128xf32>, vector<28x128xf32> -> vector<28x512xf32>
    %269 = arith.truncf %268 : vector<28x512xf32> to vector<28x512xbf16>
    %cst_142 = arith.constant dense<0.000000e+00> : vector<28x128xf32>
    %270 = tpu.matmul %269, %22, %cst_142 {dimension_numbers = #tpu.dot_dimension_numbers<[1], [0], [0], [1], [0, 0, 1, 1], [], []>} : vector<28x512xbf16>, vector<512x128xbf16>, vector<28x128xf32> -> vector<28x128xf32>
    %271 = vector.broadcast %24 : vector<1x128xf32> to vector<28x128xf32>
    %272 = arith.addf %270, %271 : vector<28x128xf32>
    %273 = math.tanh %272 : vector<28x128xf32>
    %c2_143 = arith.constant 2 : index
    %c0_144 = arith.constant 0 : index
    %c0_145 = arith.constant 0 : index
    %274 = vector.load %arg9[%c2_143, %c0_144, %c0_145] : memref<4x28x128xf32, #tpu.memory_space<vmem>>, vector<1x28x128xf32>
    %275 = vector.shape_cast %274 : vector<1x28x128xf32> to vector<28x128xf32>
    %276 = vector.shape_cast %273 : vector<28x128xf32> to vector<1x28x128xf32>
    tpu.vector_store %arg9[%c2_143, %c0_144, %c0_145], %276 {strides = array<i32>} : memref<4x28x128xf32, #tpu.memory_space<vmem>>, vector<1x28x128xf32>,
    %c3 = arith.constant 3 : index
    %c0_146 = arith.constant 0 : index
    %c0_147 = arith.constant 0 : index
    %277 = vector.load %arg1[%c3, %c0_146, %c0_147] : memref<4x32x128xf32, #tpu.memory_space<vmem>>, vector<1x32x128xf32>
    %278 = vector.shape_cast %277 : vector<1x32x128xf32> to vector<32x128xf32>
    %279 = vector.extract_strided_slice %278 {offsets = [0, 0], sizes = [28, 128], strides = [1, 1]} : vector<32x128xf32> to vector<28x128xf32>
    %280 = vector.extract_strided_slice %278 {offsets = [1, 0], sizes = [28, 128], strides = [1, 1]} : vector<32x128xf32> to vector<28x128xf32>
    %281 = vector.extract_strided_slice %278 {offsets = [2, 0], sizes = [28, 128], strides = [1, 1]} : vector<32x128xf32> to vector<28x128xf32>
    %282 = vector.extract_strided_slice %278 {offsets = [3, 0], sizes = [28, 128], strides = [1, 1]} : vector<32x128xf32> to vector<28x128xf32>
    %283 = vector.extract_strided_slice %278 {offsets = [4, 0], sizes = [28, 128], strides = [1, 1]} : vector<32x128xf32> to vector<28x128xf32>
    %284 = tpu.concatenate %279, %280, %281, %282, %283 in 1 : vector<28x128xf32>, vector<28x128xf32>, vector<28x128xf32>, vector<28x128xf32>, vector<28x128xf32> -> vector<28x640xf32>
    %285 = arith.truncf %284 : vector<28x640xf32> to vector<28x640xbf16>
    %cst_148 = arith.constant dense<0.000000e+00> : vector<28x256xf32>
    %286 = tpu.matmul %285, %0, %cst_148 {dimension_numbers = #tpu.dot_dimension_numbers<[1], [0], [0], [1], [0, 0, 1, 1], [], []>} : vector<28x640xbf16>, vector<640x256xbf16>, vector<28x256xf32> -> vector<28x256xf32>
    %287 = vector.broadcast %2 : vector<1x256xf32> to vector<28x256xf32>
    %288 = arith.addf %286, %287 : vector<28x256xf32>
    %cst_149 = arith.constant 0.000000e+00 : f32
    %289 = vector.broadcast %cst_149 : f32 to vector<28x256xf32>
    %290 = arith.maximumf %288, %289 : vector<28x256xf32>
    %c3_150 = arith.constant 3 : index
    %c0_151 = arith.constant 0 : index
    %c0_152 = arith.constant 0 : index
    %291 = vector.load %arg3[%c3_150, %c0_151, %c0_152] : memref<4x28x256xf32, #tpu.memory_space<vmem>>, vector<1x28x256xf32>
    %292 = vector.shape_cast %291 : vector<1x28x256xf32> to vector<28x256xf32>
    %293 = vector.shape_cast %290 : vector<28x256xf32> to vector<1x28x256xf32>
    tpu.vector_store %arg3[%c3_150, %c0_151, %c0_152], %293 {strides = array<i32>} : memref<4x28x256xf32, #tpu.memory_space<vmem>>, vector<1x28x256xf32>,
    %294 = arith.truncf %290 : vector<28x256xf32> to vector<28x256xbf16>
    %cst_153 = arith.constant dense<0.000000e+00> : vector<28x128xf32>
    %295 = tpu.matmul %294, %3, %cst_153 {dimension_numbers = #tpu.dot_dimension_numbers<[1], [0], [0], [1], [0, 0, 1, 1], [], []>} : vector<28x256xbf16>, vector<256x128xbf16>, vector<28x128xf32> -> vector<28x128xf32>
    %cst_154 = arith.constant dense<0.000000e+00> : vector<14x128xf32>
    %296 = tpu.matmul %4, %295, %cst_154 {dimension_numbers = #tpu.dot_dimension_numbers<[1], [0], [0], [1], [0, 0, 1, 1], [], []>} : vector<14x28xbf16>, vector<28x128xf32>, vector<14x128xf32> -> vector<14x128xf32>
    %c3_155 = arith.constant 3 : index
    %c0_156 = arith.constant 0 : index
    %c0_157 = arith.constant 0 : index
    %297 = vector.load %arg4[%c3_155, %c0_156, %c0_157] : memref<4x14x128xf32, #tpu.memory_space<vmem>>, vector<1x14x128xf32>
    %298 = vector.shape_cast %297 : vector<1x14x128xf32> to vector<14x128xf32>
    %299 = vector.shape_cast %296 : vector<14x128xf32> to vector<1x14x128xf32>
    tpu.vector_store %arg4[%c3_155, %c0_156, %c0_157], %299 {strides = array<i32>} : memref<4x14x128xf32, #tpu.memory_space<vmem>>, vector<1x14x128xf32>,
    %300 = vector.extract_strided_slice %296 {offsets = [0, 0], sizes = [10, 128], strides = [1, 1]} : vector<14x128xf32> to vector<10x128xf32>
    %301 = vector.extract_strided_slice %296 {offsets = [1, 0], sizes = [10, 128], strides = [1, 1]} : vector<14x128xf32> to vector<10x128xf32>
    %302 = vector.extract_strided_slice %296 {offsets = [2, 0], sizes = [10, 128], strides = [1, 1]} : vector<14x128xf32> to vector<10x128xf32>
    %303 = vector.extract_strided_slice %296 {offsets = [3, 0], sizes = [10, 128], strides = [1, 1]} : vector<14x128xf32> to vector<10x128xf32>
    %304 = vector.extract_strided_slice %296 {offsets = [4, 0], sizes = [10, 128], strides = [1, 1]} : vector<14x128xf32> to vector<10x128xf32>
    %305 = tpu.concatenate %300, %301, %302, %303, %304 in 1 : vector<10x128xf32>, vector<10x128xf32>, vector<10x128xf32>, vector<10x128xf32>, vector<10x128xf32> -> vector<10x640xf32>
    %306 = arith.truncf %305 : vector<10x640xf32> to vector<10x640xbf16>
    %cst_158 = arith.constant dense<0.000000e+00> : vector<10x256xf32>
    %307 = tpu.matmul %306, %5, %cst_158 {dimension_numbers = #tpu.dot_dimension_numbers<[1], [0], [0], [1], [0, 0, 1, 1], [], []>} : vector<10x640xbf16>, vector<640x256xbf16>, vector<10x256xf32> -> vector<10x256xf32>
    %308 = vector.broadcast %7 : vector<1x256xf32> to vector<10x256xf32>
    %309 = arith.addf %307, %308 : vector<10x256xf32>
    %cst_159 = arith.constant 0.000000e+00 : f32
    %310 = vector.broadcast %cst_159 : f32 to vector<10x256xf32>
    %311 = arith.maximumf %309, %310 : vector<10x256xf32>
    %c3_160 = arith.constant 3 : index
    %c0_161 = arith.constant 0 : index
    %c0_162 = arith.constant 0 : index
    %312 = vector.load %arg5[%c3_160, %c0_161, %c0_162] : memref<4x10x256xf32, #tpu.memory_space<vmem>>, vector<1x10x256xf32>
    %313 = vector.shape_cast %312 : vector<1x10x256xf32> to vector<10x256xf32>
    %314 = vector.shape_cast %311 : vector<10x256xf32> to vector<1x10x256xf32>
    tpu.vector_store %arg5[%c3_160, %c0_161, %c0_162], %314 {strides = array<i32>} : memref<4x10x256xf32, #tpu.memory_space<vmem>>, vector<1x10x256xf32>,
    %315 = arith.truncf %311 : vector<10x256xf32> to vector<10x256xbf16>
    %cst_163 = arith.constant dense<0.000000e+00> : vector<10x128xf32>
    %316 = tpu.matmul %315, %8, %cst_163 {dimension_numbers = #tpu.dot_dimension_numbers<[1], [0], [0], [1], [0, 0, 1, 1], [], []>} : vector<10x256xbf16>, vector<256x128xbf16>, vector<10x128xf32> -> vector<10x128xf32>
    %cst_164 = arith.constant dense<0.000000e+00> : vector<5x128xf32>
    %317 = tpu.matmul %9, %316, %cst_164 {dimension_numbers = #tpu.dot_dimension_numbers<[1], [0], [0], [1], [0, 0, 1, 1], [], []>} : vector<5x10xbf16>, vector<10x128xf32>, vector<5x128xf32> -> vector<5x128xf32>
    %c3_165 = arith.constant 3 : index
    %c0_166 = arith.constant 0 : index
    %c0_167 = arith.constant 0 : index
    %318 = vector.load %arg6[%c3_165, %c0_166, %c0_167] : memref<4x5x128xf32, #tpu.memory_space<vmem>>, vector<1x5x128xf32>
    %319 = vector.shape_cast %318 : vector<1x5x128xf32> to vector<5x128xf32>
    %320 = vector.shape_cast %317 : vector<5x128xf32> to vector<1x5x128xf32>
    tpu.vector_store %arg6[%c3_165, %c0_166, %c0_167], %320 {strides = array<i32>} : memref<4x5x128xf32, #tpu.memory_space<vmem>>, vector<1x5x128xf32>,
    %cst_168 = arith.constant dense<0.000000e+00> : vector<18x128xf32>
    %321 = tpu.matmul %10, %317, %cst_168 {dimension_numbers = #tpu.dot_dimension_numbers<[1], [0], [0], [1], [0, 0, 1, 1], [], []>} : vector<18x5xbf16>, vector<5x128xf32>, vector<18x128xf32> -> vector<18x128xf32>
    %cst_169 = arith.constant dense<0.000000e+00> : vector<18x128xf32>
    %322 = tpu.matmul %11, %317, %cst_169 {dimension_numbers = #tpu.dot_dimension_numbers<[1], [0], [0], [1], [0, 0, 1, 1], [], []>} : vector<18x5xbf16>, vector<5x128xf32>, vector<18x128xf32> -> vector<18x128xf32>
    %323 = tpu.concatenate %321, %322 in 1 : vector<18x128xf32>, vector<18x128xf32> -> vector<18x256xf32>
    %324 = arith.truncf %323 : vector<18x256xf32> to vector<18x256xbf16>
    %cst_170 = arith.constant dense<0.000000e+00> : vector<18x256xf32>
    %325 = tpu.matmul %324, %12, %cst_170 {dimension_numbers = #tpu.dot_dimension_numbers<[1], [0], [0], [1], [0, 0, 1, 1], [], []>} : vector<18x256xbf16>, vector<256x256xbf16>, vector<18x256xf32> -> vector<18x256xf32>
    %326 = arith.addf %325, %14 : vector<18x256xf32>
    %cst_171 = arith.constant 0.000000e+00 : f32
    %327 = vector.broadcast %cst_171 : f32 to vector<18x256xf32>
    %328 = arith.maximumf %326, %327 : vector<18x256xf32>
    %329 = vector.extract_strided_slice %328 {offsets = [4, 0], sizes = [10, 256], strides = [1, 1]} : vector<18x256xf32> to vector<10x256xf32>
    %c3_172 = arith.constant 3 : index
    %c0_173 = arith.constant 0 : index
    %c0_174 = arith.constant 0 : index
    %330 = vector.load %arg7[%c3_172, %c0_173, %c0_174] : memref<4x10x256xf32, #tpu.memory_space<vmem>>, vector<1x10x256xf32>
    %331 = vector.shape_cast %330 : vector<1x10x256xf32> to vector<10x256xf32>
    %332 = vector.shape_cast %329 : vector<10x256xf32> to vector<1x10x256xf32>
    tpu.vector_store %arg7[%c3_172, %c0_173, %c0_174], %332 {strides = array<i32>} : memref<4x10x256xf32, #tpu.memory_space<vmem>>, vector<1x10x256xf32>,
    %333 = vector.extract_strided_slice %328 {offsets = [4, 0], sizes = [14, 256], strides = [1, 1]} : vector<18x256xf32> to vector<14x256xf32>
    %334 = vector.extract_strided_slice %328 {offsets = [3, 0], sizes = [14, 256], strides = [1, 1]} : vector<18x256xf32> to vector<14x256xf32>
    %335 = vector.extract_strided_slice %328 {offsets = [2, 0], sizes = [14, 256], strides = [1, 1]} : vector<18x256xf32> to vector<14x256xf32>
    %336 = vector.extract_strided_slice %328 {offsets = [1, 0], sizes = [14, 256], strides = [1, 1]} : vector<18x256xf32> to vector<14x256xf32>
    %337 = vector.extract_strided_slice %328 {offsets = [0, 0], sizes = [14, 256], strides = [1, 1]} : vector<18x256xf32> to vector<14x256xf32>
    %338 = tpu.concatenate %333, %334, %335, %336, %337 in 1 : vector<14x256xf32>, vector<14x256xf32>, vector<14x256xf32>, vector<14x256xf32>, vector<14x256xf32> -> vector<14x1280xf32>
    %339 = arith.truncf %338 : vector<14x1280xf32> to vector<14x1280xbf16>
    %cst_175 = arith.constant dense<0.000000e+00> : vector<14x128xf32>
    %340 = tpu.matmul %339, %15, %cst_175 {dimension_numbers = #tpu.dot_dimension_numbers<[1], [0], [0], [1], [0, 0, 1, 1], [], []>} : vector<14x1280xbf16>, vector<1280x128xbf16>, vector<14x128xf32> -> vector<14x128xf32>
    %341 = vector.broadcast %17 : vector<1x128xf32> to vector<14x128xf32>
    %342 = arith.addf %340, %341 : vector<14x128xf32>
    %cst_176 = arith.constant 0.000000e+00 : f32
    %343 = vector.broadcast %cst_176 : f32 to vector<14x128xf32>
    %344 = arith.maximumf %342, %343 : vector<14x128xf32>
    %c3_177 = arith.constant 3 : index
    %c0_178 = arith.constant 0 : index
    %c0_179 = arith.constant 0 : index
    %345 = vector.load %arg8[%c3_177, %c0_178, %c0_179] : memref<4x14x128xf32, #tpu.memory_space<vmem>>, vector<1x14x128xf32>
    %346 = vector.shape_cast %345 : vector<1x14x128xf32> to vector<14x128xf32>
    %347 = vector.shape_cast %344 : vector<14x128xf32> to vector<1x14x128xf32>
    tpu.vector_store %arg8[%c3_177, %c0_178, %c0_179], %347 {strides = array<i32>} : memref<4x14x128xf32, #tpu.memory_space<vmem>>, vector<1x14x128xf32>,
    %cst_180 = arith.constant dense<0.000000e+00> : vector<28x128xf32>
    %348 = tpu.matmul %18, %344, %cst_180 {dimension_numbers = #tpu.dot_dimension_numbers<[1], [0], [0], [1], [0, 0, 1, 1], [], []>} : vector<28x14xbf16>, vector<14x128xf32>, vector<28x128xf32> -> vector<28x128xf32>
    %cst_181 = arith.constant dense<0.000000e+00> : vector<28x128xf32>
    %349 = tpu.matmul %19, %344, %cst_181 {dimension_numbers = #tpu.dot_dimension_numbers<[1], [0], [0], [1], [0, 0, 1, 1], [], []>} : vector<28x14xbf16>, vector<14x128xf32>, vector<28x128xf32> -> vector<28x128xf32>
    %cst_182 = arith.constant dense<0.000000e+00> : vector<28x128xf32>
    %350 = tpu.matmul %20, %344, %cst_182 {dimension_numbers = #tpu.dot_dimension_numbers<[1], [0], [0], [1], [0, 0, 1, 1], [], []>} : vector<28x14xbf16>, vector<14x128xf32>, vector<28x128xf32> -> vector<28x128xf32>
    %cst_183 = arith.constant dense<0.000000e+00> : vector<28x128xf32>
    %351 = tpu.matmul %21, %344, %cst_183 {dimension_numbers = #tpu.dot_dimension_numbers<[1], [0], [0], [1], [0, 0, 1, 1], [], []>} : vector<28x14xbf16>, vector<14x128xf32>, vector<28x128xf32> -> vector<28x128xf32>
    %352 = tpu.concatenate %348, %349, %350, %351 in 1 : vector<28x128xf32>, vector<28x128xf32>, vector<28x128xf32>, vector<28x128xf32> -> vector<28x512xf32>
    %353 = arith.truncf %352 : vector<28x512xf32> to vector<28x512xbf16>
    %cst_184 = arith.constant dense<0.000000e+00> : vector<28x128xf32>
    %354 = tpu.matmul %353, %22, %cst_184 {dimension_numbers = #tpu.dot_dimension_numbers<[1], [0], [0], [1], [0, 0, 1, 1], [], []>} : vector<28x512xbf16>, vector<512x128xbf16>, vector<28x128xf32> -> vector<28x128xf32>
    %355 = vector.broadcast %24 : vector<1x128xf32> to vector<28x128xf32>
    %356 = arith.addf %354, %355 : vector<28x128xf32>
    %357 = math.tanh %356 : vector<28x128xf32>
    %c3_185 = arith.constant 3 : index
    %c0_186 = arith.constant 0 : index
    %c0_187 = arith.constant 0 : index
    %358 = vector.load %arg9[%c3_185, %c0_186, %c0_187] : memref<4x28x128xf32, #tpu.memory_space<vmem>>, vector<1x28x128xf32>
    %359 = vector.shape_cast %358 : vector<1x28x128xf32> to vector<28x128xf32>
    %360 = vector.shape_cast %357 : vector<28x128xf32> to vector<1x28x128xf32>
    tpu.vector_store %arg9[%c3_185, %c0_186, %c0_187], %360 {strides = array<i32>} : memref<4x28x128xf32, #tpu.memory_space<vmem>>, vector<1x28x128xf32>,
    return
  }
  func.func @transform_0(%arg0: i32) -> (i32, i32, i32) {
    %c0_i32 = arith.constant 0 : i32
    %c0_i32_0 = arith.constant 0 : i32
    %c0_i32_1 = arith.constant 0 : i32
    return %arg0, %c0_i32, %c0_i32_0 : i32, i32, i32
  }
  func.func @transform_1(%arg0: i32) -> (i32, i32) {
    %c0_i32 = arith.constant 0 : i32
    %c0_i32_0 = arith.constant 0 : i32
    %c0_i32_1 = arith.constant 0 : i32
    return %c0_i32, %c0_i32_0 : i32, i32
  }
  func.func @transform_2(%arg0: i32) -> (i32, i32, i32) {
    %c0_i32 = arith.constant 0 : i32
    %c0_i32_0 = arith.constant 0 : i32
    %c0_i32_1 = arith.constant 0 : i32
    return %arg0, %c0_i32, %c0_i32_0 : i32, i32, i32
  }
  func.func @transform_3(%arg0: i32) -> (i32, i32, i32) {
    %c0_i32 = arith.constant 0 : i32
    %c0_i32_0 = arith.constant 0 : i32
    %c0_i32_1 = arith.constant 0 : i32
    return %arg0, %c0_i32, %c0_i32_0 : i32, i32, i32
  }
  func.func @transform_4(%arg0: i32) -> (i32, i32, i32) {
    %c0_i32 = arith.constant 0 : i32
    %c0_i32_0 = arith.constant 0 : i32
    %c0_i32_1 = arith.constant 0 : i32
    return %arg0, %c0_i32, %c0_i32_0 : i32, i32, i32
  }
  func.func @transform_5(%arg0: i32) -> (i32, i32, i32) {
    %c0_i32 = arith.constant 0 : i32
    %c0_i32_0 = arith.constant 0 : i32
    %c0_i32_1 = arith.constant 0 : i32
    return %arg0, %c0_i32, %c0_i32_0 : i32, i32, i32
  }
  func.func @transform_6(%arg0: i32) -> (i32, i32, i32) {
    %c0_i32 = arith.constant 0 : i32
    %c0_i32_0 = arith.constant 0 : i32
    %c0_i32_1 = arith.constant 0 : i32
    return %arg0, %c0_i32, %c0_i32_0 : i32, i32, i32
  }
  func.func @transform_7(%arg0: i32) -> (i32, i32, i32) {
    %c0_i32 = arith.constant 0 : i32
    %c0_i32_0 = arith.constant 0 : i32
    %c0_i32_1 = arith.constant 0 : i32
    return %arg0, %c0_i32, %c0_i32_0 : i32, i32, i32
  }
  func.func @transform_8(%arg0: i32) -> (i32, i32, i32) {
    %c0_i32 = arith.constant 0 : i32
    %c0_i32_0 = arith.constant 0 : i32
    %c0_i32_1 = arith.constant 0 : i32
    return %arg0, %c0_i32, %c0_i32_0 : i32, i32, i32
  }
}

</mosaic_0001>

<bundles_post_ra>
// kernel: tile.1
= control target key start
LH: loop header
LB: loop body
LE: loop exit
PB: predicated region body
PF: predicated region fallthrough
CT: control target
= control target key end

     0   :  { %vm36_vm0 = vcmask 130048   ;;  %s112_s8 = smov 112   ;;  %s113_s9 = smov 80   ;;  %vm42_vm1 = vcmask 1048448   ;;  %vm48_vm2 = vcmask 917248   ;;  %vm54_vm3 = vcmask 786048   ;;  %s139_s0 = inlined_call_operand.vmem [shape: bf16[10,16], index: 0, kind: input, shape index: {}]   ;;  %s140_s1 = inlined_call_operand.vmem [shape: bf16[1,160], index: 1, kind: output, shape index: {}]  }
   0x1   :  { %v101_v0 = vld [vmem:[%s139_s0] sm:$0xff]   ;;  %s34_s0 = smov 3  ;;  %s114_s10 = smov 96   ;;  %vm60_vm4 = vcmask 654848   ;;  %vm66_vm5 = vcmask 523648   ;;  %vm72_vm6 = vcmask 392448  }
   0x2   :  { %v102_v1 = vunpack.c.l.bf16 %v101_v0  ;;  %v103_v2 = vunpack.c.h.bf16 %v101_v0  ;;  %s115_s11 = smov 64   ;;  %s75_s12 = smov 3  ;;  %vm79_vm7 = vcmask 261248   ;;  %v119_v20 = vmov 0.0  }
   0x3   :  { %s116_s13 = smov 48   ;;  %s117_s14 = smov 32  }
   0x4   :  { %33 = vst [vmem:[#allocation1] sm:$0xff] %v102_v1  ;;  %20 = vst [vmem:[#allocation1 + $0x8] sm:$0xff] %v103_v2  ;;  %s118_s15 = smov 16  }
   0xb   :  { %v39_v3 = vld [vmem:[#allocation1 + $0x7] sm:$0x1]   ;;  %v51_v4 = vld [vmem:[#allocation1 + $0x5] sm:$0x1]   ;;  %v45_v5 = vld [vmem:[#allocation1 + $0x6] sm:$0x1]  }
   0xc   :  { %40 = vrot.lane.b32.xlu0 %v39_v3, %s112_s8  ;;  %52 = vrot.lane.b32.xlu1 %v51_v4, %s113_s9  ;;  %v57_v6 = vld [vmem:[#allocation1 + $0x4] sm:$0x1]   ;;  %v35_v7 = vld [vmem:[#allocation1] ss:$8 sm:%s34_s0]   ;;  %v63_v8 = vld [vmem:[#allocation1 + $0x3] sm:$0x1]  }
   0xd   :  { %37 = vst.msk [vmem:[#allocation0] ss:$8 sm:$0x3] %vm36_vm0, %v35_v7   ;;  %v69_v9 = vld [vmem:[#allocation1 + $0x2] sm:$0x1]  }
   0xe   :  { %v76_v10 = vld [vmem:[#allocation1 + $0x1] ss:$8 sm:%s75_s12]  }
  0x10   :  { %46 = vrot.lane.b32.xlu0 %v45_v5, %s114_s10  ;;  %58 = vrot.lane.b32.xlu1 %v57_v6, %s115_s11 }
  0x14   :  { %64 = vrot.lane.b32.xlu0 %v63_v8, %s116_s13  ;;  %70 = vrot.lane.b32.xlu1 %v69_v9, %s117_s14 }
  0x18   :  { %77 = vrot.lane.b32.xlu0 %v76_v10, %s118_s15 }
  0x7e   :  { %v41_v11 = vpop.permute.xlu0 %40   ;;  %v53_v12 = vpop.permute.xlu1 %52  }
  0x7f   :  { %43 = vst.msk [vmem:[#allocation0] sm:$0x1] %vm42_vm1, %v41_v11  }
  0x82   :  { %v47_v13 = vpop.permute.xlu0 %46   ;;  %v59_v14 = vpop.permute.xlu1 %58  }
  0x83   :  { %49 = vst.msk [vmem:[#allocation0] sm:$0x1] %vm48_vm2, %v47_v13  }
  0x84   :  { %55 = vst.msk [vmem:[#allocation0] sm:$0x1] %vm54_vm3, %v53_v12  }
  0x85   :  { %61 = vst.msk [vmem:[#allocation0] sm:$0x1] %vm60_vm4, %v59_v14  }
  0x86   :  { %v65_v15 = vpop.permute.xlu0 %64   ;;  %v71_v16 = vpop.permute.xlu1 %70  }
  0x87   :  { %67 = vst.msk [vmem:[#allocation0] sm:$0x1] %vm66_vm5, %v65_v15  }
  0x88   :  { %73 = vst.msk [vmem:[#allocation0] sm:$0x1] %vm72_vm6, %v71_v16  }
  0x8a   :  { %v78_v17 = vpop.permute.xlu0 %77  }
  0x8b   :  { %80 = vst.msk [vmem:[#allocation0] ss:$8 sm:$0x3] %vm79_vm7, %v78_v17  }
  0x92   :  { %v86_v18 = vld [vmem:[#allocation0] sm:$0x3]  ;;  %v92_v19 = vld [vmem:[#allocation0 + $0x8] sm:$0x3] }
  0x93   :  { %v87_v21 = vpack.c.bf16 %v119_v20, %v86_v18  ;;  %v93_v22 = vpack.c.bf16 %v119_v20, %v92_v19 }
  0x95   :  { %90 = vst [vmem:[%s140_s1] sm:$0x1] %v87_v21  ;;  %99 = vst [vmem:[%s140_s1 + $0x1] sm:$0x1] %v93_v22 }

// kernel: tile.0
= control target key start
LH: loop header
LB: loop body
LE: loop exit
PB: predicated region body
PF: predicated region fallthrough
CT: control target
= control target key end

     0   :  { %s145_s8 = smov 66   ;;  %vm35_vm0 = vcmask 48128   ;;  %s146_s9 = smov 72   ;;  %vm41_vm1 = vcmask 687728   ;;  %vm47_vm2 = vcmask 638528   ;;  %vm53_vm3 = vcmask 589328   ;;  %s174_s0 = inlined_call_operand.vmem [shape: bf16[14,6], index: 0, kind: input, shape index: {}]   ;;  %s175_s1 = inlined_call_operand.vmem [shape: bf16[1,84], index: 1, kind: output, shape index: {}]  }
   0x1   :  { %v127_v0 = vld [vmem:[%s174_s0] sm:$0xff]   ;;  %s144_s0 = smov 78   ;;  %s147_s10 = smov 60   ;;  %vm59_vm4 = vcmask 540128   ;;  %vm65_vm5 = vcmask 490928   ;;  %vm71_vm6 = vcmask 441728  }
   0x2   :  { %v129_v1 = vunpack.c.h.bf16 %v127_v0  ;;  %v128_v2 = vunpack.c.l.bf16 %v127_v0  ;;  %s148_s11 = smov 54   ;;  %s149_s12 = smov 48   ;;  %vm77_vm7 = vcmask 392528   ;;  %vm83_vm8 = vcmask 343328  }
   0x3   :  { %s150_s13 = smov 42   ;;  %s151_s14 = smov 36   ;;  %vm89_vm9 = vcmask 294128   ;;  %vm95_vm10 = vcmask 244928   ;;  %vm101_vm11 = vcmask 195728   ;;  %vm107_vm12 = vcmask 146528  }
   0x4   :  { %20 = vst [vmem:[#allocation1 + $0x8] sm:$0xff] %v129_v1  ;;  %33 = vst [vmem:[#allocation1] sm:$0xff] %v128_v2  ;;  %s152_s15 = smov 30   ;;  %s153_s16 = smov 24   ;;  %vm113_vm13 = vcmask 97328   ;;  %v157_v31 = vmov 0.0  }
   0x5   :  { %s154_s17 = smov 18   ;;  %s155_s18 = smov 12  }
   0x6   :  { %s156_s19 = smov 6  }
   0xb   :  { %v38_v3 = vld [vmem:[#allocation1 + $0xd] sm:$0x1]   ;;  %v50_v4 = vld [vmem:[#allocation1 + $0xb] sm:$0x1]   ;;  %v44_v5 = vld [vmem:[#allocation1 + $0xc] sm:$0x1]  }
   0xc   :  { %39 = vrot.lane.b32.xlu0 %v38_v3, %s144_s0  ;;  %51 = vrot.lane.b32.xlu1 %v50_v4, %s145_s8  ;;  %v56_v6 = vld [vmem:[#allocation1 + $0xa] sm:$0x1]   ;;  %v34_v7 = vld [vmem:[#allocation1] sm:$0x1]   ;;  %v62_v8 = vld [vmem:[#allocation1 + $0x9] sm:$0x1]  }
   0xd   :  { %36 = vst.msk [vmem:[#allocation0] sm:$0x1] %vm35_vm0, %v34_v7   ;;  %v68_v9 = vld [vmem:[#allocation1 + $0x8] sm:$0x1]   ;;  %v74_v10 = vld [vmem:[#allocation1 + $0x7] sm:$0x1]  }
   0xe   :  { %v80_v11 = vld [vmem:[#allocation1 + $0x6] sm:$0x1]   ;;  %v86_v12 = vld [vmem:[#allocation1 + $0x5] sm:$0x1]   ;;  %v92_v13 = vld [vmem:[#allocation1 + $0x4] sm:$0x1]  }
   0xf   :  { %v98_v14 = vld [vmem:[#allocation1 + $0x3] sm:$0x1]   ;;  %v104_v15 = vld [vmem:[#allocation1 + $0x2] sm:$0x1]   ;;  %v110_v16 = vld [vmem:[#allocation1 + $0x1] sm:$0x1]  }
  0x10   :  { %45 = vrot.lane.b32.xlu0 %v44_v5, %s146_s9  ;;  %57 = vrot.lane.b32.xlu1 %v56_v6, %s147_s10 }
  0x14   :  { %63 = vrot.lane.b32.xlu0 %v62_v8, %s148_s11  ;;  %69 = vrot.lane.b32.xlu1 %v68_v9, %s149_s12 }
  0x18   :  { %75 = vrot.lane.b32.xlu0 %v74_v10, %s150_s13  ;;  %81 = vrot.lane.b32.xlu1 %v80_v11, %s151_s14 }
  0x1c   :  { %87 = vrot.lane.b32.xlu0 %v86_v12, %s152_s15  ;;  %93 = vrot.lane.b32.xlu1 %v92_v13, %s153_s16 }
  0x20   :  { %99 = vrot.lane.b32.xlu0 %v98_v14, %s154_s17  ;;  %105 = vrot.lane.b32.xlu1 %v104_v15, %s155_s18 }
  0x24   :  { %111 = vrot.lane.b32.xlu0 %v110_v16, %s156_s19 }
  0x7e   :  { %v40_v17 = vpop.permute.xlu0 %39   ;;  %v52_v18 = vpop.permute.xlu1 %51  }
  0x7f   :  { %42 = vst.msk [vmem:[#allocation0] sm:$0x1] %vm41_vm1, %v40_v17  }
  0x82   :  { %v46_v19 = vpop.permute.xlu0 %45   ;;  %v58_v20 = vpop.permute.xlu1 %57  }
  0x83   :  { %48 = vst.msk [vmem:[#allocation0] sm:$0x1] %vm47_vm2, %v46_v19  }
  0x84   :  { %54 = vst.msk [vmem:[#allocation0] sm:$0x1] %vm53_vm3, %v52_v18  }
  0x85   :  { %60 = vst.msk [vmem:[#allocation0] sm:$0x1] %vm59_vm4, %v58_v20  }
  0x86   :  { %v64_v21 = vpop.permute.xlu0 %63   ;;  %v70_v22 = vpop.permute.xlu1 %69  }
  0x87   :  { %66 = vst.msk [vmem:[#allocation0] sm:$0x1] %vm65_vm5, %v64_v21  }
  0x88   :  { %72 = vst.msk [vmem:[#allocation0] sm:$0x1] %vm71_vm6, %v70_v22  }
  0x8a   :  { %v76_v23 = vpop.permute.xlu0 %75   ;;  %v82_v24 = vpop.permute.xlu1 %81  }
  0x8b   :  { %78 = vst.msk [vmem:[#allocation0] sm:$0x1] %vm77_vm7, %v76_v23  }
  0x8c   :  { %84 = vst.msk [vmem:[#allocation0] sm:$0x1] %vm83_vm8, %v82_v24  }
  0x8e   :  { %v88_v25 = vpop.permute.xlu0 %87   ;;  %v94_v26 = vpop.permute.xlu1 %93  }
  0x8f   :  { %90 = vst.msk [vmem:[#allocation0] sm:$0x1] %vm89_vm9, %v88_v25  }
  0x90   :  { %96 = vst.msk [vmem:[#allocation0] sm:$0x1] %vm95_vm10, %v94_v26  }
  0x92   :  { %v100_v27 = vpop.permute.xlu0 %99   ;;  %v106_v28 = vpop.permute.xlu1 %105  }
  0x93   :  { %102 = vst.msk [vmem:[#allocation0] sm:$0x1] %vm101_vm11, %v100_v27  }
  0x94   :  { %108 = vst.msk [vmem:[#allocation0] sm:$0x1] %vm107_vm12, %v106_v28  }
  0x96   :  { %v112_v29 = vpop.permute.xlu0 %111  }
  0x97   :  { %114 = vst.msk [vmem:[#allocation0] sm:$0x1] %vm113_vm13, %v112_v29  }
  0x9e   :  { %v120_v30 = vld [vmem:[#allocation0] sm:$0x3] }
  0x9f   :  { %v121_v32 = vpack.c.bf16 %v157_v31, %v120_v30 }
  0xa1   :  { %124 = vst [vmem:[%s175_s1] sm:$0x1] %v121_v32 }

// kernel: tile.38
= control target key start
LH: loop header
LB: loop body
LE: loop exit
PB: predicated region body
PF: predicated region fallthrough
CT: control target
= control target key end

     0   :  { %2 = vsyncpa [#allocation1], 0  ;;  %s52_s6 = smov [#allocation0]   ;;  %s69_s0 = inlined_call_operand.hbm [shape: f32[16], index: 0, kind: input, shape index: {}]   ;;  %s70_s1 = inlined_call_operand.vmem [shape: bf16[10,16], index: 1, kind: output, shape index: {}]  }
   0x1   :  { %s9_s7 = sshll.u32 %s52_s6, 4  ;;  %s10_s7 = int_to_ptr.vmem [resolvable:$true] %s9_s7 }
   0x2   :  { %s38_s8 = scalar_lea.vmem %s10_s7, 16  ;;  %s42_s9 = scalar_lea.vmem %s10_s7, 32 }
   0x3   :  { %p39_p0 = scmp.ne.s32.totalorder %s10_s7, %s38_s8  ;;  %p43_p1 = scmp.lt.s32.totalorder %s10_s7, %s10_s7 }
   0x4   :  { %p44_p2 = scmp.lt.s32.totalorder %s42_s9, %s38_s8 }
   0x6   :  { %p45_p3 = por %p44_p2, %p43_p1 }
   0x8   :  { %p46_p4 = pnand %p45_p3, %p39_p0 }
   0xa   :  { %49 = shalt.err (!%p46_p4)
}
   0xb   :  { %12 = dma.hbm_to_vmem [thread:$0]  %s69_s0, 16, %s10_s7, [#allocation1]  }
   0xc   :  { %50 = dma.done.wait [#allocation1], 16  }
   0xd   :  { %51 = vsyncadd [#allocation1], 4294967280  ;;  %v16_v0 = vld [vmem:[#allocation0] ss:$0 sm:$0xff] }
   0xe   :  { %v27_v1 = vpack.c.bf16 %v16_v0, %v16_v0 }
  0x10   :  { %28 = vst [vmem:[%s70_s1] sm:$0xff] %v27_v1  }
  0x11   :  { %22 = vsyncpa [#allocation1], 1 }

// kernel: tile.2
= control target key start
LH: loop header
LB: loop body
LE: loop exit
PB: predicated region body
PF: predicated region fallthrough
CT: control target
= control target key end

     0   :  { %s305_s10 = smov 114   ;;  %s306_s11 = smov 102   ;;  %vm73_vm0 = vcmask 15360   ;;  %vm67_vm1 = vcmask 48128   ;;  %vm77_vm2 = vcmask 31744   ;;  %vm80_vm3 = vcmask 1048560   ;;  %s354_s0 = inlined_call_operand.vmem [shape: bf16[28,6], index: 0, kind: input, shape index: {}]   ;;  %s355_s1 = inlined_call_operand.vmem [shape: bf16[1,168], index: 1, kind: output, shape index: {}]  }
   0x1   :  { %v275_v0 = vld [vmem:[%s354_s0 + $0x8] sm:$0xff]   ;;  %v272_v1 = vld [vmem:[%s354_s0] sm:$0xff]   ;;  %s304_s0 = smov 120   ;;  %s307_s12 = smov 108   ;;  %vm86_vm4 = vcmask 1032128   ;;  %vm92_vm5 = vcmask 982928  }
   0x2   :  { %v269_v2 = vunpack.c.l.bf16 %v275_v0  ;;  %v274_v3 = vunpack.c.h.bf16 %v272_v1  ;;  %v273_v4 = vunpack.c.l.bf16 %v272_v1  ;;  %v270_v5 = vunpack.c.h.bf16 %v275_v0  ;;  %s308_s13 = smov 90   ;;  %s309_s14 = smov 96  }
   0x3   :  { %s310_s15 = smov 126   ;;  %s311_s16 = smov 84   ;;  %vm98_vm6 = vcmask 933728   ;;  %vm104_vm7 = vcmask 884528   ;;  %vm110_vm8 = vcmask 835328   ;;  %vm116_vm9 = vcmask 786128  }
   0x4   :  { %37 = vst [vmem:[#allocation1 + $0x10] sm:$0xff] %v269_v2  ;;  %52 = vst [vmem:[#allocation1 + $0x8] sm:$0xff] %v274_v3  ;;  %s312_s17 = smov 78   ;;  %s313_s18 = smov 72   ;;  %vm122_vm10 = vcmask 736928   ;;  %vm128_vm11 = vcmask 687728  }
   0x5   :  { %65 = vst [vmem:[#allocation1] sm:$0xff] %v273_v4  ;;  %21 = vst [vmem:[#allocation1 + $0x18] sm:$0xff] %v270_v5  ;;  %s314_s19 = smov 66   ;;  %s315_s20 = smov 60   ;;  %vm134_vm12 = vcmask 638528   ;;  %vm140_vm13 = vcmask 589328  }
   0x6   :  { %s316_s21 = smov 54   ;;  %s317_s22 = smov 48   ;;  %vm146_vm14 = vcmask 540128   ;;  %vm152_vm15 = vcmask 490928   ;;  %v331_v0 = vmov 0.0  }
   0x7   :  { %s318_s23 = smov 42   ;;  %s319_s24 = smov 36  }
   0x8   :  { %s320_s25 = smov 34   ;;  %s321_s26 = smov 30  }
   0x9   :  { %s322_s27 = smov 28   ;;  %s323_s28 = smov 24  }
   0xa   :  { %s324_s29 = smov 22   ;;  %s325_s30 = smov 18  }
   0xb   :  { %v83_v6 = vld [vmem:[#allocation1 + $0x14] sm:$0x1]   ;;  %v89_v7 = vld [vmem:[#allocation1 + $0x13] sm:$0x1]   ;;  %v101_v8 = vld [vmem:[#allocation1 + $0x11] sm:$0x1]  }
   0xc   :  { %84 = vrot.lane.b32.xlu0 %v83_v6, %s304_s0  ;;  %90 = vrot.lane.b32.xlu1 %v89_v7, %s305_s10  ;;  %v95_v9 = vld [vmem:[#allocation1 + $0x12] sm:$0x1]   ;;  %v113_v10 = vld [vmem:[#allocation1 + $0xf] sm:$0x1]   ;;  %v107_v11 = vld [vmem:[#allocation1 + $0x10] sm:$0x1]  }
   0xd   :  { %v70_v12 = vld [vmem:[#allocation1 + $0x15] sm:$0x1]   ;;  %v119_v15 = vld [vmem:[#allocation1 + $0xe] sm:$0x1]   ;;  %v66_v16 = vld [vmem:[#allocation1] sm:$0x1]  }
   0xe   :  { %v72_v13 = vld [vmem:[#allocation1 + $0x15] sm:$0x1]   ;;  %68 = vst.msk [vmem:[#allocation0] sm:$0x1] %vm67_vm1, %v66_v16   ;;  %v125_v17 = vld [vmem:[#allocation1 + $0xd] sm:$0x1]  }
   0xf   :  { %v74_v14 = vsel %vm73_vm0, %v72_v13, %v70_v12  ;;  %v131_v18 = vld [vmem:[#allocation1 + $0xc] sm:$0x1]   ;;  %v137_v19 = vld [vmem:[#allocation1 + $0xb] sm:$0x1]   ;;  %v143_v20 = vld [vmem:[#allocation1 + $0xa] sm:$0x1]  }
  0x10   :  { %102 = vrot.lane.b32.xlu0 %v101_v8, %s306_s11  ;;  %96 = vrot.lane.b32.xlu1 %v95_v9, %s307_s12  ;;  %v149_v21 = vld [vmem:[#allocation1 + $0x9] sm:$0x1]   ;;  %v155_v22 = vld [vmem:[#allocation1 + $0x8] sm:$0x1]   ;;  %v161_v23 = vld [vmem:[#allocation1 + $0x7] sm:$0x1]  }
  0x11   :  { %v167_v24 = vld [vmem:[#allocation1 + $0x6] sm:$0x1]   ;;  %v173_v25 = vld [vmem:[#allocation1 + $0x1b] sm:$0x1]   ;;  %v180_v26 = vld [vmem:[#allocation1 + $0x5] sm:$0x1]  }
  0x12   :  { %v186_v27 = vld [vmem:[#allocation1 + $0x1a] sm:$0x1]   ;;  %v193_v28 = vld [vmem:[#allocation1 + $0x4] sm:$0x1]   ;;  %v199_v29 = vld [vmem:[#allocation1 + $0x19] sm:$0x1]  }
  0x13   :  { %v206_v30 = vld [vmem:[#allocation1 + $0x3] sm:$0x1]   ;;  %v212_v31 = vld [vmem:[#allocation1 + $0x18] sm:$0x1]   ;;  %v219_v32 = vld [vmem:[#allocation1 + $0x2] sm:$0x1]  }
  0x14   :  { %114 = vrot.lane.b32.xlu0 %v113_v10, %s308_s13  ;;  %108 = vrot.lane.b32.xlu1 %v107_v11, %s309_s14  ;;  %s326_s2 = smov 16   ;;  %s327_s3 = smov 12   ;;  %v225_v33 = vld [vmem:[#allocation1 + $0x17] sm:$0x1]   ;;  %v232_v34 = vld [vmem:[#allocation1 + $0x1] sm:$0x1]  }
  0x15   :  { %s328_s4 = smov 10   ;;  %s329_s5 = smov 6   ;;  %v238_v35 = vld [vmem:[#allocation1 + $0x16] sm:$0x1]   ;;  %vm158_vm0 = vcmask 441728   ;;  %vm164_vm1 = vcmask 392528  }
  0x16   :  { %s330_s6 = smov 4  }
  0x18   :  { %75 = vrot.lane.b32.xlu0 %v74_v14, %s310_s15  ;;  %120 = vrot.lane.b32.xlu1 %v119_v15, %s311_s16 }
  0x1c   :  { %126 = vrot.lane.b32.xlu0 %v125_v17, %s312_s17  ;;  %132 = vrot.lane.b32.xlu1 %v131_v18, %s313_s18 }
  0x20   :  { %138 = vrot.lane.b32.xlu0 %v137_v19, %s314_s19  ;;  %144 = vrot.lane.b32.xlu1 %v143_v20, %s315_s20 }
  0x24   :  { %150 = vrot.lane.b32.xlu0 %v149_v21, %s316_s21  ;;  %156 = vrot.lane.b32.xlu1 %v155_v22, %s317_s22 }
  0x28   :  { %162 = vrot.lane.b32.xlu0 %v161_v23, %s318_s23  ;;  %168 = vrot.lane.b32.xlu1 %v167_v24, %s319_s24 }
  0x2c   :  { %174 = vrot.lane.b32.xlu0 %v173_v25, %s320_s25  ;;  %181 = vrot.lane.b32.xlu1 %v180_v26, %s321_s26 }
  0x30   :  { %187 = vrot.lane.b32.xlu0 %v186_v27, %s322_s27  ;;  %194 = vrot.lane.b32.xlu1 %v193_v28, %s323_s28 }
  0x34   :  { %200 = vrot.lane.b32.xlu0 %v199_v29, %s324_s29  ;;  %207 = vrot.lane.b32.xlu1 %v206_v30, %s325_s30 }
  0x38   :  { %213 = vrot.lane.b32.xlu0 %v212_v31, %s326_s2  ;;  %220 = vrot.lane.b32.xlu1 %v219_v32, %s327_s3 }
  0x3c   :  { %226 = vrot.lane.b32.xlu0 %v225_v33, %s328_s4  ;;  %233 = vrot.lane.b32.xlu1 %v232_v34, %s329_s5 }
  0x40   :  { %239 = vrot.lane.b32.xlu0 %v238_v35, %s330_s6 }
  0x7e   :  { %v85_v36 = vpop.permute.xlu0 %84   ;;  %v91_v37 = vpop.permute.xlu1 %90  }
  0x82   :  { %v103_v38 = vpop.permute.xlu0 %102   ;;  %v97_v39 = vpop.permute.xlu1 %96  }
  0x86   :  { %v115_v40 = vpop.permute.xlu0 %114   ;;  %v109_v41 = vpop.permute.xlu1 %108  }
  0x8a   :  { %v76_v42 = vpop.permute.xlu0 %75   ;;  %v121_v43 = vpop.permute.xlu1 %120  }
  0x8b   :  { %79 = vst.msk [vmem:[#allocation0 + $0x8] sm:$0x1] %vm77_vm2, %v76_v42   ;;  %vm170_vm2 = vcmask 343328  }
  0x8c   :  { %81 = vst.msk [vmem:[#allocation0] sm:$0x1] %vm80_vm3, %v76_v42   ;;  %vm176_vm3 = vcmask 326928  }
  0x8d   :  { %87 = vst.msk [vmem:[#allocation0] sm:$0x1] %vm86_vm4, %v85_v36   ;;  %vm183_vm4 = vcmask 294128  }
  0x8e   :  { %93 = vst.msk [vmem:[#allocation0] sm:$0x1] %vm92_vm5, %v91_v37   ;;  %v127_v44 = vpop.permute.xlu0 %126   ;;  %v133_v45 = vpop.permute.xlu1 %132   ;;  %vm189_vm5 = vcmask 277728  }
  0x8f   :  { %99 = vst.msk [vmem:[#allocation0] sm:$0x1] %vm98_vm6, %v97_v39   ;;  %vm196_vm6 = vcmask 244928  }
  0x90   :  { %105 = vst.msk [vmem:[#allocation0] sm:$0x1] %vm104_vm7, %v103_v38   ;;  %vm202_vm7 = vcmask 228528  }
  0x91   :  { %111 = vst.msk [vmem:[#allocation0] sm:$0x1] %vm110_vm8, %v109_v41   ;;  %vm209_vm8 = vcmask 195728  }
  0x92   :  { %117 = vst.msk [vmem:[#allocation0] sm:$0x1] %vm116_vm9, %v115_v40   ;;  %v139_v46 = vpop.permute.xlu0 %138   ;;  %v145_v47 = vpop.permute.xlu1 %144   ;;  %vm215_vm9 = vcmask 179328  }
  0x93   :  { %123 = vst.msk [vmem:[#allocation0] sm:$0x1] %vm122_vm10, %v121_v43   ;;  %vm222_vm10 = vcmask 146528  }
  0x94   :  { %129 = vst.msk [vmem:[#allocation0] sm:$0x1] %vm128_vm11, %v127_v44   ;;  %vm228_vm11 = vcmask 130128  }
  0x95   :  { %135 = vst.msk [vmem:[#allocation0] sm:$0x1] %vm134_vm12, %v133_v45   ;;  %vm235_vm12 = vcmask 97328  }
  0x96   :  { %141 = vst.msk [vmem:[#allocation0] sm:$0x1] %vm140_vm13, %v139_v46   ;;  %v151_v48 = vpop.permute.xlu0 %150   ;;  %v157_v49 = vpop.permute.xlu1 %156   ;;  %vm241_vm13 = vcmask 80928  }
  0x97   :  { %147 = vst.msk [vmem:[#allocation0] sm:$0x1] %vm146_vm14, %v145_v47  }
  0x98   :  { %153 = vst.msk [vmem:[#allocation0] sm:$0x1] %vm152_vm15, %v151_v48  }
  0x99   :  { %159 = vst.msk [vmem:[#allocation0] sm:$0x1] %vm158_vm0, %v157_v49  }
  0x9a   :  { %v163_v50 = vpop.permute.xlu0 %162   ;;  %v169_v51 = vpop.permute.xlu1 %168  }
  0x9b   :  { %165 = vst.msk [vmem:[#allocation0] sm:$0x1] %vm164_vm1, %v163_v50  }
  0x9c   :  { %171 = vst.msk [vmem:[#allocation0] sm:$0x1] %vm170_vm2, %v169_v51  }
  0x9e   :  { %v175_v52 = vpop.permute.xlu0 %174   ;;  %v182_v53 = vpop.permute.xlu1 %181  }
  0x9f   :  { %178 = vst.msk [vmem:[#allocation0 + $0x8] sm:$0x1] %vm176_vm3, %v175_v52  }
  0xa0   :  { %184 = vst.msk [vmem:[#allocation0] sm:$0x1] %vm183_vm4, %v182_v53  }
  0xa2   :  { %v188_v54 = vpop.permute.xlu0 %187   ;;  %v195_v55 = vpop.permute.xlu1 %194  }
  0xa3   :  { %191 = vst.msk [vmem:[#allocation0 + $0x8] sm:$0x1] %vm189_vm5, %v188_v54  }
  0xa4   :  { %197 = vst.msk [vmem:[#allocation0] sm:$0x1] %vm196_vm6, %v195_v55  }
  0xa6   :  { %v201_v56 = vpop.permute.xlu0 %200   ;;  %v208_v57 = vpop.permute.xlu1 %207  }
  0xa7   :  { %204 = vst.msk [vmem:[#allocation0 + $0x8] sm:$0x1] %vm202_vm7, %v201_v56  }
  0xa8   :  { %210 = vst.msk [vmem:[#allocation0] sm:$0x1] %vm209_vm8, %v208_v57  }
  0xaa   :  { %v214_v58 = vpop.permute.xlu0 %213   ;;  %v221_v59 = vpop.permute.xlu1 %220  }
  0xab   :  { %217 = vst.msk [vmem:[#allocation0 + $0x8] sm:$0x1] %vm215_vm9, %v214_v58  }
  0xac   :  { %223 = vst.msk [vmem:[#allocation0] sm:$0x1] %vm222_vm10, %v221_v59  }
  0xae   :  { %v227_v60 = vpop.permute.xlu0 %226   ;;  %v234_v61 = vpop.permute.xlu1 %233  }
  0xaf   :  { %230 = vst.msk [vmem:[#allocation0 + $0x8] sm:$0x1] %vm228_vm11, %v227_v60  }
  0xb0   :  { %236 = vst.msk [vmem:[#allocation0] sm:$0x1] %vm235_vm12, %v234_v61  }
  0xb2   :  { %v240_v62 = vpop.permute.xlu0 %239  }
  0xb3   :  { %243 = vst.msk [vmem:[#allocation0 + $0x8] sm:$0x1] %vm241_vm13, %v240_v62  }
  0xb7   :  { %v249_v63 = vld [vmem:[#allocation0] sm:$0x3] }
  0xb8   :  { %v250_v1 = vpack.c.bf16 %v331_v0, %v249_v63 }
  0xba   :  { %253 = vst [vmem:[%s355_s1] sm:$0x1] %v250_v1  ;;  %v255_v2 = vld [vmem:[#allocation0 + $0x8] sm:$0x3] }
  0xbb   :  { %v256_v3 = vpack.c.bf16 %v331_v0, %v255_v2 }
  0xbd   :  { %266 = vst [vmem:[%s355_s1 + $0x1] sm:$0x1] %v256_v3 }

// kernel: le_ae_forward.1
= control target key start
LH: loop header
LB: loop body
LE: loop exit
PB: predicated region body
PF: predicated region fallthrough
CT: control target
= control target key end

     0   :  { %s13250_s27 = smov 0   ;;  %s18563_s0 = inlined_call_operand.vmem [shape: f32[8,32,128], index: 0, kind: input, shape index: {}]   ;;  %s18564_s1 = inlined_call_operand.vmem [shape: bf16[4096,256], index: 1, kind: input, shape index: {}]   ;;  %s18565_s2 = inlined_call_operand.vmem [shape: f32[8,28,256], index: 2, kind: output, shape index: {0}]   ;;  %s18566_s3 = inlined_call_operand.vmem [shape: f32[8,14,128], index: 3, kind: output, shape index: {1}]   ;;  %s18567_s4 = inlined_call_operand.vmem [shape: f32[8,10,256], index: 4, kind: output, shape index: {2}]   ;;  %s18568_s5 = inlined_call_operand.vmem [shape: f32[8,5,128], index: 5, kind: output, shape index: {3}]   ;;  %s18569_s6 = inlined_call_operand.vmem [shape: f32[8,10,256], index: 6, kind: output, shape index: {4}]   ;;  %s18570_s7 = inlined_call_operand.vmem [shape: f32[8,14,128], index: 7, kind: output, shape index: {5}]   ;;  %s18571_s8 = inlined_call_operand.vmem [shape: f32[8,28,128], index: 8, kind: output, shape index: {6}]  }
   0x1 LB: > { %s9855_s28 = sadd.s32 4294967295, %s13200_s27   ;;  %p9859_p0 = scmp.ge.s32.totalorder %s13200_s27, 1  ;;  %s13200_s27 = sphi %s13250_s27, %s19_s27  }
   0x2   : > { %p277_p1 = scmp.lt.s32.totalorder %s13200_s27, 3 }
   0x4   : > { %p278_p2 = pnand %p9859_p0, %p277_p1 }
   0x5   : > { %s9860_s25 = sshll.u32 (!%p278_p2), %s9855_s28, 2 }
   0x6   : > { %281 = sbr.rel (%p278_p2) target bundleno = 9286 (0x2446), region = 28  ;;  %p349_p3 = scmp.lt.s32.totalorder (!%p278_p2), %s9860_s25, 7 }
   0xb   : > { %v11667_v0 = vld [vmem:[%s18564_s1 + $0x74] ss:$8 sps:$4 sm:$0xff]   ;;  %v11669_v1 = vld [vmem:[%s18564_s1 + $0x70] ss:$8 sps:$4 sm:$0xff]   ;;  %v11673_v4 = vld [vmem:[%s18564_s1 + $0x64] ss:$8 sps:$4 sm:$0xff]  }
   0xc   : > { %1402 = vmatprep.subr.bf16.mxu0 %v11667_v0  ;;  %v11670_v2 = vld [vmem:[%s18564_s1 + $0x174] ss:$8 sps:$4 sm:$0xff]   ;;  %v11672_v3 = vld [vmem:[%s18564_s1 + $0x170] ss:$8 sps:$4 sm:$0xff]   ;;  %v11675_v5 = vld [vmem:[%s18564_s1 + $0x60] ss:$8 sps:$4 sm:$0xff]  }
   0xd   : > { %1403 = vmatpush1.bf16.msra.mxu0 %v11669_v1  ;;  %1455 = vmatprep.subr.bf16.mxu1 %v11670_v2  ;;  %v11676_v6 = vld [vmem:[%s18564_s1 + $0x164] ss:$8 sps:$4 sm:$0xff]   ;;  %v11678_v7 = vld [vmem:[%s18564_s1 + $0x160] ss:$8 sps:$4 sm:$0xff]   ;;  %v11679_v8 = vld [vmem:[%s18564_s1 + $0x54] ss:$8 sps:$4 sm:$0xff]  }
   0xe   : > { %1456 = vmatpush1.bf16.msra.mxu1 %v11672_v3  ;;  %1404 = vmatprep.subr.bf16.mxu0 %v11673_v4  ;;  %v11681_v9 = vld [vmem:[%s18564_s1 + $0x50] ss:$8 sps:$4 sm:$0xff]   ;;  %v11682_v10 = vld [vmem:[%s18564_s1 + $0x154] ss:$8 sps:$4 sm:$0xff]   ;;  %v11685_v11 = vld [vmem:[%s18564_s1 + $0x44] ss:$8 sps:$4 sm:$0xff]  }
   0xf   : > { %1457 = vmatprep.subr.bf16.mxu1 %v11676_v6  ;;  %v11684_v12 = vld [vmem:[%s18564_s1 + $0x150] ss:$8 sps:$4 sm:$0xff]   ;;  %v11688_v13 = vld [vmem:[%s18564_s1 + $0x144] ss:$8 sps:$4 sm:$0xff]   ;;  %v11687_v14 = vld [vmem:[%s18564_s1 + $0x40] ss:$8 sps:$4 sm:$0xff]  }
  0x10   : > { %v11691_v15 = vld [vmem:[%s18564_s1 + $0x34] ss:$8 sps:$4 sm:$0xff]   ;;  %v11690_v16 = vld [vmem:[%s18564_s1 + $0x140] ss:$8 sps:$4 sm:$0xff]   ;;  %v11693_v18 = vld [vmem:[%s18564_s1 + $0x30] ss:$8 sps:$4 sm:$0xff]  }
  0x11   : > { %1405 = vmatpush1.bf16.msra.mxu0 %v11675_v5  ;;  %v11694_v17 = vld [vmem:[%s18564_s1 + $0x134] ss:$8 sps:$4 sm:$0xff]   ;;  %v11697_v19 = vld [vmem:[%s18564_s1 + $0x24] ss:$8 sps:$4 sm:$0xff]   ;;  %v11696_v20 = vld [vmem:[%s18564_s1 + $0x130] ss:$8 sps:$4 sm:$0xff]  }
  0x12   : > { %1406 = vmatprep.subr.bf16.mxu0 %v11679_v8  ;;  %1458 = vmatpush1.bf16.msra.mxu1 %v11678_v7  ;;  %v11700_v21 = vld [vmem:[%s18564_s1 + $0x124] ss:$8 sps:$4 sm:$0xff]   ;;  %v11699_v22 = vld [vmem:[%s18564_s1 + $0x20] ss:$8 sps:$4 sm:$0xff]   ;;  %v11703_v23 = vld [vmem:[%s18564_s1 + $0x14] ss:$8 sps:$4 sm:$0xff]  }
  0x13   : > { %1459 = vmatprep.subr.bf16.mxu1 %v11682_v10  ;;  %v11702_v24 = vld [vmem:[%s18564_s1 + $0x120] ss:$8 sps:$4 sm:$0xff]   ;;  %v11706_v25 = vld [vmem:[%s18564_s1 + $0x114] ss:$8 sps:$4 sm:$0xff]   ;;  %v11705_v26 = vld [vmem:[%s18564_s1 + $0x10] ss:$8 sps:$4 sm:$0xff]  }
  0x14   : > { %v11709_v27 = vld [vmem:[%s18564_s1 + $0x4] ss:$8 sps:$4 sm:$0xff]   ;;  %v11708_v28 = vld [vmem:[%s18564_s1 + $0x110] ss:$8 sps:$4 sm:$0xff]   ;;  %v11711_v30 = vld [vmem:[%s18564_s1] ss:$8 sps:$4 sm:$0xff]  }
  0x15   : > { %1407 = vmatpush1.bf16.msra.mxu0 %v11681_v9  ;;  %v11712_v29 = vld [vmem:[%s18564_s1 + $0x104] ss:$8 sps:$4 sm:$0xff]   ;;  %v11715_v31 = vld [vmem:[%s18564_s1 + $0xf4] ss:$8 sps:$4 sm:$0xff]   ;;  %v11714_v32 = vld [vmem:[%s18564_s1 + $0x100] ss:$8 sps:$4 sm:$0xff]  }
  0x16   : > { %1408 = vmatprep.subr.bf16.mxu0 %v11685_v11  ;;  %1460 = vmatpush1.bf16.msra.mxu1 %v11684_v12  ;;  %v11718_v33 = vld [vmem:[%s18564_s1 + $0x1f4] ss:$8 sps:$4 sm:$0xff]   ;;  %v11717_v34 = vld [vmem:[%s18564_s1 + $0xf0] ss:$8 sps:$4 sm:$0xff]   ;;  %v11721_v35 = vld [vmem:[%s18564_s1 + $0xe4] ss:$8 sps:$4 sm:$0xff]  }
  0x17   : > { %1461 = vmatprep.subr.bf16.mxu1 %v11688_v13  ;;  %s18573_s25 = smov (!%p349_p3, %s9860_s25), 7  ;;  %v11720_v36 = vld [vmem:[%s18564_s1 + $0x1f0] ss:$8 sps:$4 sm:$0xff]   ;;  %v11724_v37 = vld [vmem:[%s18564_s1 + $0x1e4] ss:$8 sps:$4 sm:$0xff]   ;;  %vm936_vm0 = vcmask 1046528  }
  0x18   : > { %v11723_v38 = vld [vmem:[%s18564_s1 + $0xe0] ss:$8 sps:$4 sm:$0xff]   ;;  %v11727_v39 = vld [vmem:[%s18564_s1 + $0xd4] ss:$8 sps:$4 sm:$0xff]   ;;  %s13383_s30 = sshll.u32 %s18573_s25, 5  ;;  %vm960_vm1 = vcmask 1044480  }
  0x19   : > { %1409 = vmatpush1.bf16.msra.mxu0 %v11687_v14  ;;  %v11726_v40 = vld [vmem:[%s18564_s1 + $0x1e0] ss:$8 sps:$4 sm:$0xff]   ;;  %v11730_v41 = vld [vmem:[%s18564_s1 + $0x1d4] ss:$8 sps:$4 sm:$0xff]   ;;  %v11729_v42 = vld [vmem:[%s18564_s1 + $0xd0] ss:$8 sps:$4 sm:$0xff]   ;;  %s13398_s16 = scalar_lea.vmem %s18563_s0, %s13383_s30  ;;  %s13972_s9 = scalar_lea.vmem %s18567_s4, %s13383_s30 }
  0x1a   : > { %1410 = vmatprep.subr.bf16.mxu0 %v11691_v15  ;;  %1462 = vmatpush1.bf16.msra.mxu1 %v11690_v16  ;;  %v11733_v43 = vld [vmem:[%s18564_s1 + $0xc4] ss:$8 sps:$4 sm:$0xff]   ;;  %v11732_v44 = vld [vmem:[%s18564_s1 + $0x1d0] ss:$8 sps:$4 sm:$0xff]   ;;  %v11735_v48 = vld [vmem:[%s18564_s1 + $0xc0] ss:$8 sps:$4 sm:$0xff]   ;;  %s14248_s24 = scalar_lea.vmem %s18569_s6, %s13383_s30  ;;  %s14998_s14 = scalar_lea.vmem %s18571_s8, %s13383_s30 }
  0x1b   : > { %1463 = vmatprep.subr.bf16.mxu1 %v11694_v17  ;;  %v11736_v45 = vld [vmem:[%s18564_s1 + $0x1c4] ss:$8 sps:$4 sm:$0xff]   ;;  %v13419_v49 = vld [vmem:[%s13398_s16 + $0x10] sm:$0xff]  ;;  %v11738_v56 = vld [vmem:[%s18564_s1 + $0x1c0] ss:$8 sps:$4 sm:$0xff]   ;;  %vm948_vm2 = vcmask 1045504  }
  0x1c   : > { %v13410_v46 = vld [vmem:[%s13398_s16] sm:$0xff]  ;;  %v13413_v47 = vld [vmem:[%s13398_s16 + $0x8] sm:$0xff]  ;;  %v11739_v52 = vld [vmem:[%s18564_s1 + $0xb4] ss:$8 sps:$4 sm:$0xff]   ;;  %v940_v53 = vrot.slane %v13419_v49, 1  ;;  %v964_v58 = vrot.slane %v13419_v49, 3 }
  0x1d   : > { %1411 = vmatpush1.bf16.msra.mxu0 %v11693_v18  ;;  %v937_v50 = vrot.slane %v13410_v46, 1  ;;  %v938_v51 = vrot.slane %v13413_v47, 1  ;;  %v961_v54 = vrot.slane %v13410_v46, 3  ;;  %v962_v55 = vrot.slane %v13413_v47, 3  ;;  %v11742_v59 = vld [vmem:[%s18564_s1 + $0x1b4] ss:$8 sps:$4 sm:$0xff]  }
  0x1e   : > { %1412 = vmatprep.subr.bf16.mxu0 %v11697_v19  ;;  %1464 = vmatpush1.bf16.msra.mxu1 %v11696_v20  ;;  %v11741_v62 = vld [vmem:[%s18564_s1 + $0xb0] ss:$8 sps:$4 sm:$0xff]   ;;  %v11745_v1 = vld [vmem:[%s18564_s1 + $0xa4] ss:$8 sps:$4 sm:$0xff]   ;;  %v11747_v5 = vld [vmem:[%s18564_s1 + $0xa0] ss:$8 sps:$4 sm:$0xff]  }
  0x1f   : > { %1465 = vmatprep.subr.bf16.mxu1 %v11700_v21  ;;  %v939_v57 = vsel %vm936_vm0, %v937_v50, %v938_v51  ;;  %v941_v60 = vsel %vm936_vm0, %v938_v51, %v940_v53  ;;  %v963_v61 = vsel %vm960_vm1, %v961_v54, %v962_v55  ;;  %v965_v0 = vsel %vm960_vm1, %v962_v55, %v964_v58  ;;  %v11744_v3 = vld [vmem:[%s18564_s1 + $0x1b0] ss:$8 sps:$4 sm:$0xff]   ;;  %v11748_v4 = vld [vmem:[%s18564_s1 + $0x1a4] ss:$8 sps:$4 sm:$0xff]   ;;  %v11750_v6 = vld [vmem:[%s18564_s1 + $0x1a0] ss:$8 sps:$4 sm:$0xff]  }
  0x20   : > { %v985_v63 = vpack.c.bf16 %v941_v60, %v939_v57  ;;  %v987_v2 = vpack.c.bf16 %v965_v0, %v963_v61  ;;  %v11751_v7 = vld [vmem:[%s18564_s1 + $0x94] ss:$8 sps:$4 sm:$0xff]   ;;  %v11753_v9 = vld [vmem:[%s18564_s1 + $0x90] ss:$8 sps:$4 sm:$0xff]   ;;  %v949_v11 = vrot.slane %v13410_v46, 2  ;;  %v950_v12 = vrot.slane %v13413_v47, 2 }
  0x21   : > { %1413 = vmatpush1.bf16.msra.mxu0 %v11699_v22  ;;  %v13462_v8 = vld [vmem:[%s13398_s16 + $0x18] sm:$0xff]  ;;  %v11757_v14 = vld [vmem:[%s18564_s1 + $0x84] ss:$8 sps:$4 sm:$0xff]   ;;  %v952_v15 = vrot.slane %v13419_v49, 2  ;;  %v11759_v20 = vld [vmem:[%s18564_s1 + $0x80] ss:$8 sps:$4 sm:$0xff]  }
  0x22   : > { %1414 = vmatprep.subr.bf16.mxu0 %v11703_v23  ;;  %1466 = vmatpush1.bf16.msra.mxu1 %v11702_v24  ;;  %v11754_v10 = vld [vmem:[%s18564_s1 + $0x194] ss:$8 sps:$4 sm:$0xff]   ;;  %v11756_v13 = vld [vmem:[%s18564_s1 + $0x190] ss:$8 sps:$4 sm:$0xff]   ;;  %v942_v16 = vrot.slane %v13462_v8, 1  ;;  %v966_v17 = vrot.slane %v13462_v8, 3 }
  0x23   : > { %1467 = vmatprep.subr.bf16.mxu1 %v11706_v25  ;;  %1434 = vmatprep.mubr.bf16.mxu0 %v985_v63  ;;  %v954_v18 = vrot.slane %v13462_v8, 2  ;;  %v11760_v19 = vld [vmem:[%s18564_s1 + $0x184] ss:$8 sps:$4 sm:$0xff]   ;;  %v11763_v21 = vld [vmem:[%s18564_s1 + $0x274] ss:$8 sps:$4 sm:$0xff]   ;;  %v951_v25 = vsel %vm948_vm2, %v949_v11, %v950_v12  ;;  %v976_v54 = vrot.slane %v13419_v49, 4 }
  0x24   : > { %1487 = vmatprep.mubr.bf16.mxu1 %v987_v2  ;;  %v11762_v22 = vld [vmem:[%s18564_s1 + $0x180] ss:$8 sps:$4 sm:$0xff]   ;;  %v943_v23 = vsel %vm936_vm0, %v940_v53, %v942_v16  ;;  %v11765_v24 = vld [vmem:[%s18564_s1 + $0x270] ss:$8 sps:$4 sm:$0xff]   ;;  %v11784_v51 = vld [vmem:[%s18564_s1 + $0x204] ss:$8 sps:$4 sm:$0xff]  }
  0x25   : > { %1415 = vmatpush1.bf16.msra.mxu0 %v11705_v26  ;;  %v953_v26 = vsel %vm948_vm2, %v950_v12, %v952_v15  ;;  %v11783_v50 = vld [vmem:[%s18564_s1 + $0x210] ss:$8 sps:$4 sm:$0xff]   ;;  %v974_v53 = vrot.slane %v13413_v47, 4  ;;  %vm972_vm3 = vcmask 1043456   ;;  %v11786_v55 = vld [vmem:[%s18564_s1 + $0x200] ss:$8 sps:$4 sm:$0xff]  }
  0x26   : > { %1416 = vmatprep.subr.bf16.mxu0 %v11709_v27  ;;  %1468 = vmatpush1.bf16.msra.mxu1 %v11708_v28  ;;  %v984_v27 = vpack.c.bf16 %v13413_v47, %v13410_v46  ;;  %v11766_v28 = vld [vmem:[%s18564_s1 + $0x264] ss:$8 sps:$4 sm:$0xff]   ;;  %v11788_v60 = vld [vmem:[%s18564_s1 + $0x2f8] ss:$8 sps:$4 sm:$0xff]   ;;  %v11789_v61 = vld [vmem:[%s18564_s1 + $0x368] ss:$8 sps:$4 sm:$0xff]  }
  0x27   : > { %1469 = vmatprep.subr.bf16.mxu1 %v11712_v29  ;;  %v967_v29 = vsel %vm960_vm1, %v964_v58, %v966_v17  ;;  %v977_v57 = vsel %vm972_vm3, %v974_v53, %v976_v54  ;;  %v978_v58 = vrot.slane %v13462_v8, 4  ;;  %v11791_v63 = vld [vmem:[%s18564_s1 + $0x358] ss:$8 sps:$4 sm:$0xff]   ;;  %v11794_v2 = vld [vmem:[%s18564_s1 + $0x2c8] ss:$8 sps:$4 sm:$0xff]   ;;  %s10410_s17 = sshll.u32 %s18573_s25, 6 }
  0x28   : > { %v11792_v0 = vld [vmem:[%s18564_s1 + $0x2d8] ss:$8 sps:$4 sm:$0xff]   ;;  %s13624_s20 = scalar_lea.vmem %s18565_s2, %s10410_s17  ;;  %vm13204_vm4 = vmmov 0   ;;  %vm1731_vm5 = vcmask 228352   ;;  %s10411_s15 = sshll.u32 %s18573_s25, 4  ;;  %vm2528_vm6 = vcmask 1041408  }
  0x29   : > { %1417 = vmatpush1.bf16.msra.mxu0 %v11711_v30  ;;  %v990_v30 = vpack.c.bf16 %v942_v16, %v943_v23  ;;  %v484_v16 = vld [vmem:[%s18564_s1 + $0x280] sm:$0x11]  ;;  %s13850_s19 = scalar_lea.vmem %s18566_s3, %s10411_s15  ;;  %vm2524_vm7 = vcmask 80896   ;;  %vm2613_vm8 = vcmask 39936   ;;  %s9873_s17 = sshll.u32 %s18573_s25, 3  ;;  %vm3038_vm9 = vcmask 1040384  }
  0x2a   : > { %1418 = vmatprep.subr.bf16.mxu0 %v11715_v31  ;;  %1470 = vmatpush1.bf16.msra.mxu1 %v11714_v32  ;;  %v986_v31 = vpack.c.bf16 %v953_v26, %v951_v25  ;;  %v11768_v32 = vld [vmem:[%s18564_s1 + $0x260] ss:$8 sps:$4 sm:$0xff]   ;;  %v486_v23 = vunpack.c.h.bf16 %v484_v16  ;;  %s13996_s22 = scalar_lea.vmem %s18568_s5, %s9873_s17  ;;  %vm3067_vm10 = vcmask 1042432   ;;  %vm3866_vm11 = vcmask 113664   ;;  %s14495_s28 = scalar_lea.vmem %s18570_s7, %s10411_s15 }
  0x2b   : > { %1471 = vmatprep.subr.bf16.mxu1 %v11718_v33  ;;  %v992_v33 = vpack.c.bf16 %v966_v17, %v967_v29 }
  0x2d   : > { %1419 = vmatpush2.bf16.msra.mxu0 %v11717_v34  ;;  %v11769_v34 = vld [vmem:[%s18564_s1 + $0x254] ss:$8 sps:$4 sm:$0xff]  }
  0x2e   : > { %1420 = vmatprep.subr.bf16.mxu0 %v11721_v35  ;;  %1472 = vmatpush2.bf16.msra.mxu1 %v11720_v36  ;;  %v11771_v35 = vld [vmem:[%s18564_s1 + $0x250] ss:$8 sps:$4 sm:$0xff]   ;;  %v955_v36 = vsel %vm948_vm2, %v952_v15, %v954_v18 }
  0x2f   : > { %1473 = vmatprep.subr.bf16.mxu1 %v11724_v37  ;;  %v11772_v37 = vld [vmem:[%s18564_s1 + $0x244] ss:$8 sps:$4 sm:$0xff]  }
  0x31   : > { %1421 = vmatpush2.bf16.msra.mxu0 %v11723_v38  ;;  %v989_v38 = vpack.c.bf16 %v13462_v8, %v13419_v49  ;;  %v11787_v49 = vld [vmem:[%s18564_s1 + $0x378] ss:$8 sps:$4 sm:$0xff]  }
  0x32   : > { %1422 = vmatprep.subr.bf16.mxu0 %v11727_v39  ;;  %1474 = vmatpush2.bf16.msra.mxu1 %v11726_v40  ;;  %v991_v39 = vpack.c.bf16 %v954_v18, %v955_v36  ;;  %v11774_v40 = vld [vmem:[%s18564_s1 + $0x240] ss:$8 sps:$4 sm:$0xff]  }
  0x33   : > { %1475 = vmatprep.subr.bf16.mxu1 %v11730_v41  ;;  %v11775_v41 = vld [vmem:[%s18564_s1 + $0x234] ss:$8 sps:$4 sm:$0xff]   ;;  %v11800_v8 = vld [vmem:[%s18564_s1 + $0x298] ss:$8 sps:$4 sm:$0xff]  }
  0x35   : > { %1423 = vmatpush2.bf16.msra.mxu0 %v11729_v42  ;;  %v13202_v42 = vmov 0  }
  0x36   : > { %1424 = vmatprep.subr.bf16.mxu0 %v11733_v43  ;;  %1476 = vmatpush2.bf16.msra.mxu1 %v11732_v44  ;;  %v11777_v43 = vld [vmem:[%s18564_s1 + $0x230] ss:$8 sps:$4 sm:$0xff]   ;;  %v11778_v44 = vld [vmem:[%s18564_s1 + $0x224] ss:$8 sps:$4 sm:$0xff]  }
  0x37   : > { %1477 = vmatprep.subr.bf16.mxu1 %v11736_v45  ;;  %v11780_v45 = vld [vmem:[%s18564_s1 + $0x220] ss:$8 sps:$4 sm:$0xff]  }
  0x39   : > { %1425 = vmatpush2.bf16.msra.mxu0 %v11735_v48  ;;  %v11781_v48 = vld [vmem:[%s18564_s1 + $0x214] ss:$8 sps:$4 sm:$0xff]  }
  0x3a   : > { %1426 = vmatprep.subr.bf16.mxu0 %v11739_v52  ;;  %1478 = vmatpush2.bf16.msra.mxu1 %v11738_v56  ;;  %v973_v52 = vrot.slane %v13410_v46, 4  ;;  %v979_v46 = vsel %vm972_vm3, %v976_v54, %v978_v58 }
  0x3b   : > { %1479 = vmatprep.subr.bf16.mxu1 %v11742_v59  ;;  %v993_v47 = vpack.c.bf16 %v978_v58, %v979_v46 }
  0x3c   : > { %v975_v56 = vsel %vm972_vm3, %v973_v52, %v974_v53 }
  0x3d   : > { %1427 = vmatpush2.bf16.msra.mxu0 %v11741_v62  ;;  %v988_v59 = vpack.c.bf16 %v977_v57, %v975_v56  ;;  %v11790_v62 = vld [vmem:[%s18564_s1 + $0x2e8] ss:$8 sps:$4 sm:$0xff]  }
  0x3e   : > { %1428 = vmatprep.subr.bf16.mxu0 %v11745_v1  ;;  %1480 = vmatpush2.bf16.msra.mxu1 %v11744_v3  ;;  %v11793_v1 = vld [vmem:[%s18564_s1 + $0x348] ss:$8 sps:$4 sm:$0xff]   ;;  %v11795_v3 = vld [vmem:[%s18564_s1 + $0x338] ss:$8 sps:$4 sm:$0xff]  }
  0x3f   : > { %1481 = vmatprep.subr.bf16.mxu1 %v11748_v4  ;;  %v11796_v4 = vld [vmem:[%s18564_s1 + $0x2b8] ss:$8 sps:$4 sm:$0xff]  }
  0x41   : > { %1429 = vmatpush2.bf16.msra.mxu0 %v11747_v5  ;;  %v11797_v5 = vld [vmem:[%s18564_s1 + $0x328] ss:$8 sps:$4 sm:$0xff]  }
  0x42   : > { %1430 = vmatprep.subr.bf16.mxu0 %v11751_v7  ;;  %1482 = vmatpush2.bf16.msra.mxu1 %v11750_v6  ;;  %v11798_v6 = vld [vmem:[%s18564_s1 + $0x2a8] ss:$8 sps:$4 sm:$0xff]   ;;  %v11799_v7 = vld [vmem:[%s18564_s1 + $0x318] ss:$8 sps:$4 sm:$0xff]  }
  0x43   : > { %1483 = vmatprep.subr.bf16.mxu1 %v11754_v10  ;;  %v11802_v10 = vld [vmem:[%s18564_s1 + $0x288] ss:$8 sps:$4 sm:$0xff]  }
  0x45   : > { %1431 = vmatpush2.bf16.msra.mxu0 %v11753_v9  ;;  %v11801_v9 = vld [vmem:[%s18564_s1 + $0x308] ss:$8 sps:$4 sm:$0xff]  }
  0x46   : > { %1432 = vmatprep.subr.bf16.mxu0 %v11757_v14  ;;  %1484 = vmatpush2.bf16.msra.mxu1 %v11756_v13  ;;  %v994_v13 = vlaneseq }
  0x47   : > { %1485 = vmatprep.subr.bf16.mxu1 %v11760_v19 }
  0x48   : > { %v995_v15 = vshrl.u32 %v994_v13, 7 }
  0x49   : > { %1433 = vmatpush2.bf16.msra.mxu0 %v11759_v20  ;;  %v485_v20 = vunpack.c.l.bf16 %v484_v16  ;;  %v13203_v16 = vmov 0.0  }
  0x4a   : > { %1508 = vmatprep.subr.bf16.mxu0 %v11763_v21  ;;  %1486 = vmatpush2.bf16.msra.mxu1 %v11762_v22  ;;  %v13608_v21 = vsub.s32 0, %v995_v15 }
  0x4b   : > { %10416 = vmatprep.subr.bf16.mxu1 %v11787_v49 }
  0x4c   : > { %1435 = vmatmul.mubr.bf16.vlgmr.msra.gmra.mxu0 %v984_v27  ;;  %v13611_v25 = vrot.slane %v485_v20, %v13608_v21  ;;  %v13614_v27 = vrot.slane %v486_v23, %v13608_v21  ;;  %v11812_v20 = vld [vmem:[%s18564_s1 + $0x3f8] ss:$8 sps:$4 sm:$0xff]   ;;  %v11818_v23 = vld [vmem:[%s18564_s1 + $0x3e8] ss:$8 sps:$4 sm:$0xff]  }
  0x4d   : > { %1509 = vmatpush1.bf16.msra.mxu0 %v11765_v24  ;;  %1444 = vmatprep.mubr.bf16.mxu0 %v990_v30 }
  0x4e   : > { %1488 = vmatmul.mubr.bf16.vlgmr.msra.gmra.mxu1 %v986_v31  ;;  %1510 = vmatprep.subr.bf16.mxu0 %v11766_v28 }
  0x4f   : > { %1497 = vmatprep.mubr.bf16.mxu1 %v992_v33  ;;  %10417 = vmatpush3.bf16.msra.mxu1 %v11788_v60 }
  0x50   : > { %10418 = vmatprep.subr.bf16.mxu1 %v11789_v61 }
  0x51   : > { %1511 = vmatpush1.bf16.msra.mxu0 %v11768_v32 }
  0x52   : > { %1512 = vmatprep.subr.bf16.mxu0 %v11769_v34 }
  0x53   : > { %10419 = vmatpush3.bf16.msra.mxu1 %v11790_v62 }
  0x54   : > { %1445 = vmatmul.mubr.bf16.gmra.mxu0 %v989_v38  ;;  %10420 = vmatprep.subr.bf16.mxu1 %v11791_v63 }
  0x55   : > { %1513 = vmatpush1.bf16.msra.mxu0 %v11771_v35  ;;  %1540 = vmatprep.mubr.bf16.mxu0 %v13202_v42 }
  0x56   : > { %1514 = vmatprep.subr.bf16.mxu0 %v11772_v37  ;;  %1498 = vmatmul.mubr.bf16.gmra.mxu1 %v991_v39 }
  0x57   : > { %10421 = vmatpush3.bf16.msra.mxu1 %v11792_v0 }
  0x58   : > { %10422 = vmatprep.subr.bf16.mxu1 %v11793_v1 }
  0x59   : > { %1515 = vmatpush1.bf16.msra.mxu0 %v11774_v40 }
  0x5a   : > { %1516 = vmatprep.subr.bf16.mxu0 %v11775_v41 }
  0x5b   : > { %10423 = vmatpush3.bf16.msra.mxu1 %v11794_v2 }
  0x5c   : > { %10424 = vmatprep.subr.bf16.mxu1 %v11795_v3 }
  0x5d   : > { %1517 = vmatpush1.bf16.msra.mxu0 %v11777_v43 }
  0x5e   : > { %1518 = vmatprep.subr.bf16.mxu0 %v11778_v44 }
  0x5f   : > { %10425 = vmatpush3.bf16.msra.mxu1 %v11796_v4 }
  0x60   : > { %10426 = vmatprep.subr.bf16.mxu1 %v11797_v5 }
  0x61   : > { %1519 = vmatpush1.bf16.msra.mxu0 %v11780_v45 }
  0x62   : > { %1520 = vmatprep.subr.bf16.mxu0 %v11781_v48 }
  0x63   : > { %10427 = vmatpush3.bf16.msra.mxu1 %v11798_v6 }
  0x64   : > { %10428 = vmatprep.subr.bf16.mxu1 %v11799_v7 }
  0x65   : > { %1521 = vmatpush1.bf16.msra.mxu0 %v11783_v50 }
  0x66   : > { %1522 = vmatprep.subr.bf16.mxu0 %v11784_v51 }
  0x67   : > { %10429 = vmatpush3.bf16.msra.mxu1 %v11800_v8 }
  0x68   : > { %10430 = vmatprep.subr.bf16.mxu1 %v11801_v9 }
  0x69   : > { %1523 = vmatpush1.bf16.msra.mxu0 %v11786_v55 }
  0x6a   : > { %11400 = vmatprep.subr.mxu0 %v13203_v16 }
  0x6b   : > { %10431 = vmatpush3.bf16.msra.mxu1 %v11802_v10 }
  0x6c   : > { %1541 = vmatmul.mubr.bf16.vlgmr.msra.gmra.mxu0 %v988_v59 }
  0x6d   : > { %1550 = vmatprep.mubr.bf16.mxu0 %v13202_v42 }
  0x74   : > { %1551 = vmatmul.mubr.bf16.gmra.mxu0 %v993_v47 }
  0x75   : > { %11408 = vmatprep.mubr.msk.bf16.mxu0 %vm13204_vm4, %v13203_v16 }
 0x10c   : > { %v1436_v11 = vpop.f32.mrf.mxu0 }
 0x10d   : > { %v1437_v29 = vadd.f32 %v1436_v11, %v13611_v25 }
 0x10e   : > { %v1438_v12 = vpop.f32.mrf.mxu0  ;;  %v1489_v17 = vpop.f32.mrf.mxu1 }
 0x10f   : > { %v1439_v31 = vadd.f32 %v1438_v12, %v13614_v27  ;;  %v1490_v34 = vadd.f32 %v1489_v17, %v1437_v29  ;;  %v11804_v17 = vld [vmem:[%s18564_s1 + $0x40c] ss:$8 sps:$4 sm:$0xff]   ;;  %v11830_v29 = vld [vmem:[%s18564_s1 + $0x3c8] ss:$8 sps:$4 sm:$0xff]  }
 0x110   : > { %v1440_v14 = vpop.f32.mrf.mxu0  ;;  %v1491_v22 = vpop.f32.mrf.mxu1  ;;  %2248 = vmatprep.subr.bf16.mxu1 %v11804_v17  ;;  %v11861_v17 = vld [vmem:[%s18564_s1 + $0x57c] ss:$8 sps:$4 sm:$0xff]  }
 0x111   : > { %v1441_v35 = vadd.f32 %v1440_v14, %v13611_v25  ;;  %v1492_v37 = vadd.f32 %v1491_v22, %v1439_v31  ;;  %v11816_v22 = vld [vmem:[%s18564_s1 + $0x3ec] ss:$8 sps:$4 sm:$0xff]   ;;  %v11836_v31 = vld [vmem:[%s18564_s1 + $0x3b8] ss:$8 sps:$4 sm:$0xff]  }
 0x112   : > { %v1442_v18 = vpop.f32.mrf.mxu0  ;;  %v1493_v26 = vpop.f32.mrf.mxu1 }
 0x113   : > { %v1443_v38 = vadd.f32 %v1442_v18, %v13614_v27  ;;  %v1494_v43 = vadd.f32 %v1493_v26, %v1441_v35  ;;  %v11806_v18 = vld [vmem:[%s18564_s1 + $0x408] ss:$8 sps:$4 sm:$0xff]   ;;  %v11824_v26 = vld [vmem:[%s18564_s1 + $0x3d8] ss:$8 sps:$4 sm:$0xff]  }
 0x114   : > { %v1446_v19 = vpop.f32.mrf.mxu0  ;;  %v1495_v30 = vpop.f32.mrf.mxu1  ;;  %v11848_v35 = vld [vmem:[%s18564_s1 + $0x398] ss:$8 sps:$4 sm:$0xff]  }
 0x115   : > { %v1447_v44 = vadd.f32 %v1446_v19, %v13611_v25  ;;  %v1496_v51 = vadd.f32 %v1495_v30, %v1443_v38  ;;  %v11810_v19 = vld [vmem:[%s18564_s1 + $0x3fc] ss:$8 sps:$4 sm:$0xff]  }
 0x116   : > { %v1448_v24 = vpop.f32.mrf.mxu0  ;;  %v1499_v32 = vpop.f32.mrf.mxu1  ;;  %v11834_v30 = vld [vmem:[%s18564_s1 + $0x3bc] ss:$8 sps:$4 sm:$0xff]  }
 0x117   : > { %v1449_v52 = vadd.f32 %v1448_v24, %v13614_v27  ;;  %v1500_v57 = vadd.f32 %v1499_v32, %v1447_v44  ;;  %v11822_v24 = vld [vmem:[%s18564_s1 + $0x3dc] ss:$8 sps:$4 sm:$0xff]   ;;  %v11840_v32 = vld [vmem:[%s18564_s1 + $0x3ac] ss:$8 sps:$4 sm:$0xff]   ;;  %v11872_v44 = vld [vmem:[%s18564_s1 + $0x458] ss:$8 sps:$4 sm:$0xff]  }
 0x118   : > { %v1450_v28 = vpop.f32.mrf.mxu0  ;;  %v1501_v40 = vpop.f32.mrf.mxu1  ;;  %v11858_v38 = vld [vmem:[%s18564_s1 + $0x47c] ss:$8 sps:$4 sm:$0xff]  }
 0x119   : > { %v1451_v58 = vadd.f32 %v1450_v28, %v13611_v25  ;;  %v1502_v49 = vadd.f32 %v1501_v40, %v1449_v52  ;;  %v11828_v28 = vld [vmem:[%s18564_s1 + $0x3cc] ss:$8 sps:$4 sm:$0xff]  }
 0x11a   : > { %v1452_v33 = vpop.f32.mrf.mxu0  ;;  %v1503_v55 = vpop.f32.mrf.mxu1  ;;  %v11864_v40 = vld [vmem:[%s18564_s1 + $0x46c] ss:$8 sps:$4 sm:$0xff]  }
 0x11b   : > { %v1453_v60 = vadd.f32 %v1452_v33, %v13614_v27  ;;  %v1504_v1 = vadd.f32 %v1503_v55, %v1451_v58  ;;  %v11842_v33 = vld [vmem:[%s18564_s1 + $0x3a8] ss:$8 sps:$4 sm:$0xff]  }
 0x11c   : > { %v1505_v63 = vpop.f32.mrf.mxu1 }
 0x11d   : > { %v1506_v7 = vadd.f32 %v1505_v63, %v1453_v60  ;;  %v11803_v60 = vld [vmem:[%s18564_s1 + $0x388] ss:$8 sps:$4 sm:$0x7f]  }
 0x11e   : > { %v11809_v63 = vld [vmem:[%s18564_s1 + $0x508] ss:$8 sps:$4 sm:$0xff]  }
 0x12c   : > { %v1542_v36 = vpop.f32.mrf.mxu0 }
 0x12d   : > { %v1543_v39 = vadd.f32 %v1542_v36, %v1490_v34  ;;  %v11846_v34 = vld [vmem:[%s18564_s1 + $0x39c] ss:$8 sps:$4 sm:$0xff]   ;;  %v11852_v36 = vld [vmem:[%s18564_s1 + $0x48c] ss:$8 sps:$4 sm:$0xff]  }
 0x12e   : > { %v1544_v41 = vpop.f32.mrf.mxu0 }
 0x12f   : > { %v1561_v45 = vmax.f32 %v1543_v39, 0.0  ;;  %v1545_v48 = vadd.f32 %v1544_v41, %v1492_v37  ;;  %v11854_v37 = vld [vmem:[%s18564_s1 + $0x488] ss:$8 sps:$4 sm:$0xff]   ;;  %v11860_v39 = vld [vmem:[%s18564_s1 + $0x478] ss:$8 sps:$4 sm:$0xff]  }
 0x130   : > { %v1546_v50 = vpop.f32.mrf.mxu0  ;;  %v11866_v41 = vld [vmem:[%s18564_s1 + $0x468] ss:$8 sps:$4 sm:$0xff]  }
 0x131   : > { %1569 = vst [vmem:[%s13624_s20] sm:$0xff] %v1561_v45  ;;  %v1562_v53 = vmax.f32 %v1545_v48, 0.0  ;;  %v1547_v54 = vadd.f32 %v1546_v50, %v1494_v43  ;;  %v11870_v43 = vld [vmem:[%s18564_s1 + $0x45c] ss:$8 sps:$4 sm:$0xff]   ;;  %v11878_v48 = vld [vmem:[%s18564_s1 + $0x448] ss:$8 sps:$4 sm:$0xff]  }
 0x132   : > { %v1548_v56 = vpop.f32.mrf.mxu0  ;;  %v11882_v50 = vld [vmem:[%s18564_s1 + $0x43c] ss:$8 sps:$4 sm:$0xff]  }
 0x133   : > { %1570 = vst [vmem:[%s13624_s20 + $0x8] sm:$0xff] %v1562_v53  ;;  %v1563_v59 = vmax.f32 %v1547_v54, 0.0  ;;  %v1549_v46 = vadd.f32 %v1548_v56, %v1496_v51  ;;  %v11884_v51 = vld [vmem:[%s18564_s1 + $0x438] ss:$8 sps:$4 sm:$0xff]  }
 0x134   : > { %v1552_v47 = vpop.f32.mrf.mxu0 }
 0x135   : > { %1571 = vst [vmem:[%s13624_s20 + $0x10] sm:$0xff] %v1563_v59  ;;  %v1564_v61 = vmax.f32 %v1549_v46, 0.0  ;;  %v1553_v62 = vadd.f32 %v1552_v47, %v1500_v57  ;;  %v1577_v5 = vpack.c.bf16 %v1563_v59, %v1561_v45  ;;  %v11876_v45 = vld [vmem:[%s18564_s1 + $0x44c] ss:$8 sps:$4 sm:$0xff]  }
 0x136   : > { %v1554_v0 = vpop.f32.mrf.mxu0 }
 0x137   : > { %1572 = vst [vmem:[%s13624_s20 + $0x18] sm:$0xff] %v1564_v61  ;;  %v1565_v2 = vmax.f32 %v1553_v62, 0.0  ;;  %v1555_v3 = vadd.f32 %v1554_v0, %v1502_v49  ;;  %v1578_v4 = vpack.c.bf16 %v1564_v61, %v1562_v53  ;;  %v11807_v61 = vld [vmem:[%s18564_s1 + $0x50c] ss:$8 sps:$4 sm:$0xff]   ;;  %v11813_v0 = vld [vmem:[%s18564_s1 + $0x4fc] ss:$8 sps:$4 sm:$0xff]  }
 0x138   : > { %v1556_v6 = vpop.f32.mrf.mxu0 }
 0x139   : > { %1573 = vst [vmem:[%s13624_s20 + $0x20] sm:$0xff] %v1565_v2  ;;  %v1566_v8 = vmax.f32 %v1555_v3, 0.0  ;;  %v1557_v9 = vadd.f32 %v1556_v6, %v1504_v1  ;;  %1709 = vmatprep.mubr.bf16.mxu1 %v1578_v4  ;;  %v11815_v1 = vld [vmem:[%s18564_s1 + $0x4f8] ss:$8 sps:$4 sm:$0xff]   ;;  %v11821_v3 = vld [vmem:[%s18564_s1 + $0x4e8] ss:$8 sps:$4 sm:$0xff]  }
 0x13a   : > { %v1558_v10 = vpop.f32.mrf.mxu0  ;;  %1710 = vmatmul.mubr.bf16.vlgmr.msra.gmra.mxu1 %v1577_v5  ;;  %v11825_v4 = vld [vmem:[%s18564_s1 + $0x4dc] ss:$8 sps:$4 sm:$0xff]   ;;  %v11827_v5 = vld [vmem:[%s18564_s1 + $0x4d8] ss:$8 sps:$4 sm:$0xff]   ;;  %v11831_v6 = vld [vmem:[%s18564_s1 + $0x4cc] ss:$8 sps:$4 sm:$0xff]  }
 0x13b   : > { %1574 = vst [vmem:[%s13624_s20 + $0x28] sm:$0xff] %v1566_v8  ;;  %v1567_v11 = vmax.f32 %v1557_v9, 0.0  ;;  %v1559_v12 = vadd.f32 %v1558_v10, %v1506_v7  ;;  %2249 = vmatpush1.bf16.msra.mxu1 %v11806_v18  ;;  %v11833_v7 = vld [vmem:[%s18564_s1 + $0x4c8] ss:$8 sps:$4 sm:$0xff]   ;;  %v11839_v9 = vld [vmem:[%s18564_s1 + $0x4b8] ss:$8 sps:$4 sm:$0xff]  }
 0x13c   : > { %2250 = vmatprep.subr.bf16.mxu1 %v11810_v19  ;;  %v11843_v10 = vld [vmem:[%s18564_s1 + $0x4ac] ss:$8 sps:$4 sm:$0xff]   ;;  %v11863_v18 = vld [vmem:[%s18564_s1 + $0x578] ss:$8 sps:$4 sm:$0xff]  }
 0x13d   : > { %1575 = vst [vmem:[%s13624_s20 + $0x30] sm:$0xf] %v1567_v11  ;;  %v1568_v13 = vmax.f32 %v1559_v12, 0.0  ;;  %v1579_v15 = vpack.c.bf16 %v1567_v11, %v1565_v2  ;;  %v11819_v2 = vld [vmem:[%s18564_s1 + $0x4ec] ss:$8 sps:$4 sm:$0xff]  }
 0x13e   : > { %v11845_v11 = vld [vmem:[%s18564_s1 + $0x4a8] ss:$8 sps:$4 sm:$0xff]   ;;  %v11849_v12 = vld [vmem:[%s18564_s1 + $0x49c] ss:$8 sps:$4 sm:$0xff]   ;;  %v11867_v19 = vld [vmem:[%s18564_s1 + $0x56c] ss:$8 sps:$4 sm:$0xff]  }
 0x13f   : > { %1576 = vst [vmem:[%s13624_s20 + $0x38] sm:$0xf] %v1568_v13  ;;  %v1580_v14 = vpack.c.bf16 %v1568_v13, %v1566_v8  ;;  %2251 = vmatpush1.bf16.msra.mxu1 %v11812_v20  ;;  %v11837_v8 = vld [vmem:[%s18564_s1 + $0x4bc] ss:$8 sps:$4 sm:$0xff]   ;;  %v11851_v13 = vld [vmem:[%s18564_s1 + $0x498] ss:$8 sps:$4 sm:$0xff]  }
 0x140   : > { %2252 = vmatprep.subr.bf16.mxu1 %v11816_v22  ;;  %v11869_v20 = vld [vmem:[%s18564_s1 + $0x568] ss:$8 sps:$4 sm:$0xff]   ;;  %v11873_v22 = vld [vmem:[%s18564_s1 + $0x55c] ss:$8 sps:$4 sm:$0xff]  }
 0x141   : > { %1717 = vmatprep.mubr.bf16.mxu1 %v1580_v14  ;;  %v11855_v14 = vld [vmem:[%s18564_s1 + $0x58c] ss:$8 sps:$4 sm:$0xff]  }
 0x142   : > { %1718 = vmatmul.mubr.bf16.gmra.mxu1 %v1579_v15  ;;  %v11857_v15 = vld [vmem:[%s18564_s1 + $0x588] ss:$8 sps:$4 sm:$0xff]  }
 0x143   : > { %2253 = vmatpush1.bf16.msra.mxu1 %v11818_v23  ;;  %v11875_v23 = vld [vmem:[%s18564_s1 + $0x558] ss:$8 sps:$4 sm:$0xff]  }
 0x144   : > { %2254 = vmatprep.subr.bf16.mxu1 %v11822_v24  ;;  %v11879_v24 = vld [vmem:[%s18564_s1 + $0x54c] ss:$8 sps:$4 sm:$0xff]  }
 0x147   : > { %2255 = vmatpush1.bf16.msra.mxu1 %v11824_v26  ;;  %v11881_v26 = vld [vmem:[%s18564_s1 + $0x548] ss:$8 sps:$4 sm:$0xff]  }
 0x148   : > { %2256 = vmatprep.subr.bf16.mxu1 %v11828_v28  ;;  %v11885_v28 = vld [vmem:[%s18564_s1 + $0x53c] ss:$8 sps:$4 sm:$0xff]  }
 0x14b   : > { %2257 = vmatpush1.bf16.msra.mxu1 %v11830_v29  ;;  %v11887_v29 = vld [vmem:[%s18564_s1 + $0x538] ss:$8 sps:$4 sm:$0xff]  }
 0x14c   : > { %2258 = vmatprep.subr.bf16.mxu1 %v11834_v30  ;;  %v11888_v30 = vld [vmem:[%s18564_s1 + $0x42c] ss:$8 sps:$4 sm:$0xff]  }
 0x14f   : > { %2259 = vmatpush1.bf16.msra.mxu1 %v11836_v31  ;;  %v11890_v31 = vld [vmem:[%s18564_s1 + $0x428] ss:$8 sps:$4 sm:$0xff]  }
 0x150   : > { %2260 = vmatprep.subr.bf16.mxu1 %v11840_v32  ;;  %v11891_v32 = vld [vmem:[%s18564_s1 + $0x52c] ss:$8 sps:$4 sm:$0xff]  }
 0x153   : > { %2261 = vmatpush1.bf16.msra.mxu1 %v11842_v33  ;;  %v11893_v33 = vld [vmem:[%s18564_s1 + $0x528] ss:$8 sps:$4 sm:$0xff]  }
 0x154   : > { %2262 = vmatprep.subr.bf16.mxu1 %v11846_v34  ;;  %v11894_v34 = vld [vmem:[%s18564_s1 + $0x41c] ss:$8 sps:$4 sm:$0xff]  }
 0x157   : > { %2263 = vmatpush1.bf16.msra.mxu1 %v11848_v35  ;;  %v11896_v35 = vld [vmem:[%s18564_s1 + $0x418] ss:$8 sps:$4 sm:$0xff]  }
 0x158   : > { %2264 = vmatprep.subr.bf16.mxu1 %v11852_v36  ;;  %v11897_v36 = vld [vmem:[%s18564_s1 + $0x51c] ss:$8 sps:$4 sm:$0xff]  }
 0x15b   : > { %2265 = vmatpush2.bf16.msra.mxu1 %v11854_v37  ;;  %v11899_v37 = vld [vmem:[%s18564_s1 + $0x518] ss:$8 sps:$4 sm:$0xff]  }
 0x15c   : > { %2266 = vmatprep.subr.bf16.mxu1 %v11858_v38  ;;  %v11900_v38 = vld [vmem:[%s18564_s1 + $0x60c] ss:$8 sps:$4 sm:$0xff]  }
 0x15f   : > { %2267 = vmatpush2.bf16.msra.mxu1 %v11860_v39 }
 0x160   : > { %2268 = vmatprep.subr.bf16.mxu1 %v11864_v40 }
 0x163   : > { %2269 = vmatpush2.bf16.msra.mxu1 %v11866_v41 }
 0x164   : > { %2270 = vmatprep.subr.bf16.mxu1 %v11870_v43 }
 0x167   : > { %2271 = vmatpush2.bf16.msra.mxu1 %v11872_v44 }
 0x168   : > { %2272 = vmatprep.subr.bf16.mxu1 %v11876_v45 }
 0x16b   : > { %2273 = vmatpush2.bf16.msra.mxu1 %v11878_v48 }
 0x16c   : > { %2274 = vmatprep.subr.bf16.mxu1 %v11882_v50 }
 0x16f   : > { %2275 = vmatpush2.bf16.msra.mxu1 %v11884_v51 }
 0x170   : > { %2276 = vmatprep.subr.bf16.mxu1 %v11888_v30  ;;  %v11938_v30 = vld [vmem:[%s18564_s1 + $0x6a0] ss:$8 sps:$4 sm:$0xff]  }
 0x173   : > { %2277 = vmatpush2.bf16.msra.mxu1 %v11890_v31  ;;  %v11939_v31 = vld [vmem:[%s18564_s1 + $0x620] ss:$8 sps:$4 sm:$0xff]  }
 0x174   : > { %2278 = vmatprep.subr.bf16.mxu1 %v11894_v34 }
 0x177   : > { %2279 = vmatpush2.bf16.msra.mxu1 %v11896_v35 }
 0x178   : > { %2334 = vmatprep.subr.bf16.mxu1 %v11900_v38 }
 0x1fa   : > { %v10432_v52 = vpop.f32.mrf.mxu1 }
 0x1fc   : > { %v10433_v53 = vpop.f32.mrf.mxu1 }
 0x1fd   : > { %v10434_v62 = vadd.f32 %v10433_v53, %v10432_v52 }
 0x1fe   : > { %v10435_v54 = vpop.f32.mrf.mxu1 }
 0x200   : > { %v10436_v55 = vpop.f32.mrf.mxu1 }
 0x201   : > { %v10437_v49 = vadd.f32 %v10436_v55, %v10435_v54 }
 0x202   : > { %v10438_v56 = vpop.f32.mrf.mxu1 }
 0x204   : > { %v10439_v57 = vpop.f32.mrf.mxu1 }
 0x205   : > { %v10440_v47 = vadd.f32 %v10439_v57, %v10438_v56 }
 0x206   : > { %v10441_v58 = vpop.f32.mrf.mxu1 }
 0x208   : > { %v10442_v59 = vpop.f32.mrf.mxu1 }
 0x209   : > { %v10443_v46 = vadd.f32 %v10442_v59, %v10441_v58  ;;  %v11902_v59 = vld [vmem:[%s18564_s1 + $0x608] ss:$8 sps:$4 sm:$0xff]  }
 0x20b   : > { %11401 = vmatpush3.msk.msra.mxu0 %vm972_vm3, %v10443_v46 }
 0x20c   : > { %11402 = vmatprep.subr.mxu0 %v13203_v16 }
 0x20d   : > { %11403 = vmatpush3.msra.mxu0 %v10440_v47  ;;  %v11903_v47 = vld [vmem:[%s18564_s1 + $0x5fc] ss:$8 sps:$4 sm:$0xff]  }
 0x20e   : > { %11404 = vmatprep.subr.mxu0 %v13203_v16 }
 0x20f   : > { %11405 = vmatpush3.msra.mxu0 %v10437_v49  ;;  %v11905_v49 = vld [vmem:[%s18564_s1 + $0x5f8] ss:$8 sps:$4 sm:$0xff]  }
 0x210   : > { %11406 = vmatprep.subr.mxu0 %v13203_v16 }
 0x211   : > { %11407 = vmatpush3.msra.mxu0 %v10434_v62  ;;  %v11909_v62 = vld [vmem:[%s18564_s1 + $0x5dc] ss:$8 sps:$4 sm:$0xff]  }
 0x212   : > { %11409 = vmatmul.mubr.msk.bf16.vlgmr.msra.gmra.mxu0 %vm1731_vm5, %v11803_v60  ;;  %2291 = vmatprep.subr.bf16.mxu0 %v11807_v61  ;;  %v11906_v60 = vld [vmem:[%s18564_s1 + $0x5ec] ss:$8 sps:$4 sm:$0xff]   ;;  %v11908_v61 = vld [vmem:[%s18564_s1 + $0x5e8] ss:$8 sps:$4 sm:$0xff]  }
 0x213   : > { %2292 = vmatpush1.bf16.msra.mxu0 %v11809_v63  ;;  %v11911_v63 = vld [vmem:[%s18564_s1 + $0x5d8] ss:$8 sps:$4 sm:$0xff]  }
 0x214   : > { %2293 = vmatprep.subr.bf16.mxu0 %v11813_v0  ;;  %v11912_v0 = vld [vmem:[%s18564_s1 + $0x5cc] ss:$8 sps:$4 sm:$0xff]  }
 0x217   : > { %2294 = vmatpush1.bf16.msra.mxu0 %v11815_v1  ;;  %v11914_v1 = vld [vmem:[%s18564_s1 + $0x5c8] ss:$8 sps:$4 sm:$0xff]  }
 0x218   : > { %2295 = vmatprep.subr.bf16.mxu0 %v11819_v2  ;;  %v11915_v2 = vld [vmem:[%s18564_s1 + $0x5bc] ss:$8 sps:$4 sm:$0xff]  }
 0x21b   : > { %2296 = vmatpush1.bf16.msra.mxu0 %v11821_v3  ;;  %v11917_v3 = vld [vmem:[%s18564_s1 + $0x5b8] ss:$8 sps:$4 sm:$0xff]  }
 0x21c   : > { %2297 = vmatprep.subr.bf16.mxu0 %v11825_v4  ;;  %v11918_v4 = vld [vmem:[%s18564_s1 + $0x5ac] ss:$8 sps:$4 sm:$0xff]  }
 0x21f   : > { %2298 = vmatpush1.bf16.msra.mxu0 %v11827_v5  ;;  %v11920_v5 = vld [vmem:[%s18564_s1 + $0x5a8] ss:$8 sps:$4 sm:$0xff]  }
 0x220   : > { %2299 = vmatprep.subr.bf16.mxu0 %v11831_v6  ;;  %v11921_v6 = vld [vmem:[%s18564_s1 + $0x59c] ss:$8 sps:$4 sm:$0xff]  }
 0x223   : > { %2300 = vmatpush1.bf16.msra.mxu0 %v11833_v7 }
 0x224   : > { %2301 = vmatprep.subr.bf16.mxu0 %v11837_v8 }
 0x227   : > { %2302 = vmatpush1.bf16.msra.mxu0 %v11839_v9  ;;  %v11923_v9 = vld [vmem:[%s18564_s1 + $0x598] ss:$8 sps:$4 sm:$0xff]  }
 0x228   : > { %2303 = vmatprep.subr.bf16.mxu0 %v11843_v10 }
 0x22b   : > { %2304 = vmatpush1.bf16.msra.mxu0 %v11845_v11 }
 0x22c   : > { %2305 = vmatprep.subr.bf16.mxu0 %v11849_v12  ;;  %v11924_v12 = vld [vmem:[%s18564_s1 + $0x710] ss:$8 sps:$4 sm:$0xff]  }
 0x22f   : > { %2306 = vmatpush1.bf16.msra.mxu0 %v11851_v13  ;;  %v11925_v13 = vld [vmem:[%s18564_s1 + $0x690] ss:$8 sps:$4 sm:$0xff]  }
 0x230   : > { %2307 = vmatprep.subr.bf16.mxu0 %v11855_v14  ;;  %v11926_v14 = vld [vmem:[%s18564_s1 + $0x700] ss:$8 sps:$4 sm:$0xff]  }
 0x233   : > { %2308 = vmatpush2.bf16.msra.mxu0 %v11857_v15  ;;  %v11927_v15 = vld [vmem:[%s18564_s1 + $0x680] ss:$8 sps:$4 sm:$0xff]  }
 0x234   : > { %2309 = vmatprep.subr.bf16.mxu0 %v11861_v17  ;;  %v11928_v17 = vld [vmem:[%s18564_s1 + $0x6f0] ss:$8 sps:$4 sm:$0xff]  }
 0x237   : > { %2310 = vmatpush2.bf16.msra.mxu0 %v11863_v18  ;;  %v11929_v18 = vld [vmem:[%s18564_s1 + $0x670] ss:$8 sps:$4 sm:$0xff]  }
 0x238   : > { %2311 = vmatprep.subr.bf16.mxu0 %v11867_v19  ;;  %v11930_v19 = vld [vmem:[%s18564_s1 + $0x6e0] ss:$8 sps:$4 sm:$0xff]  }
 0x23b   : > { %2312 = vmatpush2.bf16.msra.mxu0 %v11869_v20  ;;  %v11931_v20 = vld [vmem:[%s18564_s1 + $0x660] ss:$8 sps:$4 sm:$0xff]  }
 0x23c   : > { %2313 = vmatprep.subr.bf16.mxu0 %v11873_v22  ;;  %v11932_v22 = vld [vmem:[%s18564_s1 + $0x6d0] ss:$8 sps:$4 sm:$0xff]  }
 0x23f   : > { %2314 = vmatpush2.bf16.msra.mxu0 %v11875_v23  ;;  %v11933_v23 = vld [vmem:[%s18564_s1 + $0x650] ss:$8 sps:$4 sm:$0xff]  }
 0x240   : > { %2315 = vmatprep.subr.bf16.mxu0 %v11879_v24  ;;  %v11934_v24 = vld [vmem:[%s18564_s1 + $0x6c0] ss:$8 sps:$4 sm:$0xff]  }
 0x243   : > { %2316 = vmatpush2.bf16.msra.mxu0 %v11881_v26  ;;  %v11935_v26 = vld [vmem:[%s18564_s1 + $0x640] ss:$8 sps:$4 sm:$0xff]  }
 0x244   : > { %2317 = vmatprep.subr.bf16.mxu0 %v11885_v28  ;;  %v11936_v28 = vld [vmem:[%s18564_s1 + $0x6b0] ss:$8 sps:$4 sm:$0xff]  }
 0x247   : > { %2318 = vmatpush2.bf16.msra.mxu0 %v11887_v29  ;;  %v11937_v29 = vld [vmem:[%s18564_s1 + $0x630] ss:$8 sps:$4 sm:$0xff]  }
 0x248   : > { %2319 = vmatprep.subr.bf16.mxu0 %v11891_v32  ;;  %v601_v32 = vld [vmem:[%s18564_s1 + $0x618] sm:$0x11] }
 0x249   : > { %v602_v34 = vunpack.c.l.bf16 %v601_v32  ;;  %v603_v35 = vunpack.c.h.bf16 %v601_v32  ;;  %v11958_v32 = vld [vmem:[%s18564_s1 + $0x788] ss:$8 sps:$4 sm:$0xff]  }
 0x24b   : > { %2320 = vmatpush2.bf16.msra.mxu0 %v11893_v33 }
 0x24c   : > { %2321 = vmatprep.subr.bf16.mxu0 %v11897_v36 }
 0x24f   : > { %2322 = vmatpush2.bf16.msra.mxu0 %v11899_v37  ;;  %v13959_v37 = vrot.slane %v602_v34, %v13608_v21  ;;  %v11961_v34 = vld [vmem:[%s18564_s1 + $0x778] ss:$8 sps:$4 sm:$0xff]  }
 0x250   : > { %10449 = vmatprep.subr.bf16.mxu0 %v11924_v12  ;;  %v11941_v12 = vld [vmem:[%s18564_s1 + $0x740] ss:$8 sps:$4 sm:$0xff]  }
 0x2d2   : > { %v1804_v39 = vpop.f32.mrf.mxu0 }
 0x2d3   : > { %1811 = vst [vmem:[%s13850_s19] sm:$0xff] %v1804_v39  ;;  %v1820_v41 = vrot.slane %v1804_v39, 2  ;;  %v1815_v44 = vrot.slane %v1804_v39, 1  ;;  %v1825_v48 = vrot.slane %v1804_v39, 3  ;;  %v1830_v8 = vrot.slane %v1804_v39, 4 }
 0x2d4   : > { %v11410_v40 = vpop.f32.mrf.mxu0 }
 0x2d6   : > { %v1807_v43 = vpop.f32.mrf.mxu0 }
 0x2d7   : > { %1812 = vst [vmem:[%s13850_s19 + $0x8] sm:$0x3f] %v1807_v43  ;;  %v1816_v45 = vrot.slane %v1807_v43, 1  ;;  %v1826_v50 = vrot.slane %v1807_v43, 3  ;;  %v1821_v51 = vrot.slane %v1807_v43, 2  ;;  %v1835_v46 = vpack.c.bf16 %v1807_v43, %v1804_v39 }
 0x2d8   : > { %v11411_v52 = vpop.f32.mrf.mxu0  ;;  %v1831_v7 = vrot.slane %v1807_v43, 4  ;;  %v13962_v39 = vrot.slane %v603_v35, %v13608_v21  ;;  %v11962_v35 = vld [vmem:[%s18564_s1 + $0x76c] ss:$8 sps:$4 sm:$0xff]  }
 0x2d9   : > { %v1817_v53 = vsel %vm936_vm0, %v1815_v44, %v1816_v45  ;;  %v1827_v54 = vsel %vm960_vm1, %v1825_v48, %v1826_v50  ;;  %v1822_v55 = vsel %vm948_vm2, %v1820_v41, %v1821_v51 }
 0x2da   : > { %v1836_v56 = vpack.c.bf16 %v1816_v45, %v1817_v53  ;;  %v1838_v57 = vpack.c.bf16 %v1826_v50, %v1827_v54  ;;  %v1837_v58 = vpack.c.bf16 %v1821_v51, %v1822_v55  ;;  %v1832_v10 = vsel %vm972_vm3, %v1830_v8, %v1831_v7 }
 0x2db   : > { %v1839_v11 = vpack.c.bf16 %v1831_v7, %v1832_v10  ;;  %v636_v10 = vld [vmem:[%s18564_s1 + $0x720] sm:$0x7] }
 0x2dc   : > { %2280 = vmatprep.mubr.bf16.mxu1 %v1836_v56  ;;  %2323 = vmatprep.mubr.bf16.mxu0 %v1838_v57 }
 0x2dd   : > { %2281 = vmatmul.mubr.bf16.vlgmr.msra.gmra.mxu1 %v1835_v46  ;;  %2324 = vmatmul.mubr.bf16.vlgmr.msra.gmra.mxu0 %v1837_v58 }
 0x2de   : > { %2335 = vmatpush1.bf16.msra.mxu1 %v11902_v59  ;;  %2366 = vmatprep.mubr.bf16.mxu1 %v13202_v42 }
 0x2df   : > { %2336 = vmatprep.subr.bf16.mxu1 %v11903_v47  ;;  %10450 = vmatpush3.bf16.msra.mxu0 %v11925_v13  ;;  %v11942_v13 = vld [vmem:[%s18564_s1 + $0x738] ss:$0 sps:$4 sm:$0x11]  }
 0x2e0   : > { %10451 = vmatprep.subr.bf16.mxu0 %v11926_v14  ;;  %v11943_v14 = vld [vmem:[%s18564_s1 + $0x750] ss:$0 sps:$4 sm:$0x11]  }
 0x2e2   : > { %2337 = vmatpush1.bf16.msra.mxu1 %v11905_v49 }
 0x2e3   : > { %2338 = vmatprep.subr.bf16.mxu1 %v11906_v60  ;;  %10452 = vmatpush3.bf16.msra.mxu0 %v11927_v15 }
 0x2e4   : > { %10453 = vmatprep.subr.bf16.mxu0 %v11928_v17  ;;  %v11944_v17 = vld [vmem:[%s18564_s1 + $0x7cc] ss:$8 sps:$4 sm:$0xff]  }
 0x2e6   : > { %2339 = vmatpush1.bf16.msra.mxu1 %v11908_v61 }
 0x2e7   : > { %2340 = vmatprep.subr.bf16.mxu1 %v11909_v62  ;;  %10454 = vmatpush3.bf16.msra.mxu0 %v11929_v18  ;;  %v11946_v18 = vld [vmem:[%s18564_s1 + $0x7c8] ss:$8 sps:$4 sm:$0xff]  }
 0x2e8   : > { %10455 = vmatprep.subr.bf16.mxu0 %v11930_v19 }
 0x2ea   : > { %2341 = vmatpush1.bf16.msra.mxu1 %v11911_v63 }
 0x2eb   : > { %2342 = vmatprep.subr.bf16.mxu1 %v11912_v0  ;;  %10456 = vmatpush3.bf16.msra.mxu0 %v11931_v20  ;;  %v11947_v20 = vld [vmem:[%s18564_s1 + $0x7bc] ss:$8 sps:$4 sm:$0xff]  }
 0x2ec   : > { %10457 = vmatprep.subr.bf16.mxu0 %v11932_v22 }
 0x2ee   : > { %2343 = vmatpush1.bf16.msra.mxu1 %v11914_v1 }
 0x2ef   : > { %2344 = vmatprep.subr.bf16.mxu1 %v11915_v2  ;;  %10458 = vmatpush3.bf16.msra.mxu0 %v11933_v23  ;;  %v11949_v23 = vld [vmem:[%s18564_s1 + $0x7b8] ss:$8 sps:$4 sm:$0xff]  }
 0x2f0   : > { %10459 = vmatprep.subr.bf16.mxu0 %v11934_v24 }
 0x2f2   : > { %2345 = vmatpush1.bf16.msra.mxu1 %v11917_v3 }
 0x2f3   : > { %2346 = vmatprep.subr.bf16.mxu1 %v11918_v4  ;;  %10460 = vmatpush3.bf16.msra.mxu0 %v11935_v26  ;;  %v11950_v26 = vld [vmem:[%s18564_s1 + $0x7ac] ss:$8 sps:$4 sm:$0xff]  }
 0x2f4   : > { %10461 = vmatprep.subr.bf16.mxu0 %v11936_v28  ;;  %v11952_v28 = vld [vmem:[%s18564_s1 + $0x7a8] ss:$8 sps:$4 sm:$0xff]  }
 0x2f6   : > { %2347 = vmatpush1.bf16.msra.mxu1 %v11920_v5 }
 0x2f7   : > { %2348 = vmatprep.subr.bf16.mxu1 %v11921_v6  ;;  %10462 = vmatpush3.bf16.msra.mxu0 %v11937_v29  ;;  %v11953_v29 = vld [vmem:[%s18564_s1 + $0x79c] ss:$8 sps:$4 sm:$0xff]  }
 0x2f8   : > { %10463 = vmatprep.subr.bf16.mxu0 %v11938_v30  ;;  %v11955_v30 = vld [vmem:[%s18564_s1 + $0x798] ss:$8 sps:$4 sm:$0xff]  }
 0x2fa   : > { %2349 = vmatpush1.bf16.msra.mxu1 %v11923_v9 }
 0x2fb   : > { %11412 = vmatprep.subr.mxu1 %v13203_v16  ;;  %10464 = vmatpush3.bf16.msra.mxu0 %v11939_v31  ;;  %v11956_v31 = vld [vmem:[%s18564_s1 + $0x78c] ss:$8 sps:$4 sm:$0xff]  }
 0x2fd   : > { %2367 = vmatmul.mubr.bf16.vlgmr.msra.gmra.mxu1 %v1839_v11  ;;  %v11940_v11 = vld [vmem:[%s18564_s1 + $0x728] ss:$8 sps:$4 sm:$0xff]  }
 0x2fe   : > { %11416 = vmatprep.mubr.msk.bf16.mxu1 %vm13204_vm4, %v13203_v16 }
 0x39d   : > { %v2282_v33 = vpop.f32.mrf.mxu1  ;;  %v2325_v38 = vpop.f32.mrf.mxu0 }
 0x39e   : > { %v2283_v41 = vadd.f32 %v2282_v33, %v13959_v37  ;;  %v11959_v33 = vld [vmem:[%s18564_s1 + $0x77c] ss:$8 sps:$4 sm:$0xff]  }
 0x39f   : > { %v2284_v36 = vpop.f32.mrf.mxu1  ;;  %v2327_v43 = vpop.f32.mrf.mxu0 }
 0x3a0   : > { %v2285_v44 = vadd.f32 %v2284_v36, %v13962_v39  ;;  %v2326_v48 = vadd.f32 %v2325_v38, %v2283_v41  ;;  %v11964_v36 = vld [vmem:[%s18564_s1 + $0x768] ss:$8 sps:$4 sm:$0xff]   ;;  %v11965_v38 = vld [vmem:[%s18564_s1 + $0x75c] ss:$8 sps:$4 sm:$0xff]   ;;  %v11968_v41 = vld [vmem:[%s18564_s1 + $0x84c] ss:$8 sps:$4 sm:$0xff]  }
 0x3a1   : > { %v2286_v40 = vpop.f32.mrf.mxu1  ;;  %v2329_v51 = vpop.f32.mrf.mxu0 }
 0x3a2   : > { %v2287_v50 = vadd.f32 %v2286_v40, %v13959_v37  ;;  %v2328_v53 = vadd.f32 %v2327_v43, %v2285_v44  ;;  %v11967_v40 = vld [vmem:[%s18564_s1 + $0x758] ss:$8 sps:$4 sm:$0xff]   ;;  %v11970_v43 = vld [vmem:[%s18564_s1 + $0x848] ss:$8 sps:$4 sm:$0xff]   ;;  %v11971_v44 = vld [vmem:[%s18564_s1 + $0x83c] ss:$8 sps:$4 sm:$0xff]  }
 0x3a3   : > { %v2288_v45 = vpop.f32.mrf.mxu1  ;;  %v2331_v46 = vpop.f32.mrf.mxu0 }
 0x3a4   : > { %v2289_v54 = vadd.f32 %v2288_v45, %v13962_v39  ;;  %v2330_v57 = vadd.f32 %v2329_v51, %v2287_v50  ;;  %v11973_v45 = vld [vmem:[%s18564_s1 + $0x838] ss:$8 sps:$4 sm:$0xff]   ;;  %v11976_v50 = vld [vmem:[%s18564_s1 + $0x828] ss:$8 sps:$4 sm:$0xff]   ;;  %v11977_v51 = vld [vmem:[%s18564_s1 + $0x81c] ss:$8 sps:$4 sm:$0xff]  }
 0x3a6   : > { %v2332_v49 = vadd.f32 %v2331_v46, %v2289_v54  ;;  %v11982_v54 = vld [vmem:[%s18564_s1 + $0x808] ss:$8 sps:$4 sm:$0xff]   ;;  %v11991_v46 = vld [vmem:[%s18564_s1 + $0x7d8] ss:$8 sps:$4 sm:$0xff]  }
 0x3bd   : > { %v2368_v52 = vpop.f32.mrf.mxu1 }
 0x3be   : > { %v2369_v55 = vadd.f32 %v2368_v52, %v2326_v48  ;;  %v11974_v48 = vld [vmem:[%s18564_s1 + $0x82c] ss:$8 sps:$4 sm:$0xff]   ;;  %v11979_v52 = vld [vmem:[%s18564_s1 + $0x818] ss:$8 sps:$4 sm:$0xff]  }
 0x3bf   : > { %v2370_v56 = vpop.f32.mrf.mxu1 }
 0x3c0   : > { %v2377_v58 = vmax.f32 %v2369_v55, 0.0  ;;  %v2371_v59 = vadd.f32 %v2370_v56, %v2328_v53  ;;  %v11980_v53 = vld [vmem:[%s18564_s1 + $0x80c] ss:$8 sps:$4 sm:$0xff]   ;;  %v11983_v55 = vld [vmem:[%s18564_s1 + $0x7fc] ss:$8 sps:$4 sm:$0xff]  }
 0x3c1   : > { %v2372_v47 = vpop.f32.mrf.mxu1  ;;  %v11985_v56 = vld [vmem:[%s18564_s1 + $0x7f8] ss:$8 sps:$4 sm:$0xff]  }
 0x3c2   : > { %2381 = vst [vmem:[%s13972_s9] sm:$0xff] %v2377_v58  ;;  %v2378_v60 = vmax.f32 %v2371_v59, 0.0  ;;  %v2373_v61 = vadd.f32 %v2372_v47, %v2330_v57  ;;  %v11986_v57 = vld [vmem:[%s18564_s1 + $0x7ec] ss:$8 sps:$4 sm:$0xff]   ;;  %v11989_v59 = vld [vmem:[%s18564_s1 + $0x7dc] ss:$8 sps:$4 sm:$0xff]  }
 0x3c3   : > { %v2374_v62 = vpop.f32.mrf.mxu1  ;;  %v11992_v47 = vld [vmem:[%s18564_s1 + $0xb60] ss:$8 sps:$4 sm:$0xff]  }
 0x3c4   : > { %2382 = vst [vmem:[%s13972_s9 + $0x8] sm:$0xff] %v2378_v60  ;;  %v2379_v63 = vmax.f32 %v2373_v61, 0.0  ;;  %v2375_v0 = vadd.f32 %v2374_v62, %v2332_v49  ;;  %v11993_v49 = vld [vmem:[%s18564_s1 + $0x960] ss:$8 sps:$4 sm:$0xff]   ;;  %v11997_v61 = vld [vmem:[%s18564_s1 + $0x950] ss:$8 sps:$4 sm:$0xff]  }
 0x3c5   : > { %v11999_v62 = vld [vmem:[%s18564_s1 + $0x8d0] ss:$8 sps:$4 sm:$0xff]  }
 0x3c6   : > { %2383 = vst [vmem:[%s13972_s9 + $0x10] sm:$0x3] %v2379_v63  ;;  %v2380_v1 = vmax.f32 %v2375_v0, 0.0  ;;  %v2385_v3 = vpack.c.bf16 %v2379_v63, %v2377_v58  ;;  %v11988_v58 = vld [vmem:[%s18564_s1 + $0x7e8] ss:$8 sps:$4 sm:$0xff]  }
 0x3c7   : > { %v12001_v63 = vld [vmem:[%s18564_s1 + $0x940] ss:$8 sps:$4 sm:$0xff]  }
 0x3c8   : > { %2384 = vst [vmem:[%s13972_s9 + $0x18] sm:$0x3] %v2380_v1  ;;  %v2386_v2 = vpack.c.bf16 %v2380_v1, %v2378_v60  ;;  %v11995_v60 = vld [vmem:[%s18564_s1 + $0x8e0] ss:$8 sps:$4 sm:$0xff]  }
 0x3c9   : > { %v12003_v0 = vld [vmem:[%s18564_s1 + $0x8c0] ss:$8 sps:$4 sm:$0xff]  }
 0x3ca   : > { %2515 = vmatprep.mubr.bf16.mxu0 %v2386_v2 }
 0x3cb   : > { %2516 = vmatmul.mubr.bf16.vlgmr.msra.gmra.mxu0 %v2385_v3 }
 0x3cc   : > { %11428 = vmatprep.mubr.msk.bf16.mxu0 %vm2613_vm8, %v11941_v12  ;;  %v11996_v12 = vld [vmem:[%s18564_s1 + $0xb50] ss:$8 sps:$4 sm:$0xff]  }
 0x48b   : > { %v10465_v4 = vpop.f32.mrf.mxu0 }
 0x48d   : > { %v10466_v5 = vpop.f32.mrf.mxu0 }
 0x48e   : > { %v10467_v9 = vadd.f32 %v10466_v5, %v10465_v4 }
 0x48f   : > { %v10468_v6 = vpop.f32.mrf.mxu0 }
 0x491   : > { %v10469_v7 = vpop.f32.mrf.mxu0 }
 0x492   : > { %v10470_v8 = vadd.f32 %v10469_v7, %v10468_v6 }
 0x494   : > { %11413 = vmatpush3.msk.msra.mxu1 %vm2528_vm6, %v10470_v8 }
 0x495   : > { %11414 = vmatprep.subr.mxu1 %v13203_v16 }
 0x496   : > { %11415 = vmatpush3.msra.mxu1 %v10467_v9 }
 0x497   : > { %11417 = vmatmul.mubr.msk.bf16.vlgmr.msra.gmra.mxu1 %vm2524_vm7, %v636_v10 }
 0x498   : > { %11422 = vmatprep.mubr.msk.bf16.mxu1 %vm2613_vm8, %v11940_v11  ;;  %v11994_v11 = vld [vmem:[%s18564_s1 + $0xae0] ss:$8 sps:$4 sm:$0xff]  }
 0x557   : > { %v2598_v15 = vpop.f32.mrf.mxu1 }
 0x558   : > { %2604 = vst [vmem:[%s13996_s22] sm:$0x1f] %v2598_v15  ;;  %11420 = vmatprep.subr.msk.mxu1 %vm960_vm1, %v2598_v15  ;;  %11426 = vmatprep.subr.msk.mxu0 %vm960_vm1, %v2598_v15 }
 0x559   : > { %v11418_v19 = vpop.f32.mrf.mxu1  ;;  %11421 = vmatpush3.msk.msra.mxu1 %vm960_vm1, %v2598_v15  ;;  %11427 = vmatpush3.msk.msra.mxu0 %vm960_vm1, %v2598_v15  ;;  %v12000_v15 = vld [vmem:[%s18564_s1 + $0xb40] ss:$8 sps:$4 sm:$0xff]  }
 0x55a   : > { %11423 = vmatmul.mubr.msk.bf16.vlgmr.msra.gmra.mxu1 %vm2613_vm8, %v11942_v13  ;;  %11429 = vmatmul.mubr.msk.bf16.vlgmr.msra.gmra.mxu0 %vm2613_vm8, %v11943_v14  ;;  %v11998_v14 = vld [vmem:[%s18564_s1 + $0xad0] ss:$8 sps:$4 sm:$0xff]  }
 0x55b   : > { %v2601_v22 = vpop.f32.mrf.mxu1  ;;  %2961 = vmatprep.subr.bf16.mxu1 %v11944_v17  ;;  %10480 = vmatprep.subr.bf16.mxu0 %v11993_v49  ;;  %v12002_v17 = vld [vmem:[%s18564_s1 + $0xac0] ss:$8 sps:$4 sm:$0xff]   ;;  %v12004_v19 = vld [vmem:[%s18564_s1 + $0xb30] ss:$8 sps:$4 sm:$0xff]  }
 0x55c   : > { %2962 = vmatpush1.bf16.msra.mxu1 %v11946_v18  ;;  %10481 = vmatpush3.bf16.msra.mxu0 %v11995_v60  ;;  %v12006_v22 = vld [vmem:[%s18564_s1 + $0xab0] ss:$8 sps:$4 sm:$0xff]  }
 0x55d   : > { %v11419_v24 = vpop.f32.mrf.mxu1  ;;  %2963 = vmatprep.subr.bf16.mxu1 %v11947_v20  ;;  %10482 = vmatprep.subr.bf16.mxu0 %v11997_v61  ;;  %v12005_v20 = vld [vmem:[%s18564_s1 + $0x930] ss:$8 sps:$4 sm:$0xff]  }
 0x55e   : > { %v12008_v24 = vld [vmem:[%s18564_s1 + $0xb20] ss:$8 sps:$4 sm:$0xff]  }
 0x560   : > { %2964 = vmatpush1.bf16.msra.mxu1 %v11949_v23  ;;  %10483 = vmatpush3.bf16.msra.mxu0 %v11999_v62  ;;  %v12007_v23 = vld [vmem:[%s18564_s1 + $0x8b0] ss:$8 sps:$4 sm:$0xff]  }
 0x561   : > { %2965 = vmatprep.subr.bf16.mxu1 %v11950_v26  ;;  %10484 = vmatprep.subr.bf16.mxu0 %v12001_v63  ;;  %v12009_v26 = vld [vmem:[%s18564_s1 + $0x920] ss:$8 sps:$4 sm:$0xff]  }
 0x564   : > { %2966 = vmatpush1.bf16.msra.mxu1 %v11952_v28  ;;  %10485 = vmatpush3.bf16.msra.mxu0 %v12003_v0  ;;  %v12010_v28 = vld [vmem:[%s18564_s1 + $0xaa0] ss:$8 sps:$4 sm:$0xff]  }
 0x565   : > { %2967 = vmatprep.subr.bf16.mxu1 %v11953_v29  ;;  %10486 = vmatprep.subr.bf16.mxu0 %v12005_v20  ;;  %v12011_v29 = vld [vmem:[%s18564_s1 + $0x8a0] ss:$8 sps:$4 sm:$0xff]  }
 0x568   : > { %2968 = vmatpush1.bf16.msra.mxu1 %v11955_v30  ;;  %10487 = vmatpush3.bf16.msra.mxu0 %v12007_v23  ;;  %v12012_v30 = vld [vmem:[%s18564_s1 + $0xb10] ss:$8 sps:$4 sm:$0xff]  }
 0x569   : > { %2969 = vmatprep.subr.bf16.mxu1 %v11956_v31  ;;  %10488 = vmatprep.subr.bf16.mxu0 %v12009_v26  ;;  %v12013_v31 = vld [vmem:[%s18564_s1 + $0x910] ss:$8 sps:$4 sm:$0xff]  }
 0x56c   : > { %2970 = vmatpush1.bf16.msra.mxu1 %v11958_v32  ;;  %10489 = vmatpush3.bf16.msra.mxu0 %v12011_v29  ;;  %v12014_v32 = vld [vmem:[%s18564_s1 + $0xa90] ss:$8 sps:$4 sm:$0xff]  }
 0x56d   : > { %2971 = vmatprep.subr.bf16.mxu1 %v11959_v33  ;;  %v12015_v33 = vld [vmem:[%s18564_s1 + $0x890] ss:$8 sps:$4 sm:$0xff]   ;;  %10490 = vmatprep.subr.bf16.mxu0 %v12013_v31 }
 0x570   : > { %2972 = vmatpush1.bf16.msra.mxu1 %v11961_v34  ;;  %10491 = vmatpush3.bf16.msra.mxu0 %v12015_v33  ;;  %v12016_v34 = vld [vmem:[%s18564_s1 + $0xb00] ss:$8 sps:$4 sm:$0xff]  }
 0x571   : > { %2973 = vmatprep.subr.bf16.mxu1 %v11962_v35  ;;  %v12017_v35 = vld [vmem:[%s18564_s1 + $0x900] ss:$8 sps:$4 sm:$0xff]  }
 0x572   : > { %10492 = vmatprep.subr.bf16.mxu0 %v12017_v35 }
 0x574   : > { %2974 = vmatpush1.bf16.msra.mxu1 %v11964_v36  ;;  %v12018_v36 = vld [vmem:[%s18564_s1 + $0xa80] ss:$8 sps:$4 sm:$0xff]  }
 0x575   : > { %2975 = vmatprep.subr.bf16.mxu1 %v11965_v38  ;;  %v12019_v38 = vld [vmem:[%s18564_s1 + $0x880] ss:$8 sps:$4 sm:$0xff]  }
 0x576   : > { %10493 = vmatpush3.bf16.msra.mxu0 %v12019_v38 }
 0x578   : > { %2976 = vmatpush1.bf16.msra.mxu1 %v11967_v40  ;;  %v12020_v40 = vld [vmem:[%s18564_s1 + $0xaf0] ss:$8 sps:$4 sm:$0xff]  }
 0x579   : > { %2977 = vmatprep.subr.bf16.mxu1 %v11968_v41  ;;  %v12021_v41 = vld [vmem:[%s18564_s1 + $0x8f0] ss:$8 sps:$4 sm:$0xff]  }
 0x57a   : > { %10494 = vmatprep.subr.bf16.mxu0 %v12021_v41 }
 0x57c   : > { %2978 = vmatpush2.bf16.msra.mxu1 %v11970_v43  ;;  %v12022_v43 = vld [vmem:[%s18564_s1 + $0xa70] ss:$8 sps:$4 sm:$0xff]  }
 0x57d   : > { %2979 = vmatprep.subr.bf16.mxu1 %v11971_v44  ;;  %v12023_v44 = vld [vmem:[%s18564_s1 + $0x870] ss:$8 sps:$4 sm:$0xff]  }
 0x57e   : > { %10495 = vmatpush3.bf16.msra.mxu0 %v12023_v44 }
 0x580   : > { %2980 = vmatpush2.bf16.msra.mxu1 %v11973_v45  ;;  %v12024_v45 = vld [vmem:[%s18564_s1 + $0xd60] ss:$8 sps:$4 sm:$0xff]  }
 0x581   : > { %2981 = vmatprep.subr.bf16.mxu1 %v11974_v48  ;;  %v12025_v48 = vld [vmem:[%s18564_s1 + $0xa60] ss:$8 sps:$4 sm:$0xff]  }
 0x582   : > { %10502 = vmatprep.subr.bf16.mxu0 %v12025_v48 }
 0x584   : > { %2982 = vmatpush2.bf16.msra.mxu1 %v11976_v50  ;;  %v675_v50 = vld [vmem:[%s18564_s1 + $0x858] sm:$0xff] }
 0x585   : > { %2983 = vmatprep.subr.bf16.mxu1 %v11977_v51  ;;  %v14212_v51 = vunpack.c.l.bf16 %v675_v50 }
 0x588   : > { %2984 = vmatpush2.bf16.msra.mxu1 %v11979_v52  ;;  %v676_v52 = vld [vmem:[%s18564_s1 + $0x860] sm:$0xff] }
 0x589   : > { %2985 = vmatprep.subr.bf16.mxu1 %v11980_v53  ;;  %v14217_v53 = vunpack.c.h.bf16 %v675_v50 }
 0x58c   : > { %2986 = vmatpush2.bf16.msra.mxu1 %v11982_v54 }
 0x58d   : > { %2987 = vmatprep.subr.bf16.mxu1 %v11983_v55  ;;  %v14219_v55 = vunpack.c.l.bf16 %v676_v52 }
 0x590   : > { %2988 = vmatpush2.bf16.msra.mxu1 %v11985_v56 }
 0x591   : > { %2989 = vmatprep.subr.bf16.mxu1 %v11986_v57 }
 0x594   : > { %2990 = vmatpush2.bf16.msra.mxu1 %v11988_v58  ;;  %v677_v58 = vld [vmem:[%s18564_s1 + $0x868] sm:$0x11] }
 0x595   : > { %2991 = vmatprep.subr.bf16.mxu1 %v11989_v59  ;;  %v14229_v60 = vunpack.c.l.bf16 %v677_v58 }
 0x598   : > { %2992 = vmatpush2.bf16.msra.mxu1 %v11991_v46  ;;  %v14226_v46 = vunpack.c.h.bf16 %v676_v52  ;;  %v12026_v52 = vld [vmem:[%s18564_s1 + $0xce0] ss:$8 sps:$4 sm:$0xff]  }
 0x599   : > { %10524 = vmatprep.subr.bf16.mxu1 %v11992_v47 }
 0x61a   : > { %v11424_v1 = vpop.f32.mrf.mxu1  ;;  %v11430_v2 = vpop.f32.mrf.mxu0 }
 0x61b   : > { %v2800_v13 = vpack.c.bf16 %v11430_v2, %v11430_v2  ;;  %v2799_v18 = vpack.c.bf16 %v11424_v1, %v11424_v1  ;;  %v14238_v2 = vunpack.c.h.bf16 %v677_v58 }
 0x61c   : > { %v2689_v3 = vpop.f32.mrf.mxu1  ;;  %v2783_v4 = vpop.f32.mrf.mxu0 }
 0x61e   : > { %v11425_v5 = vpop.f32.mrf.mxu1  ;;  %v11431_v6 = vpop.f32.mrf.mxu0 }
 0x620   : > { %v2692_v7 = vpop.f32.mrf.mxu1  ;;  %v2786_v8 = vpop.f32.mrf.mxu0 }
 0x621   : > { %v2797_v9 = vpack.c.bf16 %v2692_v7, %v2689_v3  ;;  %v2798_v10 = vpack.c.bf16 %v2786_v8, %v2783_v4 }
 0x623   : > { %2993 = vmatprep.mubr.bf16.mxu1 %v2798_v10 }
 0x624   : > { %2994 = vmatmul.mubr.bf16.vlgmr.msra.gmra.mxu1 %v2797_v9 }
 0x625   : > { %3003 = vmatprep.mubr.bf16.mxu1 %v2800_v13  ;;  %10525 = vmatpush3.bf16.msra.mxu1 %v11994_v11 }
 0x626   : > { %10526 = vmatprep.subr.bf16.mxu1 %v11996_v12 }
 0x629   : > { %10527 = vmatpush3.bf16.msra.mxu1 %v11998_v14 }
 0x62a   : > { %10528 = vmatprep.subr.bf16.mxu1 %v12000_v15 }
 0x62c   : > { %3004 = vmatmul.mubr.bf16.gmra.mxu1 %v2799_v18 }
 0x62d   : > { %10529 = vmatpush3.bf16.msra.mxu1 %v12002_v17 }
 0x62e   : > { %10530 = vmatprep.subr.bf16.mxu1 %v12004_v19 }
 0x631   : > { %10531 = vmatpush3.bf16.msra.mxu1 %v12006_v22 }
 0x632   : > { %10532 = vmatprep.subr.bf16.mxu1 %v12008_v24 }
 0x635   : > { %10533 = vmatpush3.bf16.msra.mxu1 %v12010_v28 }
 0x636   : > { %10534 = vmatprep.subr.bf16.mxu1 %v12012_v30 }
 0x639   : > { %10535 = vmatpush3.bf16.msra.mxu1 %v12014_v32 }
 0x63a   : > { %10536 = vmatprep.subr.bf16.mxu1 %v12016_v34 }
 0x63d   : > { %10537 = vmatpush3.bf16.msra.mxu1 %v12018_v36 }
 0x63e   : > { %10538 = vmatprep.subr.bf16.mxu1 %v12020_v40 }
 0x641   : > { %10539 = vmatpush3.bf16.msra.mxu1 %v12022_v43 }
 0x642   : > { %10568 = vmatprep.subr.bf16.mxu1 %v12024_v45 }
 0x6e4   : > { %v2995_v54 = vpop.f32.mrf.mxu1 }
 0x6e5   : > { %v2996_v56 = vadd.f32 %v2995_v54, %v14212_v51 }
 0x6e6   : > { %v2997_v57 = vpop.f32.mrf.mxu1 }
 0x6e7   : > { %v2998_v59 = vadd.f32 %v2997_v57, %v14217_v53  ;;  %v14231_v61 = vmax.f32 %v2996_v56, 0.0  ;;  %v12027_v57 = vld [vmem:[%s18564_s1 + $0x9e0] ss:$8 sps:$4 sm:$0xff]  }
 0x6e8   : > { %v2999_v47 = vpop.f32.mrf.mxu1 }
 0x6e9   : > { %v3000_v49 = vadd.f32 %v2999_v47, %v14219_v55  ;;  %v14233_v62 = vmax.f32 %v2998_v59, 0.0  ;;  %v3055_v9 = vrot.slane %v14231_v61, 6  ;;  %v3022_v10 = vrot.slane %v14231_v61, 4 }
 0x6ea   : > { %v3001_v63 = vpop.f32.mrf.mxu1 }
 0x6eb   : > { %v14235_v0 = vmax.f32 %v3000_v49, 0.0  ;;  %v3002_v1 = vadd.f32 %v3001_v63, %v14226_v46  ;;  %v3056_v8 = vrot.slane %v14233_v62, 6  ;;  %v3025_v20 = vrot.slane %v14233_v62, 4  ;;  %v12028_v49 = vld [vmem:[%s18564_s1 + $0xd50] ss:$8 sps:$4 sm:$0xff]  }
 0x6ec   : > { %v3005_v3 = vpop.f32.mrf.mxu1  ;;  %v3040_v33 = vrot.slane %v14233_v62, 7 }
 0x6ed   : > { %v14240_v4 = vmax.f32 %v3002_v1, 0.0  ;;  %v3006_v5 = vadd.f32 %v3005_v3, %v14229_v60  ;;  %v3057_v6 = vrot.slane %v14235_v0, 6  ;;  %v14254_v11 = vrot.slane %v14235_v0, 4 }
 0x6ee   : > { %v3007_v7 = vpop.f32.mrf.mxu1  ;;  %v3082_v15 = vpack.c.bf16 %v14235_v0, %v14231_v61  ;;  %v3070_v38 = vrot.slane %v14235_v0, 5 }
 0x6ef   : > { %v14256_v12 = vmax.f32 %v3006_v5, 0.0  ;;  %v3008_v13 = vadd.f32 %v3007_v7, %v14238_v2  ;;  %v3059_v14 = vrot.slane %v14240_v4, 6  ;;  %v3083_v18 = vpack.c.bf16 %v14240_v4, %v14233_v62  ;;  %3034 = vst [vmem:[%s14248_s24 + $0x10] sm:$0x3] %v14254_v11  ;;  %v12029_v5 = vld [vmem:[%s18564_s1 + $0xa50] ss:$8 sps:$4 sm:$0xff]  }
 0x6f0   : > { %v3009_v17 = vpop.f32.mrf.mxu1  ;;  %v3058_v19 = vsel %vm2528_vm6, %v3055_v9, %v3057_v6  ;;  %v3026_v22 = vrot.slane %v14240_v4, 4  ;;  %v3096_v28 = vpack.c.bf16 %v3057_v6, %v3057_v6  ;;  %v3127_v36 = vrot.slane %v3082_v15, 2 }
 0x6f1   : > { %v3092_v23 = vpack.c.bf16 %v14256_v12, %v14256_v12  ;;  %v3017_v24 = vmax.f32 %v3008_v13, 0.0  ;;  %v3060_v26 = vsel %vm2528_vm6, %v3056_v8, %v3059_v14  ;;  %v3097_v31 = vpack.c.bf16 %v3059_v14, %v3059_v14  ;;  %v12030_v17 = vld [vmem:[%s18564_s1 + $0xcd0] ss:$8 sps:$4 sm:$0xff]  }
 0x6f2   : > { %v3010_v29 = vpop.f32.mrf.mxu1  ;;  %v3087_v30 = vpack.c.bf16 %v3060_v26, %v3056_v8  ;;  %v3086_v32 = vpack.c.bf16 %v3058_v19, %v3055_v9  ;;  %3035 = vst [vmem:[%s14248_s24 + $0x18] sm:$0x3] %v3026_v22  ;;  %v3130_v48 = vrot.slane %v3083_v18, 2  ;;  %v3140_v50 = vrot.slane %v3096_v28, 2  ;;  %v12031_v19 = vld [vmem:[%s18564_s1 + $0x9d0] ss:$8 sps:$4 sm:$0xff]  }
 0x6f3   : > { %v3128_v34 = vrot.slane %v3092_v23, 2  ;;  %v3093_v35 = vpack.c.bf16 %v3017_v24, %v3017_v24  ;;  %v3047_v40 = vrot.slane %v3017_v24, 7  ;;  %v3143_v43 = vrot.slane %v3097_v31, 2  ;;  %v12032_v24 = vld [vmem:[%s18564_s1 + $0xd40] ss:$8 sps:$4 sm:$0xff]  }
 0x6f4   : > { %v3142_v41 = vrot.slane %v3087_v30, 2  ;;  %v3139_v44 = vrot.slane %v3086_v32, 2  ;;  %v3027_v54 = vsel %vm972_vm3, %v3025_v20, %v3026_v22  ;;  %v3101_v59 = vpack.c.bf16 %v3026_v22, %v3026_v22  ;;  %v12033_v26 = vld [vmem:[%s18564_s1 + $0xa40] ss:$8 sps:$4 sm:$0xff]  }
 0x6f5   : > { %v3131_v45 = vrot.slane %v3093_v35, 2  ;;  %3033 = vst [vmem:[%s14248_s24 + $0x8] sm:$0xff] %v3027_v54  ;;  %v3091_v58 = vpack.c.bf16 %v3027_v54, %v3025_v20  ;;  %v3043_v47 = vrot.slane %v14240_v4, 7  ;;  %v3129_v3 = vsel %vm948_vm2, %v3127_v36, %v3128_v34  ;;  %v12034_v31 = vld [vmem:[%s18564_s1 + $0xcc0] ss:$8 sps:$4 sm:$0xff]  }
 0x6f6   : > { %v3144_v56 = vsel %vm948_vm2, %v3142_v41, %v3143_v43  ;;  %v3141_v1 = vsel %vm948_vm2, %v3139_v44, %v3140_v50  ;;  %v14298_v6 = vsel %vm972_vm3, %v3022_v10, %v14254_v11  ;;  %v3155_v8 = vrot.slane %v3101_v59, 2  ;;  %v12035_v32 = vld [vmem:[%s18564_s1 + $0x9c0] ss:$8 sps:$4 sm:$0xff]   ;;  %v12037_v36 = vld [vmem:[%s18564_s1 + $0xa30] ss:$8 sps:$4 sm:$0xff]  }
 0x6f7   : > { %3761 = vmatprep.mubr.bf16.mxu1 %v3144_v56  ;;  %v3132_v63 = vsel %vm948_vm2, %v3130_v48, %v3131_v45  ;;  %v3154_v7 = vrot.slane %v3091_v58, 2  ;;  %v3044_v9 = vsel %vm3038_vm9, %v3040_v33, %v3043_v47  ;;  %v3048_v13 = vsel %vm3038_vm9, %v3043_v47, %v3047_v40  ;;  %3032 = vst [vmem:[%s14248_s24] sm:$0xff] %v14298_v6  ;;  %v12038_v40 = vld [vmem:[%s18564_s1 + $0xcb0] ss:$8 sps:$4 sm:$0xff]   ;;  %v12040_v43 = vld [vmem:[%s18564_s1 + $0xd20] ss:$8 sps:$4 sm:$0xff]  }
 0x6f8   : > { %3679 = vmatprep.mubr.bf16.mxu0 %v3132_v63  ;;  %3762 = vmatmul.mubr.bf16.vlgmr.msra.gmra.mxu1 %v3141_v1  ;;  %v3085_v14 = vpack.c.bf16 %v3044_v9, %v3040_v33  ;;  %v3095_v15 = vpack.c.bf16 %v3048_v13, %v3048_v13  ;;  %v3068_v20 = vrot.slane %v14231_v61, 5  ;;  %v3098_v29 = vpack.c.bf16 %v3070_v38, %v3070_v38  ;;  %v12036_v33 = vld [vmem:[%s18564_s1 + $0xd30] ss:$8 sps:$4 sm:$0xff]   ;;  %v12041_v45 = vld [vmem:[%s18564_s1 + $0xa20] ss:$8 sps:$4 sm:$0xff]  }
 0x6f9   : > { %10569 = vmatpush3.bf16.msra.mxu1 %v12026_v52  ;;  %3680 = vmatmul.mubr.bf16.vlgmr.msra.gmra.mxu0 %v3129_v3  ;;  %v3156_v18 = vsel %vm948_vm2, %v3154_v7, %v3155_v8  ;;  %v12039_v41 = vld [vmem:[%s18564_s1 + $0x9b0] ss:$8 sps:$4 sm:$0xff]   ;;  %v12042_v48 = vld [vmem:[%s18564_s1 + $0xca0] ss:$8 sps:$4 sm:$0xff]   ;;  %v3045_v56 = vrot.slane %v14256_v12, 7  ;;  %v3072_v47 = vrot.slane %v14240_v4, 5  ;;  %v3090_v8 = vpack.c.bf16 %v14298_v6, %v3022_v10 }
 0x6fa   : > { %10503 = vmatpush3.bf16.msra.mxu0 %v12027_v57  ;;  %10570 = vmatprep.subr.bf16.mxu1 %v12028_v49  ;;  %v3136_v22 = vrot.slane %v3085_v14, 2  ;;  %v3137_v23 = vrot.slane %v3095_v15, 2  ;;  %v3071_v28 = vsel %vm3067_vm10, %v3068_v20, %v3070_v38  ;;  %v3146_v35 = vrot.slane %v3098_v29, 2  ;;  %v12043_v50 = vld [vmem:[%s18564_s1 + $0x9a0] ss:$8 sps:$4 sm:$0xff]  }
 0x6fb   : > { %3843 = vmatprep.mubr.bf16.mxu1 %v3156_v18  ;;  %10504 = vmatprep.subr.bf16.mxu0 %v12029_v5  ;;  %v3088_v34 = vpack.c.bf16 %v3071_v28, %v3068_v20  ;;  %v12044_v52 = vld [vmem:[%s18564_s1 + $0xd10] ss:$8 sps:$4 sm:$0xff]   ;;  %v12048_v59 = vld [vmem:[%s18564_s1 + $0xd00] ss:$8 sps:$4 sm:$0xff]   ;;  %v3041_v49 = vrot.slane %v14235_v0, 7  ;;  %v3069_v63 = vrot.slane %v14233_v62, 5  ;;  %v3100_v9 = vpack.c.bf16 %v14254_v11, %v14254_v11 }
 0x6fc   : > { %v3138_v30 = vsel %vm948_vm2, %v3136_v22, %v3137_v23  ;;  %v12045_v54 = vld [vmem:[%s18564_s1 + $0xa10] ss:$8 sps:$4 sm:$0xff]   ;;  %v12049_v12 = vld [vmem:[%s18564_s1 + $0xa00] ss:$8 sps:$4 sm:$0xff]   ;;  %v3039_v5 = vrot.slane %v14231_v61, 7  ;;  %v3099_v18 = vpack.c.bf16 %v3072_v47, %v3072_v47  ;;  %v3151_v6 = vrot.slane %v3090_v8, 2 }
 0x6fd   : > { %10571 = vmatpush3.bf16.msra.mxu1 %v12030_v17  ;;  %3720 = vmatprep.mubr.bf16.mxu0 %v3138_v30  ;;  %v3145_v38 = vrot.slane %v3088_v34, 2  ;;  %v12046_v57 = vld [vmem:[%s18564_s1 + $0xc90] ss:$8 sps:$4 sm:$0xff]   ;;  %v3046_v1 = vsel %vm3038_vm9, %v3041_v49, %v3045_v56  ;;  %v12050_v3 = vld [vmem:[%s18564_s1 + $0xc80] ss:$8 sps:$4 sm:$0xff]   ;;  %v3073_v62 = vsel %vm3067_vm10, %v3069_v63, %v3072_v47  ;;  %v3152_v11 = vrot.slane %v3100_v9, 2 }
 0x6fe   : > { %10505 = vmatpush3.bf16.msra.mxu0 %v12031_v19  ;;  %10572 = vmatprep.subr.bf16.mxu1 %v12032_v24  ;;  %v12047_v58 = vld [vmem:[%s18564_s1 + $0x990] ss:$8 sps:$4 sm:$0xff]   ;;  %v12051_v0 = vld [vmem:[%s18564_s1 + $0x980] ss:$8 sps:$4 sm:$0xff]   ;;  %v3042_v13 = vsel %vm3038_vm9, %v3039_v5, %v3041_v49  ;;  %v3094_v14 = vpack.c.bf16 %v3046_v1, %v3046_v1  ;;  %v3089_v17 = vpack.c.bf16 %v3073_v62, %v3069_v63  ;;  %v3149_v23 = vrot.slane %v3099_v18, 2 }
 0x6ff   : > { %10506 = vmatprep.subr.bf16.mxu0 %v12033_v26  ;;  %v14342_v44 = vsel %vm948_vm2, %v3145_v38, %v3146_v35  ;;  %v12052_v4 = vld [vmem:[%s18564_s1 + $0xcf0] ss:$8 sps:$4 sm:$0xff]   ;;  %v3084_v10 = vpack.c.bf16 %v3042_v13, %v3039_v5  ;;  %v12056_v19 = vld [vmem:[%s18564_s1 + $0xc60] ss:$8 sps:$4 sm:$0xff]   ;;  %v3153_v28 = vsel %vm948_vm2, %v3151_v6, %v3152_v11 }
 0x700   : > { %v12053_v7 = vld [vmem:[%s18564_s1 + $0x9f0] ss:$8 sps:$4 sm:$0xff]   ;;  %v3134_v20 = vrot.slane %v3094_v14, 2  ;;  %v3148_v22 = vrot.slane %v3089_v17, 2  ;;  %v12057_v26 = vld [vmem:[%s18564_s1 + $0xbe0] ss:$8 sps:$4 sm:$0xff]  }
 0x701   : > { %10573 = vmatpush3.bf16.msra.mxu1 %v12034_v31  ;;  %v12054_v15 = vld [vmem:[%s18564_s1 + $0xc70] ss:$8 sps:$4 sm:$0xff]   ;;  %v3133_v24 = vrot.slane %v3084_v10, 2  ;;  %v12061_v34 = vld [vmem:[%s18564_s1 + $0xbc0] ss:$8 sps:$4 sm:$0xff]  }
 0x702   : > { %10507 = vmatpush3.bf16.msra.mxu0 %v12035_v32  ;;  %10574 = vmatprep.subr.bf16.mxu1 %v12036_v33  ;;  %v12055_v61 = vld [vmem:[%s18564_s1 + $0x970] ss:$8 sps:$4 sm:$0xff]   ;;  %v3150_v31 = vsel %vm948_vm2, %v3148_v22, %v3149_v23  ;;  %v12060_v33 = vld [vmem:[%s18564_s1 + $0xc40] ss:$8 sps:$4 sm:$0xff]  }
 0x703   : > { %10508 = vmatprep.subr.bf16.mxu0 %v12037_v36  ;;  %v12058_v29 = vld [vmem:[%s18564_s1 + $0xc50] ss:$8 sps:$4 sm:$0xff]   ;;  %v3135_v30 = vsel %vm948_vm2, %v3133_v24, %v3134_v20  ;;  %v12064_v38 = vld [vmem:[%s18564_s1 + $0xc20] ss:$8 sps:$4 sm:$0xff]  }
 0x704   : > { %v12059_v32 = vld [vmem:[%s18564_s1 + $0xbd0] ss:$8 sps:$4 sm:$0xff]  }
 0x705   : > { %10575 = vmatpush3.bf16.msra.mxu1 %v12038_v40  ;;  %v12062_v35 = vld [vmem:[%s18564_s1 + $0xc30] ss:$8 sps:$4 sm:$0xff]   ;;  %v12065_v40 = vld [vmem:[%s18564_s1 + $0xba0] ss:$8 sps:$4 sm:$0xff]  }
 0x706   : > { %10509 = vmatpush3.bf16.msra.mxu0 %v12039_v41  ;;  %10576 = vmatprep.subr.bf16.mxu1 %v12040_v43  ;;  %v12063_v36 = vld [vmem:[%s18564_s1 + $0xbb0] ss:$8 sps:$4 sm:$0xff]  }
 0x707   : > { %10510 = vmatprep.subr.bf16.mxu0 %v12041_v45  ;;  %v12066_v41 = vld [vmem:[%s18564_s1 + $0xc10] ss:$8 sps:$4 sm:$0xff]   ;;  %v12068_v45 = vld [vmem:[%s18564_s1 + $0xc00] ss:$8 sps:$4 sm:$0xff]  }
 0x708   : > { %v12067_v43 = vld [vmem:[%s18564_s1 + $0xb90] ss:$8 sps:$4 sm:$0xff]  }
 0x709   : > { %10577 = vmatpush3.bf16.msra.mxu1 %v12042_v48  ;;  %v12069_v48 = vld [vmem:[%s18564_s1 + $0xb80] ss:$8 sps:$4 sm:$0xff]  }
 0x70a   : > { %10511 = vmatpush3.bf16.msra.mxu0 %v12043_v50  ;;  %10578 = vmatprep.subr.bf16.mxu1 %v12044_v52  ;;  %v12070_v50 = vld [vmem:[%s18564_s1 + $0xbf0] ss:$8 sps:$4 sm:$0xff]  }
 0x70b   : > { %10512 = vmatprep.subr.bf16.mxu0 %v12045_v54  ;;  %v12071_v52 = vld [vmem:[%s18564_s1 + $0xb70] ss:$8 sps:$4 sm:$0xff]  }
 0x70c   : > { %v12072_v54 = vld [vmem:[%s18564_s1 + $0xd78] ss:$8 sps:$4 sm:$0xff]   ;;  %v12080_v56 = vld [vmem:[%s18564_s1 + $0xee8] ss:$8 sps:$4 sm:$0xff]  }
 0x70d   : > { %10579 = vmatpush3.bf16.msra.mxu1 %v12046_v57  ;;  %v12081_v57 = vld [vmem:[%s18564_s1 + $0xe68] ss:$8 sps:$4 sm:$0xff]   ;;  %v12086_v49 = vld [vmem:[%s18564_s1 + $0xeb8] ss:$8 sps:$4 sm:$0xff]  }
 0x70e   : > { %10513 = vmatpush3.bf16.msra.mxu0 %v12047_v58  ;;  %10580 = vmatprep.subr.bf16.mxu1 %v12048_v59  ;;  %v12082_v58 = vld [vmem:[%s18564_s1 + $0xed8] ss:$8 sps:$4 sm:$0xff]   ;;  %v12084_v59 = vld [vmem:[%s18564_s1 + $0xec8] ss:$8 sps:$4 sm:$0xff]  }
 0x70f   : > { %10514 = vmatprep.subr.bf16.mxu0 %v12049_v12  ;;  %v12085_v47 = vld [vmem:[%s18564_s1 + $0xe48] ss:$8 sps:$4 sm:$0xff]   ;;  %v12087_v12 = vld [vmem:[%s18564_s1 + $0xe38] ss:$8 sps:$4 sm:$0xff]  }
 0x711   : > { %10581 = vmatpush3.bf16.msra.mxu1 %v12050_v3 }
 0x712   : > { %10515 = vmatpush3.bf16.msra.mxu0 %v12051_v0  ;;  %10582 = vmatprep.subr.bf16.mxu1 %v12052_v4 }
 0x713   : > { %10516 = vmatprep.subr.bf16.mxu0 %v12053_v7  ;;  %v844_v7 = vld [vmem:[%s18564_s1 + $0xd70] sm:$0x1] }
 0x714   : > { %v845_v13 = vunpack.c.l.bf16 %v844_v7  ;;  %v12094_v7 = vld [vmem:[%s18564_s1 + $0xe18] ss:$8 sps:$4 sm:$0xff]  }
 0x715   : > { %10583 = vmatpush3.bf16.msra.mxu1 %v12054_v15 }
 0x716   : > { %10517 = vmatpush3.bf16.msra.mxu0 %v12055_v61  ;;  %10606 = vmatprep.subr.bf16.mxu1 %v12080_v56  ;;  %v14486_v17 = vrot.slane %v845_v13, %v13608_v21  ;;  %v12097_v13 = vld [vmem:[%s18564_s1 + $0xfc8] ss:$8 sps:$4 sm:$0xff]  }
 0x717   : > { %10546 = vmatprep.subr.bf16.mxu0 %v12056_v19 }
 0x718   : > { %3844 = vmatmul.mubr.bf16.vlgmr.msra.gmra.mxu1 %v3153_v28 }
 0x719   : > { %3721 = vmatmul.mubr.bf16.vlgmr.msra.gmra.mxu0 %v3135_v30  ;;  %10607 = vmatpush3.bf16.msra.mxu1 %v12081_v57 }
 0x71a   : > { %10547 = vmatpush3.bf16.msra.mxu0 %v12057_v26  ;;  %3802 = vmatprep.mubr.bf16.mxu0 %v3150_v31 }
 0x71b   : > { %10548 = vmatprep.subr.bf16.mxu0 %v12058_v29  ;;  %10608 = vmatprep.subr.bf16.mxu1 %v12082_v58  ;;  %v12073_v58 = vld [vmem:[%s18564_s1 + $0xd88] ss:$8 sps:$4 sm:$0x3f]  }
 0x71e   : > { %10549 = vmatpush3.bf16.msra.mxu0 %v12059_v32 }
 0x71f   : > { %10550 = vmatprep.subr.bf16.mxu0 %v12060_v33 }
 0x722   : > { %10551 = vmatpush3.bf16.msra.mxu0 %v12061_v34 }
 0x723   : > { %10552 = vmatprep.subr.bf16.mxu0 %v12062_v35 }
 0x726   : > { %10553 = vmatpush3.bf16.msra.mxu0 %v12063_v36 }
 0x727   : > { %10554 = vmatprep.subr.bf16.mxu0 %v12064_v38 }
 0x72a   : > { %10555 = vmatpush3.bf16.msra.mxu0 %v12065_v40 }
 0x72b   : > { %10556 = vmatprep.subr.bf16.mxu0 %v12066_v41 }
 0x72e   : > { %10557 = vmatpush3.bf16.msra.mxu0 %v12067_v43 }
 0x72f   : > { %10558 = vmatprep.subr.bf16.mxu0 %v12068_v45 }
 0x732   : > { %10559 = vmatpush3.bf16.msra.mxu0 %v12069_v48 }
 0x733   : > { %10560 = vmatprep.subr.bf16.mxu0 %v12070_v50 }
 0x736   : > { %10561 = vmatpush3.bf16.msra.mxu0 %v12071_v52 }
 0x739   : > { %3803 = vmatmul.mubr.bf16.vlgmr.msra.gmra.mxu0 %v14342_v44  ;;  %v12083_v44 = vld [vmem:[%s18564_s1 + $0xe58] ss:$8 sps:$4 sm:$0xff]  }
 0x73a   : > { %11436 = vmatprep.mubr.msk.bf16.mxu0 %vm3866_vm11, %v12072_v54  ;;  %10609 = vmatpush3.bf16.msra.mxu1 %v12083_v44  ;;  %v12074_v44 = vld [vmem:[%s18564_s1 + $0xd98] ss:$8 sps:$4 sm:$0xff]  }
 0x73b   : > { %10610 = vmatprep.subr.bf16.mxu1 %v12084_v59  ;;  %v12075_v59 = vld [vmem:[%s18564_s1 + $0xda8] ss:$8 sps:$4 sm:$0x3f]  }
 0x73e   : > { %10611 = vmatpush3.bf16.msra.mxu1 %v12085_v47  ;;  %v12076_v47 = vld [vmem:[%s18564_s1 + $0xdb8] ss:$8 sps:$4 sm:$0xff]  }
 0x73f   : > { %10612 = vmatprep.subr.bf16.mxu1 %v12086_v49  ;;  %v12077_v49 = vld [vmem:[%s18564_s1 + $0xdc8] ss:$8 sps:$4 sm:$0x3f]  }
 0x742   : > { %10613 = vmatpush3.bf16.msra.mxu1 %v12087_v12  ;;  %v12078_v12 = vld [vmem:[%s18564_s1 + $0xdd8] ss:$8 sps:$4 sm:$0xff]  }
 0x7b8   : > { %v10540_v5 = vpop.f32.mrf.mxu1 }
 0x7b9   : > { %v10496_v63 = vpop.f32.mrf.mxu0 }
 0x7ba   : > { %v10541_v4 = vpop.f32.mrf.mxu1 }
 0x7bb   : > { %v10497_v1 = vpop.f32.mrf.mxu0  ;;  %v10542_v26 = vadd.f32 %v10541_v4, %v10540_v5  ;;  %v12090_v5 = vld [vmem:[%s18564_s1 + $0xe28] ss:$8 sps:$4 sm:$0xff]   ;;  %v12092_v4 = vld [vmem:[%s18564_s1 + $0xe98] ss:$8 sps:$4 sm:$0xff]  }
 0x7bc   : > { %v10543_v8 = vpop.f32.mrf.mxu1  ;;  %v10498_v18 = vadd.f32 %v10497_v1, %v10496_v63  ;;  %v12079_v63 = vld [vmem:[%s18564_s1 + $0xde8] ss:$8 sps:$4 sm:$0x3f]  }
 0x7bd   : > { %v10499_v3 = vpop.f32.mrf.mxu0  ;;  %v12088_v1 = vld [vmem:[%s18564_s1 + $0xea8] ss:$8 sps:$4 sm:$0xff]  }
 0x7be   : > { %v10544_v14 = vpop.f32.mrf.mxu1  ;;  %v3682_v11 = vadd.f32 %v10498_v18, %v14486_v17  ;;  %10614 = vmatprep.subr.bf16.mxu1 %v12088_v1  ;;  %v12100_v18 = vld [vmem:[%s18564_s1 + $0xe78] ss:$8 sps:$4 sm:$0xff]  }
 0x7bf   : > { %v10500_v0 = vpop.f32.mrf.mxu0  ;;  %v10545_v35 = vadd.f32 %v10544_v14, %v10543_v8  ;;  %10615 = vmatpush3.bf16.msra.mxu1 %v12090_v5  ;;  %v12095_v8 = vld [vmem:[%s18564_s1 + $0xf58] ss:$8 sps:$4 sm:$0xff]   ;;  %v12098_v14 = vld [vmem:[%s18564_s1 + $0xe08] ss:$8 sps:$4 sm:$0xff]  }
 0x7c0   : > { %v10501_v19 = vadd.f32 %v10500_v0, %v10499_v3  ;;  %v12089_v3 = vld [vmem:[%s18564_s1 + $0xfe8] ss:$8 sps:$4 sm:$0xff]   ;;  %10616 = vmatprep.subr.bf16.mxu1 %v12092_v4 }
 0x7c1   : > { %v12091_v0 = vld [vmem:[%s18564_s1 + $0xf68] ss:$8 sps:$4 sm:$0xff]  }
 0x7c2   : > { %v3685_v28 = vadd.f32 %v10501_v19, %v14486_v17  ;;  %v12144_v19 = vld [vmem:[%s18564_s1 + $0x74] ss:$8 sps:$4 sm:$0xff]  }
 0x7c3   : > { %10617 = vmatpush3.bf16.msra.mxu1 %v12094_v7 }
 0x7d8   : > { %v10584_v61 = vpop.f32.mrf.mxu1 }
 0x7d9   : > { %v10518_v62 = vpop.f32.mrf.mxu0 }
 0x7da   : > { %v10585_v20 = vpop.f32.mrf.mxu1 }
 0x7db   : > { %v10519_v9 = vpop.f32.mrf.mxu0  ;;  %v10586_v36 = vadd.f32 %v10585_v20, %v10584_v61  ;;  %v12101_v61 = vld [vmem:[%s18564_s1 + $0xfb8] ss:$8 sps:$4 sm:$0xff]   ;;  %v12105_v20 = vld [vmem:[%s18564_s1 + $0xf28] ss:$8 sps:$4 sm:$0xff]  }
 0x7dc   : > { %v10520_v10 = vadd.f32 %v10519_v9, %v10518_v62  ;;  %v10587_v29 = vpop.f32.mrf.mxu1  ;;  %v12093_v62 = vld [vmem:[%s18564_s1 + $0xfd8] ss:$8 sps:$4 sm:$0xff]   ;;  %v12096_v9 = vld [vmem:[%s18564_s1 + $0xe88] ss:$8 sps:$4 sm:$0xff]  }
 0x7dd   : > { %v10521_v15 = vpop.f32.mrf.mxu0  ;;  %10618 = vmatprep.subr.bf16.mxu1 %v12096_v9 }
 0x7de   : > { %v3723_v22 = vadd.f32 %v10520_v10, %v3682_v11  ;;  %v10588_v40 = vpop.f32.mrf.mxu1  ;;  %10619 = vmatpush3.bf16.msra.mxu1 %v12098_v14  ;;  %v12102_v10 = vld [vmem:[%s18564_s1 + $0xdf8] ss:$8 sps:$4 sm:$0xff]   ;;  %v12104_v11 = vld [vmem:[%s18564_s1 + $0xfa8] ss:$8 sps:$4 sm:$0xff]  }
 0x7df   : > { %v10522_v6 = vpop.f32.mrf.mxu0  ;;  %v10589_v50 = vadd.f32 %v10588_v40, %v10587_v29  ;;  %10620 = vmatprep.subr.bf16.mxu1 %v12100_v18  ;;  %v12111_v29 = vld [vmem:[%s18564_s1 + $0xef8] ss:$8 sps:$4 sm:$0xff]  }
 0x7e0   : > { %v10523_v23 = vadd.f32 %v10522_v6, %v10521_v15  ;;  %v3764_v32 = vadd.f32 %v10542_v26, %v3723_v22  ;;  %v12099_v15 = vld [vmem:[%s18564_s1 + $0xf48] ss:$8 sps:$4 sm:$0xff]   ;;  %v12103_v6 = vld [vmem:[%s18564_s1 + $0xf38] ss:$8 sps:$4 sm:$0xff]  }
 0x7e1   : > { %v12106_v22 = vld [vmem:[%s18564_s1 + $0xf98] ss:$8 sps:$4 sm:$0xff]   ;;  %v12109_v26 = vld [vmem:[%s18564_s1 + $0xf08] ss:$8 sps:$4 sm:$0xff]  }
 0x7e2   : > { %v3726_v31 = vadd.f32 %v10523_v23, %v3685_v28  ;;  %10621 = vmatpush3.bf16.msra.mxu1 %v12102_v10  ;;  %v12107_v23 = vld [vmem:[%s18564_s1 + $0xf18] ss:$8 sps:$4 sm:$0xff]  }
 0x7e3   : > { %4621 = vmatprep.subr.bf16.mxu1 %v12144_v19  ;;  %v12110_v28 = vld [vmem:[%s18564_s1 + $0xf78] ss:$8 sps:$4 sm:$0xff]   ;;  %v12149_v19 = vld [vmem:[%s18564_s1 + $0x54] ss:$8 sps:$4 sm:$0xff]  }
 0x7e4   : > { %v3767_v45 = vadd.f32 %v10545_v35, %v3726_v31  ;;  %v14614_v31 = vld [vmem:[%s13398_s16 + $0x20] sm:$0xff] }
 0x7e5   : > { %v4567_v5 = vrot.slane %v14614_v31, 1 }
 0x7f9   : > { %v10562_v24 = vpop.f32.mrf.mxu0 }
 0x7fb   : > { %v10563_v30 = vpop.f32.mrf.mxu0 }
 0x7fc   : > { %v10564_v33 = vadd.f32 %v10563_v30, %v10562_v24  ;;  %v12108_v24 = vld [vmem:[%s18564_s1 + $0xf88] ss:$8 sps:$4 sm:$0xff]   ;;  %v12145_v30 = vld [vmem:[%s18564_s1 + $0x174] ss:$8 sps:$4 sm:$0xff]  }
 0x7fd   : > { %v10565_v34 = vpop.f32.mrf.mxu0 }
 0x7fe   : > { %v3805_v38 = vadd.f32 %v10564_v33, %v3764_v32  ;;  %v14617_v32 = vld [vmem:[%s13398_s16 + $0x28] sm:$0xff]  ;;  %v14620_v33 = vld [vmem:[%s13398_s16 + $0x30] sm:$0xff] }
 0x7ff   : > { %v10566_v41 = vpop.f32.mrf.mxu0  ;;  %v4579_v35 = vrot.slane %v14617_v32, 2  ;;  %v4570_v4 = vrot.slane %v14620_v33, 1 }
 0x800   : > { %v3846_v43 = vadd.f32 %v10586_v36, %v3805_v38  ;;  %v10567_v48 = vadd.f32 %v10566_v41, %v10565_v34  ;;  %v4578_v34 = vrot.slane %v14614_v31, 2  ;;  %v4581_v36 = vrot.slane %v14620_v33, 2 }
 0x802   : > { %v3852_v52 = vmax.f32 %v3846_v43, 0.0  ;;  %v3808_v54 = vadd.f32 %v10567_v48, %v3767_v45  ;;  %v14626_v38 = vsel %vm948_vm2, %v4578_v34, %v4579_v35  ;;  %v14631_v40 = vsel %vm948_vm2, %v4579_v35, %v4581_v36  ;;  %v12153_v34 = vld [vmem:[%s18564_s1 + $0x34] ss:$8 sps:$4 sm:$0xff]  }
 0x803   : > { %v4613_v41 = vpack.c.bf16 %v14631_v40, %v14626_v38  ;;  %v4600_v43 = vrot.slane %v14614_v31, 4  ;;  %v4601_v45 = vrot.slane %v14617_v32, 4  ;;  %v4603_v48 = vrot.slane %v14620_v33, 4  ;;  %v12220_v38 = vld [vmem:[%s18564_s1 + $0x2f8] ss:$8 sps:$4 sm:$0xff]  }
 0x804   : > { %3854 = vst [vmem:[%s14495_s28] sm:$0xff] %v3852_v52  ;;  %v3849_v56 = vadd.f32 %v10589_v50, %v3808_v54  ;;  %v12221_v40 = vld [vmem:[%s18564_s1 + $0x368] ss:$8 sps:$4 sm:$0xff]  }
 0x805   : > { %v14639_v50 = vsel %vm972_vm3, %v4600_v43, %v4601_v45  ;;  %v4589_v43 = vrot.slane %v14614_v31, 3 }
 0x806   : > { %v3853_v57 = vmax.f32 %v3849_v56, 0.0 }
 0x808   : > { %3855 = vst [vmem:[%s14495_s28 + $0x8] sm:$0x3f] %v3853_v57  ;;  %11432 = vmatprep.subr.msk.mxu0 %vm948_vm2, %v3853_v57 }
 0x809   : > { %11433 = vmatpush3.msk.msra.mxu0 %vm948_vm2, %v3853_v57 }
 0x80a   : > { %11434 = vmatprep.subr.mxu0 %v3852_v52 }
 0x80b   : > { %11435 = vmatpush3.msra.mxu0 %v3852_v52 }
 0x80c   : > { %11437 = vmatmul.mubr.msk.bf16.vlgmr.msra.gmra.mxu0 %vm3866_vm11, %v12073_v58  ;;  %11440 = vmatprep.subr.msk.mxu0 %vm948_vm2, %v3853_v57 }
 0x80d   : > { %11441 = vmatpush3.msk.msra.mxu0 %vm948_vm2, %v3853_v57  ;;  %11444 = vmatprep.mubr.msk.bf16.mxu0 %vm3866_vm11, %v12074_v44 }
 0x80e   : > { %11442 = vmatprep.subr.mxu0 %v3852_v52 }
 0x80f   : > { %11443 = vmatpush3.msra.mxu0 %v3852_v52 }
 0x810   : > { %11448 = vmatprep.subr.msk.mxu0 %vm948_vm2, %v3853_v57 }
 0x814   : > { %11445 = vmatmul.mubr.msk.bf16.vlgmr.msra.gmra.mxu0 %vm3866_vm11, %v12075_v59 }
 0x815   : > { %11449 = vmatpush3.msk.msra.mxu0 %vm948_vm2, %v3853_v57  ;;  %11452 = vmatprep.mubr.msk.bf16.mxu0 %vm3866_vm11, %v12076_v47 }
 0x816   : > { %11450 = vmatprep.subr.mxu0 %v3852_v52 }
 0x817   : > { %11451 = vmatpush3.msra.mxu0 %v3852_v52 }
 0x818   : > { %11456 = vmatprep.subr.msk.mxu0 %vm948_vm2, %v3853_v57 }
 0x81c   : > { %11453 = vmatmul.mubr.msk.bf16.vlgmr.msra.gmra.mxu0 %vm3866_vm11, %v12077_v49 }
 0x81d   : > { %11457 = vmatpush3.msk.msra.mxu0 %vm948_vm2, %v3853_v57  ;;  %11460 = vmatprep.mubr.msk.bf16.mxu0 %vm3866_vm11, %v12078_v12 }
 0x81e   : > { %11458 = vmatprep.subr.mxu0 %v3852_v52 }
 0x81f   : > { %11459 = vmatpush3.msra.mxu0 %v3852_v52  ;;  %v14644_v52 = vsel %vm972_vm3, %v4601_v45, %v4603_v48  ;;  %v4590_v45 = vrot.slane %v14617_v32, 3 }
 0x820   : > { %10634 = vmatprep.subr.bf16.mxu0 %v12089_v3  ;;  %v4615_v54 = vpack.c.bf16 %v14644_v52, %v14639_v50  ;;  %v12235_v50 = vld [vmem:[%s18564_s1 + $0x2a8] ss:$8 sps:$4 sm:$0xff]  }
 0x821   : > { %v12238_v52 = vld [vmem:[%s18564_s1 + $0x308] ss:$8 sps:$4 sm:$0xff]  }
 0x824   : > { %11461 = vmatmul.mubr.msk.bf16.vlgmr.msra.gmra.mxu0 %vm3866_vm11, %v12079_v63 }
 0x825   : > { %10635 = vmatpush3.bf16.msra.mxu0 %v12091_v0  ;;  %v4568_v0 = vrot.slane %v14617_v32, 1 }
 0x826   : > { %10636 = vmatprep.subr.bf16.mxu0 %v12093_v62 }
 0x827   : > { %v4569_v14 = vsel %vm936_vm0, %v4567_v5, %v4568_v0  ;;  %v12160_v5 = vld [vmem:[%s18564_s1 + $0x14] ss:$8 sps:$4 sm:$0xff]  }
 0x829   : > { %10637 = vmatpush3.bf16.msra.mxu0 %v12095_v8  ;;  %v12146_v8 = vld [vmem:[%s18564_s1 + $0x70] ss:$8 sps:$4 sm:$0xff]  }
 0x82a   : > { %10638 = vmatprep.subr.bf16.mxu0 %v12097_v13  ;;  %v12147_v13 = vld [vmem:[%s18564_s1 + $0x64] ss:$8 sps:$4 sm:$0xff]  }
 0x82d   : > { %10639 = vmatpush3.bf16.msra.mxu0 %v12099_v15  ;;  %v4571_v15 = vsel %vm936_vm0, %v4568_v0, %v4570_v4  ;;  %v12161_v0 = vld [vmem:[%s18564_s1 + $0x154] ss:$8 sps:$4 sm:$0xff]  }
 0x82e   : > { %10640 = vmatprep.subr.bf16.mxu0 %v12101_v61  ;;  %v12148_v61 = vld [vmem:[%s18564_s1 + $0x60] ss:$8 sps:$4 sm:$0xff]   ;;  %v4612_v10 = vpack.c.bf16 %v4571_v15, %v4569_v14  ;;  %v12168_v15 = vld [vmem:[%s18564_s1 + $0xf4] ss:$8 sps:$4 sm:$0xff]  }
 0x82f   : > { %v12167_v14 = vld [vmem:[%s18564_s1 + $0x140] ss:$8 sps:$4 sm:$0xff]  }
 0x831   : > { %10641 = vmatpush3.bf16.msra.mxu0 %v12103_v6 }
 0x832   : > { %10642 = vmatprep.subr.bf16.mxu0 %v12104_v11 }
 0x835   : > { %10643 = vmatpush3.bf16.msra.mxu0 %v12105_v20 }
 0x836   : > { %10644 = vmatprep.subr.bf16.mxu0 %v12106_v22  ;;  %v12150_v22 = vld [vmem:[%s18564_s1 + $0x50] ss:$8 sps:$4 sm:$0xff]  }
 0x839   : > { %10645 = vmatpush3.bf16.msra.mxu0 %v12107_v23 }
 0x83a   : > { %10646 = vmatprep.subr.bf16.mxu0 %v12108_v24  ;;  %v12151_v24 = vld [vmem:[%s18564_s1 + $0x44] ss:$8 sps:$4 sm:$0xff]  }
 0x83d   : > { %10647 = vmatpush3.bf16.msra.mxu0 %v12109_v26 }
 0x83e   : > { %10648 = vmatprep.subr.bf16.mxu0 %v12110_v28 }
 0x841   : > { %10649 = vmatpush3.bf16.msra.mxu0 %v12111_v29 }
 0x842   : > { %4674 = vmatprep.subr.bf16.mxu0 %v12145_v30  ;;  %v12152_v30 = vld [vmem:[%s18564_s1 + $0x40] ss:$8 sps:$4 sm:$0xff]  }
 0x8cc   : > { %v11438_v56 = vpop.f32.mrf.mxu0 }
 0x8ce   : > { %v3942_v57 = vpop.f32.mrf.mxu0 }
 0x8d0   : > { %v11439_v58 = vpop.f32.mrf.mxu0 }
 0x8d1   : > { %v4252_v6 = vpack.c.bf16 %v11439_v58, %v11438_v56  ;;  %v4592_v56 = vrot.slane %v14620_v33, 3  ;;  %v12155_v58 = vld [vmem:[%s18564_s1 + $0x170] ss:$8 sps:$4 sm:$0xff]  }
 0x8d2   : > { %v3945_v44 = vpop.f32.mrf.mxu0 }
 0x8d3   : > { %v4248_v1 = vpack.c.bf16 %v3945_v44, %v3942_v57  ;;  %v12154_v57 = vld [vmem:[%s18564_s1 + $0x30] ss:$8 sps:$4 sm:$0xff]   ;;  %v12156_v44 = vld [vmem:[%s18564_s1 + $0x24] ss:$8 sps:$4 sm:$0xff]  }
 0x8d4   : > { %v11446_v59 = vpop.f32.mrf.mxu0 }
 0x8d6   : > { %v4039_v47 = vpop.f32.mrf.mxu0 }
 0x8d8   : > { %v11447_v49 = vpop.f32.mrf.mxu0 }
 0x8d9   : > { %v4253_v62 = vpack.c.bf16 %v11447_v49, %v11446_v59  ;;  %v12157_v59 = vld [vmem:[%s18564_s1 + $0x164] ss:$8 sps:$4 sm:$0xff]   ;;  %v4593_v49 = vsel %vm960_vm1, %v4590_v45, %v4592_v56 }
 0x8da   : > { %v4042_v12 = vpop.f32.mrf.mxu0 }
 0x8db   : > { %v4249_v63 = vpack.c.bf16 %v4042_v12, %v4039_v47  ;;  %v4591_v47 = vsel %vm960_vm1, %v4589_v43, %v4590_v45  ;;  %v12158_v12 = vld [vmem:[%s18564_s1 + $0x20] ss:$8 sps:$4 sm:$0xff]   ;;  %v12185_v43 = vld [vmem:[%s18564_s1 + $0x1f4] ss:$8 sps:$4 sm:$0xff]   ;;  %v12186_v45 = vld [vmem:[%s18564_s1 + $0xb0] ss:$8 sps:$4 sm:$0xff]  }
 0x8dc   : > { %v14648_v3 = vpop.f32.mrf.mxu0 }
 0x8dd   : > { %4484 = vmatprep.mubr.bf16.mxu1 %v4249_v63  ;;  %v12159_v63 = vld [vmem:[%s18564_s1 + $0x160] ss:$8 sps:$4 sm:$0xff]  }
 0x8de   : > { %v4136_v7 = vpop.f32.mrf.mxu0  ;;  %4485 = vmatmul.mubr.bf16.vlgmr.msra.gmra.mxu1 %v4248_v1 }
 0x8df   : > { %4622 = vmatpush1.bf16.msra.mxu1 %v12146_v8  ;;  %4492 = vmatprep.mubr.bf16.mxu1 %v4253_v62  ;;  %v4614_v62 = vpack.c.bf16 %v4593_v49, %v4591_v47  ;;  %v12164_v8 = vld [vmem:[%s18564_s1 + $0x4] ss:$8 sps:$4 sm:$0xff]   ;;  %v12191_v47 = vld [vmem:[%s18564_s1 + $0x1e0] ss:$8 sps:$4 sm:$0xff]   ;;  %v14804_v49 = vld [vmem:[%s13398_s16 + $0x38] sm:$0xff] }
 0x8e0   : > { %v11455_v9 = vpop.f32.mrf.mxu0  ;;  %4623 = vmatprep.subr.bf16.mxu1 %v12147_v13  ;;  %v12166_v13 = vld [vmem:[%s18564_s1] ss:$8 sps:$4 sm:$0xff]  }
 0x8e1   : > { %v4254_v1 = vpack.c.bf16 %v11455_v9, %v14648_v3  ;;  %v12163_v3 = vld [vmem:[%s18564_s1 + $0x150] ss:$8 sps:$4 sm:$0xff]   ;;  %v12165_v9 = vld [vmem:[%s18564_s1 + $0x144] ss:$8 sps:$4 sm:$0xff]  }
 0x8e2   : > { %v4139_v18 = vpop.f32.mrf.mxu0 }
 0x8e3   : > { %4624 = vmatpush1.bf16.msra.mxu1 %v12148_v61  ;;  %v4250_v26 = vpack.c.bf16 %v4139_v18, %v4136_v7  ;;  %v12162_v7 = vld [vmem:[%s18564_s1 + $0x10] ss:$8 sps:$4 sm:$0xff]   ;;  %v12169_v18 = vld [vmem:[%s18564_s1 + $0x134] ss:$8 sps:$4 sm:$0xff]  }
 0x8e4   : > { %v11462_v11 = vpop.f32.mrf.mxu0  ;;  %4625 = vmatprep.subr.bf16.mxu1 %v12149_v19  ;;  %v12170_v61 = vld [vmem:[%s18564_s1 + $0xf0] ss:$8 sps:$4 sm:$0xff]   ;;  %v12174_v19 = vld [vmem:[%s18564_s1 + $0xe0] ss:$8 sps:$4 sm:$0xff]  }
 0x8e6   : > { %v4233_v20 = vpop.f32.mrf.mxu0  ;;  %4493 = vmatmul.mubr.bf16.gmra.mxu1 %v4252_v6  ;;  %v12172_v6 = vld [vmem:[%s18564_s1 + $0xe4] ss:$8 sps:$4 sm:$0xff]  }
 0x8e7   : > { %4626 = vmatpush1.bf16.msra.mxu1 %v12150_v22  ;;  %4653 = vmatprep.mubr.bf16.mxu1 %v4612_v10  ;;  %v12171_v10 = vld [vmem:[%s18564_s1 + $0x130] ss:$8 sps:$4 sm:$0xff]   ;;  %v12176_v22 = vld [vmem:[%s18564_s1 + $0xd4] ss:$8 sps:$4 sm:$0xff]  }
 0x8e8   : > { %v11463_v23 = vpop.f32.mrf.mxu0  ;;  %4627 = vmatprep.subr.bf16.mxu1 %v12151_v24  ;;  %v12178_v24 = vld [vmem:[%s18564_s1 + $0xd0] ss:$8 sps:$4 sm:$0xff]  }
 0x8e9   : > { %v4255_v35 = vpack.c.bf16 %v11463_v23, %v11462_v11  ;;  %v12173_v11 = vld [vmem:[%s18564_s1 + $0x124] ss:$8 sps:$4 sm:$0xff]   ;;  %v12177_v23 = vld [vmem:[%s18564_s1 + $0x114] ss:$8 sps:$4 sm:$0xff]  }
 0x8ea   : > { %v4236_v28 = vpop.f32.mrf.mxu0 }
 0x8eb   : > { %v4251_v29 = vpack.c.bf16 %v4236_v28, %v4233_v20  ;;  %4628 = vmatpush1.bf16.msra.mxu1 %v12152_v30  ;;  %v12175_v20 = vld [vmem:[%s18564_s1 + $0x120] ss:$8 sps:$4 sm:$0xff]   ;;  %v12180_v28 = vld [vmem:[%s18564_s1 + $0xc4] ss:$8 sps:$4 sm:$0xff]  }
 0x8ec   : > { %4629 = vmatprep.subr.bf16.mxu1 %v12153_v34  ;;  %v12182_v30 = vld [vmem:[%s18564_s1 + $0xc0] ss:$8 sps:$4 sm:$0xff]  }
 0x8ed   : > { %4533 = vmatprep.mubr.bf16.mxu0 %v4251_v29  ;;  %v12181_v29 = vld [vmem:[%s18564_s1 + $0x104] ss:$8 sps:$4 sm:$0xff]   ;;  %v12183_v34 = vld [vmem:[%s18564_s1 + $0x100] ss:$8 sps:$4 sm:$0xff]  }
 0x8ee   : > { %4534 = vmatmul.mubr.bf16.vlgmr.msra.gmra.mxu0 %v4250_v26  ;;  %v12179_v26 = vld [vmem:[%s18564_s1 + $0x110] ss:$8 sps:$4 sm:$0xff]  }
 0x8ef   : > { %4630 = vmatpush1.bf16.msra.mxu1 %v12154_v57  ;;  %4675 = vmatpush1.bf16.msra.mxu0 %v12155_v58  ;;  %v12187_v57 = vld [vmem:[%s18564_s1 + $0x1f0] ss:$8 sps:$4 sm:$0xff]   ;;  %v12188_v58 = vld [vmem:[%s18564_s1 + $0xa4] ss:$8 sps:$4 sm:$0xff]  }
 0x8f0   : > { %4631 = vmatprep.subr.bf16.mxu1 %v12156_v44  ;;  %4676 = vmatprep.subr.bf16.mxu0 %v12157_v59  ;;  %v12189_v44 = vld [vmem:[%s18564_s1 + $0x1e4] ss:$8 sps:$4 sm:$0xff]   ;;  %v12190_v59 = vld [vmem:[%s18564_s1 + $0xa0] ss:$8 sps:$4 sm:$0xff]  }
 0x8f1   : > { %4541 = vmatprep.mubr.bf16.mxu0 %v4255_v35  ;;  %v12184_v35 = vld [vmem:[%s18564_s1 + $0xb4] ss:$8 sps:$4 sm:$0xff]  }
 0x8f3   : > { %4632 = vmatpush1.bf16.msra.mxu1 %v12158_v12  ;;  %4677 = vmatpush1.bf16.msra.mxu0 %v12159_v63  ;;  %v12192_v12 = vld [vmem:[%s18564_s1 + $0x94] ss:$8 sps:$4 sm:$0xff]  }
 0x8f4   : > { %4633 = vmatprep.subr.bf16.mxu1 %v12160_v5  ;;  %4678 = vmatprep.subr.bf16.mxu0 %v12161_v0  ;;  %v12193_v63 = vld [vmem:[%s18564_s1 + $0x1d4] ss:$8 sps:$4 sm:$0xff]   ;;  %v12194_v5 = vld [vmem:[%s18564_s1 + $0x90] ss:$8 sps:$4 sm:$0xff]  }
 0x8f5   : > { %v12195_v0 = vld [vmem:[%s18564_s1 + $0x1d0] ss:$8 sps:$4 sm:$0xff]  }
 0x8f6   : > { %4542 = vmatmul.mubr.bf16.gmra.mxu0 %v4254_v1  ;;  %v4572_v1 = vrot.slane %v14804_v49, 1 }
 0x8f7   : > { %4634 = vmatpush1.bf16.msra.mxu1 %v12162_v7  ;;  %4679 = vmatpush1.bf16.msra.mxu0 %v12163_v3  ;;  %v12197_v7 = vld [vmem:[%s18564_s1 + $0x1c4] ss:$8 sps:$4 sm:$0xff]   ;;  %v4611_v3 = vpack.c.bf16 %v14617_v32, %v14614_v31  ;;  %v12201_v31 = vld [vmem:[%s18564_s1 + $0x274] ss:$8 sps:$4 sm:$0xff]  }
 0x8f8   : > { %4635 = vmatprep.subr.bf16.mxu1 %v12164_v8  ;;  %4680 = vmatprep.subr.bf16.mxu0 %v12165_v9  ;;  %v4573_v8 = vsel %vm936_vm0, %v4570_v4, %v4572_v1  ;;  %v12198_v9 = vld [vmem:[%s18564_s1 + $0x80] ss:$8 sps:$4 sm:$0xff]   ;;  %v12202_v4 = vld [vmem:[%s18564_s1 + $0x1b0] ss:$8 sps:$4 sm:$0xff]  }
 0x8f9   : > { %4706 = vmatprep.mubr.bf16.mxu0 %v4614_v62  ;;  %v12196_v62 = vld [vmem:[%s18564_s1 + $0x84] ss:$8 sps:$4 sm:$0xff]   ;;  %v4617_v32 = vpack.c.bf16 %v4572_v1, %v4573_v8  ;;  %v12232_v8 = vld [vmem:[%s18564_s1 + $0x338] ss:$8 sps:$4 sm:$0xff]  }
 0x8fa   : > { %v12227_v1 = vld [vmem:[%s18564_s1 + $0x204] ss:$8 sps:$4 sm:$0xff]  }
 0x8fb   : > { %4636 = vmatpush1.bf16.msra.mxu1 %v12166_v13  ;;  %4681 = vmatpush1.bf16.msra.mxu0 %v12167_v14  ;;  %v12199_v13 = vld [vmem:[%s18564_s1 + $0x1c0] ss:$8 sps:$4 sm:$0xff]   ;;  %v12200_v14 = vld [vmem:[%s18564_s1 + $0x1b4] ss:$8 sps:$4 sm:$0xff]  }
 0x8fc   : > { %4637 = vmatprep.subr.bf16.mxu1 %v12168_v15  ;;  %4682 = vmatprep.subr.bf16.mxu0 %v12169_v18  ;;  %v12203_v15 = vld [vmem:[%s18564_s1 + $0x270] ss:$8 sps:$4 sm:$0xff]   ;;  %v12204_v18 = vld [vmem:[%s18564_s1 + $0x1a4] ss:$8 sps:$4 sm:$0xff]  }
 0x8ff   : > { %4638 = vmatpush2.bf16.msra.mxu1 %v12170_v61  ;;  %4683 = vmatpush1.bf16.msra.mxu0 %v12171_v10  ;;  %v12205_v61 = vld [vmem:[%s18564_s1 + $0x264] ss:$8 sps:$4 sm:$0xff]   ;;  %v4616_v10 = vpack.c.bf16 %v14804_v49, %v14620_v33  ;;  %v12236_v33 = vld [vmem:[%s18564_s1 + $0x318] ss:$8 sps:$4 sm:$0xff]  }
 0x900   : > { %4639 = vmatprep.subr.bf16.mxu1 %v12172_v6  ;;  %4684 = vmatprep.subr.bf16.mxu0 %v12173_v11  ;;  %v12206_v6 = vld [vmem:[%s18564_s1 + $0x1a0] ss:$8 sps:$4 sm:$0xff]  }
 0x901   : > { %v12207_v11 = vld [vmem:[%s18564_s1 + $0x260] ss:$8 sps:$4 sm:$0xff]  }
 0x903   : > { %4640 = vmatpush2.bf16.msra.mxu1 %v12174_v19  ;;  %4685 = vmatpush1.bf16.msra.mxu0 %v12175_v20  ;;  %v12208_v19 = vld [vmem:[%s18564_s1 + $0x194] ss:$8 sps:$4 sm:$0xff]  }
 0x904   : > { %4641 = vmatprep.subr.bf16.mxu1 %v12176_v22  ;;  %4686 = vmatprep.subr.bf16.mxu0 %v12177_v23  ;;  %v12209_v20 = vld [vmem:[%s18564_s1 + $0x254] ss:$8 sps:$4 sm:$0xff]   ;;  %v4594_v22 = vrot.slane %v14804_v49, 3  ;;  %v12210_v23 = vld [vmem:[%s18564_s1 + $0x190] ss:$8 sps:$4 sm:$0xff]  }
 0x907   : > { %4642 = vmatpush2.bf16.msra.mxu1 %v12178_v24  ;;  %4687 = vmatpush1.bf16.msra.mxu0 %v12179_v26  ;;  %v12211_v24 = vld [vmem:[%s18564_s1 + $0x250] ss:$8 sps:$4 sm:$0xff]   ;;  %v12212_v26 = vld [vmem:[%s18564_s1 + $0x184] ss:$8 sps:$4 sm:$0xff]  }
 0x908   : > { %4643 = vmatprep.subr.bf16.mxu1 %v12180_v28  ;;  %4688 = vmatprep.subr.bf16.mxu0 %v12181_v29  ;;  %v12213_v28 = vld [vmem:[%s18564_s1 + $0x244] ss:$8 sps:$4 sm:$0xff]   ;;  %v4595_v29 = vsel %vm960_vm1, %v4592_v56, %v4594_v22  ;;  %v12217_v56 = vld [vmem:[%s18564_s1 + $0x378] ss:$8 sps:$4 sm:$0xff]  }
 0x90b   : > { %4644 = vmatpush2.bf16.msra.mxu1 %v12182_v30  ;;  %4689 = vmatpush1.bf16.msra.mxu0 %v12183_v34  ;;  %v12214_v30 = vld [vmem:[%s18564_s1 + $0x180] ss:$8 sps:$4 sm:$0xff]  }
 0x90c   : > { %4645 = vmatprep.subr.bf16.mxu1 %v12184_v35  ;;  %4690 = vmatprep.subr.bf16.mxu0 %v12185_v43  ;;  %v12215_v34 = vld [vmem:[%s18564_s1 + $0x240] ss:$8 sps:$4 sm:$0xff]   ;;  %v4619_v35 = vpack.c.bf16 %v4594_v22, %v4595_v29  ;;  %v4583_v43 = vrot.slane %v14804_v49, 2 }
 0x90f   : > { %4646 = vmatpush2.bf16.msra.mxu1 %v12186_v45  ;;  %4691 = vmatpush2.bf16.msra.mxu0 %v12187_v57  ;;  %v12216_v45 = vld [vmem:[%s18564_s1 + $0x234] ss:$8 sps:$4 sm:$0xff]   ;;  %v12218_v57 = vld [vmem:[%s18564_s1 + $0x230] ss:$8 sps:$4 sm:$0xff]  }
 0x910   : > { %4647 = vmatprep.subr.bf16.mxu1 %v12188_v58  ;;  %4692 = vmatprep.subr.bf16.mxu0 %v12189_v44  ;;  %v4584_v58 = vsel %vm948_vm2, %v4581_v36, %v4583_v43  ;;  %v12219_v44 = vld [vmem:[%s18564_s1 + $0x224] ss:$8 sps:$4 sm:$0xff]   ;;  %v12222_v36 = vld [vmem:[%s18564_s1 + $0x220] ss:$8 sps:$4 sm:$0xff]  }
 0x913   : > { %4648 = vmatpush2.bf16.msra.mxu1 %v12190_v59  ;;  %4693 = vmatpush2.bf16.msra.mxu0 %v12191_v47  ;;  %v12223_v59 = vld [vmem:[%s18564_s1 + $0x214] ss:$8 sps:$4 sm:$0xff]   ;;  %v12224_v47 = vld [vmem:[%s18564_s1 + $0x2e8] ss:$8 sps:$4 sm:$0xff]  }
 0x914   : > { %4649 = vmatprep.subr.bf16.mxu1 %v12192_v12  ;;  %4694 = vmatprep.subr.bf16.mxu0 %v12193_v63  ;;  %v12225_v12 = vld [vmem:[%s18564_s1 + $0x358] ss:$8 sps:$4 sm:$0xff]  }
 0x915   : > { %v12226_v63 = vld [vmem:[%s18564_s1 + $0x210] ss:$8 sps:$4 sm:$0xff]  }
 0x917   : > { %4650 = vmatpush2.bf16.msra.mxu1 %v12194_v5  ;;  %4695 = vmatpush2.bf16.msra.mxu0 %v12195_v0  ;;  %v12228_v5 = vld [vmem:[%s18564_s1 + $0x2d8] ss:$8 sps:$4 sm:$0xff]   ;;  %v12229_v0 = vld [vmem:[%s18564_s1 + $0x348] ss:$8 sps:$4 sm:$0xff]  }
 0x918   : > { %4651 = vmatprep.subr.bf16.mxu1 %v12196_v62  ;;  %4696 = vmatprep.subr.bf16.mxu0 %v12197_v7  ;;  %v12230_v62 = vld [vmem:[%s18564_s1 + $0x200] ss:$8 sps:$4 sm:$0xff]   ;;  %v4605_v7 = vrot.slane %v14804_v49, 4 }
 0x91a   : > { %v4606_v49 = vsel %vm972_vm3, %v4603_v48, %v4605_v7  ;;  %v12237_v48 = vld [vmem:[%s18564_s1 + $0x298] ss:$8 sps:$4 sm:$0xff]  }
 0x91b   : > { %4652 = vmatpush2.bf16.msra.mxu1 %v12198_v9  ;;  %4697 = vmatpush2.bf16.msra.mxu0 %v12199_v13  ;;  %v12233_v9 = vld [vmem:[%s18564_s1 + $0x2b8] ss:$8 sps:$4 sm:$0xff]   ;;  %v12234_v13 = vld [vmem:[%s18564_s1 + $0x328] ss:$8 sps:$4 sm:$0xff]  }
 0x91c   : > { %4698 = vmatprep.subr.bf16.mxu0 %v12200_v14  ;;  %4727 = vmatprep.subr.bf16.mxu1 %v12201_v31  ;;  %v4620_v14 = vpack.c.bf16 %v4605_v7, %v4606_v49  ;;  %v12240_v31 = vld [vmem:[%s18564_s1 + $0x40c] ss:$8 sps:$4 sm:$0xff]  }
 0x91e   : > { %4654 = vmatmul.mubr.bf16.vlgmr.msra.gmra.mxu1 %v4611_v3  ;;  %v12231_v3 = vld [vmem:[%s18564_s1 + $0x2c8] ss:$8 sps:$4 sm:$0xff]  }
 0x91f   : > { %4699 = vmatpush2.bf16.msra.mxu0 %v12202_v4  ;;  %4728 = vmatpush1.bf16.msra.mxu1 %v12203_v15 }
 0x920   : > { %4700 = vmatprep.subr.bf16.mxu0 %v12204_v18  ;;  %4729 = vmatprep.subr.bf16.mxu1 %v12205_v61  ;;  %v926_v18 = vld [vmem:[%s18564_s1 + $0xff8] sm:$0x1] }
 0x921   : > { %4663 = vmatprep.mubr.bf16.mxu1 %v4617_v32 }
 0x923   : > { %4701 = vmatpush2.bf16.msra.mxu0 %v12206_v6  ;;  %4730 = vmatpush1.bf16.msra.mxu1 %v12207_v11 }
 0x924   : > { %4702 = vmatprep.subr.bf16.mxu0 %v12208_v19  ;;  %4731 = vmatprep.subr.bf16.mxu1 %v12209_v20 }
 0x926   : > { %4664 = vmatmul.mubr.bf16.gmra.mxu1 %v4616_v10  ;;  %v927_v10 = vunpack.c.l.bf16 %v926_v18 }
 0x927   : > { %4703 = vmatpush2.bf16.msra.mxu0 %v12210_v23  ;;  %4732 = vmatpush1.bf16.msra.mxu1 %v12211_v24 }
 0x928   : > { %4704 = vmatprep.subr.bf16.mxu0 %v12212_v26  ;;  %4733 = vmatprep.subr.bf16.mxu1 %v12213_v28  ;;  %v14988_v11 = vrot.slane %v927_v10, %v13608_v21 }
 0x929   : > { %4759 = vmatprep.mubr.bf16.mxu1 %v13202_v42 }
 0x92b   : > { %4705 = vmatpush2.bf16.msra.mxu0 %v12214_v30  ;;  %4734 = vmatpush1.bf16.msra.mxu1 %v12215_v34 }
 0x92c   : > { %4735 = vmatprep.subr.bf16.mxu1 %v12216_v45  ;;  %10662 = vmatprep.subr.bf16.mxu0 %v12217_v56 }
 0x92e   : > { %4707 = vmatmul.mubr.bf16.vlgmr.msra.gmra.mxu0 %v4613_v41  ;;  %v4618_v41 = vpack.c.bf16 %v4583_v43, %v4584_v58 }
 0x92f   : > { %4736 = vmatpush1.bf16.msra.mxu1 %v12218_v57  ;;  %4716 = vmatprep.mubr.bf16.mxu0 %v4619_v35 }
 0x930   : > { %4737 = vmatprep.subr.bf16.mxu1 %v12219_v44  ;;  %10663 = vmatpush3.bf16.msra.mxu0 %v12220_v38 }
 0x931   : > { %10664 = vmatprep.subr.bf16.mxu0 %v12221_v40 }
 0x933   : > { %4738 = vmatpush1.bf16.msra.mxu1 %v12222_v36 }
 0x934   : > { %4739 = vmatprep.subr.bf16.mxu1 %v12223_v59  ;;  %10665 = vmatpush3.bf16.msra.mxu0 %v12224_v47 }
 0x935   : > { %10666 = vmatprep.subr.bf16.mxu0 %v12225_v12 }
 0x936   : > { %4717 = vmatmul.mubr.bf16.gmra.mxu0 %v4618_v41 }
 0x937   : > { %4740 = vmatpush1.bf16.msra.mxu1 %v12226_v63 }
 0x938   : > { %4741 = vmatprep.subr.bf16.mxu1 %v12227_v1  ;;  %10667 = vmatpush3.bf16.msra.mxu0 %v12228_v5 }
 0x939   : > { %10668 = vmatprep.subr.bf16.mxu0 %v12229_v0 }
 0x93b   : > { %4742 = vmatpush1.bf16.msra.mxu1 %v12230_v62 }
 0x93c   : > { %10669 = vmatpush3.bf16.msra.mxu0 %v12231_v3  ;;  %11464 = vmatprep.subr.mxu1 %v13203_v16 }
 0x93d   : > { %10670 = vmatprep.subr.bf16.mxu0 %v12232_v8 }
 0x93e   : > { %4760 = vmatmul.mubr.bf16.vlgmr.msra.gmra.mxu1 %v4615_v54  ;;  %v12239_v54 = vld [vmem:[%s18564_s1 + $0x288] ss:$8 sps:$4 sm:$0xff]  }
 0x93f   : > { %4769 = vmatprep.mubr.bf16.mxu1 %v13202_v42 }
 0x940   : > { %10671 = vmatpush3.bf16.msra.mxu0 %v12233_v9 }
 0x941   : > { %10672 = vmatprep.subr.bf16.mxu0 %v12234_v13 }
 0x944   : > { %10673 = vmatpush3.bf16.msra.mxu0 %v12235_v50 }
 0x945   : > { %10674 = vmatprep.subr.bf16.mxu0 %v12236_v33 }
 0x946   : > { %4770 = vmatmul.mubr.bf16.gmra.mxu1 %v4620_v14 }
 0x947   : > { %11472 = vmatprep.mubr.msk.bf16.mxu1 %vm13204_vm4, %v13203_v16 }
 0x948   : > { %10675 = vmatpush3.bf16.msra.mxu0 %v12237_v48 }
 0x949   : > { %10676 = vmatprep.subr.bf16.mxu0 %v12238_v52 }
 0x94c   : > { %10677 = vmatpush3.bf16.msra.mxu0 %v12239_v54 }
 0x94d   : > { %4956 = vmatprep.subr.bf16.mxu0 %v12240_v31 }
 0x99e   : > { %v10622_v32 = vpop.f32.mrf.mxu1 }
 0x9a0   : > { %v10623_v4 = vpop.f32.mrf.mxu1 }
 0x9a1   : > { %v10624_v19 = vadd.f32 %v10623_v4, %v10622_v32 }
 0x9a2   : > { %v10625_v15 = vpop.f32.mrf.mxu1 }
 0x9a3   : > { %v4487_v24 = vadd.f32 %v10624_v19, %v14988_v11 }
 0x9a4   : > { %v10626_v61 = vpop.f32.mrf.mxu1 }
 0x9a5   : > { %v10627_v26 = vadd.f32 %v10626_v61, %v10625_v15 }
 0x9a6   : > { %v10628_v6 = vpop.f32.mrf.mxu1 }
 0x9a7   : > { %v4490_v43 = vadd.f32 %v10627_v26, %v14988_v11 }
 0x9a8   : > { %v10629_v20 = vpop.f32.mrf.mxu1 }
 0x9a9   : > { %v10630_v45 = vadd.f32 %v10629_v20, %v10628_v6 }
 0x9aa   : > { %v10631_v29 = vpop.f32.mrf.mxu1 }
 0x9ab   : > { %v4495_v38 = vadd.f32 %v10630_v45, %v14988_v11 }
 0x9ac   : > { %v10632_v21 = vpop.f32.mrf.mxu1 }
 0x9ad   : > { %v10633_v40 = vadd.f32 %v10632_v21, %v10631_v29 }
 0x9ae   : > { %v10650_v22 = vpop.f32.mrf.mxu0 }
 0x9af   : > { %v4498_v12 = vadd.f32 %v10633_v40, %v14988_v11 }
 0x9b0   : > { %v10651_v23 = vpop.f32.mrf.mxu0 }
 0x9b1   : > { %v10652_v28 = vadd.f32 %v10651_v23, %v10650_v22 }
 0x9b2   : > { %v10653_v30 = vpop.f32.mrf.mxu0 }
 0x9b3   : > { %v4536_v34 = vadd.f32 %v10652_v28, %v4487_v24 }
 0x9b4   : > { %v10654_v35 = vpop.f32.mrf.mxu0 }
 0x9b5   : > { %12112 = vtanh.f32 %v4536_v34  ;;  %v10655_v56 = vadd.f32 %v10654_v35, %v10653_v30 }
 0x9b6   : > { %v10656_v57 = vpop.f32.mrf.mxu0 }
 0x9b7   : > { %v4539_v58 = vadd.f32 %v10655_v56, %v4490_v43 }
 0x9b8   : > { %v10657_v44 = vpop.f32.mrf.mxu0 }
 0x9b9   : > { %12114 = vtanh.f32 %v4539_v58  ;;  %v10658_v41 = vadd.f32 %v10657_v44, %v10656_v57 }
 0x9ba   : > { %v10659_v36 = vpop.f32.mrf.mxu0 }
 0x9bb   : > { %v4544_v59 = vadd.f32 %v10658_v41, %v4495_v38 }
 0x9bc   : > { %v10660_v47 = vpop.f32.mrf.mxu0 }
 0x9bd   : > { %12116 = vtanh.f32 %v4544_v59  ;;  %v10661_v63 = vadd.f32 %v10660_v47, %v10659_v36 }
 0x9bf   : > { %v4547_v1 = vadd.f32 %v10661_v63, %v4498_v12 }
 0x9c1   : > { %12118 = vtanh.f32 %v4547_v1 }
 0x9c2   : > { %v12113_v5 = vpop.eup %12112 }
 0x9c3   : > { %4554 = vst [vmem:[%s14998_s14] sm:$0xff] %v12113_v5 }
 0x9c6   : > { %v12115_v0 = vpop.eup %12114 }
 0x9c7   : > { %4555 = vst [vmem:[%s14998_s14 + $0x8] sm:$0xff] %v12115_v0 }
 0x9ca   : > { %v12117_v62 = vpop.eup %12116 }
 0x9cb   : > { %4556 = vst [vmem:[%s14998_s14 + $0x10] sm:$0xff] %v12117_v62 }
 0x9ce   : > { %v12119_v7 = vpop.eup %12118 }
 0x9cf   : > { %4557 = vst [vmem:[%s14998_s14 + $0x18] sm:$0xf] %v12119_v7 }
 0x9de   : > { %v4655_v3 = vpop.f32.mrf.mxu1 }
 0x9df   : > { %v4656_v31 = vadd.f32 %v4655_v3, %v13611_v25 }
 0x9e0   : > { %v4657_v8 = vpop.f32.mrf.mxu1 }
 0x9e1   : > { %v4658_v15 = vadd.f32 %v4657_v8, %v13614_v27 }
 0x9e2   : > { %v4659_v49 = vpop.f32.mrf.mxu1 }
 0x9e3   : > { %v4660_v10 = vadd.f32 %v4659_v49, %v13611_v25 }
 0x9e4   : > { %v4661_v9 = vpop.f32.mrf.mxu1 }
 0x9e5   : > { %v4662_v20 = vadd.f32 %v4661_v9, %v13614_v27 }
 0x9e6   : > { %v4665_v14 = vpop.f32.mrf.mxu1 }
 0x9e7   : > { %v4666_v24 = vadd.f32 %v4665_v14, %v13611_v25 }
 0x9e8   : > { %v4667_v33 = vpop.f32.mrf.mxu1 }
 0x9e9   : > { %v4668_v34 = vadd.f32 %v4667_v33, %v13614_v27  ;;  %v12241_v33 = vld [vmem:[%s18564_s1 + $0x408] ss:$8 sps:$4 sm:$0xff]  }
 0x9ea   : > { %v4669_v52 = vpop.f32.mrf.mxu1 }
 0x9eb   : > { %v4670_v40 = vadd.f32 %v4669_v52, %v13611_v25 }
 0x9ec   : > { %v4671_v32 = vpop.f32.mrf.mxu1 }
 0x9ed   : > { %v4672_v47 = vadd.f32 %v4671_v32, %v13614_v27 }
 0x9ee   : > { %v4708_v13 = vpop.f32.mrf.mxu0 }
 0x9ef   : > { %v4709_v18 = vadd.f32 %v4708_v13, %v4656_v31  ;;  %v12243_v31 = vld [vmem:[%s18564_s1 + $0x3f8] ss:$8 sps:$4 sm:$0xff]  }
 0x9f0   : > { %v4710_v50 = vpop.f32.mrf.mxu0 }
 0x9f1   : > { %v4711_v6 = vadd.f32 %v4710_v50, %v4658_v15  ;;  %v12245_v15 = vld [vmem:[%s18564_s1 + $0x3e8] ss:$8 sps:$4 sm:$0xff]  }
 0x9f2   : > { %v4712_v48 = vpop.f32.mrf.mxu0 }
 0x9f3   : > { %v4713_v26 = vadd.f32 %v4712_v48, %v4660_v10  ;;  %v12242_v48 = vld [vmem:[%s18564_s1 + $0x3fc] ss:$8 sps:$4 sm:$0xff]   ;;  %v12248_v10 = vld [vmem:[%s18564_s1 + $0x3cc] ss:$8 sps:$4 sm:$0xff]  }
 0x9f4   : > { %v4714_v54 = vpop.f32.mrf.mxu0 }
 0x9f5   : > { %v4715_v35 = vadd.f32 %v4714_v54, %v4662_v20  ;;  %v12251_v20 = vld [vmem:[%s18564_s1 + $0x3b8] ss:$8 sps:$4 sm:$0xff]  }
 0x9f6   : > { %v4718_v4 = vpop.f32.mrf.mxu0 }
 0x9f7   : > { %v4719_v57 = vadd.f32 %v4718_v4, %v4666_v24  ;;  %v12244_v4 = vld [vmem:[%s18564_s1 + $0x3ec] ss:$8 sps:$4 sm:$0xff]   ;;  %v12254_v24 = vld [vmem:[%s18564_s1 + $0x39c] ss:$8 sps:$4 sm:$0xff]  }
 0x9f8   : > { %v4720_v22 = vpop.f32.mrf.mxu0 }
 0x9f9   : > { %v4721_v41 = vadd.f32 %v4720_v22, %v4668_v34  ;;  %v12252_v22 = vld [vmem:[%s18564_s1 + $0x3ac] ss:$8 sps:$4 sm:$0xff]   ;;  %v12259_v34 = vld [vmem:[%s18564_s1 + $0x478] ss:$8 sps:$4 sm:$0xff]  }
 0x9fa   : > { %v4722_v56 = vpop.f32.mrf.mxu0 }
 0x9fb   : > { %v4723_v1 = vadd.f32 %v4722_v56, %v4670_v40  ;;  %v12263_v56 = vld [vmem:[%s18564_s1 + $0x458] ss:$8 sps:$4 sm:$0xff]   ;;  %v12269_v40 = vld [vmem:[%s18564_s1 + $0x428] ss:$8 sps:$4 sm:$0xff]  }
 0x9fc   : > { %v4724_v12 = vpop.f32.mrf.mxu0 }
 0x9fd   : > { %v4725_v8 = vadd.f32 %v4724_v12, %v4672_v47 }
 0x9fe   : > { %v4761_v61 = vpop.f32.mrf.mxu1 }
 0x9ff   : > { %v4762_v19 = vadd.f32 %v4761_v61, %v4709_v18  ;;  %v12246_v18 = vld [vmem:[%s18564_s1 + $0x3dc] ss:$8 sps:$4 sm:$0xff]   ;;  %v12247_v61 = vld [vmem:[%s18564_s1 + $0x3d8] ss:$8 sps:$4 sm:$0xff]  }
 0xa00   : > { %v4763_v23 = vpop.f32.mrf.mxu1 }
 0xa01   : > { %v4780_v28 = vmax.f32 %v4762_v19, 0.0  ;;  %v4764_v29 = vadd.f32 %v4763_v23, %v4711_v6  ;;  %v12249_v6 = vld [vmem:[%s18564_s1 + $0x3c8] ss:$8 sps:$4 sm:$0xff]   ;;  %v12250_v19 = vld [vmem:[%s18564_s1 + $0x3bc] ss:$8 sps:$4 sm:$0xff]  }
 0xa02   : > { %v4765_v30 = vpop.f32.mrf.mxu1  ;;  %v12253_v23 = vld [vmem:[%s18564_s1 + $0x3a8] ss:$8 sps:$4 sm:$0xff]  }
 0xa03   : > { %10258 = vst [vmem:[%s13624_s20 + $0x40] sm:$0xff] %v4780_v28  ;;  %v4781_v43 = vmax.f32 %v4764_v29, 0.0  ;;  %v4766_v45 = vadd.f32 %v4765_v30, %v4713_v26  ;;  %v12255_v26 = vld [vmem:[%s18564_s1 + $0x398] ss:$8 sps:$4 sm:$0xff]   ;;  %v12257_v29 = vld [vmem:[%s18564_s1 + $0x488] ss:$8 sps:$4 sm:$0xff]  }
 0xa04   : > { %v4767_v21 = vpop.f32.mrf.mxu1  ;;  %v12258_v30 = vld [vmem:[%s18564_s1 + $0x47c] ss:$8 sps:$4 sm:$0xff]  }
 0xa05   : > { %10259 = vst [vmem:[%s13624_s20 + $0x48] sm:$0xff] %v4781_v43  ;;  %v4782_v58 = vmax.f32 %v4766_v45, 0.0  ;;  %v4768_v44 = vadd.f32 %v4767_v21, %v4715_v35  ;;  %v12260_v35 = vld [vmem:[%s18564_s1 + $0x46c] ss:$8 sps:$4 sm:$0xff]   ;;  %v12262_v45 = vld [vmem:[%s18564_s1 + $0x45c] ss:$8 sps:$4 sm:$0xff]  }
 0xa06   : > { %v4771_v38 = vpop.f32.mrf.mxu1  ;;  %v12264_v21 = vld [vmem:[%s18564_s1 + $0x44c] ss:$8 sps:$4 sm:$0xff]  }
 0xa07   : > { %10260 = vst [vmem:[%s13624_s20 + $0x50] sm:$0xff] %v4782_v58  ;;  %v4783_v36 = vmax.f32 %v4768_v44, 0.0  ;;  %v4772_v59 = vadd.f32 %v4771_v38, %v4719_v57  ;;  %v4797_v7 = vpack.c.bf16 %v4782_v58, %v4780_v28  ;;  %v12256_v28 = vld [vmem:[%s18564_s1 + $0x48c] ss:$8 sps:$4 sm:$0xff]   ;;  %v12265_v57 = vld [vmem:[%s18564_s1 + $0x448] ss:$8 sps:$4 sm:$0xff]  }
 0xa08   : > { %v4773_v63 = vpop.f32.mrf.mxu1  ;;  %v12266_v58 = vld [vmem:[%s18564_s1 + $0x43c] ss:$8 sps:$4 sm:$0xff]   ;;  %v12267_v44 = vld [vmem:[%s18564_s1 + $0x438] ss:$8 sps:$4 sm:$0xff]   ;;  %v12268_v38 = vld [vmem:[%s18564_s1 + $0x42c] ss:$8 sps:$4 sm:$0xff]  }
 0xa09   : > { %10261 = vst [vmem:[%s13624_s20 + $0x58] sm:$0xff] %v4783_v36  ;;  %v4784_v5 = vmax.f32 %v4772_v59, 0.0  ;;  %v4774_v0 = vadd.f32 %v4773_v63, %v4721_v41  ;;  %v4798_v62 = vpack.c.bf16 %v4783_v36, %v4781_v43  ;;  %v12261_v43 = vld [vmem:[%s18564_s1 + $0x468] ss:$8 sps:$4 sm:$0xff]   ;;  %v12270_v41 = vld [vmem:[%s18564_s1 + $0x41c] ss:$8 sps:$4 sm:$0xff]  }
 0xa0a   : > { %v4775_v3 = vpop.f32.mrf.mxu1  ;;  %v12271_v36 = vld [vmem:[%s18564_s1 + $0x418] ss:$8 sps:$4 sm:$0xff]   ;;  %v12272_v59 = vld [vmem:[%s18564_s1 + $0x60c] ss:$8 sps:$4 sm:$0xff]  }
 0xa0b   : > { %10262 = vst [vmem:[%s13624_s20 + $0x60] sm:$0xff] %v4784_v5  ;;  %v4785_v49 = vmax.f32 %v4774_v0, 0.0  ;;  %v4776_v9 = vadd.f32 %v4775_v3, %v4723_v1  ;;  %4833 = vmatprep.mubr.bf16.mxu0 %v4798_v62 }
 0xa0c   : > { %v4777_v13 = vpop.f32.mrf.mxu1  ;;  %4834 = vmatmul.mubr.bf16.vlgmr.msra.gmra.mxu0 %v4797_v7 }
 0xa0d   : > { %10263 = vst [vmem:[%s13624_s20 + $0x68] sm:$0xff] %v4785_v49  ;;  %v4786_v14 = vmax.f32 %v4776_v9, 0.0  ;;  %v4778_v50 = vadd.f32 %v4777_v13, %v4725_v8  ;;  %4957 = vmatpush1.bf16.msra.mxu0 %v12241_v33  ;;  %v12273_v13 = vld [vmem:[%s18564_s1 + $0x388] ss:$8 sps:$4 sm:$0x7f]  }
 0xa0e   : > { %4958 = vmatprep.subr.bf16.mxu0 %v12242_v48  ;;  %v12276_v33 = vld [vmem:[%s18564_s1 + $0x4fc] ss:$8 sps:$4 sm:$0xff]   ;;  %v12277_v48 = vld [vmem:[%s18564_s1 + $0x4f8] ss:$8 sps:$4 sm:$0xff]  }
 0xa0f   : > { %10264 = vst [vmem:[%s13624_s20 + $0x70] sm:$0xf] %v4786_v14  ;;  %v4787_v52 = vmax.f32 %v4778_v50, 0.0  ;;  %v4799_v32 = vpack.c.bf16 %v4786_v14, %v4784_v5  ;;  %v12274_v14 = vld [vmem:[%s18564_s1 + $0x50c] ss:$8 sps:$4 sm:$0xff]  }
 0xa10   : > { %v12275_v50 = vld [vmem:[%s18564_s1 + $0x508] ss:$8 sps:$4 sm:$0xff]  }
 0xa11   : > { %10265 = vst [vmem:[%s13624_s20 + $0x78] sm:$0xf] %v4787_v52  ;;  %v4800_v54 = vpack.c.bf16 %v4787_v52, %v4785_v49  ;;  %4959 = vmatpush1.bf16.msra.mxu0 %v12243_v31  ;;  %v12278_v52 = vld [vmem:[%s18564_s1 + $0x4ec] ss:$8 sps:$4 sm:$0xff]   ;;  %v12280_v31 = vld [vmem:[%s18564_s1 + $0x4dc] ss:$8 sps:$4 sm:$0xff]  }
 0xa12   : > { %4960 = vmatprep.subr.bf16.mxu0 %v12244_v4  ;;  %v12282_v4 = vld [vmem:[%s18564_s1 + $0x4cc] ss:$8 sps:$4 sm:$0xff]  }
 0xa13   : > { %4841 = vmatprep.mubr.bf16.mxu0 %v4800_v54  ;;  %v12279_v54 = vld [vmem:[%s18564_s1 + $0x4e8] ss:$8 sps:$4 sm:$0xff]  }
 0xa14   : > { %4842 = vmatmul.mubr.bf16.gmra.mxu0 %v4799_v32  ;;  %v12281_v32 = vld [vmem:[%s18564_s1 + $0x4d8] ss:$8 sps:$4 sm:$0xff]  }
 0xa15   : > { %4961 = vmatpush1.bf16.msra.mxu0 %v12245_v15  ;;  %v12283_v15 = vld [vmem:[%s18564_s1 + $0x4c8] ss:$8 sps:$4 sm:$0xff]  }
 0xa16   : > { %4962 = vmatprep.subr.bf16.mxu0 %v12246_v18  ;;  %v12284_v18 = vld [vmem:[%s18564_s1 + $0x4bc] ss:$8 sps:$4 sm:$0xff]  }
 0xa19   : > { %4963 = vmatpush1.bf16.msra.mxu0 %v12247_v61  ;;  %v12285_v61 = vld [vmem:[%s18564_s1 + $0x4b8] ss:$8 sps:$4 sm:$0xff]  }
 0xa1a   : > { %4964 = vmatprep.subr.bf16.mxu0 %v12248_v10  ;;  %v12286_v10 = vld [vmem:[%s18564_s1 + $0x4ac] ss:$8 sps:$4 sm:$0xff]  }
 0xa1d   : > { %4965 = vmatpush1.bf16.msra.mxu0 %v12249_v6  ;;  %v12287_v6 = vld [vmem:[%s18564_s1 + $0x4a8] ss:$8 sps:$4 sm:$0xff]  }
 0xa1e   : > { %4966 = vmatprep.subr.bf16.mxu0 %v12250_v19  ;;  %v12288_v19 = vld [vmem:[%s18564_s1 + $0x49c] ss:$8 sps:$4 sm:$0xff]  }
 0xa21   : > { %4967 = vmatpush1.bf16.msra.mxu0 %v12251_v20  ;;  %v12289_v20 = vld [vmem:[%s18564_s1 + $0x498] ss:$8 sps:$4 sm:$0xff]  }
 0xa22   : > { %4968 = vmatprep.subr.bf16.mxu0 %v12252_v22  ;;  %v12290_v22 = vld [vmem:[%s18564_s1 + $0x58c] ss:$8 sps:$4 sm:$0xff]  }
 0xa25   : > { %4969 = vmatpush1.bf16.msra.mxu0 %v12253_v23  ;;  %v12291_v23 = vld [vmem:[%s18564_s1 + $0x588] ss:$8 sps:$4 sm:$0xff]  }
 0xa26   : > { %4970 = vmatprep.subr.bf16.mxu0 %v12254_v24  ;;  %v12292_v24 = vld [vmem:[%s18564_s1 + $0x57c] ss:$8 sps:$4 sm:$0xff]  }
 0xa29   : > { %4971 = vmatpush1.bf16.msra.mxu0 %v12255_v26  ;;  %v12293_v26 = vld [vmem:[%s18564_s1 + $0x578] ss:$8 sps:$4 sm:$0xff]  }
 0xa2a   : > { %4972 = vmatprep.subr.bf16.mxu0 %v12256_v28  ;;  %v12294_v28 = vld [vmem:[%s18564_s1 + $0x56c] ss:$8 sps:$4 sm:$0xff]  }
 0xa2d   : > { %4973 = vmatpush2.bf16.msra.mxu0 %v12257_v29  ;;  %v12295_v29 = vld [vmem:[%s18564_s1 + $0x568] ss:$8 sps:$4 sm:$0xff]  }
 0xa2e   : > { %4974 = vmatprep.subr.bf16.mxu0 %v12258_v30  ;;  %v12296_v30 = vld [vmem:[%s18564_s1 + $0x55c] ss:$8 sps:$4 sm:$0xff]  }
 0xa31   : > { %4975 = vmatpush2.bf16.msra.mxu0 %v12259_v34  ;;  %v12297_v34 = vld [vmem:[%s18564_s1 + $0x558] ss:$8 sps:$4 sm:$0xff]  }
 0xa32   : > { %4976 = vmatprep.subr.bf16.mxu0 %v12260_v35  ;;  %v12298_v35 = vld [vmem:[%s18564_s1 + $0x54c] ss:$8 sps:$4 sm:$0xff]  }
 0xa35   : > { %4977 = vmatpush2.bf16.msra.mxu0 %v12261_v43  ;;  %v12299_v43 = vld [vmem:[%s18564_s1 + $0x548] ss:$8 sps:$4 sm:$0xff]  }
 0xa36   : > { %4978 = vmatprep.subr.bf16.mxu0 %v12262_v45  ;;  %v12300_v45 = vld [vmem:[%s18564_s1 + $0x53c] ss:$8 sps:$4 sm:$0xff]  }
 0xa39   : > { %4979 = vmatpush2.bf16.msra.mxu0 %v12263_v56  ;;  %v12301_v56 = vld [vmem:[%s18564_s1 + $0x538] ss:$8 sps:$4 sm:$0xff]  }
 0xa3a   : > { %4980 = vmatprep.subr.bf16.mxu0 %v12264_v21  ;;  %v12302_v21 = vld [vmem:[%s18564_s1 + $0x52c] ss:$8 sps:$4 sm:$0xff]  }
 0xa3d   : > { %4981 = vmatpush2.bf16.msra.mxu0 %v12265_v57  ;;  %v12303_v57 = vld [vmem:[%s18564_s1 + $0x528] ss:$8 sps:$4 sm:$0xff]  }
 0xa3e   : > { %4982 = vmatprep.subr.bf16.mxu0 %v12266_v58  ;;  %v12304_v58 = vld [vmem:[%s18564_s1 + $0x51c] ss:$8 sps:$4 sm:$0xff]  }
 0xa41   : > { %4983 = vmatpush2.bf16.msra.mxu0 %v12267_v44  ;;  %v12305_v44 = vld [vmem:[%s18564_s1 + $0x518] ss:$8 sps:$4 sm:$0xff]  }
 0xa42   : > { %4984 = vmatprep.subr.bf16.mxu0 %v12268_v38  ;;  %v12306_v38 = vld [vmem:[%s18564_s1 + $0x710] ss:$8 sps:$4 sm:$0xff]  }
 0xa45   : > { %4985 = vmatpush2.bf16.msra.mxu0 %v12269_v40 }
 0xa46   : > { %4986 = vmatprep.subr.bf16.mxu0 %v12270_v41 }
 0xa49   : > { %4987 = vmatpush2.bf16.msra.mxu0 %v12271_v36 }
 0xa4a   : > { %5042 = vmatprep.subr.bf16.mxu0 %v12272_v59 }
 0xacc   : > { %v10678_v47 = vpop.f32.mrf.mxu0 }
 0xace   : > { %v10679_v12 = vpop.f32.mrf.mxu0 }
 0xacf   : > { %v10680_v9 = vadd.f32 %v10679_v12, %v10678_v47 }
 0xad0   : > { %v10681_v63 = vpop.f32.mrf.mxu0 }
 0xad2   : > { %v10682_v1 = vpop.f32.mrf.mxu0 }
 0xad3   : > { %v10683_v49 = vadd.f32 %v10682_v1, %v10681_v63 }
 0xad4   : > { %v10684_v5 = vpop.f32.mrf.mxu0 }
 0xad6   : > { %v10685_v0 = vpop.f32.mrf.mxu0 }
 0xad7   : > { %v10686_v8 = vadd.f32 %v10685_v0, %v10684_v5 }
 0xad8   : > { %v10687_v62 = vpop.f32.mrf.mxu0 }
 0xada   : > { %v10688_v7 = vpop.f32.mrf.mxu0 }
 0xadb   : > { %v10689_v3 = vadd.f32 %v10688_v7, %v10687_v62 }
 0xadd   : > { %11465 = vmatpush3.msk.msra.mxu1 %vm972_vm3, %v10689_v3 }
 0xade   : > { %11466 = vmatprep.subr.mxu1 %v13203_v16 }
 0xadf   : > { %11467 = vmatpush3.msra.mxu1 %v10686_v8 }
 0xae0   : > { %11468 = vmatprep.subr.mxu1 %v13203_v16 }
 0xae1   : > { %11469 = vmatpush3.msra.mxu1 %v10683_v49 }
 0xae2   : > { %11470 = vmatprep.subr.mxu1 %v13203_v16 }
 0xae3   : > { %11471 = vmatpush3.msra.mxu1 %v10680_v9 }
 0xae4   : > { %11473 = vmatmul.mubr.msk.bf16.vlgmr.msra.gmra.mxu1 %vm1731_vm5, %v12273_v13  ;;  %4999 = vmatprep.subr.bf16.mxu1 %v12274_v14  ;;  %v12307_v14 = vld [vmem:[%s18564_s1 + $0x608] ss:$8 sps:$4 sm:$0xff]  }
 0xae5   : > { %5000 = vmatpush1.bf16.msra.mxu1 %v12275_v50  ;;  %v12308_v50 = vld [vmem:[%s18564_s1 + $0x5fc] ss:$8 sps:$4 sm:$0xff]  }
 0xae6   : > { %5001 = vmatprep.subr.bf16.mxu1 %v12276_v33  ;;  %v12309_v33 = vld [vmem:[%s18564_s1 + $0x690] ss:$8 sps:$4 sm:$0xff]  }
 0xae9   : > { %5002 = vmatpush1.bf16.msra.mxu1 %v12277_v48  ;;  %v12310_v48 = vld [vmem:[%s18564_s1 + $0x700] ss:$8 sps:$4 sm:$0xff]  }
 0xaea   : > { %5003 = vmatprep.subr.bf16.mxu1 %v12278_v52  ;;  %v12311_v52 = vld [vmem:[%s18564_s1 + $0x5f8] ss:$8 sps:$4 sm:$0xff]  }
 0xaed   : > { %5004 = vmatpush1.bf16.msra.mxu1 %v12279_v54  ;;  %v12312_v54 = vld [vmem:[%s18564_s1 + $0x5ec] ss:$8 sps:$4 sm:$0xff]  }
 0xaee   : > { %5005 = vmatprep.subr.bf16.mxu1 %v12280_v31  ;;  %v12313_v31 = vld [vmem:[%s18564_s1 + $0x680] ss:$8 sps:$4 sm:$0xff]  }
 0xaf1   : > { %5006 = vmatpush1.bf16.msra.mxu1 %v12281_v32  ;;  %v12314_v32 = vld [vmem:[%s18564_s1 + $0x6f0] ss:$8 sps:$4 sm:$0xff]  }
 0xaf2   : > { %5007 = vmatprep.subr.bf16.mxu1 %v12282_v4  ;;  %v12315_v4 = vld [vmem:[%s18564_s1 + $0x5e8] ss:$8 sps:$4 sm:$0xff]  }
 0xaf5   : > { %5008 = vmatpush1.bf16.msra.mxu1 %v12283_v15  ;;  %v12316_v15 = vld [vmem:[%s18564_s1 + $0x5dc] ss:$8 sps:$4 sm:$0xff]  }
 0xaf6   : > { %5009 = vmatprep.subr.bf16.mxu1 %v12284_v18  ;;  %v12317_v18 = vld [vmem:[%s18564_s1 + $0x670] ss:$8 sps:$4 sm:$0xff]  }
 0xaf9   : > { %5010 = vmatpush1.bf16.msra.mxu1 %v12285_v61  ;;  %v12318_v61 = vld [vmem:[%s18564_s1 + $0x6e0] ss:$8 sps:$4 sm:$0xff]  }
 0xafa   : > { %5011 = vmatprep.subr.bf16.mxu1 %v12286_v10  ;;  %v12319_v10 = vld [vmem:[%s18564_s1 + $0x5d8] ss:$8 sps:$4 sm:$0xff]  }
 0xafd   : > { %5012 = vmatpush1.bf16.msra.mxu1 %v12287_v6  ;;  %v12320_v6 = vld [vmem:[%s18564_s1 + $0x5cc] ss:$8 sps:$4 sm:$0xff]  }
 0xafe   : > { %5013 = vmatprep.subr.bf16.mxu1 %v12288_v19  ;;  %v12321_v19 = vld [vmem:[%s18564_s1 + $0x660] ss:$8 sps:$4 sm:$0xff]  }
 0xb01   : > { %5014 = vmatpush1.bf16.msra.mxu1 %v12289_v20  ;;  %v12322_v20 = vld [vmem:[%s18564_s1 + $0x6d0] ss:$8 sps:$4 sm:$0xff]  }
 0xb02   : > { %5015 = vmatprep.subr.bf16.mxu1 %v12290_v22  ;;  %v12323_v22 = vld [vmem:[%s18564_s1 + $0x5c8] ss:$8 sps:$4 sm:$0xff]  }
 0xb05   : > { %5016 = vmatpush2.bf16.msra.mxu1 %v12291_v23  ;;  %v12324_v23 = vld [vmem:[%s18564_s1 + $0x5bc] ss:$8 sps:$4 sm:$0xff]  }
 0xb06   : > { %5017 = vmatprep.subr.bf16.mxu1 %v12292_v24  ;;  %v12325_v24 = vld [vmem:[%s18564_s1 + $0x650] ss:$8 sps:$4 sm:$0xff]  }
 0xb09   : > { %5018 = vmatpush2.bf16.msra.mxu1 %v12293_v26  ;;  %v12326_v26 = vld [vmem:[%s18564_s1 + $0x6c0] ss:$8 sps:$4 sm:$0xff]  }
 0xb0a   : > { %5019 = vmatprep.subr.bf16.mxu1 %v12294_v28  ;;  %v12327_v28 = vld [vmem:[%s18564_s1 + $0x5b8] ss:$8 sps:$4 sm:$0xff]  }
 0xb0d   : > { %5020 = vmatpush2.bf16.msra.mxu1 %v12295_v29  ;;  %v12328_v29 = vld [vmem:[%s18564_s1 + $0x5ac] ss:$8 sps:$4 sm:$0xff]  }
 0xb0e   : > { %5021 = vmatprep.subr.bf16.mxu1 %v12296_v30  ;;  %v12329_v30 = vld [vmem:[%s18564_s1 + $0x640] ss:$8 sps:$4 sm:$0xff]  }
 0xb11   : > { %5022 = vmatpush2.bf16.msra.mxu1 %v12297_v34 }
 0xb12   : > { %5023 = vmatprep.subr.bf16.mxu1 %v12298_v35  ;;  %v12330_v35 = vld [vmem:[%s18564_s1 + $0x6b0] ss:$8 sps:$4 sm:$0xff]  }
 0xb15   : > { %5024 = vmatpush2.bf16.msra.mxu1 %v12299_v43 }
 0xb16   : > { %5025 = vmatprep.subr.bf16.mxu1 %v12300_v45  ;;  %v12331_v45 = vld [vmem:[%s18564_s1 + $0x5a8] ss:$8 sps:$4 sm:$0xff]  }
 0xb19   : > { %5026 = vmatpush2.bf16.msra.mxu1 %v12301_v56  ;;  %v12332_v56 = vld [vmem:[%s18564_s1 + $0x59c] ss:$8 sps:$4 sm:$0xff]  }
 0xb1a   : > { %5027 = vmatprep.subr.bf16.mxu1 %v12302_v21  ;;  %v12333_v21 = vld [vmem:[%s18564_s1 + $0x630] ss:$8 sps:$4 sm:$0xff]  }
 0xb1d   : > { %5028 = vmatpush2.bf16.msra.mxu1 %v12303_v57 }
 0xb1e   : > { %5029 = vmatprep.subr.bf16.mxu1 %v12304_v58  ;;  %v12334_v58 = vld [vmem:[%s18564_s1 + $0x6a0] ss:$8 sps:$4 sm:$0xff]  }
 0xb21   : > { %5030 = vmatpush2.bf16.msra.mxu1 %v12305_v44  ;;  %v12335_v44 = vld [vmem:[%s18564_s1 + $0x598] ss:$8 sps:$4 sm:$0xff]  }
 0xb22   : > { %10695 = vmatprep.subr.bf16.mxu1 %v12306_v38 }
 0xba4   : > { %v15223_v40 = vpop.f32.mrf.mxu1 }
 0xba5   : > { %10268 = vst [vmem:[%s13850_s19 + $0x10] sm:$0xff] %v15223_v40  ;;  %v4936_v36 = vrot.slane %v15223_v40, 2  ;;  %v4931_v47 = vrot.slane %v15223_v40, 1  ;;  %v4941_v63 = vrot.slane %v15223_v40, 3  ;;  %v4946_v43 = vrot.slane %v15223_v40, 4 }
 0xba6   : > { %v11474_v41 = vpop.f32.mrf.mxu1 }
 0xba8   : > { %v15228_v59 = vpop.f32.mrf.mxu1 }
 0xba9   : > { %10269 = vst [vmem:[%s13850_s19 + $0x18] sm:$0x3f] %v15228_v59  ;;  %v4932_v12 = vrot.slane %v15228_v59, 1  ;;  %v4942_v1 = vrot.slane %v15228_v59, 3  ;;  %v4937_v5 = vrot.slane %v15228_v59, 2  ;;  %v4951_v13 = vpack.c.bf16 %v15228_v59, %v15223_v40 }
 0xbaa   : > { %v11475_v0 = vpop.f32.mrf.mxu1  ;;  %v4947_v34 = vrot.slane %v15228_v59, 4  ;;  %v12336_v40 = vld [vmem:[%s18564_s1 + $0x620] ss:$8 sps:$4 sm:$0xff]  }
 0xbab   : > { %v4933_v62 = vsel %vm936_vm0, %v4931_v47, %v4932_v12  ;;  %v4943_v7 = vsel %vm960_vm1, %v4941_v63, %v4942_v1  ;;  %v4938_v3 = vsel %vm948_vm2, %v4936_v36, %v4937_v5 }
 0xbac   : > { %v4952_v8 = vpack.c.bf16 %v4932_v12, %v4933_v62  ;;  %v4954_v49 = vpack.c.bf16 %v4942_v1, %v4943_v7  ;;  %v4953_v9 = vpack.c.bf16 %v4937_v5, %v4938_v3  ;;  %v4948_v57 = vsel %vm972_vm3, %v4946_v43, %v4947_v34  ;;  %v12340_v43 = vld [vmem:[%s18564_s1 + $0x738] ss:$0 sps:$4 sm:$0x11]  }
 0xbad   : > { %v4955_v38 = vpack.c.bf16 %v4947_v34, %v4948_v57  ;;  %v12343_v57 = vld [vmem:[%s18564_s1 + $0x960] ss:$8 sps:$4 sm:$0xff]  }
 0xbae   : > { %4988 = vmatprep.mubr.bf16.mxu0 %v4952_v8  ;;  %5031 = vmatprep.mubr.bf16.mxu1 %v4954_v49 }
 0xbaf   : > { %4989 = vmatmul.mubr.bf16.vlgmr.msra.gmra.mxu0 %v4951_v13  ;;  %5032 = vmatmul.mubr.bf16.vlgmr.msra.gmra.mxu1 %v4953_v9 }
 0xbb0   : > { %5043 = vmatpush1.bf16.msra.mxu0 %v12307_v14  ;;  %5074 = vmatprep.mubr.bf16.mxu0 %v13202_v42 }
 0xbb1   : > { %5044 = vmatprep.subr.bf16.mxu0 %v12308_v50  ;;  %10696 = vmatpush3.bf16.msra.mxu1 %v12309_v33 }
 0xbb2   : > { %10697 = vmatprep.subr.bf16.mxu1 %v12310_v48 }
 0xbb4   : > { %5045 = vmatpush1.bf16.msra.mxu0 %v12311_v52 }
 0xbb5   : > { %5046 = vmatprep.subr.bf16.mxu0 %v12312_v54  ;;  %10698 = vmatpush3.bf16.msra.mxu1 %v12313_v31 }
 0xbb6   : > { %10699 = vmatprep.subr.bf16.mxu1 %v12314_v32 }
 0xbb8   : > { %5047 = vmatpush1.bf16.msra.mxu0 %v12315_v4 }
 0xbb9   : > { %5048 = vmatprep.subr.bf16.mxu0 %v12316_v15  ;;  %10700 = vmatpush3.bf16.msra.mxu1 %v12317_v18 }
 0xbba   : > { %10701 = vmatprep.subr.bf16.mxu1 %v12318_v61 }
 0xbbc   : > { %5049 = vmatpush1.bf16.msra.mxu0 %v12319_v10 }
 0xbbd   : > { %5050 = vmatprep.subr.bf16.mxu0 %v12320_v6  ;;  %10702 = vmatpush3.bf16.msra.mxu1 %v12321_v19  ;;  %v12337_v19 = vld [vmem:[%s18564_s1 + $0x740] ss:$8 sps:$4 sm:$0xff]  }
 0xbbe   : > { %10703 = vmatprep.subr.bf16.mxu1 %v12322_v20 }
 0xbc0   : > { %5051 = vmatpush1.bf16.msra.mxu0 %v12323_v22 }
 0xbc1   : > { %5052 = vmatprep.subr.bf16.mxu0 %v12324_v23  ;;  %10704 = vmatpush3.bf16.msra.mxu1 %v12325_v24 }
 0xbc2   : > { %10705 = vmatprep.subr.bf16.mxu1 %v12326_v26 }
 0xbc4   : > { %5053 = vmatpush1.bf16.msra.mxu0 %v12327_v28 }
 0xbc5   : > { %5054 = vmatprep.subr.bf16.mxu0 %v12328_v29  ;;  %10706 = vmatpush3.bf16.msra.mxu1 %v12329_v30  ;;  %v12338_v29 = vld [vmem:[%s18564_s1 + $0x720] sm:$0x7]  ;;  %v12339_v30 = vld [vmem:[%s18564_s1 + $0x728] ss:$8 sps:$4 sm:$0xff]  }
 0xbc6   : > { %10707 = vmatprep.subr.bf16.mxu1 %v12330_v35 }
 0xbc8   : > { %5055 = vmatpush1.bf16.msra.mxu0 %v12331_v45  ;;  %v12341_v45 = vld [vmem:[%s18564_s1 + $0x750] ss:$0 sps:$4 sm:$0x11]  }
 0xbc9   : > { %5056 = vmatprep.subr.bf16.mxu0 %v12332_v56  ;;  %10708 = vmatpush3.bf16.msra.mxu1 %v12333_v21  ;;  %v12342_v21 = vld [vmem:[%s18564_s1 + $0x7cc] ss:$8 sps:$4 sm:$0xff]  }
 0xbca   : > { %10709 = vmatprep.subr.bf16.mxu1 %v12334_v58  ;;  %v12344_v58 = vld [vmem:[%s18564_s1 + $0x7c8] ss:$8 sps:$4 sm:$0xff]  }
 0xbcc   : > { %5057 = vmatpush1.bf16.msra.mxu0 %v12335_v44  ;;  %v12345_v44 = vld [vmem:[%s18564_s1 + $0x8e0] ss:$8 sps:$4 sm:$0xff]  }
 0xbcd   : > { %10710 = vmatpush3.bf16.msra.mxu1 %v12336_v40  ;;  %11476 = vmatprep.subr.mxu0 %v13203_v16  ;;  %v12346_v40 = vld [vmem:[%s18564_s1 + $0x7bc] ss:$8 sps:$4 sm:$0xff]  }
 0xbcf   : > { %5075 = vmatmul.mubr.bf16.vlgmr.msra.gmra.mxu0 %v4955_v38 }
 0xbd0   : > { %11480 = vmatprep.mubr.msk.bf16.mxu0 %vm13204_vm4, %v13203_v16 }
 0xc6f   : > { %v4990_v41 = vpop.f32.mrf.mxu0  ;;  %v5033_v59 = vpop.f32.mrf.mxu1 }
 0xc70   : > { %v4991_v12 = vadd.f32 %v4990_v41, %v13959_v37  ;;  %v12347_v41 = vld [vmem:[%s18564_s1 + $0x950] ss:$8 sps:$4 sm:$0xff]  }
 0xc71   : > { %v4992_v36 = vpop.f32.mrf.mxu0  ;;  %v5035_v63 = vpop.f32.mrf.mxu1 }
 0xc72   : > { %v4993_v1 = vadd.f32 %v4992_v36, %v13962_v39  ;;  %v5034_v0 = vadd.f32 %v5033_v59, %v4991_v12  ;;  %v12348_v36 = vld [vmem:[%s18564_s1 + $0x7b8] ss:$8 sps:$4 sm:$0xff]  }
 0xc73   : > { %v4994_v47 = vpop.f32.mrf.mxu0  ;;  %v5037_v7 = vpop.f32.mrf.mxu1  ;;  %v12349_v59 = vld [vmem:[%s18564_s1 + $0x8d0] ss:$8 sps:$4 sm:$0xff]   ;;  %v12351_v12 = vld [vmem:[%s18564_s1 + $0x940] ss:$8 sps:$4 sm:$0xff]  }
 0xc74   : > { %v4995_v62 = vadd.f32 %v4994_v47, %v13959_v37  ;;  %v5036_v8 = vadd.f32 %v5035_v63, %v4993_v1  ;;  %v12350_v47 = vld [vmem:[%s18564_s1 + $0x7ac] ss:$8 sps:$4 sm:$0xff]   ;;  %v12352_v63 = vld [vmem:[%s18564_s1 + $0x7a8] ss:$8 sps:$4 sm:$0xff]  }
 0xc75   : > { %v4996_v5 = vpop.f32.mrf.mxu0  ;;  %v5039_v48 = vpop.f32.mrf.mxu1  ;;  %v12353_v1 = vld [vmem:[%s18564_s1 + $0x8c0] ss:$8 sps:$4 sm:$0xff]  }
 0xc76   : > { %v4997_v49 = vadd.f32 %v4996_v5, %v13962_v39  ;;  %v5038_v14 = vadd.f32 %v5037_v7, %v4995_v62  ;;  %v12354_v5 = vld [vmem:[%s18564_s1 + $0x79c] ss:$8 sps:$4 sm:$0xff]   ;;  %v12356_v62 = vld [vmem:[%s18564_s1 + $0x798] ss:$8 sps:$4 sm:$0xff]  }
 0xc77   : > { %v12357_v7 = vld [vmem:[%s18564_s1 + $0x8b0] ss:$8 sps:$4 sm:$0xff]  }
 0xc78   : > { %v5040_v54 = vadd.f32 %v5039_v48, %v4997_v49  ;;  %v12360_v49 = vld [vmem:[%s18564_s1 + $0x788] ss:$8 sps:$4 sm:$0xff]   ;;  %v12366_v48 = vld [vmem:[%s18564_s1 + $0x76c] ss:$8 sps:$4 sm:$0xff]  }
 0xc8f   : > { %v5076_v3 = vpop.f32.mrf.mxu0 }
 0xc90   : > { %v5077_v9 = vadd.f32 %v5076_v3, %v5034_v0  ;;  %v12355_v0 = vld [vmem:[%s18564_s1 + $0x930] ss:$8 sps:$4 sm:$0xff]   ;;  %v12358_v3 = vld [vmem:[%s18564_s1 + $0x78c] ss:$8 sps:$4 sm:$0xff]  }
 0xc91   : > { %v5078_v13 = vpop.f32.mrf.mxu0 }
 0xc92   : > { %v5085_v50 = vmax.f32 %v5077_v9, 0.0  ;;  %v5079_v33 = vadd.f32 %v5078_v13, %v5036_v8  ;;  %v12359_v8 = vld [vmem:[%s18564_s1 + $0x920] ss:$8 sps:$4 sm:$0xff]   ;;  %v12362_v13 = vld [vmem:[%s18564_s1 + $0x77c] ss:$8 sps:$4 sm:$0xff]  }
 0xc93   : > { %v5080_v52 = vpop.f32.mrf.mxu0  ;;  %v12361_v9 = vld [vmem:[%s18564_s1 + $0x8a0] ss:$8 sps:$4 sm:$0xff]  }
 0xc94   : > { %10270 = vst [vmem:[%s13972_s9 + $0x20] sm:$0xff] %v5085_v50  ;;  %v5086_v31 = vmax.f32 %v5079_v33, 0.0  ;;  %v5081_v32 = vadd.f32 %v5080_v52, %v5038_v14  ;;  %v12363_v14 = vld [vmem:[%s18564_s1 + $0x910] ss:$8 sps:$4 sm:$0xff]   ;;  %v12367_v52 = vld [vmem:[%s18564_s1 + $0x900] ss:$8 sps:$4 sm:$0xff]  }
 0xc95   : > { %v5082_v4 = vpop.f32.mrf.mxu0  ;;  %v12365_v33 = vld [vmem:[%s18564_s1 + $0x890] ss:$8 sps:$4 sm:$0xff]  }
 0xc96   : > { %10271 = vst [vmem:[%s13972_s9 + $0x28] sm:$0xff] %v5086_v31  ;;  %v5087_v15 = vmax.f32 %v5081_v32, 0.0  ;;  %v5083_v18 = vadd.f32 %v5082_v4, %v5040_v54  ;;  %v12368_v54 = vld [vmem:[%s18564_s1 + $0x768] ss:$8 sps:$4 sm:$0xff]   ;;  %v12370_v32 = vld [vmem:[%s18564_s1 + $0x75c] ss:$8 sps:$4 sm:$0xff]  }
 0xc97   : > { %v12371_v4 = vld [vmem:[%s18564_s1 + $0x8f0] ss:$8 sps:$4 sm:$0xff]  }
 0xc98   : > { %10272 = vst [vmem:[%s13972_s9 + $0x30] sm:$0x3] %v5087_v15  ;;  %v5088_v61 = vmax.f32 %v5083_v18, 0.0  ;;  %v5094_v6 = vpack.c.bf16 %v5087_v15, %v5085_v50  ;;  %v12364_v50 = vld [vmem:[%s18564_s1 + $0x778] ss:$8 sps:$4 sm:$0xff]  }
 0xc99   : > { %v12372_v15 = vld [vmem:[%s18564_s1 + $0x758] ss:$8 sps:$4 sm:$0xff]  }
 0xc9a   : > { %10273 = vst [vmem:[%s13972_s9 + $0x38] sm:$0x3] %v5088_v61  ;;  %v5095_v10 = vpack.c.bf16 %v5088_v61, %v5086_v31  ;;  %v12369_v31 = vld [vmem:[%s18564_s1 + $0x880] ss:$8 sps:$4 sm:$0xff]   ;;  %v12373_v18 = vld [vmem:[%s18564_s1 + $0x870] ss:$8 sps:$4 sm:$0xff]  }
 0xc9b   : > { %v12374_v61 = vld [vmem:[%s18564_s1 + $0x84c] ss:$8 sps:$4 sm:$0xff]  }
 0xc9c   : > { %5128 = vmatprep.mubr.bf16.mxu1 %v5095_v10  ;;  %v12375_v10 = vld [vmem:[%s18564_s1 + $0xa60] ss:$8 sps:$4 sm:$0xff]  }
 0xc9d   : > { %5129 = vmatmul.mubr.bf16.vlgmr.msra.gmra.mxu1 %v5094_v6  ;;  %v12376_v6 = vld [vmem:[%s18564_s1 + $0x848] ss:$8 sps:$4 sm:$0xff]  }
 0xc9e   : > { %11492 = vmatprep.mubr.msk.bf16.mxu1 %vm2613_vm8, %v12337_v19  ;;  %v12377_v19 = vld [vmem:[%s18564_s1 + $0x83c] ss:$8 sps:$4 sm:$0xff]  }
 0xd5d   : > { %v10711_v20 = vpop.f32.mrf.mxu1 }
 0xd5f   : > { %v10712_v22 = vpop.f32.mrf.mxu1 }
 0xd60   : > { %v10713_v28 = vadd.f32 %v10712_v22, %v10711_v20  ;;  %v12378_v20 = vld [vmem:[%s18564_s1 + $0x838] ss:$8 sps:$4 sm:$0xff]   ;;  %v12379_v22 = vld [vmem:[%s18564_s1 + $0x82c] ss:$8 sps:$4 sm:$0xff]  }
 0xd61   : > { %v10714_v23 = vpop.f32.mrf.mxu1 }
 0xd63   : > { %v10715_v24 = vpop.f32.mrf.mxu1 }
 0xd64   : > { %v10716_v26 = vadd.f32 %v10715_v24, %v10714_v23  ;;  %v12380_v23 = vld [vmem:[%s18564_s1 + $0x828] ss:$8 sps:$4 sm:$0xff]   ;;  %v12381_v24 = vld [vmem:[%s18564_s1 + $0x81c] ss:$8 sps:$4 sm:$0xff]  }
 0xd66   : > { %11477 = vmatpush3.msk.msra.mxu0 %vm2528_vm6, %v10716_v26  ;;  %v12382_v26 = vld [vmem:[%s18564_s1 + $0x818] ss:$8 sps:$4 sm:$0xff]  }
 0xd67   : > { %11478 = vmatprep.subr.mxu0 %v13203_v16 }
 0xd68   : > { %11479 = vmatpush3.msra.mxu0 %v10713_v28  ;;  %v12383_v28 = vld [vmem:[%s18564_s1 + $0x80c] ss:$8 sps:$4 sm:$0xff]  }
 0xd69   : > { %11481 = vmatmul.mubr.msk.bf16.vlgmr.msra.gmra.mxu0 %vm2524_vm7, %v12338_v29  ;;  %v12384_v29 = vld [vmem:[%s18564_s1 + $0x808] ss:$8 sps:$4 sm:$0xff]  }
 0xd6a   : > { %11486 = vmatprep.mubr.msk.bf16.mxu0 %vm2613_vm8, %v12339_v30  ;;  %v12385_v30 = vld [vmem:[%s18564_s1 + $0x7fc] ss:$8 sps:$4 sm:$0xff]  }
 0xe29   : > { %v5206_v34 = vpop.f32.mrf.mxu0 }
 0xe2a   : > { %10276 = vst [vmem:[%s13996_s22 + $0x8] sm:$0x1f] %v5206_v34  ;;  %11484 = vmatprep.subr.msk.mxu0 %vm960_vm1, %v5206_v34  ;;  %11490 = vmatprep.subr.msk.mxu1 %vm960_vm1, %v5206_v34 }
 0xe2b   : > { %v11482_v35 = vpop.f32.mrf.mxu0  ;;  %11485 = vmatpush3.msk.msra.mxu0 %vm960_vm1, %v5206_v34  ;;  %11491 = vmatpush3.msk.msra.mxu1 %vm960_vm1, %v5206_v34  ;;  %v12386_v34 = vld [vmem:[%s18564_s1 + $0x7f8] ss:$8 sps:$4 sm:$0xff]  }
 0xe2c   : > { %11487 = vmatmul.mubr.msk.bf16.vlgmr.msra.gmra.mxu0 %vm2613_vm8, %v12340_v43  ;;  %11493 = vmatmul.mubr.msk.bf16.vlgmr.msra.gmra.mxu1 %vm2613_vm8, %v12341_v45  ;;  %v12387_v35 = vld [vmem:[%s18564_s1 + $0x7ec] ss:$8 sps:$4 sm:$0xff]   ;;  %v12388_v43 = vld [vmem:[%s18564_s1 + $0x7e8] ss:$8 sps:$4 sm:$0xff]   ;;  %v12389_v45 = vld [vmem:[%s18564_s1 + $0x7dc] ss:$8 sps:$4 sm:$0xff]  }
 0xe2d   : > { %v5209_v56 = vpop.f32.mrf.mxu0  ;;  %5381 = vmatprep.subr.bf16.mxu0 %v12342_v21  ;;  %10726 = vmatprep.subr.bf16.mxu1 %v12343_v57  ;;  %v12391_v21 = vld [vmem:[%s18564_s1 + $0xb60] ss:$8 sps:$4 sm:$0xff]  }
 0xe2e   : > { %5382 = vmatpush1.bf16.msra.mxu0 %v12344_v58  ;;  %10727 = vmatpush3.bf16.msra.mxu1 %v12345_v44  ;;  %v12390_v56 = vld [vmem:[%s18564_s1 + $0x7d8] ss:$8 sps:$4 sm:$0xff]  }
 0xe2f   : > { %v11483_v38 = vpop.f32.mrf.mxu0  ;;  %5383 = vmatprep.subr.bf16.mxu0 %v12346_v40  ;;  %10728 = vmatprep.subr.bf16.mxu1 %v12347_v41 }
 0xe32   : > { %5384 = vmatpush1.bf16.msra.mxu0 %v12348_v36  ;;  %10729 = vmatpush3.bf16.msra.mxu1 %v12349_v59 }
 0xe33   : > { %5385 = vmatprep.subr.bf16.mxu0 %v12350_v47  ;;  %10730 = vmatprep.subr.bf16.mxu1 %v12351_v12 }
 0xe36   : > { %5386 = vmatpush1.bf16.msra.mxu0 %v12352_v63  ;;  %10731 = vmatpush3.bf16.msra.mxu1 %v12353_v1  ;;  %v12392_v1 = vld [vmem:[%s18564_s1 + $0xae0] ss:$8 sps:$4 sm:$0xff]  }
 0xe37   : > { %5387 = vmatprep.subr.bf16.mxu0 %v12354_v5  ;;  %10732 = vmatprep.subr.bf16.mxu1 %v12355_v0  ;;  %v12393_v5 = vld [vmem:[%s18564_s1 + $0xb50] ss:$8 sps:$4 sm:$0xff]  }
 0xe38   : > { %v12394_v0 = vld [vmem:[%s18564_s1 + $0xad0] ss:$8 sps:$4 sm:$0xff]  }
 0xe3a   : > { %5388 = vmatpush1.bf16.msra.mxu0 %v12356_v62  ;;  %10733 = vmatpush3.bf16.msra.mxu1 %v12357_v7  ;;  %v12395_v7 = vld [vmem:[%s18564_s1 + $0xb40] ss:$8 sps:$4 sm:$0xff]  }
 0xe3b   : > { %5389 = vmatprep.subr.bf16.mxu0 %v12358_v3  ;;  %10734 = vmatprep.subr.bf16.mxu1 %v12359_v8  ;;  %v12396_v3 = vld [vmem:[%s18564_s1 + $0xac0] ss:$8 sps:$4 sm:$0xff]   ;;  %v12397_v8 = vld [vmem:[%s18564_s1 + $0xb30] ss:$8 sps:$4 sm:$0xff]  }
 0xe3e   : > { %5390 = vmatpush1.bf16.msra.mxu0 %v12360_v49  ;;  %10735 = vmatpush3.bf16.msra.mxu1 %v12361_v9  ;;  %v12398_v49 = vld [vmem:[%s18564_s1 + $0xab0] ss:$8 sps:$4 sm:$0xff]   ;;  %v12399_v9 = vld [vmem:[%s18564_s1 + $0xb20] ss:$8 sps:$4 sm:$0xff]  }
 0xe3f   : > { %5391 = vmatprep.subr.bf16.mxu0 %v12362_v13  ;;  %10736 = vmatprep.subr.bf16.mxu1 %v12363_v14  ;;  %v12400_v13 = vld [vmem:[%s18564_s1 + $0xaa0] ss:$8 sps:$4 sm:$0xff]   ;;  %v12401_v14 = vld [vmem:[%s18564_s1 + $0xb10] ss:$8 sps:$4 sm:$0xff]  }
 0xe42   : > { %5392 = vmatpush1.bf16.msra.mxu0 %v12364_v50  ;;  %10737 = vmatpush3.bf16.msra.mxu1 %v12365_v33  ;;  %v12402_v50 = vld [vmem:[%s18564_s1 + $0xa90] ss:$8 sps:$4 sm:$0xff]   ;;  %v12403_v33 = vld [vmem:[%s18564_s1 + $0xb00] ss:$8 sps:$4 sm:$0xff]  }
 0xe43   : > { %5393 = vmatprep.subr.bf16.mxu0 %v12366_v48  ;;  %10738 = vmatprep.subr.bf16.mxu1 %v12367_v52  ;;  %v12404_v48 = vld [vmem:[%s18564_s1 + $0xa80] ss:$8 sps:$4 sm:$0xff]   ;;  %v12405_v52 = vld [vmem:[%s18564_s1 + $0xaf0] ss:$8 sps:$4 sm:$0xff]  }
 0xe46   : > { %5394 = vmatpush1.bf16.msra.mxu0 %v12368_v54  ;;  %10739 = vmatpush3.bf16.msra.mxu1 %v12369_v31  ;;  %v12406_v54 = vld [vmem:[%s18564_s1 + $0xa70] ss:$8 sps:$4 sm:$0xff]   ;;  %v12407_v31 = vld [vmem:[%s18564_s1 + $0xd60] ss:$8 sps:$4 sm:$0xff]  }
 0xe47   : > { %5395 = vmatprep.subr.bf16.mxu0 %v12370_v32  ;;  %10740 = vmatprep.subr.bf16.mxu1 %v12371_v4 }
 0xe4a   : > { %5396 = vmatpush1.bf16.msra.mxu0 %v12372_v15  ;;  %10741 = vmatpush3.bf16.msra.mxu1 %v12373_v18 }
 0xe4b   : > { %5397 = vmatprep.subr.bf16.mxu0 %v12374_v61  ;;  %10748 = vmatprep.subr.bf16.mxu1 %v12375_v10 }
 0xe4e   : > { %5398 = vmatpush2.bf16.msra.mxu0 %v12376_v6 }
 0xe4f   : > { %5399 = vmatprep.subr.bf16.mxu0 %v12377_v19 }
 0xe52   : > { %5400 = vmatpush2.bf16.msra.mxu0 %v12378_v20 }
 0xe53   : > { %5401 = vmatprep.subr.bf16.mxu0 %v12379_v22 }
 0xe56   : > { %5402 = vmatpush2.bf16.msra.mxu0 %v12380_v23 }
 0xe57   : > { %5403 = vmatprep.subr.bf16.mxu0 %v12381_v24 }
 0xe5a   : > { %5404 = vmatpush2.bf16.msra.mxu0 %v12382_v26 }
 0xe5b   : > { %5405 = vmatprep.subr.bf16.mxu0 %v12383_v28 }
 0xe5e   : > { %5406 = vmatpush2.bf16.msra.mxu0 %v12384_v29 }
 0xe5f   : > { %5407 = vmatprep.subr.bf16.mxu0 %v12385_v30 }
 0xe62   : > { %5408 = vmatpush2.bf16.msra.mxu0 %v12386_v34 }
 0xe63   : > { %5409 = vmatprep.subr.bf16.mxu0 %v12387_v35 }
 0xe66   : > { %5410 = vmatpush2.bf16.msra.mxu0 %v12388_v43 }
 0xe67   : > { %5411 = vmatprep.subr.bf16.mxu0 %v12389_v45 }
 0xe6a   : > { %5412 = vmatpush2.bf16.msra.mxu0 %v12390_v56 }
 0xe6b   : > { %10770 = vmatprep.subr.bf16.mxu0 %v12391_v21 }
 0xeec   : > { %v11488_v57 = vpop.f32.mrf.mxu0  ;;  %v11494_v58 = vpop.f32.mrf.mxu1 }
 0xeed   : > { %v5380_v63 = vpack.c.bf16 %v11494_v58, %v11494_v58  ;;  %v5379_v62 = vpack.c.bf16 %v11488_v57, %v11488_v57 }
 0xeee   : > { %v5283_v44 = vpop.f32.mrf.mxu0  ;;  %v5363_v38 = vpop.f32.mrf.mxu1 }
 0xef0   : > { %v11489_v40 = vpop.f32.mrf.mxu0  ;;  %v11495_v41 = vpop.f32.mrf.mxu1 }
 0xef2   : > { %v5286_v36 = vpop.f32.mrf.mxu0  ;;  %v5366_v59 = vpop.f32.mrf.mxu1 }
 0xef3   : > { %v5377_v47 = vpack.c.bf16 %v5286_v36, %v5283_v44  ;;  %v5378_v12 = vpack.c.bf16 %v5366_v59, %v5363_v38 }
 0xef5   : > { %5413 = vmatprep.mubr.bf16.mxu0 %v5378_v12 }
 0xef6   : > { %5414 = vmatmul.mubr.bf16.vlgmr.msra.gmra.mxu0 %v5377_v47 }
 0xef7   : > { %5423 = vmatprep.mubr.bf16.mxu0 %v5380_v63  ;;  %10771 = vmatpush3.bf16.msra.mxu0 %v12392_v1 }
 0xef8   : > { %10772 = vmatprep.subr.bf16.mxu0 %v12393_v5 }
 0xefb   : > { %10773 = vmatpush3.bf16.msra.mxu0 %v12394_v0 }
 0xefc   : > { %10774 = vmatprep.subr.bf16.mxu0 %v12395_v7 }
 0xefe   : > { %5424 = vmatmul.mubr.bf16.gmra.mxu0 %v5379_v62 }
 0xeff   : > { %10775 = vmatpush3.bf16.msra.mxu0 %v12396_v3 }
 0xf00   : > { %10776 = vmatprep.subr.bf16.mxu0 %v12397_v8 }
 0xf03   : > { %10777 = vmatpush3.bf16.msra.mxu0 %v12398_v49 }
 0xf04   : > { %10778 = vmatprep.subr.bf16.mxu0 %v12399_v9 }
 0xf07   : > { %10779 = vmatpush3.bf16.msra.mxu0 %v12400_v13 }
 0xf08   : > { %10780 = vmatprep.subr.bf16.mxu0 %v12401_v14 }
 0xf0b   : > { %10781 = vmatpush3.bf16.msra.mxu0 %v12402_v50 }
 0xf0c   : > { %10782 = vmatprep.subr.bf16.mxu0 %v12403_v33 }
 0xf0f   : > { %10783 = vmatpush3.bf16.msra.mxu0 %v12404_v48 }
 0xf10   : > { %10784 = vmatprep.subr.bf16.mxu0 %v12405_v52 }
 0xf13   : > { %10785 = vmatpush3.bf16.msra.mxu0 %v12406_v54 }
 0xf14   : > { %10814 = vmatprep.subr.bf16.mxu0 %v12407_v31 }
 0xfb6   : > { %v5415_v32 = vpop.f32.mrf.mxu0 }
 0xfb7   : > { %v5416_v4 = vadd.f32 %v5415_v32, %v14212_v51 }
 0xfb8   : > { %v5417_v15 = vpop.f32.mrf.mxu0 }
 0xfb9   : > { %v5418_v18 = vadd.f32 %v5417_v15, %v14217_v53  ;;  %v15575_v6 = vmax.f32 %v5416_v4, 0.0 }
 0xfba   : > { %v5419_v61 = vpop.f32.mrf.mxu0 }
 0xfbb   : > { %v5420_v10 = vadd.f32 %v5419_v61, %v14219_v55  ;;  %v15577_v19 = vmax.f32 %v5418_v18, 0.0  ;;  %v5475_v35 = vrot.slane %v15575_v6, 6  ;;  %v5442_v45 = vrot.slane %v15575_v6, 4 }
 0xfbc   : > { %v5421_v20 = vpop.f32.mrf.mxu0 }
 0xfbd   : > { %v15579_v22 = vmax.f32 %v5420_v10, 0.0  ;;  %v5422_v23 = vadd.f32 %v5421_v20, %v14226_v46  ;;  %v5476_v34 = vrot.slane %v15577_v19, 6  ;;  %v5445_v41 = vrot.slane %v15577_v19, 4 }
 0xfbe   : > { %v5425_v24 = vpop.f32.mrf.mxu0  ;;  %v5460_v7 = vrot.slane %v15577_v19, 7 }
 0xfbf   : > { %v15583_v26 = vrot.slane %v15579_v22, 4  ;;  %v15585_v28 = vmax.f32 %v5422_v23, 0.0  ;;  %v5426_v29 = vadd.f32 %v5425_v24, %v14229_v60  ;;  %v5477_v43 = vrot.slane %v15579_v22, 6 }
 0xfc0   : > { %v5427_v30 = vpop.f32.mrf.mxu0  ;;  %v5501_v58 = vpack.c.bf16 %v15579_v22, %v15575_v6  ;;  %v5489_v9 = vrot.slane %v15579_v22, 5 }
 0xfc1   : > { %10285 = vst [vmem:[%s14248_s24 + $0x30] sm:$0x3] %v15583_v26  ;;  %v15594_v56 = vmax.f32 %v5426_v29, 0.0  ;;  %v5428_v21 = vadd.f32 %v5427_v30, %v14238_v2  ;;  %v5479_v57 = vrot.slane %v15585_v28, 6  ;;  %v5502_v38 = vpack.c.bf16 %v15585_v28, %v15577_v19 }
 0xfc2   : > { %v5429_v44 = vpop.f32.mrf.mxu0  ;;  %v5478_v40 = vsel %vm2528_vm6, %v5475_v35, %v5477_v43  ;;  %v5446_v36 = vrot.slane %v15585_v28, 4  ;;  %v5515_v63 = vpack.c.bf16 %v5477_v43, %v5477_v43  ;;  %v5541_v49 = vrot.slane %v5501_v58, 2 }
 0xfc3   : > { %v5511_v59 = vpack.c.bf16 %v15594_v56, %v15594_v56  ;;  %v5437_v47 = vmax.f32 %v5428_v21, 0.0  ;;  %v5480_v12 = vsel %vm2528_vm6, %v5476_v34, %v5479_v57  ;;  %v5516_v0 = vpack.c.bf16 %v5479_v57, %v5479_v57  ;;  %v12409_v57 = vld [vmem:[%s18564_s1 + $0x9e0] ss:$8 sps:$4 sm:$0xff]   ;;  %v12410_v44 = vld [vmem:[%s18564_s1 + $0xd50] ss:$8 sps:$4 sm:$0xff]  }
 0xfc4   : > { %v5430_v1 = vpop.f32.mrf.mxu0  ;;  %v5506_v5 = vpack.c.bf16 %v5480_v12, %v5476_v34  ;;  %v5505_v62 = vpack.c.bf16 %v5478_v40, %v5475_v35  ;;  %10286 = vst [vmem:[%s14248_s24 + $0x38] sm:$0x3] %v5446_v36  ;;  %v5544_v52 = vrot.slane %v5502_v38, 2  ;;  %v5554_v54 = vrot.slane %v5515_v63, 2  ;;  %v12408_v35 = vld [vmem:[%s18564_s1 + $0xce0] ss:$8 sps:$4 sm:$0xff]  }
 0xfc5   : > { %v5542_v3 = vrot.slane %v5511_v59, 2  ;;  %v5512_v8 = vpack.c.bf16 %v5437_v47, %v5437_v47  ;;  %v5467_v13 = vrot.slane %v5437_v47, 7  ;;  %v5557_v50 = vrot.slane %v5516_v0, 2  ;;  %v12412_v63 = vld [vmem:[%s18564_s1 + $0xcd0] ss:$8 sps:$4 sm:$0xff]  }
 0xfc6   : > { %v5556_v14 = vrot.slane %v5506_v5, 2  ;;  %v5553_v33 = vrot.slane %v5505_v62, 2  ;;  %v5447_v31 = vsel %vm972_vm3, %v5445_v41, %v5446_v36  ;;  %v5520_v15 = vpack.c.bf16 %v5446_v36, %v5446_v36  ;;  %v12411_v36 = vld [vmem:[%s18564_s1 + $0xa50] ss:$8 sps:$4 sm:$0xff]   ;;  %v12414_v62 = vld [vmem:[%s18564_s1 + $0xd40] ss:$8 sps:$4 sm:$0xff]  }
 0xfc7   : > { %v5545_v48 = vrot.slane %v5512_v8, 2  ;;  %10284 = vst [vmem:[%s14248_s24 + $0x28] sm:$0xff] %v5447_v31  ;;  %v5510_v4 = vpack.c.bf16 %v5447_v31, %v5445_v41  ;;  %v5463_v18 = vrot.slane %v15585_v28, 7  ;;  %v5543_v20 = vsel %vm948_vm2, %v5541_v49, %v5542_v3  ;;  %v12413_v1 = vld [vmem:[%s18564_s1 + $0x9d0] ss:$8 sps:$4 sm:$0xff]  }
 0xfc8   : > { %v5558_v32 = vsel %vm948_vm2, %v5556_v14, %v5557_v50  ;;  %v5555_v10 = vsel %vm948_vm2, %v5553_v33, %v5554_v54  ;;  %v15622_v23 = vsel %vm972_vm3, %v5442_v45, %v15583_v26  ;;  %v5569_v29 = vrot.slane %v5520_v15, 2  ;;  %v12416_v8 = vld [vmem:[%s18564_s1 + $0xcc0] ss:$8 sps:$4 sm:$0xff]   ;;  %v12419_v14 = vld [vmem:[%s18564_s1 + $0xa30] ss:$8 sps:$4 sm:$0xff]  }
 0xfc9   : > { %5695 = vmatprep.mubr.bf16.mxu0 %v5558_v32  ;;  %v5546_v61 = vsel %vm948_vm2, %v5544_v52, %v5545_v48  ;;  %v5568_v24 = vrot.slane %v5510_v4, 2  ;;  %v5464_v30 = vsel %vm3038_vm9, %v5460_v7, %v5463_v18  ;;  %v5468_v34 = vsel %vm3038_vm9, %v5463_v18, %v5467_v13  ;;  %10283 = vst [vmem:[%s14248_s24 + $0x20] sm:$0xff] %v15622_v23  ;;  %v12417_v49 = vld [vmem:[%s18564_s1 + $0x9c0] ss:$8 sps:$4 sm:$0xff]   ;;  %v12420_v50 = vld [vmem:[%s18564_s1 + $0xcb0] ss:$8 sps:$4 sm:$0xff]  }
 0xfca   : > { %5613 = vmatprep.mubr.bf16.mxu1 %v5546_v61  ;;  %5696 = vmatmul.mubr.bf16.vlgmr.msra.gmra.mxu0 %v5555_v10  ;;  %v5504_v43 = vpack.c.bf16 %v5464_v30, %v5460_v7  ;;  %v5514_v21 = vpack.c.bf16 %v5468_v34, %v5468_v34  ;;  %v5487_v38 = vrot.slane %v15575_v6, 5  ;;  %v5517_v47 = vpack.c.bf16 %v5489_v9, %v5489_v9  ;;  %v12415_v7 = vld [vmem:[%s18564_s1 + $0xa40] ss:$8 sps:$4 sm:$0xff]   ;;  %v12421_v33 = vld [vmem:[%s18564_s1 + $0x9b0] ss:$8 sps:$4 sm:$0xff]  }
 0xfcb   : > { %10815 = vmatpush3.bf16.msra.mxu0 %v12408_v35  ;;  %5614 = vmatmul.mubr.bf16.vlgmr.msra.gmra.mxu1 %v5543_v20  ;;  %v5570_v58 = vsel %vm948_vm2, %v5568_v24, %v5569_v29  ;;  %v12422_v48 = vld [vmem:[%s18564_s1 + $0xd20] ss:$8 sps:$4 sm:$0xff]   ;;  %v5465_v54 = vrot.slane %v15594_v56, 7  ;;  %v12426_v4 = vld [vmem:[%s18564_s1 + $0xd10] ss:$8 sps:$4 sm:$0xff]   ;;  %v5491_v15 = vrot.slane %v15585_v28, 5  ;;  %v5509_v30 = vpack.c.bf16 %v15622_v23, %v5442_v45 }
 0xfcc   : > { %10749 = vmatpush3.bf16.msra.mxu1 %v12409_v57  ;;  %10816 = vmatprep.subr.bf16.mxu0 %v12410_v44  ;;  %v5550_v40 = vrot.slane %v5504_v43, 2  ;;  %v5551_v41 = vrot.slane %v5514_v21, 2  ;;  %v5490_v59 = vsel %vm3067_vm10, %v5487_v38, %v5489_v9  ;;  %v5560_v0 = vrot.slane %v5517_v47, 2  ;;  %v12418_v9 = vld [vmem:[%s18564_s1 + $0xd30] ss:$8 sps:$4 sm:$0xff]  }
 0xfcd   : > { %5777 = vmatprep.mubr.bf16.mxu0 %v5570_v58  ;;  %10750 = vmatprep.subr.bf16.mxu1 %v12411_v36  ;;  %v5507_v5 = vpack.c.bf16 %v5490_v59, %v5487_v38  ;;  %v12423_v52 = vld [vmem:[%s18564_s1 + $0xa20] ss:$8 sps:$4 sm:$0xff]   ;;  %v5461_v18 = vrot.slane %v15579_v22, 7  ;;  %v12427_v56 = vld [vmem:[%s18564_s1 + $0xa10] ss:$8 sps:$4 sm:$0xff]   ;;  %v5488_v61 = vrot.slane %v15577_v19, 5  ;;  %v5519_v34 = vpack.c.bf16 %v15583_v26, %v15583_v26 }
 0xfce   : > { %v5552_v12 = vsel %vm948_vm2, %v5550_v40, %v5551_v41  ;;  %v12424_v31 = vld [vmem:[%s18564_s1 + $0xca0] ss:$8 sps:$4 sm:$0xff]   ;;  %v12428_v20 = vld [vmem:[%s18564_s1 + $0xc90] ss:$8 sps:$4 sm:$0xff]   ;;  %v5459_v24 = vrot.slane %v15575_v6, 7  ;;  %v5518_v58 = vpack.c.bf16 %v5491_v15, %v5491_v15  ;;  %v5565_v23 = vrot.slane %v5509_v30, 2 }
 0xfcf   : > { %10817 = vmatpush3.bf16.msra.mxu0 %v12412_v63  ;;  %5654 = vmatprep.mubr.bf16.mxu1 %v5552_v12  ;;  %v5559_v3 = vrot.slane %v5507_v5, 2  ;;  %v12425_v32 = vld [vmem:[%s18564_s1 + $0x9a0] ss:$8 sps:$4 sm:$0xff]   ;;  %v5466_v10 = vsel %vm3038_vm9, %v5461_v18, %v5465_v54  ;;  %v12429_v22 = vld [vmem:[%s18564_s1 + $0x990] ss:$8 sps:$4 sm:$0xff]   ;;  %v5492_v19 = vsel %vm3067_vm10, %v5488_v61, %v5491_v15  ;;  %v5566_v38 = vrot.slane %v5519_v34, 2 }
 0xfd0   : > { %10751 = vmatpush3.bf16.msra.mxu1 %v12413_v1  ;;  %10818 = vmatprep.subr.bf16.mxu0 %v12414_v62  ;;  %v12430_v28 = vld [vmem:[%s18564_s1 + $0xd00] ss:$8 sps:$4 sm:$0xff]   ;;  %v5462_v35 = vsel %vm3038_vm9, %v5459_v24, %v5461_v18  ;;  %v5513_v43 = vpack.c.bf16 %v5466_v10, %v5466_v10  ;;  %v5508_v57 = vpack.c.bf16 %v5492_v19, %v5488_v61  ;;  %v12434_v6 = vld [vmem:[%s18564_s1 + $0xcf0] ss:$8 sps:$4 sm:$0xff]   ;;  %v5563_v59 = vrot.slane %v5518_v58, 2 }
 0xfd1   : > { %10752 = vmatprep.subr.bf16.mxu1 %v12415_v7  ;;  %v15666_v13 = vsel %vm948_vm2, %v5559_v3, %v5560_v0  ;;  %v12431_v29 = vld [vmem:[%s18564_s1 + $0xa00] ss:$8 sps:$4 sm:$0xff]   ;;  %v5503_v26 = vpack.c.bf16 %v5462_v35, %v5459_v24  ;;  %v12435_v45 = vld [vmem:[%s18564_s1 + $0x9f0] ss:$8 sps:$4 sm:$0xff]   ;;  %v5567_v1 = vsel %vm948_vm2, %v5565_v23, %v5566_v38 }
 0xfd2   : > { %v12432_v21 = vld [vmem:[%s18564_s1 + $0xc80] ss:$8 sps:$4 sm:$0xff]   ;;  %v5548_v40 = vrot.slane %v5513_v43, 2  ;;  %v12436_v41 = vld [vmem:[%s18564_s1 + $0xc70] ss:$8 sps:$4 sm:$0xff]   ;;  %v5562_v36 = vrot.slane %v5508_v57, 2 }
 0xfd3   : > { %10819 = vmatpush3.bf16.msra.mxu0 %v12416_v8  ;;  %v12433_v44 = vld [vmem:[%s18564_s1 + $0x980] ss:$8 sps:$4 sm:$0xff]   ;;  %v12437_v47 = vld [vmem:[%s18564_s1 + $0x970] ss:$8 sps:$4 sm:$0xff]   ;;  %v5547_v12 = vrot.slane %v5503_v26, 2 }
 0xfd4   : > { %10753 = vmatpush3.bf16.msra.mxu1 %v12417_v49  ;;  %10820 = vmatprep.subr.bf16.mxu0 %v12418_v9  ;;  %v12438_v63 = vld [vmem:[%s18564_s1 + $0xee8] ss:$8 sps:$4 sm:$0xff]   ;;  %v5564_v62 = vsel %vm948_vm2, %v5562_v36, %v5563_v59  ;;  %v12443_v49 = vld [vmem:[%s18564_s1 + $0xed8] ss:$8 sps:$4 sm:$0xff]   ;;  %v12470_v57 = vld [vmem:[%s18564_s1 + $0x74] ss:$8 sps:$4 sm:$0xff]  }
 0xfd5   : > { %10754 = vmatprep.subr.bf16.mxu1 %v12419_v14  ;;  %v12439_v5 = vld [vmem:[%s18564_s1 + $0xc60] ss:$8 sps:$4 sm:$0xff]   ;;  %v5549_v0 = vsel %vm948_vm2, %v5547_v12, %v5548_v40  ;;  %v12442_v8 = vld [vmem:[%s18564_s1 + $0xc50] ss:$8 sps:$4 sm:$0xff]  }
 0xfd6   : > { %v12440_v7 = vld [vmem:[%s18564_s1 + $0xe68] ss:$8 sps:$4 sm:$0xff]   ;;  %v12444_v9 = vld [vmem:[%s18564_s1 + $0xe58] ss:$8 sps:$4 sm:$0xff]  }
 0xfd7   : > { %10821 = vmatpush3.bf16.msra.mxu0 %v12420_v50  ;;  %v12441_v3 = vld [vmem:[%s18564_s1 + $0xbe0] ss:$8 sps:$4 sm:$0xff]   ;;  %v12445_v14 = vld [vmem:[%s18564_s1 + $0xbd0] ss:$8 sps:$4 sm:$0xff]  }
 0xfd8   : > { %10755 = vmatpush3.bf16.msra.mxu1 %v12421_v33  ;;  %10822 = vmatprep.subr.bf16.mxu0 %v12422_v48  ;;  %v12446_v50 = vld [vmem:[%s18564_s1 + $0xec8] ss:$8 sps:$4 sm:$0xff]   ;;  %v12450_v54 = vld [vmem:[%s18564_s1 + $0xeb8] ss:$8 sps:$4 sm:$0xff]  }
 0xfd9   : > { %10756 = vmatprep.subr.bf16.mxu1 %v12423_v52  ;;  %v12447_v33 = vld [vmem:[%s18564_s1 + $0xc40] ss:$8 sps:$4 sm:$0xff]   ;;  %v12467_v35 = vld [vmem:[%s18564_s1 + $0xbf0] ss:$8 sps:$4 sm:$0xff]  }
 0xfda   : > { %v12448_v48 = vld [vmem:[%s18564_s1 + $0xe48] ss:$8 sps:$4 sm:$0xff]   ;;  %v12458_v10 = vld [vmem:[%s18564_s1 + $0xe98] ss:$8 sps:$4 sm:$0xff]  }
 0xfdb   : > { %10823 = vmatpush3.bf16.msra.mxu0 %v12424_v31  ;;  %v12449_v52 = vld [vmem:[%s18564_s1 + $0xbc0] ss:$8 sps:$4 sm:$0xff]   ;;  %v12451_v31 = vld [vmem:[%s18564_s1 + $0xc30] ss:$8 sps:$4 sm:$0xff]  }
 0xfdc   : > { %10757 = vmatpush3.bf16.msra.mxu1 %v12425_v32  ;;  %10824 = vmatprep.subr.bf16.mxu0 %v12426_v4  ;;  %v12452_v32 = vld [vmem:[%s18564_s1 + $0xe38] ss:$8 sps:$4 sm:$0xff]   ;;  %v12454_v15 = vld [vmem:[%s18564_s1 + $0xea8] ss:$8 sps:$4 sm:$0xff]  }
 0xfdd   : > { %10758 = vmatprep.subr.bf16.mxu1 %v12427_v56  ;;  %v12453_v4 = vld [vmem:[%s18564_s1 + $0xbb0] ss:$8 sps:$4 sm:$0xff]   ;;  %v12455_v18 = vld [vmem:[%s18564_s1 + $0xc20] ss:$8 sps:$4 sm:$0xff]  }
 0xfde   : > { %v12456_v56 = vld [vmem:[%s18564_s1 + $0xe28] ss:$8 sps:$4 sm:$0xff]   ;;  %v12460_v24 = vld [vmem:[%s18564_s1 + $0xe18] ss:$8 sps:$4 sm:$0xff]  }
 0xfdf   : > { %10825 = vmatpush3.bf16.msra.mxu0 %v12428_v20  ;;  %v12457_v61 = vld [vmem:[%s18564_s1 + $0xba0] ss:$8 sps:$4 sm:$0xff]   ;;  %v12459_v20 = vld [vmem:[%s18564_s1 + $0xc10] ss:$8 sps:$4 sm:$0xff]  }
 0xfe0   : > { %10759 = vmatpush3.bf16.msra.mxu1 %v12429_v22  ;;  %10826 = vmatprep.subr.bf16.mxu0 %v12430_v28  ;;  %v12461_v22 = vld [vmem:[%s18564_s1 + $0xb90] ss:$8 sps:$4 sm:$0xff]   ;;  %v12463_v19 = vld [vmem:[%s18564_s1 + $0xc00] ss:$8 sps:$4 sm:$0xff]  }
 0xfe1   : > { %10760 = vmatprep.subr.bf16.mxu1 %v12431_v29  ;;  %v12462_v28 = vld [vmem:[%s18564_s1 + $0xe88] ss:$8 sps:$4 sm:$0xff]   ;;  %v12466_v34 = vld [vmem:[%s18564_s1 + $0xe78] ss:$8 sps:$4 sm:$0xff]  }
 0xfe2   : > { %v12464_v29 = vld [vmem:[%s18564_s1 + $0xe08] ss:$8 sps:$4 sm:$0xff]   ;;  %v12468_v43 = vld [vmem:[%s18564_s1 + $0xdf8] ss:$8 sps:$4 sm:$0xff]  }
 0xfe3   : > { %10827 = vmatpush3.bf16.msra.mxu0 %v12432_v21  ;;  %v12465_v30 = vld [vmem:[%s18564_s1 + $0xb80] ss:$8 sps:$4 sm:$0xff]   ;;  %v12469_v21 = vld [vmem:[%s18564_s1 + $0xb70] ss:$8 sps:$4 sm:$0xff]  }
 0xfe4   : > { %10761 = vmatpush3.bf16.msra.mxu1 %v12433_v44  ;;  %10828 = vmatprep.subr.bf16.mxu0 %v12434_v6  ;;  %v12471_v58 = vld [vmem:[%s18564_s1 + $0xd78] ss:$8 sps:$4 sm:$0xff]  }
 0xfe5   : > { %10762 = vmatprep.subr.bf16.mxu1 %v12435_v45 }
 0xfe7   : > { %10829 = vmatpush3.bf16.msra.mxu0 %v12436_v41 }
 0xfe8   : > { %10763 = vmatpush3.bf16.msra.mxu1 %v12437_v47  ;;  %10852 = vmatprep.subr.bf16.mxu0 %v12438_v63 }
 0xfe9   : > { %10792 = vmatprep.subr.bf16.mxu1 %v12439_v5 }
 0xfea   : > { %5778 = vmatmul.mubr.bf16.vlgmr.msra.gmra.mxu0 %v5567_v1 }
 0xfeb   : > { %5655 = vmatmul.mubr.bf16.vlgmr.msra.gmra.mxu1 %v5549_v0  ;;  %10853 = vmatpush3.bf16.msra.mxu0 %v12440_v7 }
 0xfec   : > { %10793 = vmatpush3.bf16.msra.mxu1 %v12441_v3  ;;  %5736 = vmatprep.mubr.bf16.mxu1 %v5564_v62 }
 0xfed   : > { %10794 = vmatprep.subr.bf16.mxu1 %v12442_v8  ;;  %10854 = vmatprep.subr.bf16.mxu0 %v12443_v49 }
 0xfef   : > { %10855 = vmatpush3.bf16.msra.mxu0 %v12444_v9 }
 0xff0   : > { %10795 = vmatpush3.bf16.msra.mxu1 %v12445_v14  ;;  %10856 = vmatprep.subr.bf16.mxu0 %v12446_v50 }
 0xff1   : > { %10796 = vmatprep.subr.bf16.mxu1 %v12447_v33 }
 0xff3   : > { %10857 = vmatpush3.bf16.msra.mxu0 %v12448_v48 }
 0xff4   : > { %10797 = vmatpush3.bf16.msra.mxu1 %v12449_v52  ;;  %10858 = vmatprep.subr.bf16.mxu0 %v12450_v54 }
 0xff5   : > { %10798 = vmatprep.subr.bf16.mxu1 %v12451_v31 }
 0xff7   : > { %10859 = vmatpush3.bf16.msra.mxu0 %v12452_v32 }
 0xff8   : > { %10799 = vmatpush3.bf16.msra.mxu1 %v12453_v4  ;;  %10860 = vmatprep.subr.bf16.mxu0 %v12454_v15 }
 0xff9   : > { %10800 = vmatprep.subr.bf16.mxu1 %v12455_v18 }
 0xffb   : > { %10861 = vmatpush3.bf16.msra.mxu0 %v12456_v56 }
 0xffc   : > { %10801 = vmatpush3.bf16.msra.mxu1 %v12457_v61  ;;  %10862 = vmatprep.subr.bf16.mxu0 %v12458_v10 }
 0xffd   : > { %10802 = vmatprep.subr.bf16.mxu1 %v12459_v20 }
 0xfff   : > { %10863 = vmatpush3.bf16.msra.mxu0 %v12460_v24 }
0x1000   : > { %10803 = vmatpush3.bf16.msra.mxu1 %v12461_v22  ;;  %10864 = vmatprep.subr.bf16.mxu0 %v12462_v28 }
0x1001   : > { %10804 = vmatprep.subr.bf16.mxu1 %v12463_v19 }
0x1003   : > { %10865 = vmatpush3.bf16.msra.mxu0 %v12464_v29  ;;  %v12472_v29 = vld [vmem:[%s18564_s1 + $0xd88] ss:$8 sps:$4 sm:$0x3f]  }
0x1004   : > { %10805 = vmatpush3.bf16.msra.mxu1 %v12465_v30  ;;  %10866 = vmatprep.subr.bf16.mxu0 %v12466_v34  ;;  %v12473_v30 = vld [vmem:[%s18564_s1 + $0xd98] ss:$8 sps:$4 sm:$0xff]   ;;  %v12474_v34 = vld [vmem:[%s18564_s1 + $0xda8] ss:$8 sps:$4 sm:$0x3f]  }
0x1005   : > { %10806 = vmatprep.subr.bf16.mxu1 %v12467_v35  ;;  %v12475_v35 = vld [vmem:[%s18564_s1 + $0xdb8] ss:$8 sps:$4 sm:$0xff]  }
0x1007   : > { %10867 = vmatpush3.bf16.msra.mxu0 %v12468_v43  ;;  %v12476_v43 = vld [vmem:[%s18564_s1 + $0xdc8] ss:$8 sps:$4 sm:$0x3f]  }
0x1008   : > { %10807 = vmatpush3.bf16.msra.mxu1 %v12469_v21  ;;  %6296 = vmatprep.subr.bf16.mxu0 %v12470_v57  ;;  %v12477_v21 = vld [vmem:[%s18564_s1 + $0xdd8] ss:$8 sps:$4 sm:$0xff]   ;;  %v12478_v57 = vld [vmem:[%s18564_s1 + $0xfe8] ss:$8 sps:$4 sm:$0xff]  }
0x100b   : > { %5737 = vmatmul.mubr.bf16.vlgmr.msra.gmra.mxu1 %v15666_v13 }
0x100c   : > { %11500 = vmatprep.mubr.msk.bf16.mxu1 %vm3866_vm11, %v12471_v58  ;;  %v12479_v58 = vld [vmem:[%s18564_s1 + $0xde8] ss:$8 sps:$4 sm:$0x3f]  }
0x108a   : > { %v10786_v45 = vpop.f32.mrf.mxu0 }
0x108b   : > { %v10742_v44 = vpop.f32.mrf.mxu1 }
0x108c   : > { %v10787_v38 = vpop.f32.mrf.mxu0 }
0x108d   : > { %v10743_v6 = vpop.f32.mrf.mxu1  ;;  %v10788_v49 = vadd.f32 %v10787_v38, %v10786_v45  ;;  %v12483_v45 = vld [vmem:[%s18564_s1 + $0xfc8] ss:$8 sps:$4 sm:$0xff]   ;;  %v12485_v38 = vld [vmem:[%s18564_s1 + $0xfb8] ss:$8 sps:$4 sm:$0xff]  }
0x108e   : > { %v10789_v41 = vpop.f32.mrf.mxu0  ;;  %v10744_v12 = vadd.f32 %v10743_v6, %v10742_v44  ;;  %v12480_v44 = vld [vmem:[%s18564_s1 + $0xf68] ss:$8 sps:$4 sm:$0xff]   ;;  %v12481_v6 = vld [vmem:[%s18564_s1 + $0xfd8] ss:$8 sps:$4 sm:$0xff]  }
0x108f   : > { %v10745_v26 = vpop.f32.mrf.mxu1 }
0x1090   : > { %v10790_v59 = vpop.f32.mrf.mxu0  ;;  %v5616_v5 = vadd.f32 %v10744_v12, %v14486_v17  ;;  %v12491_v12 = vld [vmem:[%s18564_s1 + $0xf88] ss:$8 sps:$4 sm:$0xff]  }
0x1091   : > { %v10746_v23 = vpop.f32.mrf.mxu1  ;;  %v10791_v31 = vadd.f32 %v10790_v59, %v10789_v41  ;;  %v12487_v41 = vld [vmem:[%s18564_s1 + $0xfa8] ss:$8 sps:$4 sm:$0xff]   ;;  %v12489_v59 = vld [vmem:[%s18564_s1 + $0xf98] ss:$8 sps:$4 sm:$0xff]  }
0x1092   : > { %v10747_v0 = vadd.f32 %v10746_v23, %v10745_v26  ;;  %v12482_v26 = vld [vmem:[%s18564_s1 + $0xf58] ss:$8 sps:$4 sm:$0xff]   ;;  %v12484_v23 = vld [vmem:[%s18564_s1 + $0xf48] ss:$8 sps:$4 sm:$0xff]  }
0x1094   : > { %v5619_v9 = vadd.f32 %v10747_v0, %v14486_v17  ;;  %v15937_v0 = vld [vmem:[%s13398_s16 + $0x40] sm:$0xff] }
0x10aa   : > { %v10830_v63 = vpop.f32.mrf.mxu0 }
0x10ab   : > { %v10764_v40 = vpop.f32.mrf.mxu1 }
0x10ac   : > { %v10831_v62 = vpop.f32.mrf.mxu0 }
0x10ad   : > { %v10765_v36 = vpop.f32.mrf.mxu1  ;;  %v10832_v32 = vadd.f32 %v10831_v62, %v10830_v63  ;;  %v12492_v63 = vld [vmem:[%s18564_s1 + $0xf08] ss:$8 sps:$4 sm:$0xff]  }
0x10ae   : > { %v10766_v13 = vadd.f32 %v10765_v36, %v10764_v40  ;;  %v10833_v14 = vpop.f32.mrf.mxu0  ;;  %v12486_v40 = vld [vmem:[%s18564_s1 + $0xf38] ss:$8 sps:$4 sm:$0xff]   ;;  %v12488_v36 = vld [vmem:[%s18564_s1 + $0xf28] ss:$8 sps:$4 sm:$0xff]  }
0x10af   : > { %v10767_v47 = vpop.f32.mrf.mxu1  ;;  %v15940_v62 = vld [vmem:[%s13398_s16 + $0x48] sm:$0xff] }
0x10b0   : > { %v5657_v7 = vadd.f32 %v10766_v13, %v5616_v5  ;;  %v10834_v15 = vpop.f32.mrf.mxu0  ;;  %v12493_v13 = vld [vmem:[%s18564_s1 + $0xf78] ss:$8 sps:$4 sm:$0xff]   ;;  %v12495_v5 = vld [vmem:[%s18564_s1 + $0x174] ss:$8 sps:$4 sm:$0xff]  }
0x10b1   : > { %v10768_v1 = vpop.f32.mrf.mxu1  ;;  %v10835_v20 = vadd.f32 %v10834_v15, %v10833_v14 }
0x10b2   : > { %v10769_v3 = vadd.f32 %v10768_v1, %v10767_v47  ;;  %v5698_v48 = vadd.f32 %v10788_v49, %v5657_v7  ;;  %v12490_v47 = vld [vmem:[%s18564_s1 + $0xf18] ss:$8 sps:$4 sm:$0xff]   ;;  %v15943_v7 = vld [vmem:[%s13398_s16 + $0x50] sm:$0xff] }
0x10b3   : > { %v12494_v1 = vld [vmem:[%s18564_s1 + $0xef8] ss:$8 sps:$4 sm:$0xff]   ;;  %v6256_v49 = vrot.slane %v15943_v7, 2 }
0x10b4   : > { %v5660_v33 = vadd.f32 %v10769_v3, %v5619_v9  ;;  %v6253_v3 = vrot.slane %v15937_v0, 2 }
0x10b6   : > { %v5701_v61 = vadd.f32 %v10791_v31, %v5660_v33  ;;  %v6275_v33 = vrot.slane %v15937_v0, 4 }
0x10cb   : > { %v10808_v8 = vpop.f32.mrf.mxu1 }
0x10cd   : > { %v10809_v50 = vpop.f32.mrf.mxu1 }
0x10ce   : > { %v10810_v52 = vadd.f32 %v10809_v50, %v10808_v8  ;;  %v6254_v8 = vrot.slane %v15940_v62, 2 }
0x10cf   : > { %v10811_v54 = vpop.f32.mrf.mxu1 }
0x10d0   : > { %v5739_v4 = vadd.f32 %v10810_v52, %v5698_v48  ;;  %v15949_v9 = vsel %vm948_vm2, %v6253_v3, %v6254_v8  ;;  %v15954_v14 = vsel %vm948_vm2, %v6254_v8, %v6256_v49  ;;  %v6276_v48 = vrot.slane %v15940_v62, 4  ;;  %v12503_v3 = vld [vmem:[%s18564_s1 + $0x34] ss:$8 sps:$4 sm:$0xff]  }
0x10d1   : > { %v10812_v18 = vpop.f32.mrf.mxu1  ;;  %v6288_v50 = vpack.c.bf16 %v15954_v14, %v15949_v9  ;;  %v6278_v52 = vrot.slane %v15943_v7, 4  ;;  %v12570_v9 = vld [vmem:[%s18564_s1 + $0x2f8] ss:$8 sps:$4 sm:$0xff]   ;;  %v12571_v14 = vld [vmem:[%s18564_s1 + $0x368] ss:$8 sps:$4 sm:$0xff]  }
0x10d2   : > { %v5780_v56 = vadd.f32 %v10832_v32, %v5739_v4  ;;  %v10813_v10 = vadd.f32 %v10812_v18, %v10811_v54  ;;  %v15962_v54 = vsel %vm972_vm3, %v6275_v33, %v6276_v48  ;;  %v6264_v33 = vrot.slane %v15937_v0, 3 }
0x10d3   : > { %v15967_v31 = vsel %vm972_vm3, %v6276_v48, %v6278_v52  ;;  %v6265_v48 = vrot.slane %v15940_v62, 3 }
0x10d4   : > { %v5786_v24 = vmax.f32 %v5780_v56, 0.0  ;;  %v5742_v22 = vadd.f32 %v10813_v10, %v5701_v61  ;;  %v6290_v32 = vpack.c.bf16 %v15967_v31, %v15962_v54  ;;  %v12585_v54 = vld [vmem:[%s18564_s1 + $0x2a8] ss:$8 sps:$4 sm:$0xff]  }
0x10d5   : > { %v12588_v31 = vld [vmem:[%s18564_s1 + $0x308] ss:$8 sps:$4 sm:$0xff]  }
0x10d6   : > { %10287 = vst [vmem:[%s14495_s28 + $0x10] sm:$0xff] %v5786_v24  ;;  %v5783_v28 = vadd.f32 %v10835_v20, %v5742_v22 }
0x10d8   : > { %v5787_v19 = vmax.f32 %v5783_v28, 0.0 }
0x10da   : > { %10288 = vst [vmem:[%s14495_s28 + $0x18] sm:$0x3f] %v5787_v19  ;;  %11496 = vmatprep.subr.msk.mxu1 %vm948_vm2, %v5787_v19 }
0x10db   : > { %11497 = vmatpush3.msk.msra.mxu1 %vm948_vm2, %v5787_v19 }
0x10dc   : > { %11498 = vmatprep.subr.mxu1 %v5786_v24 }
0x10dd   : > { %11499 = vmatpush3.msra.mxu1 %v5786_v24 }
0x10de   : > { %11501 = vmatmul.mubr.msk.bf16.vlgmr.msra.gmra.mxu1 %vm3866_vm11, %v12472_v29  ;;  %11504 = vmatprep.subr.msk.mxu1 %vm948_vm2, %v5787_v19  ;;  %v6242_v29 = vrot.slane %v15937_v0, 1 }
0x10df   : > { %11505 = vmatpush3.msk.msra.mxu1 %vm948_vm2, %v5787_v19  ;;  %11508 = vmatprep.mubr.msk.bf16.mxu1 %vm3866_vm11, %v12473_v30  ;;  %v6243_v30 = vrot.slane %v15940_v62, 1 }
0x10e0   : > { %11506 = vmatprep.subr.mxu1 %v5786_v24 }
0x10e1   : > { %11507 = vmatpush3.msra.mxu1 %v5786_v24 }
0x10e2   : > { %11512 = vmatprep.subr.msk.mxu1 %vm948_vm2, %v5787_v19 }
0x10e6   : > { %11509 = vmatmul.mubr.msk.bf16.vlgmr.msra.gmra.mxu1 %vm3866_vm11, %v12474_v34  ;;  %v6245_v34 = vrot.slane %v15943_v7, 1 }
0x10e7   : > { %11513 = vmatpush3.msk.msra.mxu1 %vm948_vm2, %v5787_v19  ;;  %11516 = vmatprep.mubr.msk.bf16.mxu1 %vm3866_vm11, %v12475_v35 }
0x10e8   : > { %11514 = vmatprep.subr.mxu1 %v5786_v24 }
0x10e9   : > { %11515 = vmatpush3.msra.mxu1 %v5786_v24 }
0x10ea   : > { %11520 = vmatprep.subr.msk.mxu1 %vm948_vm2, %v5787_v19 }
0x10ee   : > { %11517 = vmatmul.mubr.msk.bf16.vlgmr.msra.gmra.mxu1 %vm3866_vm11, %v12476_v43 }
0x10ef   : > { %11521 = vmatpush3.msk.msra.mxu1 %vm948_vm2, %v5787_v19  ;;  %11524 = vmatprep.mubr.msk.bf16.mxu1 %vm3866_vm11, %v12477_v21  ;;  %v12496_v21 = vld [vmem:[%s18564_s1 + $0x70] ss:$8 sps:$4 sm:$0xff]  }
0x10f0   : > { %11522 = vmatprep.subr.mxu1 %v5786_v24 }
0x10f1   : > { %11523 = vmatpush3.msra.mxu1 %v5786_v24 }
0x10f2   : > { %10880 = vmatprep.subr.bf16.mxu1 %v12478_v57 }
0x10f6   : > { %11525 = vmatmul.mubr.msk.bf16.vlgmr.msra.gmra.mxu1 %vm3866_vm11, %v12479_v58  ;;  %v12497_v58 = vld [vmem:[%s18564_s1 + $0x64] ss:$8 sps:$4 sm:$0xff]  }
0x10f7   : > { %10881 = vmatpush3.bf16.msra.mxu1 %v12480_v44  ;;  %v6244_v44 = vsel %vm936_vm0, %v6242_v29, %v6243_v30  ;;  %v12510_v29 = vld [vmem:[%s18564_s1 + $0x14] ss:$8 sps:$4 sm:$0xff]  }
0x10f8   : > { %10882 = vmatprep.subr.bf16.mxu1 %v12481_v6  ;;  %v6246_v6 = vsel %vm936_vm0, %v6243_v30, %v6245_v34  ;;  %v12511_v30 = vld [vmem:[%s18564_s1 + $0x154] ss:$8 sps:$4 sm:$0xff]  }
0x10fb   : > { %10883 = vmatpush3.bf16.msra.mxu1 %v12482_v26 }
0x10fc   : > { %10884 = vmatprep.subr.bf16.mxu1 %v12483_v45  ;;  %v12498_v45 = vld [vmem:[%s18564_s1 + $0x60] ss:$8 sps:$4 sm:$0xff]  }
0x10ff   : > { %10885 = vmatpush3.bf16.msra.mxu1 %v12484_v23  ;;  %v6287_v23 = vpack.c.bf16 %v6246_v6, %v6244_v44  ;;  %v12517_v44 = vld [vmem:[%s18564_s1 + $0x140] ss:$8 sps:$4 sm:$0xff]   ;;  %v12518_v6 = vld [vmem:[%s18564_s1 + $0xf4] ss:$8 sps:$4 sm:$0xff]  }
0x1100   : > { %10886 = vmatprep.subr.bf16.mxu1 %v12485_v38 }
0x1103   : > { %10887 = vmatpush3.bf16.msra.mxu1 %v12486_v40 }
0x1104   : > { %10888 = vmatprep.subr.bf16.mxu1 %v12487_v41  ;;  %v12499_v41 = vld [vmem:[%s18564_s1 + $0x54] ss:$8 sps:$4 sm:$0xff]  }
0x1107   : > { %10889 = vmatpush3.bf16.msra.mxu1 %v12488_v36 }
0x1108   : > { %10890 = vmatprep.subr.bf16.mxu1 %v12489_v59  ;;  %v12500_v59 = vld [vmem:[%s18564_s1 + $0x50] ss:$8 sps:$4 sm:$0xff]  }
0x110b   : > { %10891 = vmatpush3.bf16.msra.mxu1 %v12490_v47 }
0x110c   : > { %10892 = vmatprep.subr.bf16.mxu1 %v12491_v12  ;;  %v12501_v12 = vld [vmem:[%s18564_s1 + $0x44] ss:$8 sps:$4 sm:$0xff]  }
0x110f   : > { %10893 = vmatpush3.bf16.msra.mxu1 %v12492_v63 }
0x1110   : > { %10894 = vmatprep.subr.bf16.mxu1 %v12493_v13 }
0x1113   : > { %10895 = vmatpush3.bf16.msra.mxu1 %v12494_v1 }
0x1114   : > { %6349 = vmatprep.subr.bf16.mxu1 %v12495_v5  ;;  %v12502_v5 = vld [vmem:[%s18564_s1 + $0x40] ss:$8 sps:$4 sm:$0xff]  }
0x119e   : > { %v11502_v4 = vpop.f32.mrf.mxu1 }
0x11a0   : > { %v5860_v15 = vpop.f32.mrf.mxu1 }
0x11a2   : > { %v11503_v18 = vpop.f32.mrf.mxu1 }
0x11a3   : > { %v6122_v38 = vpack.c.bf16 %v11503_v18, %v11502_v4  ;;  %v6267_v4 = vrot.slane %v15943_v7, 3  ;;  %v12505_v18 = vld [vmem:[%s18564_s1 + $0x170] ss:$8 sps:$4 sm:$0xff]  }
0x11a4   : > { %v5863_v56 = vpop.f32.mrf.mxu1 }
0x11a5   : > { %v6118_v28 = vpack.c.bf16 %v5863_v56, %v5860_v15  ;;  %v12504_v15 = vld [vmem:[%s18564_s1 + $0x30] ss:$8 sps:$4 sm:$0xff]   ;;  %v12506_v56 = vld [vmem:[%s18564_s1 + $0x24] ss:$8 sps:$4 sm:$0xff]  }
0x11a6   : > { %v11510_v61 = vpop.f32.mrf.mxu1 }
0x11a8   : > { %v5941_v10 = vpop.f32.mrf.mxu1 }
0x11aa   : > { %v11511_v20 = vpop.f32.mrf.mxu1 }
0x11ab   : > { %v6123_v35 = vpack.c.bf16 %v11511_v20, %v11510_v61  ;;  %v12507_v61 = vld [vmem:[%s18564_s1 + $0x164] ss:$8 sps:$4 sm:$0xff]   ;;  %v6268_v20 = vsel %vm960_vm1, %v6265_v48, %v6267_v4 }
0x11ac   : > { %v5944_v24 = vpop.f32.mrf.mxu1 }
0x11ad   : > { %v6119_v22 = vpack.c.bf16 %v5944_v24, %v5941_v10  ;;  %v6266_v10 = vsel %vm960_vm1, %v6264_v33, %v6265_v48  ;;  %v12508_v24 = vld [vmem:[%s18564_s1 + $0x20] ss:$8 sps:$4 sm:$0xff]   ;;  %v12535_v33 = vld [vmem:[%s18564_s1 + $0x1f4] ss:$8 sps:$4 sm:$0xff]   ;;  %v12536_v48 = vld [vmem:[%s18564_s1 + $0xb0] ss:$8 sps:$4 sm:$0xff]  }
0x11ae   : > { %v15971_v19 = vpop.f32.mrf.mxu1 }
0x11af   : > { %6158 = vmatprep.mubr.bf16.mxu0 %v6119_v22  ;;  %v12509_v22 = vld [vmem:[%s18564_s1 + $0x160] ss:$8 sps:$4 sm:$0xff]  }
0x11b0   : > { %v6022_v43 = vpop.f32.mrf.mxu1  ;;  %6159 = vmatmul.mubr.bf16.vlgmr.msra.gmra.mxu0 %v6118_v28 }
0x11b1   : > { %6297 = vmatpush1.bf16.msra.mxu0 %v12496_v21  ;;  %6166 = vmatprep.mubr.bf16.mxu0 %v6123_v35  ;;  %v6289_v35 = vpack.c.bf16 %v6268_v20, %v6266_v10  ;;  %v12514_v21 = vld [vmem:[%s18564_s1 + $0x4] ss:$8 sps:$4 sm:$0xff]   ;;  %v12541_v10 = vld [vmem:[%s18564_s1 + $0x1e0] ss:$8 sps:$4 sm:$0xff]   ;;  %v16127_v20 = vld [vmem:[%s13398_s16 + $0x58] sm:$0xff] }
0x11b2   : > { %v11519_v57 = vpop.f32.mrf.mxu1  ;;  %6298 = vmatprep.subr.bf16.mxu0 %v12497_v58  ;;  %v12516_v58 = vld [vmem:[%s18564_s1] ss:$8 sps:$4 sm:$0xff]  }
0x11b3   : > { %v6124_v28 = vpack.c.bf16 %v11519_v57, %v15971_v19  ;;  %v12513_v19 = vld [vmem:[%s18564_s1 + $0x150] ss:$8 sps:$4 sm:$0xff]   ;;  %v12515_v57 = vld [vmem:[%s18564_s1 + $0x144] ss:$8 sps:$4 sm:$0xff]  }
0x11b4   : > { %v6025_v26 = vpop.f32.mrf.mxu1 }
0x11b5   : > { %6299 = vmatpush1.bf16.msra.mxu0 %v12498_v45  ;;  %v6120_v63 = vpack.c.bf16 %v6025_v26, %v6022_v43  ;;  %v12512_v43 = vld [vmem:[%s18564_s1 + $0x10] ss:$8 sps:$4 sm:$0xff]   ;;  %v12519_v26 = vld [vmem:[%s18564_s1 + $0x134] ss:$8 sps:$4 sm:$0xff]  }
0x11b6   : > { %v11526_v40 = vpop.f32.mrf.mxu1  ;;  %6300 = vmatprep.subr.bf16.mxu0 %v12499_v41  ;;  %v12520_v45 = vld [vmem:[%s18564_s1 + $0xf0] ss:$8 sps:$4 sm:$0xff]   ;;  %v12524_v41 = vld [vmem:[%s18564_s1 + $0xe0] ss:$8 sps:$4 sm:$0xff]  }
0x11b8   : > { %v6103_v36 = vpop.f32.mrf.mxu1  ;;  %6167 = vmatmul.mubr.bf16.gmra.mxu0 %v6122_v38  ;;  %v12522_v38 = vld [vmem:[%s18564_s1 + $0xe4] ss:$8 sps:$4 sm:$0xff]  }
0x11b9   : > { %6301 = vmatpush1.bf16.msra.mxu0 %v12500_v59  ;;  %6328 = vmatprep.mubr.bf16.mxu0 %v6287_v23  ;;  %v12521_v23 = vld [vmem:[%s18564_s1 + $0x130] ss:$8 sps:$4 sm:$0xff]   ;;  %v12526_v59 = vld [vmem:[%s18564_s1 + $0xd4] ss:$8 sps:$4 sm:$0xff]  }
0x11ba   : > { %v11527_v47 = vpop.f32.mrf.mxu1  ;;  %6302 = vmatprep.subr.bf16.mxu0 %v12501_v12  ;;  %v12528_v12 = vld [vmem:[%s18564_s1 + $0xd0] ss:$8 sps:$4 sm:$0xff]  }
0x11bb   : > { %v6125_v8 = vpack.c.bf16 %v11527_v47, %v11526_v40  ;;  %v12523_v40 = vld [vmem:[%s18564_s1 + $0x124] ss:$8 sps:$4 sm:$0xff]   ;;  %v12527_v47 = vld [vmem:[%s18564_s1 + $0x114] ss:$8 sps:$4 sm:$0xff]  }
0x11bc   : > { %v6106_v13 = vpop.f32.mrf.mxu1 }
0x11bd   : > { %v6121_v1 = vpack.c.bf16 %v6106_v13, %v6103_v36  ;;  %6303 = vmatpush1.bf16.msra.mxu0 %v12502_v5  ;;  %v12525_v36 = vld [vmem:[%s18564_s1 + $0x120] ss:$8 sps:$4 sm:$0xff]   ;;  %v12530_v13 = vld [vmem:[%s18564_s1 + $0xc4] ss:$8 sps:$4 sm:$0xff]  }
0x11be   : > { %6304 = vmatprep.subr.bf16.mxu0 %v12503_v3  ;;  %v12532_v5 = vld [vmem:[%s18564_s1 + $0xc0] ss:$8 sps:$4 sm:$0xff]  }
0x11bf   : > { %6207 = vmatprep.mubr.bf16.mxu1 %v6121_v1  ;;  %v12531_v1 = vld [vmem:[%s18564_s1 + $0x104] ss:$8 sps:$4 sm:$0xff]   ;;  %v12533_v3 = vld [vmem:[%s18564_s1 + $0x100] ss:$8 sps:$4 sm:$0xff]  }
0x11c0   : > { %6208 = vmatmul.mubr.bf16.vlgmr.msra.gmra.mxu1 %v6120_v63  ;;  %v12529_v63 = vld [vmem:[%s18564_s1 + $0x110] ss:$8 sps:$4 sm:$0xff]  }
0x11c1   : > { %6305 = vmatpush1.bf16.msra.mxu0 %v12504_v15  ;;  %6350 = vmatpush1.bf16.msra.mxu1 %v12505_v18  ;;  %v12537_v15 = vld [vmem:[%s18564_s1 + $0x1f0] ss:$8 sps:$4 sm:$0xff]   ;;  %v12538_v18 = vld [vmem:[%s18564_s1 + $0xa4] ss:$8 sps:$4 sm:$0xff]  }
0x11c2   : > { %6306 = vmatprep.subr.bf16.mxu0 %v12506_v56  ;;  %6351 = vmatprep.subr.bf16.mxu1 %v12507_v61  ;;  %v12539_v56 = vld [vmem:[%s18564_s1 + $0x1e4] ss:$8 sps:$4 sm:$0xff]   ;;  %v12540_v61 = vld [vmem:[%s18564_s1 + $0xa0] ss:$8 sps:$4 sm:$0xff]  }
0x11c3   : > { %6215 = vmatprep.mubr.bf16.mxu1 %v6125_v8  ;;  %v12534_v8 = vld [vmem:[%s18564_s1 + $0xb4] ss:$8 sps:$4 sm:$0xff]  }
0x11c5   : > { %6307 = vmatpush1.bf16.msra.mxu0 %v12508_v24  ;;  %6352 = vmatpush1.bf16.msra.mxu1 %v12509_v22  ;;  %v12542_v24 = vld [vmem:[%s18564_s1 + $0x94] ss:$8 sps:$4 sm:$0xff]  }
0x11c6   : > { %6308 = vmatprep.subr.bf16.mxu0 %v12510_v29  ;;  %6353 = vmatprep.subr.bf16.mxu1 %v12511_v30  ;;  %v12543_v22 = vld [vmem:[%s18564_s1 + $0x1d4] ss:$8 sps:$4 sm:$0xff]   ;;  %v12544_v29 = vld [vmem:[%s18564_s1 + $0x90] ss:$8 sps:$4 sm:$0xff]  }
0x11c7   : > { %v12545_v30 = vld [vmem:[%s18564_s1 + $0x1d0] ss:$8 sps:$4 sm:$0xff]  }
0x11c8   : > { %6216 = vmatmul.mubr.bf16.gmra.mxu1 %v6124_v28  ;;  %v6247_v28 = vrot.slane %v16127_v20, 1 }
0x11c9   : > { %6309 = vmatpush1.bf16.msra.mxu0 %v12512_v43  ;;  %6354 = vmatpush1.bf16.msra.mxu1 %v12513_v19  ;;  %v12547_v43 = vld [vmem:[%s18564_s1 + $0x1c4] ss:$8 sps:$4 sm:$0xff]   ;;  %v6286_v19 = vpack.c.bf16 %v15940_v62, %v15937_v0  ;;  %v12551_v0 = vld [vmem:[%s18564_s1 + $0x274] ss:$8 sps:$4 sm:$0xff]  }
0x11ca   : > { %6310 = vmatprep.subr.bf16.mxu0 %v12514_v21  ;;  %6355 = vmatprep.subr.bf16.mxu1 %v12515_v57  ;;  %v6248_v21 = vsel %vm936_vm0, %v6245_v34, %v6247_v28  ;;  %v12548_v57 = vld [vmem:[%s18564_s1 + $0x80] ss:$8 sps:$4 sm:$0xff]   ;;  %v12552_v34 = vld [vmem:[%s18564_s1 + $0x1b0] ss:$8 sps:$4 sm:$0xff]  }
0x11cb   : > { %6381 = vmatprep.mubr.bf16.mxu1 %v6289_v35  ;;  %v12546_v35 = vld [vmem:[%s18564_s1 + $0x84] ss:$8 sps:$4 sm:$0xff]   ;;  %v6292_v62 = vpack.c.bf16 %v6247_v28, %v6248_v21  ;;  %v12582_v21 = vld [vmem:[%s18564_s1 + $0x338] ss:$8 sps:$4 sm:$0xff]  }
0x11cc   : > { %v12577_v28 = vld [vmem:[%s18564_s1 + $0x204] ss:$8 sps:$4 sm:$0xff]  }
0x11cd   : > { %6311 = vmatpush1.bf16.msra.mxu0 %v12516_v58  ;;  %6356 = vmatpush1.bf16.msra.mxu1 %v12517_v44  ;;  %v12549_v58 = vld [vmem:[%s18564_s1 + $0x1c0] ss:$8 sps:$4 sm:$0xff]   ;;  %v12550_v44 = vld [vmem:[%s18564_s1 + $0x1b4] ss:$8 sps:$4 sm:$0xff]  }
0x11ce   : > { %6312 = vmatprep.subr.bf16.mxu0 %v12518_v6  ;;  %6357 = vmatprep.subr.bf16.mxu1 %v12519_v26  ;;  %v12553_v6 = vld [vmem:[%s18564_s1 + $0x270] ss:$8 sps:$4 sm:$0xff]   ;;  %v12554_v26 = vld [vmem:[%s18564_s1 + $0x1a4] ss:$8 sps:$4 sm:$0xff]  }
0x11d1   : > { %6313 = vmatpush2.bf16.msra.mxu0 %v12520_v45  ;;  %6358 = vmatpush1.bf16.msra.mxu1 %v12521_v23  ;;  %v12555_v45 = vld [vmem:[%s18564_s1 + $0x264] ss:$8 sps:$4 sm:$0xff]   ;;  %v6291_v23 = vpack.c.bf16 %v16127_v20, %v15943_v7  ;;  %v12586_v7 = vld [vmem:[%s18564_s1 + $0x318] ss:$8 sps:$4 sm:$0xff]  }
0x11d2   : > { %6314 = vmatprep.subr.bf16.mxu0 %v12522_v38  ;;  %6359 = vmatprep.subr.bf16.mxu1 %v12523_v40  ;;  %v12556_v38 = vld [vmem:[%s18564_s1 + $0x1a0] ss:$8 sps:$4 sm:$0xff]  }
0x11d3   : > { %v12557_v40 = vld [vmem:[%s18564_s1 + $0x260] ss:$8 sps:$4 sm:$0xff]  }
0x11d5   : > { %6315 = vmatpush2.bf16.msra.mxu0 %v12524_v41  ;;  %6360 = vmatpush1.bf16.msra.mxu1 %v12525_v36  ;;  %v12558_v41 = vld [vmem:[%s18564_s1 + $0x194] ss:$8 sps:$4 sm:$0xff]  }
0x11d6   : > { %6316 = vmatprep.subr.bf16.mxu0 %v12526_v59  ;;  %6361 = vmatprep.subr.bf16.mxu1 %v12527_v47  ;;  %v12559_v36 = vld [vmem:[%s18564_s1 + $0x254] ss:$8 sps:$4 sm:$0xff]   ;;  %v6269_v59 = vrot.slane %v16127_v20, 3  ;;  %v12560_v47 = vld [vmem:[%s18564_s1 + $0x190] ss:$8 sps:$4 sm:$0xff]  }
0x11d9   : > { %6317 = vmatpush2.bf16.msra.mxu0 %v12528_v12  ;;  %6362 = vmatpush1.bf16.msra.mxu1 %v12529_v63  ;;  %v12561_v12 = vld [vmem:[%s18564_s1 + $0x250] ss:$8 sps:$4 sm:$0xff]   ;;  %v12562_v63 = vld [vmem:[%s18564_s1 + $0x184] ss:$8 sps:$4 sm:$0xff]  }
0x11da   : > { %6318 = vmatprep.subr.bf16.mxu0 %v12530_v13  ;;  %6363 = vmatprep.subr.bf16.mxu1 %v12531_v1  ;;  %v12563_v13 = vld [vmem:[%s18564_s1 + $0x244] ss:$8 sps:$4 sm:$0xff]   ;;  %v6270_v1 = vsel %vm960_vm1, %v6267_v4, %v6269_v59  ;;  %v12567_v4 = vld [vmem:[%s18564_s1 + $0x378] ss:$8 sps:$4 sm:$0xff]  }
0x11dd   : > { %6319 = vmatpush2.bf16.msra.mxu0 %v12532_v5  ;;  %6364 = vmatpush1.bf16.msra.mxu1 %v12533_v3  ;;  %v12564_v5 = vld [vmem:[%s18564_s1 + $0x180] ss:$8 sps:$4 sm:$0xff]  }
0x11de   : > { %6320 = vmatprep.subr.bf16.mxu0 %v12534_v8  ;;  %6365 = vmatprep.subr.bf16.mxu1 %v12535_v33  ;;  %v12565_v3 = vld [vmem:[%s18564_s1 + $0x240] ss:$8 sps:$4 sm:$0xff]   ;;  %v6294_v8 = vpack.c.bf16 %v6269_v59, %v6270_v1  ;;  %v6258_v33 = vrot.slane %v16127_v20, 2 }
0x11e1   : > { %6321 = vmatpush2.bf16.msra.mxu0 %v12536_v48  ;;  %6366 = vmatpush2.bf16.msra.mxu1 %v12537_v15  ;;  %v12566_v48 = vld [vmem:[%s18564_s1 + $0x234] ss:$8 sps:$4 sm:$0xff]   ;;  %v12568_v15 = vld [vmem:[%s18564_s1 + $0x230] ss:$8 sps:$4 sm:$0xff]  }
0x11e2   : > { %6322 = vmatprep.subr.bf16.mxu0 %v12538_v18  ;;  %6367 = vmatprep.subr.bf16.mxu1 %v12539_v56  ;;  %v6259_v18 = vsel %vm948_vm2, %v6256_v49, %v6258_v33  ;;  %v12569_v56 = vld [vmem:[%s18564_s1 + $0x224] ss:$8 sps:$4 sm:$0xff]   ;;  %v12572_v49 = vld [vmem:[%s18564_s1 + $0x220] ss:$8 sps:$4 sm:$0xff]  }
0x11e5   : > { %6323 = vmatpush2.bf16.msra.mxu0 %v12540_v61  ;;  %6368 = vmatpush2.bf16.msra.mxu1 %v12541_v10  ;;  %v12573_v61 = vld [vmem:[%s18564_s1 + $0x214] ss:$8 sps:$4 sm:$0xff]   ;;  %v12574_v10 = vld [vmem:[%s18564_s1 + $0x2e8] ss:$8 sps:$4 sm:$0xff]  }
0x11e6   : > { %6324 = vmatprep.subr.bf16.mxu0 %v12542_v24  ;;  %6369 = vmatprep.subr.bf16.mxu1 %v12543_v22  ;;  %v12575_v24 = vld [vmem:[%s18564_s1 + $0x358] ss:$8 sps:$4 sm:$0xff]  }
0x11e7   : > { %v12576_v22 = vld [vmem:[%s18564_s1 + $0x210] ss:$8 sps:$4 sm:$0xff]  }
0x11e9   : > { %6325 = vmatpush2.bf16.msra.mxu0 %v12544_v29  ;;  %6370 = vmatpush2.bf16.msra.mxu1 %v12545_v30  ;;  %v12578_v29 = vld [vmem:[%s18564_s1 + $0x2d8] ss:$8 sps:$4 sm:$0xff]   ;;  %v12579_v30 = vld [vmem:[%s18564_s1 + $0x348] ss:$8 sps:$4 sm:$0xff]  }
0x11ea   : > { %6326 = vmatprep.subr.bf16.mxu0 %v12546_v35  ;;  %6371 = vmatprep.subr.bf16.mxu1 %v12547_v43  ;;  %v12580_v35 = vld [vmem:[%s18564_s1 + $0x200] ss:$8 sps:$4 sm:$0xff]   ;;  %v6280_v43 = vrot.slane %v16127_v20, 4 }
0x11ec   : > { %v6281_v20 = vsel %vm972_vm3, %v6278_v52, %v6280_v43  ;;  %v12587_v52 = vld [vmem:[%s18564_s1 + $0x298] ss:$8 sps:$4 sm:$0xff]  }
0x11ed   : > { %6327 = vmatpush2.bf16.msra.mxu0 %v12548_v57  ;;  %6372 = vmatpush2.bf16.msra.mxu1 %v12549_v58  ;;  %v12583_v57 = vld [vmem:[%s18564_s1 + $0x2b8] ss:$8 sps:$4 sm:$0xff]   ;;  %v12584_v58 = vld [vmem:[%s18564_s1 + $0x328] ss:$8 sps:$4 sm:$0xff]  }
0x11ee   : > { %6373 = vmatprep.subr.bf16.mxu1 %v12550_v44  ;;  %6402 = vmatprep.subr.bf16.mxu0 %v12551_v0  ;;  %v6295_v44 = vpack.c.bf16 %v6280_v43, %v6281_v20  ;;  %v12590_v0 = vld [vmem:[%s18564_s1 + $0x40c] ss:$8 sps:$4 sm:$0xff]  }
0x11f0   : > { %6329 = vmatmul.mubr.bf16.vlgmr.msra.gmra.mxu0 %v6286_v19  ;;  %v12581_v19 = vld [vmem:[%s18564_s1 + $0x2c8] ss:$8 sps:$4 sm:$0xff]  }
0x11f1   : > { %6374 = vmatpush2.bf16.msra.mxu1 %v12552_v34  ;;  %6403 = vmatpush1.bf16.msra.mxu0 %v12553_v6 }
0x11f2   : > { %6375 = vmatprep.subr.bf16.mxu1 %v12554_v26  ;;  %6404 = vmatprep.subr.bf16.mxu0 %v12555_v45 }
0x11f3   : > { %6338 = vmatprep.mubr.bf16.mxu0 %v6292_v62 }
0x11f5   : > { %6376 = vmatpush2.bf16.msra.mxu1 %v12556_v38  ;;  %6405 = vmatpush1.bf16.msra.mxu0 %v12557_v40 }
0x11f6   : > { %6377 = vmatprep.subr.bf16.mxu1 %v12558_v41  ;;  %6406 = vmatprep.subr.bf16.mxu0 %v12559_v36 }
0x11f8   : > { %6339 = vmatmul.mubr.bf16.gmra.mxu0 %v6291_v23 }
0x11f9   : > { %6378 = vmatpush2.bf16.msra.mxu1 %v12560_v47  ;;  %6407 = vmatpush1.bf16.msra.mxu0 %v12561_v12 }
0x11fa   : > { %6379 = vmatprep.subr.bf16.mxu1 %v12562_v63  ;;  %6408 = vmatprep.subr.bf16.mxu0 %v12563_v13 }
0x11fb   : > { %6434 = vmatprep.mubr.bf16.mxu0 %v13202_v42 }
0x11fd   : > { %6380 = vmatpush2.bf16.msra.mxu1 %v12564_v5  ;;  %6409 = vmatpush1.bf16.msra.mxu0 %v12565_v3 }
0x11fe   : > { %6410 = vmatprep.subr.bf16.mxu0 %v12566_v48  ;;  %10908 = vmatprep.subr.bf16.mxu1 %v12567_v4 }
0x1200   : > { %6382 = vmatmul.mubr.bf16.vlgmr.msra.gmra.mxu1 %v6288_v50  ;;  %v6293_v50 = vpack.c.bf16 %v6258_v33, %v6259_v18 }
0x1201   : > { %6411 = vmatpush1.bf16.msra.mxu0 %v12568_v15  ;;  %6391 = vmatprep.mubr.bf16.mxu1 %v6294_v8 }
0x1202   : > { %6412 = vmatprep.subr.bf16.mxu0 %v12569_v56  ;;  %10909 = vmatpush3.bf16.msra.mxu1 %v12570_v9 }
0x1203   : > { %10910 = vmatprep.subr.bf16.mxu1 %v12571_v14 }
0x1205   : > { %6413 = vmatpush1.bf16.msra.mxu0 %v12572_v49 }
0x1206   : > { %6414 = vmatprep.subr.bf16.mxu0 %v12573_v61  ;;  %10911 = vmatpush3.bf16.msra.mxu1 %v12574_v10 }
0x1207   : > { %10912 = vmatprep.subr.bf16.mxu1 %v12575_v24 }
0x1208   : > { %6392 = vmatmul.mubr.bf16.gmra.mxu1 %v6293_v50 }
0x1209   : > { %6415 = vmatpush1.bf16.msra.mxu0 %v12576_v22 }
0x120a   : > { %6416 = vmatprep.subr.bf16.mxu0 %v12577_v28  ;;  %10913 = vmatpush3.bf16.msra.mxu1 %v12578_v29 }
0x120b   : > { %10914 = vmatprep.subr.bf16.mxu1 %v12579_v30 }
0x120d   : > { %6417 = vmatpush1.bf16.msra.mxu0 %v12580_v35 }
0x120e   : > { %10915 = vmatpush3.bf16.msra.mxu1 %v12581_v19  ;;  %11528 = vmatprep.subr.mxu0 %v13203_v16 }
0x120f   : > { %10916 = vmatprep.subr.bf16.mxu1 %v12582_v21 }
0x1210   : > { %6435 = vmatmul.mubr.bf16.vlgmr.msra.gmra.mxu0 %v6290_v32  ;;  %v12589_v32 = vld [vmem:[%s18564_s1 + $0x288] ss:$8 sps:$4 sm:$0xff]  }
0x1211   : > { %6444 = vmatprep.mubr.bf16.mxu0 %v13202_v42 }
0x1212   : > { %10917 = vmatpush3.bf16.msra.mxu1 %v12583_v57 }
0x1213   : > { %10918 = vmatprep.subr.bf16.mxu1 %v12584_v58 }
0x1216   : > { %10919 = vmatpush3.bf16.msra.mxu1 %v12585_v54 }
0x1217   : > { %10920 = vmatprep.subr.bf16.mxu1 %v12586_v7 }
0x1218   : > { %6445 = vmatmul.mubr.bf16.gmra.mxu0 %v6295_v44 }
0x1219   : > { %11536 = vmatprep.mubr.msk.bf16.mxu0 %vm13204_vm4, %v13203_v16 }
0x121a   : > { %10921 = vmatpush3.bf16.msra.mxu1 %v12587_v52 }
0x121b   : > { %10922 = vmatprep.subr.bf16.mxu1 %v12588_v31 }
0x121e   : > { %10923 = vmatpush3.bf16.msra.mxu1 %v12589_v32 }
0x121f   : > { %6631 = vmatprep.subr.bf16.mxu1 %v12590_v0 }
0x1270   : > { %v10868_v62 = vpop.f32.mrf.mxu0 }
0x1272   : > { %v10869_v34 = vpop.f32.mrf.mxu0 }
0x1273   : > { %v10870_v23 = vadd.f32 %v10869_v34, %v10868_v62 }
0x1274   : > { %v10871_v6 = vpop.f32.mrf.mxu0 }
0x1275   : > { %v6161_v36 = vadd.f32 %v10870_v23, %v14988_v11 }
0x1276   : > { %v10872_v26 = vpop.f32.mrf.mxu0 }
0x1277   : > { %v10873_v59 = vadd.f32 %v10872_v26, %v10871_v6 }
0x1278   : > { %v10874_v45 = vpop.f32.mrf.mxu0 }
0x1279   : > { %v6164_v5 = vadd.f32 %v10873_v59, %v14988_v11 }
0x127a   : > { %v10875_v38 = vpop.f32.mrf.mxu0 }
0x127b   : > { %v10876_v3 = vadd.f32 %v10875_v38, %v10874_v45 }
0x127c   : > { %v10877_v12 = vpop.f32.mrf.mxu0 }
0x127d   : > { %v6169_v18 = vadd.f32 %v10876_v3, %v14988_v11 }
0x127e   : > { %v10878_v33 = vpop.f32.mrf.mxu0 }
0x127f   : > { %v10879_v56 = vadd.f32 %v10878_v33, %v10877_v12 }
0x1280   : > { %v10896_v40 = vpop.f32.mrf.mxu1 }
0x1281   : > { %v6172_v61 = vadd.f32 %v10879_v56, %v14988_v11 }
0x1282   : > { %v10897_v41 = vpop.f32.mrf.mxu1 }
0x1283   : > { %v10898_v47 = vadd.f32 %v10897_v41, %v10896_v40 }
0x1284   : > { %v10899_v63 = vpop.f32.mrf.mxu1 }
0x1285   : > { %v6210_v13 = vadd.f32 %v10898_v47, %v6161_v36 }
0x1286   : > { %v10900_v1 = vpop.f32.mrf.mxu1 }
0x1287   : > { %12120 = vtanh.f32 %v6210_v13  ;;  %v10901_v8 = vadd.f32 %v10900_v1, %v10899_v63 }
0x1288   : > { %v10902_v48 = vpop.f32.mrf.mxu1 }
0x1289   : > { %v6213_v4 = vadd.f32 %v10901_v8, %v6164_v5 }
0x128a   : > { %v10903_v15 = vpop.f32.mrf.mxu1 }
0x128b   : > { %12122 = vtanh.f32 %v6213_v4  ;;  %v10904_v9 = vadd.f32 %v10903_v15, %v10902_v48 }
0x128c   : > { %v10905_v14 = vpop.f32.mrf.mxu1 }
0x128d   : > { %v6218_v50 = vadd.f32 %v10904_v9, %v6169_v18 }
0x128e   : > { %v10906_v49 = vpop.f32.mrf.mxu1 }
0x128f   : > { %12124 = vtanh.f32 %v6218_v50  ;;  %v10907_v10 = vadd.f32 %v10906_v49, %v10905_v14 }
0x1291   : > { %v6221_v24 = vadd.f32 %v10907_v10, %v6172_v61 }
0x1293   : > { %12126 = vtanh.f32 %v6221_v24 }
0x1294   : > { %v12121_v22 = vpop.eup %12120 }
0x1295   : > { %10301 = vst [vmem:[%s14998_s14 + $0x20] sm:$0xff] %v12121_v22 }
0x1298   : > { %v12123_v28 = vpop.eup %12122 }
0x1299   : > { %10302 = vst [vmem:[%s14998_s14 + $0x28] sm:$0xff] %v12123_v28 }
0x129c   : > { %v12125_v29 = vpop.eup %12124 }
0x129d   : > { %10303 = vst [vmem:[%s14998_s14 + $0x30] sm:$0xff] %v12125_v29 }
0x12a0   : > { %v12127_v30 = vpop.eup %12126 }
0x12a1   : > { %10304 = vst [vmem:[%s14998_s14 + $0x38] sm:$0xf] %v12127_v30 }
0x12b0   : > { %v6330_v35 = vpop.f32.mrf.mxu0 }
0x12b1   : > { %v6331_v31 = vadd.f32 %v6330_v35, %v13611_v25 }
0x12b2   : > { %v6332_v43 = vpop.f32.mrf.mxu0 }
0x12b3   : > { %v6333_v62 = vadd.f32 %v6332_v43, %v13614_v27 }
0x12b4   : > { %v6334_v19 = vpop.f32.mrf.mxu0 }
0x12b5   : > { %v6335_v26 = vadd.f32 %v6334_v19, %v13611_v25 }
0x12b6   : > { %v6336_v21 = vpop.f32.mrf.mxu0 }
0x12b7   : > { %v6337_v38 = vadd.f32 %v6336_v21, %v13614_v27 }
0x12b8   : > { %v6340_v57 = vpop.f32.mrf.mxu0 }
0x12b9   : > { %v6341_v36 = vadd.f32 %v6340_v57, %v13611_v25 }
0x12ba   : > { %v6342_v44 = vpop.f32.mrf.mxu0 }
0x12bb   : > { %v6343_v13 = vadd.f32 %v6342_v44, %v13614_v27  ;;  %v12591_v44 = vld [vmem:[%s18564_s1 + $0x408] ss:$8 sps:$4 sm:$0xff]  }
0x12bc   : > { %v6344_v7 = vpop.f32.mrf.mxu0 }
0x12bd   : > { %v6345_v56 = vadd.f32 %v6344_v7, %v13611_v25 }
0x12be   : > { %v6346_v32 = vpop.f32.mrf.mxu0 }
0x12bf   : > { %v6347_v49 = vadd.f32 %v6346_v32, %v13614_v27 }
0x12c0   : > { %v6383_v20 = vpop.f32.mrf.mxu1 }
0x12c1   : > { %v6384_v34 = vadd.f32 %v6383_v20, %v6331_v31  ;;  %v12593_v31 = vld [vmem:[%s18564_s1 + $0x3f8] ss:$8 sps:$4 sm:$0xff]  }
0x12c2   : > { %v6385_v58 = vpop.f32.mrf.mxu1 }
0x12c3   : > { %v6386_v45 = vadd.f32 %v6385_v58, %v6333_v62  ;;  %v12595_v62 = vld [vmem:[%s18564_s1 + $0x3e8] ss:$8 sps:$4 sm:$0xff]  }
0x12c4   : > { %v6387_v54 = vpop.f32.mrf.mxu1 }
0x12c5   : > { %v6388_v59 = vadd.f32 %v6387_v54, %v6335_v26  ;;  %v12592_v54 = vld [vmem:[%s18564_s1 + $0x3fc] ss:$8 sps:$4 sm:$0xff]   ;;  %v12598_v26 = vld [vmem:[%s18564_s1 + $0x3cc] ss:$8 sps:$4 sm:$0xff]  }
0x12c6   : > { %v6389_v52 = vpop.f32.mrf.mxu1 }
0x12c7   : > { %v6390_v1 = vadd.f32 %v6389_v52, %v6337_v38  ;;  %v12601_v38 = vld [vmem:[%s18564_s1 + $0x3b8] ss:$8 sps:$4 sm:$0xff]  }
0x12c8   : > { %v6393_v0 = vpop.f32.mrf.mxu1 }
0x12c9   : > { %v6394_v48 = vadd.f32 %v6393_v0, %v6341_v36  ;;  %v12594_v0 = vld [vmem:[%s18564_s1 + $0x3ec] ss:$8 sps:$4 sm:$0xff]   ;;  %v12604_v36 = vld [vmem:[%s18564_s1 + $0x39c] ss:$8 sps:$4 sm:$0xff]  }
0x12ca   : > { %v6395_v40 = vpop.f32.mrf.mxu1 }
0x12cb   : > { %v6396_v9 = vadd.f32 %v6395_v40, %v6343_v13  ;;  %v12602_v40 = vld [vmem:[%s18564_s1 + $0x3ac] ss:$8 sps:$4 sm:$0xff]   ;;  %v12609_v13 = vld [vmem:[%s18564_s1 + $0x478] ss:$8 sps:$4 sm:$0xff]  }
0x12cc   : > { %v6397_v8 = vpop.f32.mrf.mxu1 }
0x12cd   : > { %v6398_v24 = vadd.f32 %v6397_v8, %v6345_v56  ;;  %v12613_v8 = vld [vmem:[%s18564_s1 + $0x458] ss:$8 sps:$4 sm:$0xff]   ;;  %v12619_v56 = vld [vmem:[%s18564_s1 + $0x428] ss:$8 sps:$4 sm:$0xff]  }
0x12ce   : > { %v6399_v61 = vpop.f32.mrf.mxu1 }
0x12cf   : > { %v6400_v43 = vadd.f32 %v6399_v61, %v6347_v49 }
0x12d0   : > { %v6436_v6 = vpop.f32.mrf.mxu0 }
0x12d1   : > { %v6437_v23 = vadd.f32 %v6436_v6, %v6384_v34  ;;  %v12596_v34 = vld [vmem:[%s18564_s1 + $0x3dc] ss:$8 sps:$4 sm:$0xff]   ;;  %v12597_v6 = vld [vmem:[%s18564_s1 + $0x3d8] ss:$8 sps:$4 sm:$0xff]  }
0x12d2   : > { %v6438_v41 = vpop.f32.mrf.mxu0 }
0x12d3   : > { %v6455_v47 = vmax.f32 %v6437_v23, 0.0  ;;  %v6439_v12 = vadd.f32 %v6438_v41, %v6386_v45  ;;  %v12599_v45 = vld [vmem:[%s18564_s1 + $0x3c8] ss:$8 sps:$4 sm:$0xff]   ;;  %v12600_v23 = vld [vmem:[%s18564_s1 + $0x3bc] ss:$8 sps:$4 sm:$0xff]  }
0x12d4   : > { %v6440_v63 = vpop.f32.mrf.mxu0  ;;  %v12603_v41 = vld [vmem:[%s18564_s1 + $0x3a8] ss:$8 sps:$4 sm:$0xff]  }
0x12d5   : > { %10309 = vst [vmem:[%s13624_s20 + $0x80] sm:$0xff] %v6455_v47  ;;  %v6456_v5 = vmax.f32 %v6439_v12, 0.0  ;;  %v6441_v3 = vadd.f32 %v6440_v63, %v6388_v59  ;;  %v12605_v59 = vld [vmem:[%s18564_s1 + $0x398] ss:$8 sps:$4 sm:$0xff]   ;;  %v12607_v12 = vld [vmem:[%s18564_s1 + $0x488] ss:$8 sps:$4 sm:$0xff]  }
0x12d6   : > { %v6442_v33 = vpop.f32.mrf.mxu0  ;;  %v12608_v63 = vld [vmem:[%s18564_s1 + $0x47c] ss:$8 sps:$4 sm:$0xff]  }
0x12d7   : > { %10310 = vst [vmem:[%s13624_s20 + $0x88] sm:$0xff] %v6456_v5  ;;  %v6457_v4 = vmax.f32 %v6441_v3, 0.0  ;;  %v6443_v15 = vadd.f32 %v6442_v33, %v6390_v1  ;;  %v12610_v1 = vld [vmem:[%s18564_s1 + $0x46c] ss:$8 sps:$4 sm:$0xff]   ;;  %v12612_v3 = vld [vmem:[%s18564_s1 + $0x45c] ss:$8 sps:$4 sm:$0xff]  }
0x12d8   : > { %v6446_v18 = vpop.f32.mrf.mxu0  ;;  %v12614_v33 = vld [vmem:[%s18564_s1 + $0x44c] ss:$8 sps:$4 sm:$0xff]  }
0x12d9   : > { %10311 = vst [vmem:[%s13624_s20 + $0x90] sm:$0xff] %v6457_v4  ;;  %v6458_v14 = vmax.f32 %v6443_v15, 0.0  ;;  %v6447_v50 = vadd.f32 %v6446_v18, %v6394_v48  ;;  %v6472_v30 = vpack.c.bf16 %v6457_v4, %v6455_v47  ;;  %v12606_v47 = vld [vmem:[%s18564_s1 + $0x48c] ss:$8 sps:$4 sm:$0xff]   ;;  %v12615_v48 = vld [vmem:[%s18564_s1 + $0x448] ss:$8 sps:$4 sm:$0xff]  }
0x12da   : > { %v6448_v10 = vpop.f32.mrf.mxu0  ;;  %v12616_v4 = vld [vmem:[%s18564_s1 + $0x43c] ss:$8 sps:$4 sm:$0xff]   ;;  %v12617_v15 = vld [vmem:[%s18564_s1 + $0x438] ss:$8 sps:$4 sm:$0xff]   ;;  %v12618_v18 = vld [vmem:[%s18564_s1 + $0x42c] ss:$8 sps:$4 sm:$0xff]  }
0x12db   : > { %10312 = vst [vmem:[%s13624_s20 + $0x98] sm:$0xff] %v6458_v14  ;;  %v6459_v22 = vmax.f32 %v6447_v50, 0.0  ;;  %v6449_v28 = vadd.f32 %v6448_v10, %v6396_v9  ;;  %v6473_v29 = vpack.c.bf16 %v6458_v14, %v6456_v5  ;;  %v12611_v5 = vld [vmem:[%s18564_s1 + $0x468] ss:$8 sps:$4 sm:$0xff]   ;;  %v12620_v9 = vld [vmem:[%s18564_s1 + $0x41c] ss:$8 sps:$4 sm:$0xff]  }
0x12dc   : > { %v6450_v35 = vpop.f32.mrf.mxu0  ;;  %v12621_v14 = vld [vmem:[%s18564_s1 + $0x418] ss:$8 sps:$4 sm:$0xff]   ;;  %v12622_v50 = vld [vmem:[%s18564_s1 + $0x60c] ss:$8 sps:$4 sm:$0xff]  }
0x12dd   : > { %10313 = vst [vmem:[%s13624_s20 + $0xa0] sm:$0xff] %v6459_v22  ;;  %v6460_v19 = vmax.f32 %v6449_v28, 0.0  ;;  %v6451_v21 = vadd.f32 %v6450_v35, %v6398_v24  ;;  %6508 = vmatprep.mubr.bf16.mxu1 %v6473_v29 }
0x12de   : > { %v6452_v20 = vpop.f32.mrf.mxu0  ;;  %6509 = vmatmul.mubr.bf16.vlgmr.msra.gmra.mxu1 %v6472_v30 }
0x12df   : > { %10314 = vst [vmem:[%s13624_s20 + $0xa8] sm:$0xff] %v6460_v19  ;;  %v6461_v57 = vmax.f32 %v6451_v21, 0.0  ;;  %v6453_v58 = vadd.f32 %v6452_v20, %v6400_v43  ;;  %6632 = vmatpush1.bf16.msra.mxu1 %v12591_v44  ;;  %v12623_v20 = vld [vmem:[%s18564_s1 + $0x388] ss:$8 sps:$4 sm:$0x7f]  }
0x12e0   : > { %6633 = vmatprep.subr.bf16.mxu1 %v12592_v54  ;;  %v12626_v44 = vld [vmem:[%s18564_s1 + $0x4fc] ss:$8 sps:$4 sm:$0xff]   ;;  %v12627_v54 = vld [vmem:[%s18564_s1 + $0x4f8] ss:$8 sps:$4 sm:$0xff]  }
0x12e1   : > { %10315 = vst [vmem:[%s13624_s20 + $0xb0] sm:$0xf] %v6461_v57  ;;  %v6462_v7 = vmax.f32 %v6453_v58, 0.0  ;;  %v6474_v32 = vpack.c.bf16 %v6461_v57, %v6459_v22  ;;  %v12624_v57 = vld [vmem:[%s18564_s1 + $0x50c] ss:$8 sps:$4 sm:$0xff]  }
0x12e2   : > { %v12625_v58 = vld [vmem:[%s18564_s1 + $0x508] ss:$8 sps:$4 sm:$0xff]  }
0x12e3   : > { %10316 = vst [vmem:[%s13624_s20 + $0xb8] sm:$0xf] %v6462_v7  ;;  %v6475_v52 = vpack.c.bf16 %v6462_v7, %v6460_v19  ;;  %6634 = vmatpush1.bf16.msra.mxu1 %v12593_v31  ;;  %v12628_v7 = vld [vmem:[%s18564_s1 + $0x4ec] ss:$8 sps:$4 sm:$0xff]   ;;  %v12630_v31 = vld [vmem:[%s18564_s1 + $0x4dc] ss:$8 sps:$4 sm:$0xff]  }
0x12e4   : > { %6635 = vmatprep.subr.bf16.mxu1 %v12594_v0  ;;  %v12632_v0 = vld [vmem:[%s18564_s1 + $0x4cc] ss:$8 sps:$4 sm:$0xff]  }
0x12e5   : > { %6516 = vmatprep.mubr.bf16.mxu1 %v6475_v52  ;;  %v12629_v52 = vld [vmem:[%s18564_s1 + $0x4e8] ss:$8 sps:$4 sm:$0xff]  }
0x12e6   : > { %6517 = vmatmul.mubr.bf16.gmra.mxu1 %v6474_v32  ;;  %v12631_v32 = vld [vmem:[%s18564_s1 + $0x4d8] ss:$8 sps:$4 sm:$0xff]  }
0x12e7   : > { %6636 = vmatpush1.bf16.msra.mxu1 %v12595_v62  ;;  %v12633_v62 = vld [vmem:[%s18564_s1 + $0x4c8] ss:$8 sps:$4 sm:$0xff]  }
0x12e8   : > { %6637 = vmatprep.subr.bf16.mxu1 %v12596_v34  ;;  %v12634_v34 = vld [vmem:[%s18564_s1 + $0x4bc] ss:$8 sps:$4 sm:$0xff]  }
0x12eb   : > { %6638 = vmatpush1.bf16.msra.mxu1 %v12597_v6  ;;  %v12635_v6 = vld [vmem:[%s18564_s1 + $0x4b8] ss:$8 sps:$4 sm:$0xff]  }
0x12ec   : > { %6639 = vmatprep.subr.bf16.mxu1 %v12598_v26  ;;  %v12636_v26 = vld [vmem:[%s18564_s1 + $0x4ac] ss:$8 sps:$4 sm:$0xff]  }
0x12ef   : > { %6640 = vmatpush1.bf16.msra.mxu1 %v12599_v45  ;;  %v12637_v45 = vld [vmem:[%s18564_s1 + $0x4a8] ss:$8 sps:$4 sm:$0xff]  }
0x12f0   : > { %6641 = vmatprep.subr.bf16.mxu1 %v12600_v23  ;;  %v12638_v23 = vld [vmem:[%s18564_s1 + $0x49c] ss:$8 sps:$4 sm:$0xff]  }
0x12f3   : > { %6642 = vmatpush1.bf16.msra.mxu1 %v12601_v38  ;;  %v12639_v38 = vld [vmem:[%s18564_s1 + $0x498] ss:$8 sps:$4 sm:$0xff]  }
0x12f4   : > { %6643 = vmatprep.subr.bf16.mxu1 %v12602_v40  ;;  %v12640_v40 = vld [vmem:[%s18564_s1 + $0x58c] ss:$8 sps:$4 sm:$0xff]  }
0x12f7   : > { %6644 = vmatpush1.bf16.msra.mxu1 %v12603_v41  ;;  %v12641_v41 = vld [vmem:[%s18564_s1 + $0x588] ss:$8 sps:$4 sm:$0xff]  }
0x12f8   : > { %6645 = vmatprep.subr.bf16.mxu1 %v12604_v36  ;;  %v12642_v36 = vld [vmem:[%s18564_s1 + $0x57c] ss:$8 sps:$4 sm:$0xff]  }
0x12fb   : > { %6646 = vmatpush1.bf16.msra.mxu1 %v12605_v59  ;;  %v12643_v59 = vld [vmem:[%s18564_s1 + $0x578] ss:$8 sps:$4 sm:$0xff]  }
0x12fc   : > { %6647 = vmatprep.subr.bf16.mxu1 %v12606_v47  ;;  %v12644_v47 = vld [vmem:[%s18564_s1 + $0x56c] ss:$8 sps:$4 sm:$0xff]  }
0x12ff   : > { %6648 = vmatpush2.bf16.msra.mxu1 %v12607_v12  ;;  %v12645_v12 = vld [vmem:[%s18564_s1 + $0x568] ss:$8 sps:$4 sm:$0xff]  }
0x1300   : > { %6649 = vmatprep.subr.bf16.mxu1 %v12608_v63  ;;  %v12646_v63 = vld [vmem:[%s18564_s1 + $0x55c] ss:$8 sps:$4 sm:$0xff]  }
0x1303   : > { %6650 = vmatpush2.bf16.msra.mxu1 %v12609_v13  ;;  %v12647_v13 = vld [vmem:[%s18564_s1 + $0x558] ss:$8 sps:$4 sm:$0xff]  }
0x1304   : > { %6651 = vmatprep.subr.bf16.mxu1 %v12610_v1  ;;  %v12648_v1 = vld [vmem:[%s18564_s1 + $0x54c] ss:$8 sps:$4 sm:$0xff]  }
0x1307   : > { %6652 = vmatpush2.bf16.msra.mxu1 %v12611_v5  ;;  %v12649_v5 = vld [vmem:[%s18564_s1 + $0x548] ss:$8 sps:$4 sm:$0xff]  }
0x1308   : > { %6653 = vmatprep.subr.bf16.mxu1 %v12612_v3  ;;  %v12650_v3 = vld [vmem:[%s18564_s1 + $0x53c] ss:$8 sps:$4 sm:$0xff]  }
0x130b   : > { %6654 = vmatpush2.bf16.msra.mxu1 %v12613_v8  ;;  %v12651_v8 = vld [vmem:[%s18564_s1 + $0x538] ss:$8 sps:$4 sm:$0xff]  }
0x130c   : > { %6655 = vmatprep.subr.bf16.mxu1 %v12614_v33  ;;  %v12652_v33 = vld [vmem:[%s18564_s1 + $0x52c] ss:$8 sps:$4 sm:$0xff]  }
0x130f   : > { %6656 = vmatpush2.bf16.msra.mxu1 %v12615_v48  ;;  %v12653_v48 = vld [vmem:[%s18564_s1 + $0x528] ss:$8 sps:$4 sm:$0xff]  }
0x1310   : > { %6657 = vmatprep.subr.bf16.mxu1 %v12616_v4  ;;  %v12654_v4 = vld [vmem:[%s18564_s1 + $0x51c] ss:$8 sps:$4 sm:$0xff]  }
0x1313   : > { %6658 = vmatpush2.bf16.msra.mxu1 %v12617_v15  ;;  %v12655_v15 = vld [vmem:[%s18564_s1 + $0x518] ss:$8 sps:$4 sm:$0xff]  }
0x1314   : > { %6659 = vmatprep.subr.bf16.mxu1 %v12618_v18  ;;  %v12656_v18 = vld [vmem:[%s18564_s1 + $0x710] ss:$8 sps:$4 sm:$0xff]  }
0x1317   : > { %6660 = vmatpush2.bf16.msra.mxu1 %v12619_v56 }
0x1318   : > { %6661 = vmatprep.subr.bf16.mxu1 %v12620_v9 }
0x131b   : > { %6662 = vmatpush2.bf16.msra.mxu1 %v12621_v14 }
0x131c   : > { %6717 = vmatprep.subr.bf16.mxu1 %v12622_v50 }
0x139e   : > { %v10924_v49 = vpop.f32.mrf.mxu1 }
0x13a0   : > { %v10925_v61 = vpop.f32.mrf.mxu1 }
0x13a1   : > { %v10926_v21 = vadd.f32 %v10925_v61, %v10924_v49 }
0x13a2   : > { %v10927_v10 = vpop.f32.mrf.mxu1 }
0x13a4   : > { %v10928_v24 = vpop.f32.mrf.mxu1 }
0x13a5   : > { %v10929_v19 = vadd.f32 %v10928_v24, %v10927_v10 }
0x13a6   : > { %v10930_v22 = vpop.f32.mrf.mxu1 }
0x13a8   : > { %v10931_v28 = vpop.f32.mrf.mxu1 }
0x13a9   : > { %v10932_v43 = vadd.f32 %v10931_v28, %v10930_v22 }
0x13aa   : > { %v10933_v29 = vpop.f32.mrf.mxu1 }
0x13ac   : > { %v10934_v30 = vpop.f32.mrf.mxu1 }
0x13ad   : > { %v10935_v35 = vadd.f32 %v10934_v30, %v10933_v29 }
0x13af   : > { %11529 = vmatpush3.msk.msra.mxu0 %vm972_vm3, %v10935_v35 }
0x13b0   : > { %11530 = vmatprep.subr.mxu0 %v13203_v16 }
0x13b1   : > { %11531 = vmatpush3.msra.mxu0 %v10932_v43 }
0x13b2   : > { %11532 = vmatprep.subr.mxu0 %v13203_v16 }
0x13b3   : > { %11533 = vmatpush3.msra.mxu0 %v10929_v19 }
0x13b4   : > { %11534 = vmatprep.subr.mxu0 %v13203_v16 }
0x13b5   : > { %11535 = vmatpush3.msra.mxu0 %v10926_v21 }
0x13b6   : > { %11537 = vmatmul.mubr.msk.bf16.vlgmr.msra.gmra.mxu0 %vm1731_vm5, %v12623_v20  ;;  %6674 = vmatprep.subr.bf16.mxu0 %v12624_v57  ;;  %v12657_v57 = vld [vmem:[%s18564_s1 + $0x608] ss:$8 sps:$4 sm:$0xff]  }
0x13b7   : > { %6675 = vmatpush1.bf16.msra.mxu0 %v12625_v58  ;;  %v12658_v58 = vld [vmem:[%s18564_s1 + $0x5fc] ss:$8 sps:$4 sm:$0xff]  }
0x13b8   : > { %6676 = vmatprep.subr.bf16.mxu0 %v12626_v44  ;;  %v12659_v44 = vld [vmem:[%s18564_s1 + $0x690] ss:$8 sps:$4 sm:$0xff]  }
0x13bb   : > { %6677 = vmatpush1.bf16.msra.mxu0 %v12627_v54  ;;  %v12660_v54 = vld [vmem:[%s18564_s1 + $0x700] ss:$8 sps:$4 sm:$0xff]  }
0x13bc   : > { %6678 = vmatprep.subr.bf16.mxu0 %v12628_v7  ;;  %v12661_v7 = vld [vmem:[%s18564_s1 + $0x5f8] ss:$8 sps:$4 sm:$0xff]  }
0x13bf   : > { %6679 = vmatpush1.bf16.msra.mxu0 %v12629_v52  ;;  %v12662_v52 = vld [vmem:[%s18564_s1 + $0x5ec] ss:$8 sps:$4 sm:$0xff]  }
0x13c0   : > { %6680 = vmatprep.subr.bf16.mxu0 %v12630_v31  ;;  %v12663_v31 = vld [vmem:[%s18564_s1 + $0x680] ss:$8 sps:$4 sm:$0xff]  }
0x13c3   : > { %6681 = vmatpush1.bf16.msra.mxu0 %v12631_v32  ;;  %v12664_v32 = vld [vmem:[%s18564_s1 + $0x6f0] ss:$8 sps:$4 sm:$0xff]  }
0x13c4   : > { %6682 = vmatprep.subr.bf16.mxu0 %v12632_v0  ;;  %v12665_v0 = vld [vmem:[%s18564_s1 + $0x5e8] ss:$8 sps:$4 sm:$0xff]  }
0x13c7   : > { %6683 = vmatpush1.bf16.msra.mxu0 %v12633_v62  ;;  %v12666_v62 = vld [vmem:[%s18564_s1 + $0x5dc] ss:$8 sps:$4 sm:$0xff]  }
0x13c8   : > { %6684 = vmatprep.subr.bf16.mxu0 %v12634_v34  ;;  %v12667_v34 = vld [vmem:[%s18564_s1 + $0x670] ss:$8 sps:$4 sm:$0xff]  }
0x13cb   : > { %6685 = vmatpush1.bf16.msra.mxu0 %v12635_v6  ;;  %v12668_v6 = vld [vmem:[%s18564_s1 + $0x6e0] ss:$8 sps:$4 sm:$0xff]  }
0x13cc   : > { %6686 = vmatprep.subr.bf16.mxu0 %v12636_v26  ;;  %v12669_v26 = vld [vmem:[%s18564_s1 + $0x5d8] ss:$8 sps:$4 sm:$0xff]  }
0x13cf   : > { %6687 = vmatpush1.bf16.msra.mxu0 %v12637_v45  ;;  %v12670_v45 = vld [vmem:[%s18564_s1 + $0x5cc] ss:$8 sps:$4 sm:$0xff]  }
0x13d0   : > { %6688 = vmatprep.subr.bf16.mxu0 %v12638_v23  ;;  %v12671_v23 = vld [vmem:[%s18564_s1 + $0x660] ss:$8 sps:$4 sm:$0xff]  }
0x13d3   : > { %6689 = vmatpush1.bf16.msra.mxu0 %v12639_v38  ;;  %v12672_v38 = vld [vmem:[%s18564_s1 + $0x6d0] ss:$8 sps:$4 sm:$0xff]  }
0x13d4   : > { %6690 = vmatprep.subr.bf16.mxu0 %v12640_v40  ;;  %v12673_v40 = vld [vmem:[%s18564_s1 + $0x5c8] ss:$8 sps:$4 sm:$0xff]  }
0x13d7   : > { %6691 = vmatpush2.bf16.msra.mxu0 %v12641_v41  ;;  %v12674_v41 = vld [vmem:[%s18564_s1 + $0x5bc] ss:$8 sps:$4 sm:$0xff]  }
0x13d8   : > { %6692 = vmatprep.subr.bf16.mxu0 %v12642_v36  ;;  %v12675_v36 = vld [vmem:[%s18564_s1 + $0x650] ss:$8 sps:$4 sm:$0xff]  }
0x13db   : > { %6693 = vmatpush2.bf16.msra.mxu0 %v12643_v59  ;;  %v12676_v59 = vld [vmem:[%s18564_s1 + $0x6c0] ss:$8 sps:$4 sm:$0xff]  }
0x13dc   : > { %6694 = vmatprep.subr.bf16.mxu0 %v12644_v47  ;;  %v12677_v47 = vld [vmem:[%s18564_s1 + $0x5b8] ss:$8 sps:$4 sm:$0xff]  }
0x13df   : > { %6695 = vmatpush2.bf16.msra.mxu0 %v12645_v12  ;;  %v12678_v12 = vld [vmem:[%s18564_s1 + $0x5ac] ss:$8 sps:$4 sm:$0xff]  }
0x13e0   : > { %6696 = vmatprep.subr.bf16.mxu0 %v12646_v63 }
0x13e3   : > { %6697 = vmatpush2.bf16.msra.mxu0 %v12647_v13  ;;  %v12679_v13 = vld [vmem:[%s18564_s1 + $0x640] ss:$8 sps:$4 sm:$0xff]  }
0x13e4   : > { %6698 = vmatprep.subr.bf16.mxu0 %v12648_v1  ;;  %v12680_v1 = vld [vmem:[%s18564_s1 + $0x6b0] ss:$8 sps:$4 sm:$0xff]  }
0x13e7   : > { %6699 = vmatpush2.bf16.msra.mxu0 %v12649_v5 }
0x13e8   : > { %6700 = vmatprep.subr.bf16.mxu0 %v12650_v3  ;;  %v12681_v3 = vld [vmem:[%s18564_s1 + $0x5a8] ss:$8 sps:$4 sm:$0xff]  }
0x13eb   : > { %6701 = vmatpush2.bf16.msra.mxu0 %v12651_v8  ;;  %v12682_v8 = vld [vmem:[%s18564_s1 + $0x59c] ss:$8 sps:$4 sm:$0xff]  }
0x13ec   : > { %6702 = vmatprep.subr.bf16.mxu0 %v12652_v33 }
0x13ef   : > { %6703 = vmatpush2.bf16.msra.mxu0 %v12653_v48  ;;  %v12683_v48 = vld [vmem:[%s18564_s1 + $0x630] ss:$8 sps:$4 sm:$0xff]  }
0x13f0   : > { %6704 = vmatprep.subr.bf16.mxu0 %v12654_v4  ;;  %v12684_v4 = vld [vmem:[%s18564_s1 + $0x6a0] ss:$8 sps:$4 sm:$0xff]  }
0x13f3   : > { %6705 = vmatpush2.bf16.msra.mxu0 %v12655_v15  ;;  %v12685_v15 = vld [vmem:[%s18564_s1 + $0x598] ss:$8 sps:$4 sm:$0xff]  }
0x13f4   : > { %10941 = vmatprep.subr.bf16.mxu0 %v12656_v18 }
0x1476   : > { %v16534_v56 = vpop.f32.mrf.mxu0 }
0x1477   : > { %10319 = vst [vmem:[%s13850_s19 + $0x20] sm:$0xff] %v16534_v56  ;;  %v6611_v50 = vrot.slane %v16534_v56, 2  ;;  %v6606_v61 = vrot.slane %v16534_v56, 1  ;;  %v6616_v22 = vrot.slane %v16534_v56, 3  ;;  %v6621_v5 = vrot.slane %v16534_v56, 4 }
0x1478   : > { %v11538_v9 = vpop.f32.mrf.mxu0 }
0x147a   : > { %v16538_v14 = vpop.f32.mrf.mxu0 }
0x147b   : > { %10320 = vst [vmem:[%s13850_s19 + $0x28] sm:$0x3f] %v16538_v14  ;;  %v6612_v49 = vrot.slane %v16538_v14, 2  ;;  %v6607_v10 = vrot.slane %v16538_v14, 1  ;;  %v6617_v28 = vrot.slane %v16538_v14, 3  ;;  %v6626_v21 = vpack.c.bf16 %v16538_v14, %v16534_v56 }
0x147c   : > { %v11539_v24 = vpop.f32.mrf.mxu0  ;;  %v6622_v63 = vrot.slane %v16538_v14, 4  ;;  %v12686_v56 = vld [vmem:[%s18564_s1 + $0x620] ss:$8 sps:$4 sm:$0xff]  }
0x147d   : > { %v6608_v29 = vsel %vm936_vm0, %v6606_v61, %v6607_v10  ;;  %v6613_v30 = vsel %vm948_vm2, %v6611_v50, %v6612_v49  ;;  %v6618_v43 = vsel %vm960_vm1, %v6616_v22, %v6617_v28 }
0x147e   : > { %v6627_v35 = vpack.c.bf16 %v6607_v10, %v6608_v29  ;;  %v6628_v19 = vpack.c.bf16 %v6612_v49, %v6613_v30  ;;  %v6629_v20 = vpack.c.bf16 %v6617_v28, %v6618_v43  ;;  %v6623_v33 = vsel %vm972_vm3, %v6621_v5, %v6622_v63  ;;  %v12690_v5 = vld [vmem:[%s18564_s1 + $0x738] ss:$0 sps:$4 sm:$0x11]  }
0x147f   : > { %v6630_v18 = vpack.c.bf16 %v6622_v63, %v6623_v33  ;;  %v12689_v63 = vld [vmem:[%s18564_s1 + $0x728] ss:$8 sps:$4 sm:$0xff]   ;;  %v12692_v33 = vld [vmem:[%s18564_s1 + $0x7cc] ss:$8 sps:$4 sm:$0xff]  }
0x1480   : > { %6663 = vmatprep.mubr.bf16.mxu1 %v6627_v35  ;;  %6706 = vmatprep.mubr.bf16.mxu0 %v6629_v20 }
0x1481   : > { %6664 = vmatmul.mubr.bf16.vlgmr.msra.gmra.mxu1 %v6626_v21  ;;  %6707 = vmatmul.mubr.bf16.vlgmr.msra.gmra.mxu0 %v6628_v19 }
0x1482   : > { %6718 = vmatpush1.bf16.msra.mxu1 %v12657_v57  ;;  %6749 = vmatprep.mubr.bf16.mxu1 %v13202_v42 }
0x1483   : > { %6719 = vmatprep.subr.bf16.mxu1 %v12658_v58  ;;  %10942 = vmatpush3.bf16.msra.mxu0 %v12659_v44 }
0x1484   : > { %10943 = vmatprep.subr.bf16.mxu0 %v12660_v54 }
0x1486   : > { %6720 = vmatpush1.bf16.msra.mxu1 %v12661_v7 }
0x1487   : > { %6721 = vmatprep.subr.bf16.mxu1 %v12662_v52  ;;  %10944 = vmatpush3.bf16.msra.mxu0 %v12663_v31 }
0x1488   : > { %10945 = vmatprep.subr.bf16.mxu0 %v12664_v32 }
0x148a   : > { %6722 = vmatpush1.bf16.msra.mxu1 %v12665_v0 }
0x148b   : > { %6723 = vmatprep.subr.bf16.mxu1 %v12666_v62  ;;  %10946 = vmatpush3.bf16.msra.mxu0 %v12667_v34 }
0x148c   : > { %10947 = vmatprep.subr.bf16.mxu0 %v12668_v6 }
0x148e   : > { %6724 = vmatpush1.bf16.msra.mxu1 %v12669_v26 }
0x148f   : > { %6725 = vmatprep.subr.bf16.mxu1 %v12670_v45  ;;  %10948 = vmatpush3.bf16.msra.mxu0 %v12671_v23  ;;  %v12687_v23 = vld [vmem:[%s18564_s1 + $0x740] ss:$8 sps:$4 sm:$0xff]  }
0x1490   : > { %10949 = vmatprep.subr.bf16.mxu0 %v12672_v38 }
0x1492   : > { %6726 = vmatpush1.bf16.msra.mxu1 %v12673_v40 }
0x1493   : > { %6727 = vmatprep.subr.bf16.mxu1 %v12674_v41  ;;  %10950 = vmatpush3.bf16.msra.mxu0 %v12675_v36 }
0x1494   : > { %10951 = vmatprep.subr.bf16.mxu0 %v12676_v59 }
0x1496   : > { %6728 = vmatpush1.bf16.msra.mxu1 %v12677_v47 }
0x1497   : > { %6729 = vmatprep.subr.bf16.mxu1 %v12678_v12  ;;  %10952 = vmatpush3.bf16.msra.mxu0 %v12679_v13  ;;  %v12688_v12 = vld [vmem:[%s18564_s1 + $0x720] sm:$0x7] }
0x1498   : > { %10953 = vmatprep.subr.bf16.mxu0 %v12680_v1 }
0x149a   : > { %6730 = vmatpush1.bf16.msra.mxu1 %v12681_v3  ;;  %v12691_v3 = vld [vmem:[%s18564_s1 + $0x750] ss:$0 sps:$4 sm:$0x11]  }
0x149b   : > { %6731 = vmatprep.subr.bf16.mxu1 %v12682_v8  ;;  %10954 = vmatpush3.bf16.msra.mxu0 %v12683_v48  ;;  %v12693_v48 = vld [vmem:[%s18564_s1 + $0x960] ss:$8 sps:$4 sm:$0xff]  }
0x149c   : > { %10955 = vmatprep.subr.bf16.mxu0 %v12684_v4  ;;  %v12694_v4 = vld [vmem:[%s18564_s1 + $0x7c8] ss:$8 sps:$4 sm:$0xff]  }
0x149e   : > { %6732 = vmatpush1.bf16.msra.mxu1 %v12685_v15  ;;  %v12695_v15 = vld [vmem:[%s18564_s1 + $0x8e0] ss:$8 sps:$4 sm:$0xff]  }
0x149f   : > { %11540 = vmatprep.subr.mxu1 %v13203_v16  ;;  %10956 = vmatpush3.bf16.msra.mxu0 %v12686_v56  ;;  %v12696_v56 = vld [vmem:[%s18564_s1 + $0x7bc] ss:$8 sps:$4 sm:$0xff]  }
0x14a1   : > { %6750 = vmatmul.mubr.bf16.vlgmr.msra.gmra.mxu1 %v6630_v18 }
0x14a2   : > { %11544 = vmatprep.mubr.msk.bf16.mxu1 %vm13204_vm4, %v13203_v16 }
0x1541   : > { %v6665_v9 = vpop.f32.mrf.mxu1  ;;  %v6708_v50 = vpop.f32.mrf.mxu0 }
0x1542   : > { %v6666_v61 = vadd.f32 %v6665_v9, %v13959_v37  ;;  %v12697_v9 = vld [vmem:[%s18564_s1 + $0x950] ss:$8 sps:$4 sm:$0xff]  }
0x1543   : > { %v6667_v14 = vpop.f32.mrf.mxu1  ;;  %v6710_v10 = vpop.f32.mrf.mxu0 }
0x1544   : > { %v6668_v24 = vadd.f32 %v6667_v14, %v13962_v39  ;;  %v6709_v28 = vadd.f32 %v6708_v50, %v6666_v61  ;;  %v12698_v14 = vld [vmem:[%s18564_s1 + $0x7b8] ss:$8 sps:$4 sm:$0xff]  }
0x1545   : > { %v6669_v49 = vpop.f32.mrf.mxu1  ;;  %v6712_v30 = vpop.f32.mrf.mxu0  ;;  %v12699_v50 = vld [vmem:[%s18564_s1 + $0x8d0] ss:$8 sps:$4 sm:$0xff]   ;;  %v12701_v61 = vld [vmem:[%s18564_s1 + $0x940] ss:$8 sps:$4 sm:$0xff]  }
0x1546   : > { %v6670_v29 = vadd.f32 %v6669_v49, %v13959_v37  ;;  %v6711_v43 = vadd.f32 %v6710_v10, %v6668_v24  ;;  %v12700_v49 = vld [vmem:[%s18564_s1 + $0x7ac] ss:$8 sps:$4 sm:$0xff]   ;;  %v12702_v10 = vld [vmem:[%s18564_s1 + $0x7a8] ss:$8 sps:$4 sm:$0xff]  }
0x1547   : > { %v6671_v22 = vpop.f32.mrf.mxu1  ;;  %v6714_v54 = vpop.f32.mrf.mxu0  ;;  %v12703_v24 = vld [vmem:[%s18564_s1 + $0x8c0] ss:$8 sps:$4 sm:$0xff]  }
0x1548   : > { %v6672_v19 = vadd.f32 %v6671_v22, %v13962_v39  ;;  %v6713_v57 = vadd.f32 %v6712_v30, %v6670_v29  ;;  %v12704_v22 = vld [vmem:[%s18564_s1 + $0x79c] ss:$8 sps:$4 sm:$0xff]   ;;  %v12706_v29 = vld [vmem:[%s18564_s1 + $0x798] ss:$8 sps:$4 sm:$0xff]  }
0x1549   : > { %v12707_v30 = vld [vmem:[%s18564_s1 + $0x8b0] ss:$8 sps:$4 sm:$0xff]  }
0x154a   : > { %v6715_v52 = vadd.f32 %v6714_v54, %v6672_v19  ;;  %v12710_v19 = vld [vmem:[%s18564_s1 + $0x788] ss:$8 sps:$4 sm:$0xff]   ;;  %v12716_v54 = vld [vmem:[%s18564_s1 + $0x76c] ss:$8 sps:$4 sm:$0xff]  }
0x1561   : > { %v6751_v35 = vpop.f32.mrf.mxu1 }
0x1562   : > { %v6752_v21 = vadd.f32 %v6751_v35, %v6709_v28  ;;  %v12705_v28 = vld [vmem:[%s18564_s1 + $0x930] ss:$8 sps:$4 sm:$0xff]   ;;  %v12708_v35 = vld [vmem:[%s18564_s1 + $0x78c] ss:$8 sps:$4 sm:$0xff]  }
0x1563   : > { %v6753_v20 = vpop.f32.mrf.mxu1 }
0x1564   : > { %v6760_v58 = vmax.f32 %v6752_v21, 0.0  ;;  %v6754_v44 = vadd.f32 %v6753_v20, %v6711_v43  ;;  %v12709_v43 = vld [vmem:[%s18564_s1 + $0x920] ss:$8 sps:$4 sm:$0xff]   ;;  %v12712_v20 = vld [vmem:[%s18564_s1 + $0x77c] ss:$8 sps:$4 sm:$0xff]  }
0x1565   : > { %v6755_v7 = vpop.f32.mrf.mxu1  ;;  %v12711_v21 = vld [vmem:[%s18564_s1 + $0x8a0] ss:$8 sps:$4 sm:$0xff]  }
0x1566   : > { %10321 = vst [vmem:[%s13972_s9 + $0x40] sm:$0xff] %v6760_v58  ;;  %v6761_v31 = vmax.f32 %v6754_v44, 0.0  ;;  %v6756_v32 = vadd.f32 %v6755_v7, %v6713_v57  ;;  %v12713_v57 = vld [vmem:[%s18564_s1 + $0x910] ss:$8 sps:$4 sm:$0xff]   ;;  %v12717_v7 = vld [vmem:[%s18564_s1 + $0x900] ss:$8 sps:$4 sm:$0xff]  }
0x1567   : > { %v6757_v0 = vpop.f32.mrf.mxu1  ;;  %v12715_v44 = vld [vmem:[%s18564_s1 + $0x890] ss:$8 sps:$4 sm:$0xff]  }
0x1568   : > { %10322 = vst [vmem:[%s13972_s9 + $0x48] sm:$0xff] %v6761_v31  ;;  %v6762_v62 = vmax.f32 %v6756_v32, 0.0  ;;  %v6758_v34 = vadd.f32 %v6757_v0, %v6715_v52  ;;  %v12718_v52 = vld [vmem:[%s18564_s1 + $0x768] ss:$8 sps:$4 sm:$0xff]   ;;  %v12720_v32 = vld [vmem:[%s18564_s1 + $0x75c] ss:$8 sps:$4 sm:$0xff]  }
0x1569   : > { %v12721_v0 = vld [vmem:[%s18564_s1 + $0x8f0] ss:$8 sps:$4 sm:$0xff]  }
0x156a   : > { %10323 = vst [vmem:[%s13972_s9 + $0x50] sm:$0x3] %v6762_v62  ;;  %v6763_v6 = vmax.f32 %v6758_v34, 0.0  ;;  %v6769_v45 = vpack.c.bf16 %v6762_v62, %v6760_v58  ;;  %v12714_v58 = vld [vmem:[%s18564_s1 + $0x778] ss:$8 sps:$4 sm:$0xff]  }
0x156b   : > { %v12722_v62 = vld [vmem:[%s18564_s1 + $0x758] ss:$8 sps:$4 sm:$0xff]  }
0x156c   : > { %10324 = vst [vmem:[%s13972_s9 + $0x58] sm:$0x3] %v6763_v6  ;;  %v6770_v26 = vpack.c.bf16 %v6763_v6, %v6761_v31  ;;  %v12719_v31 = vld [vmem:[%s18564_s1 + $0x880] ss:$8 sps:$4 sm:$0xff]   ;;  %v12723_v34 = vld [vmem:[%s18564_s1 + $0x870] ss:$8 sps:$4 sm:$0xff]  }
0x156d   : > { %v12724_v6 = vld [vmem:[%s18564_s1 + $0x84c] ss:$8 sps:$4 sm:$0xff]  }
0x156e   : > { %6803 = vmatprep.mubr.bf16.mxu0 %v6770_v26  ;;  %v12725_v26 = vld [vmem:[%s18564_s1 + $0xa60] ss:$8 sps:$4 sm:$0xff]  }
0x156f   : > { %6804 = vmatmul.mubr.bf16.vlgmr.msra.gmra.mxu0 %v6769_v45  ;;  %v12726_v45 = vld [vmem:[%s18564_s1 + $0x848] ss:$8 sps:$4 sm:$0xff]  }
0x1570   : > { %11556 = vmatprep.mubr.msk.bf16.mxu0 %vm2613_vm8, %v12687_v23  ;;  %v12727_v23 = vld [vmem:[%s18564_s1 + $0x83c] ss:$8 sps:$4 sm:$0xff]  }
0x162f   : > { %v10957_v38 = vpop.f32.mrf.mxu0 }
0x1631   : > { %v10958_v40 = vpop.f32.mrf.mxu0 }
0x1632   : > { %v10959_v47 = vadd.f32 %v10958_v40, %v10957_v38  ;;  %v12728_v38 = vld [vmem:[%s18564_s1 + $0x838] ss:$8 sps:$4 sm:$0xff]   ;;  %v12729_v40 = vld [vmem:[%s18564_s1 + $0x82c] ss:$8 sps:$4 sm:$0xff]  }
0x1633   : > { %v10960_v41 = vpop.f32.mrf.mxu0 }
0x1635   : > { %v10961_v36 = vpop.f32.mrf.mxu0 }
0x1636   : > { %v10962_v59 = vadd.f32 %v10961_v36, %v10960_v41  ;;  %v12730_v41 = vld [vmem:[%s18564_s1 + $0x828] ss:$8 sps:$4 sm:$0xff]   ;;  %v12731_v36 = vld [vmem:[%s18564_s1 + $0x81c] ss:$8 sps:$4 sm:$0xff]  }
0x1638   : > { %11541 = vmatpush3.msk.msra.mxu1 %vm2528_vm6, %v10962_v59  ;;  %v12732_v59 = vld [vmem:[%s18564_s1 + $0x818] ss:$8 sps:$4 sm:$0xff]  }
0x1639   : > { %11542 = vmatprep.subr.mxu1 %v13203_v16 }
0x163a   : > { %11543 = vmatpush3.msra.mxu1 %v10959_v47  ;;  %v12733_v47 = vld [vmem:[%s18564_s1 + $0x80c] ss:$8 sps:$4 sm:$0xff]  }
0x163b   : > { %11545 = vmatmul.mubr.msk.bf16.vlgmr.msra.gmra.mxu1 %vm2524_vm7, %v12688_v12  ;;  %v12734_v12 = vld [vmem:[%s18564_s1 + $0x808] ss:$8 sps:$4 sm:$0xff]  }
0x163c   : > { %11550 = vmatprep.mubr.msk.bf16.mxu1 %vm2613_vm8, %v12689_v63  ;;  %v12735_v63 = vld [vmem:[%s18564_s1 + $0x7fc] ss:$8 sps:$4 sm:$0xff]  }
0x16fb   : > { %v6881_v13 = vpop.f32.mrf.mxu1 }
0x16fc   : > { %10327 = vst [vmem:[%s13996_s22 + $0x10] sm:$0x1f] %v6881_v13  ;;  %11548 = vmatprep.subr.msk.mxu1 %vm960_vm1, %v6881_v13  ;;  %11554 = vmatprep.subr.msk.mxu0 %vm960_vm1, %v6881_v13 }
0x16fd   : > { %v11546_v1 = vpop.f32.mrf.mxu1  ;;  %11549 = vmatpush3.msk.msra.mxu1 %vm960_vm1, %v6881_v13  ;;  %11555 = vmatpush3.msk.msra.mxu0 %vm960_vm1, %v6881_v13  ;;  %v12736_v13 = vld [vmem:[%s18564_s1 + $0x7f8] ss:$8 sps:$4 sm:$0xff]  }
0x16fe   : > { %11551 = vmatmul.mubr.msk.bf16.vlgmr.msra.gmra.mxu1 %vm2613_vm8, %v12690_v5  ;;  %11557 = vmatmul.mubr.msk.bf16.vlgmr.msra.gmra.mxu0 %vm2613_vm8, %v12691_v3  ;;  %v12737_v1 = vld [vmem:[%s18564_s1 + $0x7ec] ss:$8 sps:$4 sm:$0xff]   ;;  %v12738_v5 = vld [vmem:[%s18564_s1 + $0x7e8] ss:$8 sps:$4 sm:$0xff]   ;;  %v12739_v3 = vld [vmem:[%s18564_s1 + $0x7dc] ss:$8 sps:$4 sm:$0xff]  }
0x16ff   : > { %v6884_v8 = vpop.f32.mrf.mxu1  ;;  %7056 = vmatprep.subr.bf16.mxu1 %v12692_v33  ;;  %10972 = vmatprep.subr.bf16.mxu0 %v12693_v48  ;;  %v12741_v33 = vld [vmem:[%s18564_s1 + $0xb60] ss:$8 sps:$4 sm:$0xff]  }
0x1700   : > { %7057 = vmatpush1.bf16.msra.mxu1 %v12694_v4  ;;  %10973 = vmatpush3.bf16.msra.mxu0 %v12695_v15  ;;  %v12740_v8 = vld [vmem:[%s18564_s1 + $0x7d8] ss:$8 sps:$4 sm:$0xff]  }
0x1701   : > { %v11547_v18 = vpop.f32.mrf.mxu1  ;;  %7058 = vmatprep.subr.bf16.mxu1 %v12696_v56  ;;  %10974 = vmatprep.subr.bf16.mxu0 %v12697_v9 }
0x1704   : > { %7059 = vmatpush1.bf16.msra.mxu1 %v12698_v14  ;;  %10975 = vmatpush3.bf16.msra.mxu0 %v12699_v50 }
0x1705   : > { %7060 = vmatprep.subr.bf16.mxu1 %v12700_v49  ;;  %10976 = vmatprep.subr.bf16.mxu0 %v12701_v61 }
0x1708   : > { %7061 = vmatpush1.bf16.msra.mxu1 %v12702_v10  ;;  %10977 = vmatpush3.bf16.msra.mxu0 %v12703_v24  ;;  %v12742_v24 = vld [vmem:[%s18564_s1 + $0xae0] ss:$8 sps:$4 sm:$0xff]  }
0x1709   : > { %7062 = vmatprep.subr.bf16.mxu1 %v12704_v22  ;;  %10978 = vmatprep.subr.bf16.mxu0 %v12705_v28  ;;  %v12743_v22 = vld [vmem:[%s18564_s1 + $0xb50] ss:$8 sps:$4 sm:$0xff]  }
0x170a   : > { %v12744_v28 = vld [vmem:[%s18564_s1 + $0xad0] ss:$8 sps:$4 sm:$0xff]  }
0x170c   : > { %7063 = vmatpush1.bf16.msra.mxu1 %v12706_v29  ;;  %10979 = vmatpush3.bf16.msra.mxu0 %v12707_v30  ;;  %v12745_v30 = vld [vmem:[%s18564_s1 + $0xb40] ss:$8 sps:$4 sm:$0xff]  }
0x170d   : > { %7064 = vmatprep.subr.bf16.mxu1 %v12708_v35  ;;  %10980 = vmatprep.subr.bf16.mxu0 %v12709_v43  ;;  %v12746_v35 = vld [vmem:[%s18564_s1 + $0xac0] ss:$8 sps:$4 sm:$0xff]   ;;  %v12747_v43 = vld [vmem:[%s18564_s1 + $0xb30] ss:$8 sps:$4 sm:$0xff]  }
0x1710   : > { %7065 = vmatpush1.bf16.msra.mxu1 %v12710_v19  ;;  %10981 = vmatpush3.bf16.msra.mxu0 %v12711_v21  ;;  %v12748_v19 = vld [vmem:[%s18564_s1 + $0xab0] ss:$8 sps:$4 sm:$0xff]   ;;  %v12749_v21 = vld [vmem:[%s18564_s1 + $0xb20] ss:$8 sps:$4 sm:$0xff]  }
0x1711   : > { %7066 = vmatprep.subr.bf16.mxu1 %v12712_v20  ;;  %10982 = vmatprep.subr.bf16.mxu0 %v12713_v57  ;;  %v12750_v20 = vld [vmem:[%s18564_s1 + $0xaa0] ss:$8 sps:$4 sm:$0xff]   ;;  %v12751_v57 = vld [vmem:[%s18564_s1 + $0xb10] ss:$8 sps:$4 sm:$0xff]  }
0x1714   : > { %7067 = vmatpush1.bf16.msra.mxu1 %v12714_v58  ;;  %10983 = vmatpush3.bf16.msra.mxu0 %v12715_v44  ;;  %v12752_v58 = vld [vmem:[%s18564_s1 + $0xa90] ss:$8 sps:$4 sm:$0xff]   ;;  %v12753_v44 = vld [vmem:[%s18564_s1 + $0xb00] ss:$8 sps:$4 sm:$0xff]  }
0x1715   : > { %7068 = vmatprep.subr.bf16.mxu1 %v12716_v54  ;;  %10984 = vmatprep.subr.bf16.mxu0 %v12717_v7  ;;  %v12754_v54 = vld [vmem:[%s18564_s1 + $0xa80] ss:$8 sps:$4 sm:$0xff]   ;;  %v12755_v7 = vld [vmem:[%s18564_s1 + $0xaf0] ss:$8 sps:$4 sm:$0xff]  }
0x1718   : > { %7069 = vmatpush1.bf16.msra.mxu1 %v12718_v52  ;;  %10985 = vmatpush3.bf16.msra.mxu0 %v12719_v31  ;;  %v12756_v52 = vld [vmem:[%s18564_s1 + $0xa70] ss:$8 sps:$4 sm:$0xff]   ;;  %v12757_v31 = vld [vmem:[%s18564_s1 + $0xd60] ss:$8 sps:$4 sm:$0xff]  }
0x1719   : > { %7070 = vmatprep.subr.bf16.mxu1 %v12720_v32  ;;  %10986 = vmatprep.subr.bf16.mxu0 %v12721_v0 }
0x171c   : > { %7071 = vmatpush1.bf16.msra.mxu1 %v12722_v62  ;;  %10987 = vmatpush3.bf16.msra.mxu0 %v12723_v34 }
0x171d   : > { %7072 = vmatprep.subr.bf16.mxu1 %v12724_v6  ;;  %10994 = vmatprep.subr.bf16.mxu0 %v12725_v26 }
0x1720   : > { %7073 = vmatpush2.bf16.msra.mxu1 %v12726_v45 }
0x1721   : > { %7074 = vmatprep.subr.bf16.mxu1 %v12727_v23 }
0x1724   : > { %7075 = vmatpush2.bf16.msra.mxu1 %v12728_v38 }
0x1725   : > { %7076 = vmatprep.subr.bf16.mxu1 %v12729_v40 }
0x1728   : > { %7077 = vmatpush2.bf16.msra.mxu1 %v12730_v41 }
0x1729   : > { %7078 = vmatprep.subr.bf16.mxu1 %v12731_v36 }
0x172c   : > { %7079 = vmatpush2.bf16.msra.mxu1 %v12732_v59 }
0x172d   : > { %7080 = vmatprep.subr.bf16.mxu1 %v12733_v47 }
0x1730   : > { %7081 = vmatpush2.bf16.msra.mxu1 %v12734_v12 }
0x1731   : > { %7082 = vmatprep.subr.bf16.mxu1 %v12735_v63 }
0x1734   : > { %7083 = vmatpush2.bf16.msra.mxu1 %v12736_v13 }
0x1735   : > { %7084 = vmatprep.subr.bf16.mxu1 %v12737_v1 }
0x1738   : > { %7085 = vmatpush2.bf16.msra.mxu1 %v12738_v5 }
0x1739   : > { %7086 = vmatprep.subr.bf16.mxu1 %v12739_v3 }
0x173c   : > { %7087 = vmatpush2.bf16.msra.mxu1 %v12740_v8 }
0x173d   : > { %11016 = vmatprep.subr.bf16.mxu1 %v12741_v33 }
0x17be   : > { %v11552_v48 = vpop.f32.mrf.mxu1  ;;  %v11558_v4 = vpop.f32.mrf.mxu0 }
0x17bf   : > { %v7055_v10 = vpack.c.bf16 %v11558_v4, %v11558_v4  ;;  %v7054_v29 = vpack.c.bf16 %v11552_v48, %v11552_v48 }
0x17c0   : > { %v6958_v15 = vpop.f32.mrf.mxu1  ;;  %v7038_v18 = vpop.f32.mrf.mxu0 }
0x17c2   : > { %v11553_v56 = vpop.f32.mrf.mxu1  ;;  %v11559_v9 = vpop.f32.mrf.mxu0 }
0x17c4   : > { %v6961_v14 = vpop.f32.mrf.mxu1  ;;  %v7041_v50 = vpop.f32.mrf.mxu0 }
0x17c5   : > { %v7052_v49 = vpack.c.bf16 %v6961_v14, %v6958_v15  ;;  %v7053_v61 = vpack.c.bf16 %v7041_v50, %v7038_v18 }
0x17c7   : > { %7088 = vmatprep.mubr.bf16.mxu1 %v7053_v61 }
0x17c8   : > { %7089 = vmatmul.mubr.bf16.vlgmr.msra.gmra.mxu1 %v7052_v49 }
0x17c9   : > { %7098 = vmatprep.mubr.bf16.mxu1 %v7055_v10  ;;  %11017 = vmatpush3.bf16.msra.mxu1 %v12742_v24 }
0x17ca   : > { %11018 = vmatprep.subr.bf16.mxu1 %v12743_v22 }
0x17cd   : > { %11019 = vmatpush3.bf16.msra.mxu1 %v12744_v28 }
0x17ce   : > { %11020 = vmatprep.subr.bf16.mxu1 %v12745_v30 }
0x17d0   : > { %7099 = vmatmul.mubr.bf16.gmra.mxu1 %v7054_v29 }
0x17d1   : > { %11021 = vmatpush3.bf16.msra.mxu1 %v12746_v35 }
0x17d2   : > { %11022 = vmatprep.subr.bf16.mxu1 %v12747_v43 }
0x17d5   : > { %11023 = vmatpush3.bf16.msra.mxu1 %v12748_v19 }
0x17d6   : > { %11024 = vmatprep.subr.bf16.mxu1 %v12749_v21 }
0x17d9   : > { %11025 = vmatpush3.bf16.msra.mxu1 %v12750_v20 }
0x17da   : > { %11026 = vmatprep.subr.bf16.mxu1 %v12751_v57 }
0x17dd   : > { %11027 = vmatpush3.bf16.msra.mxu1 %v12752_v58 }
0x17de   : > { %11028 = vmatprep.subr.bf16.mxu1 %v12753_v44 }
0x17e1   : > { %11029 = vmatpush3.bf16.msra.mxu1 %v12754_v54 }
0x17e2   : > { %11030 = vmatprep.subr.bf16.mxu1 %v12755_v7 }
0x17e5   : > { %11031 = vmatpush3.bf16.msra.mxu1 %v12756_v52 }
0x17e6   : > { %11060 = vmatprep.subr.bf16.mxu1 %v12757_v31 }
0x1888   : > { %v7090_v32 = vpop.f32.mrf.mxu1 }
0x1889   : > { %v7091_v0 = vadd.f32 %v7090_v32, %v14212_v51 }
0x188a   : > { %v7092_v62 = vpop.f32.mrf.mxu1 }
0x188b   : > { %v7093_v34 = vadd.f32 %v7092_v62, %v14217_v53  ;;  %v16886_v45 = vmax.f32 %v7091_v0, 0.0 }
0x188c   : > { %v7094_v6 = vpop.f32.mrf.mxu1 }
0x188d   : > { %v7095_v26 = vadd.f32 %v7094_v6, %v14219_v55  ;;  %v16888_v23 = vmax.f32 %v7093_v34, 0.0  ;;  %v7150_v13 = vrot.slane %v16886_v45, 6  ;;  %v7117_v56 = vrot.slane %v16886_v45, 4 }
0x188e   : > { %v7096_v38 = vpop.f32.mrf.mxu1 }
0x188f   : > { %v16890_v40 = vmax.f32 %v7095_v26, 0.0  ;;  %v7097_v41 = vadd.f32 %v7096_v38, %v14226_v46  ;;  %v7151_v5 = vrot.slane %v16888_v23, 6  ;;  %v7120_v35 = vrot.slane %v16888_v23, 4 }
0x1890   : > { %v7100_v36 = vpop.f32.mrf.mxu1  ;;  %v7135_v43 = vrot.slane %v16888_v23, 7 }
0x1891   : > { %v16894_v59 = vrot.slane %v16890_v40, 4  ;;  %v7152_v47 = vrot.slane %v16890_v40, 6  ;;  %v16897_v12 = vmax.f32 %v7097_v41, 0.0  ;;  %v7101_v63 = vadd.f32 %v7100_v36, %v14229_v60 }
0x1892   : > { %v7102_v1 = vpop.f32.mrf.mxu1  ;;  %v7176_v28 = vpack.c.bf16 %v16890_v40, %v16886_v45 }
0x1893   : > { %10336 = vst [vmem:[%s14248_s24 + $0x50] sm:$0x3] %v16894_v59  ;;  %v16904_v3 = vmax.f32 %v7101_v63, 0.0  ;;  %v7103_v8 = vadd.f32 %v7102_v1, %v14238_v2  ;;  %v7154_v33 = vrot.slane %v16897_v12, 6  ;;  %v7177_v48 = vpack.c.bf16 %v16897_v12, %v16888_v23  ;;  %v12758_v63 = vld [vmem:[%s18564_s1 + $0xce0] ss:$8 sps:$4 sm:$0xff]  }
0x1894   : > { %v7104_v4 = vpop.f32.mrf.mxu1  ;;  %v7153_v15 = vsel %vm2528_vm6, %v7150_v13, %v7152_v47  ;;  %v7121_v18 = vrot.slane %v16897_v12, 4  ;;  %v7190_v49 = vpack.c.bf16 %v7152_v47, %v7152_v47  ;;  %v7216_v31 = vrot.slane %v7176_v28, 2 }
0x1895   : > { %v7186_v9 = vpack.c.bf16 %v16904_v3, %v16904_v3  ;;  %v7112_v14 = vmax.f32 %v7103_v8, 0.0  ;;  %v7155_v50 = vsel %vm2528_vm6, %v7151_v5, %v7154_v33  ;;  %v7191_v24 = vpack.c.bf16 %v7154_v33, %v7154_v33  ;;  %v12760_v4 = vld [vmem:[%s18564_s1 + $0xd50] ss:$8 sps:$4 sm:$0xff]  }
0x1896   : > { %v7105_v61 = vpop.f32.mrf.mxu1  ;;  %v7181_v10 = vpack.c.bf16 %v7155_v50, %v7151_v5  ;;  %v7180_v22 = vpack.c.bf16 %v7153_v15, %v7150_v13  ;;  %10337 = vst [vmem:[%s14248_s24 + $0x58] sm:$0x3] %v7121_v18  ;;  %v7219_v30 = vrot.slane %v7177_v48, 2  ;;  %v7229_v54 = vrot.slane %v7190_v49, 2  ;;  %v12759_v5 = vld [vmem:[%s18564_s1 + $0x9e0] ss:$8 sps:$4 sm:$0xff]  }
0x1897   : > { %v7187_v29 = vpack.c.bf16 %v7112_v14, %v7112_v14  ;;  %v7217_v19 = vrot.slane %v7186_v9, 2  ;;  %v7232_v20 = vrot.slane %v7191_v24, 2  ;;  %v7142_v58 = vrot.slane %v7112_v14, 7  ;;  %v12762_v49 = vld [vmem:[%s18564_s1 + $0xcd0] ss:$8 sps:$4 sm:$0xff]  }
0x1898   : > { %v7231_v21 = vrot.slane %v7181_v10, 2  ;;  %v7228_v57 = vrot.slane %v7180_v22, 2  ;;  %v7122_v7 = vsel %vm972_vm3, %v7120_v35, %v7121_v18  ;;  %v7195_v0 = vpack.c.bf16 %v7121_v18, %v7121_v18  ;;  %v12761_v18 = vld [vmem:[%s18564_s1 + $0xa50] ss:$8 sps:$4 sm:$0xff]   ;;  %v12764_v22 = vld [vmem:[%s18564_s1 + $0xd40] ss:$8 sps:$4 sm:$0xff]  }
0x1899   : > { %v7220_v44 = vrot.slane %v7187_v29, 2  ;;  %10335 = vst [vmem:[%s14248_s24 + $0x48] sm:$0xff] %v7122_v7  ;;  %v7185_v32 = vpack.c.bf16 %v7122_v7, %v7120_v35  ;;  %v7138_v6 = vrot.slane %v16897_v12, 7  ;;  %v16931_v26 = vsel %vm972_vm3, %v7117_v56, %v16894_v59  ;;  %v12763_v24 = vld [vmem:[%s18564_s1 + $0x9d0] ss:$8 sps:$4 sm:$0xff]  }
0x189a   : > { %v7233_v52 = vsel %vm948_vm2, %v7231_v21, %v7232_v20  ;;  %v7230_v34 = vsel %vm948_vm2, %v7228_v57, %v7229_v54  ;;  %v7218_v38 = vsel %vm948_vm2, %v7216_v31, %v7217_v19  ;;  %v7244_v36 = vrot.slane %v7195_v0, 2  ;;  %10334 = vst [vmem:[%s14248_s24 + $0x40] sm:$0xff] %v16931_v26  ;;  %v12765_v29 = vld [vmem:[%s18564_s1 + $0xa40] ss:$8 sps:$4 sm:$0xff]   ;;  %v12768_v21 = vld [vmem:[%s18564_s1 + $0xd30] ss:$8 sps:$4 sm:$0xff]  }
0x189b   : > { %7370 = vmatprep.mubr.bf16.mxu1 %v7233_v52  ;;  %v7221_v62 = vsel %vm948_vm2, %v7219_v30, %v7220_v44  ;;  %v7243_v41 = vrot.slane %v7185_v32, 2  ;;  %v7164_v47 = vrot.slane %v16890_v40, 5  ;;  %v7139_v13 = vsel %vm3038_vm9, %v7135_v43, %v7138_v6  ;;  %v12767_v19 = vld [vmem:[%s18564_s1 + $0x9c0] ss:$8 sps:$4 sm:$0xff]   ;;  %v12769_v57 = vld [vmem:[%s18564_s1 + $0xa30] ss:$8 sps:$4 sm:$0xff]  }
0x189c   : > { %7288 = vmatprep.mubr.bf16.mxu0 %v7221_v62  ;;  %7371 = vmatmul.mubr.bf16.vlgmr.msra.gmra.mxu1 %v7230_v34  ;;  %v7143_v1 = vsel %vm3038_vm9, %v7138_v6, %v7142_v58  ;;  %v7179_v33 = vpack.c.bf16 %v7139_v13, %v7135_v43  ;;  %v7162_v15 = vrot.slane %v16886_v45, 5  ;;  %v12766_v43 = vld [vmem:[%s18564_s1 + $0xcc0] ss:$8 sps:$4 sm:$0xff]   ;;  %v12770_v58 = vld [vmem:[%s18564_s1 + $0xcb0] ss:$8 sps:$4 sm:$0xff]   ;;  %v7140_v52 = vrot.slane %v16904_v3, 7 }
0x189d   : > { %11061 = vmatpush3.bf16.msra.mxu1 %v12758_v63  ;;  %7289 = vmatmul.mubr.bf16.vlgmr.msra.gmra.mxu0 %v7218_v38  ;;  %v7245_v8 = vsel %vm948_vm2, %v7243_v41, %v7244_v36  ;;  %v7189_v48 = vpack.c.bf16 %v7143_v1, %v7143_v1  ;;  %v7192_v28 = vpack.c.bf16 %v7164_v47, %v7164_v47  ;;  %v12771_v44 = vld [vmem:[%s18564_s1 + $0x9b0] ss:$8 sps:$4 sm:$0xff]   ;;  %v12772_v54 = vld [vmem:[%s18564_s1 + $0xd20] ss:$8 sps:$4 sm:$0xff]   ;;  %v7166_v62 = vrot.slane %v16897_v12, 5 }
0x189e   : > { %10995 = vmatpush3.bf16.msra.mxu0 %v12759_v5  ;;  %11062 = vmatprep.subr.bf16.mxu1 %v12760_v4  ;;  %v7225_v9 = vrot.slane %v7179_v33, 2  ;;  %v7165_v50 = vsel %vm3067_vm10, %v7162_v15, %v7164_v47  ;;  %v12773_v7 = vld [vmem:[%s18564_s1 + $0xa20] ss:$8 sps:$4 sm:$0xff]   ;;  %v12776_v0 = vld [vmem:[%s18564_s1 + $0xd10] ss:$8 sps:$4 sm:$0xff]   ;;  %v7136_v34 = vrot.slane %v16890_v40, 7  ;;  %v7184_v63 = vpack.c.bf16 %v16931_v26, %v7117_v56 }
0x189f   : > { %7452 = vmatprep.mubr.bf16.mxu1 %v7245_v8  ;;  %10996 = vmatprep.subr.bf16.mxu0 %v12761_v18  ;;  %v7226_v14 = vrot.slane %v7189_v48, 2  ;;  %v7182_v61 = vpack.c.bf16 %v7165_v50, %v7162_v15  ;;  %v7235_v35 = vrot.slane %v7192_v28, 2  ;;  %v12774_v31 = vld [vmem:[%s18564_s1 + $0xca0] ss:$8 sps:$4 sm:$0xff]   ;;  %v12777_v3 = vld [vmem:[%s18564_s1 + $0xa10] ss:$8 sps:$4 sm:$0xff]   ;;  %v7194_v13 = vpack.c.bf16 %v16894_v59, %v16894_v59 }
0x18a0   : > { %v12775_v32 = vld [vmem:[%s18564_s1 + $0x9a0] ss:$8 sps:$4 sm:$0xff]   ;;  %v7163_v6 = vrot.slane %v16888_v23, 5  ;;  %v7141_v38 = vsel %vm3038_vm9, %v7136_v34, %v7140_v52  ;;  %v12778_v41 = vld [vmem:[%s18564_s1 + $0xc90] ss:$8 sps:$4 sm:$0xff]   ;;  %v7134_v36 = vrot.slane %v16886_v45, 7  ;;  %v7193_v48 = vpack.c.bf16 %v7166_v62, %v7166_v62 }
0x18a1   : > { %11063 = vmatpush3.bf16.msra.mxu1 %v12762_v49  ;;  %v7227_v10 = vsel %vm948_vm2, %v7225_v9, %v7226_v14  ;;  %v7234_v30 = vrot.slane %v7182_v61, 2  ;;  %v12779_v40 = vld [vmem:[%s18564_s1 + $0x990] ss:$8 sps:$4 sm:$0xff]   ;;  %v12780_v12 = vld [vmem:[%s18564_s1 + $0xd00] ss:$8 sps:$4 sm:$0xff]   ;;  %v7188_v5 = vpack.c.bf16 %v7141_v38, %v7141_v38  ;;  %v7240_v26 = vrot.slane %v7184_v63, 2 }
0x18a2   : > { %10997 = vmatpush3.bf16.msra.mxu0 %v12763_v24  ;;  %11064 = vmatprep.subr.bf16.mxu1 %v12764_v22  ;;  %v7167_v23 = vsel %vm3067_vm10, %v7163_v6, %v7166_v62  ;;  %v12781_v47 = vld [vmem:[%s18564_s1 + $0xa00] ss:$8 sps:$4 sm:$0xff]   ;;  %v7137_v1 = vsel %vm3038_vm9, %v7134_v36, %v7136_v34  ;;  %v12784_v45 = vld [vmem:[%s18564_s1 + $0xcf0] ss:$8 sps:$4 sm:$0xff]   ;;  %v7241_v15 = vrot.slane %v7194_v13, 2  ;;  %v7238_v50 = vrot.slane %v7193_v48, 2 }
0x18a3   : > { %7329 = vmatprep.mubr.bf16.mxu0 %v7227_v10  ;;  %10998 = vmatprep.subr.bf16.mxu0 %v12765_v29  ;;  %v16977_v20 = vsel %vm948_vm2, %v7234_v30, %v7235_v35  ;;  %v12782_v8 = vld [vmem:[%s18564_s1 + $0xc80] ss:$8 sps:$4 sm:$0xff]   ;;  %v7183_v33 = vpack.c.bf16 %v7167_v23, %v7163_v6  ;;  %v7178_v59 = vpack.c.bf16 %v7137_v1, %v7134_v36  ;;  %v12785_v56 = vld [vmem:[%s18564_s1 + $0x9f0] ss:$8 sps:$4 sm:$0xff]   ;;  %v7223_v18 = vrot.slane %v7188_v5, 2 }
0x18a4   : > { %v12783_v4 = vld [vmem:[%s18564_s1 + $0x980] ss:$8 sps:$4 sm:$0xff]   ;;  %v12786_v9 = vld [vmem:[%s18564_s1 + $0xc70] ss:$8 sps:$4 sm:$0xff]   ;;  %v7242_v24 = vsel %vm948_vm2, %v7240_v26, %v7241_v15 }
0x18a5   : > { %11065 = vmatpush3.bf16.msra.mxu1 %v12766_v43  ;;  %v7237_v14 = vrot.slane %v7183_v33, 2  ;;  %v12787_v49 = vld [vmem:[%s18564_s1 + $0x970] ss:$8 sps:$4 sm:$0xff]   ;;  %v7222_v61 = vrot.slane %v7178_v59, 2  ;;  %v12789_v22 = vld [vmem:[%s18564_s1 + $0xc60] ss:$8 sps:$4 sm:$0xff]  }
0x18a6   : > { %10999 = vmatpush3.bf16.msra.mxu0 %v12767_v19  ;;  %11066 = vmatprep.subr.bf16.mxu1 %v12768_v21  ;;  %v12788_v10 = vld [vmem:[%s18564_s1 + $0xee8] ss:$8 sps:$4 sm:$0xff]   ;;  %v12793_v19 = vld [vmem:[%s18564_s1 + $0xed8] ss:$8 sps:$4 sm:$0xff]   ;;  %v12820_v33 = vld [vmem:[%s18564_s1 + $0x74] ss:$8 sps:$4 sm:$0xff]  }
0x18a7   : > { %11000 = vmatprep.subr.bf16.mxu0 %v12769_v57  ;;  %v7224_v28 = vsel %vm948_vm2, %v7222_v61, %v7223_v18  ;;  %v7239_v29 = vsel %vm948_vm2, %v7237_v14, %v7238_v50  ;;  %v12790_v30 = vld [vmem:[%s18564_s1 + $0xe68] ss:$8 sps:$4 sm:$0xff]   ;;  %v12794_v21 = vld [vmem:[%s18564_s1 + $0xe58] ss:$8 sps:$4 sm:$0xff]  }
0x18a8   : > { %v12791_v35 = vld [vmem:[%s18564_s1 + $0xbe0] ss:$8 sps:$4 sm:$0xff]   ;;  %v12792_v43 = vld [vmem:[%s18564_s1 + $0xc50] ss:$8 sps:$4 sm:$0xff]  }
0x18a9   : > { %11067 = vmatpush3.bf16.msra.mxu1 %v12770_v58  ;;  %v12795_v57 = vld [vmem:[%s18564_s1 + $0xbd0] ss:$8 sps:$4 sm:$0xff]   ;;  %v12805_v34 = vld [vmem:[%s18564_s1 + $0xc20] ss:$8 sps:$4 sm:$0xff]  }
0x18aa   : > { %11001 = vmatpush3.bf16.msra.mxu0 %v12771_v44  ;;  %11068 = vmatprep.subr.bf16.mxu1 %v12772_v54  ;;  %v12796_v58 = vld [vmem:[%s18564_s1 + $0xec8] ss:$8 sps:$4 sm:$0xff]   ;;  %v12800_v52 = vld [vmem:[%s18564_s1 + $0xeb8] ss:$8 sps:$4 sm:$0xff]  }
0x18ab   : > { %11002 = vmatprep.subr.bf16.mxu0 %v12773_v7  ;;  %v12797_v44 = vld [vmem:[%s18564_s1 + $0xc40] ss:$8 sps:$4 sm:$0xff]   ;;  %v12817_v1 = vld [vmem:[%s18564_s1 + $0xbf0] ss:$8 sps:$4 sm:$0xff]  }
0x18ac   : > { %v12798_v54 = vld [vmem:[%s18564_s1 + $0xe48] ss:$8 sps:$4 sm:$0xff]   ;;  %v12808_v38 = vld [vmem:[%s18564_s1 + $0xe98] ss:$8 sps:$4 sm:$0xff]  }
0x18ad   : > { %11069 = vmatpush3.bf16.msra.mxu1 %v12774_v31  ;;  %v12799_v7 = vld [vmem:[%s18564_s1 + $0xbc0] ss:$8 sps:$4 sm:$0xff]   ;;  %v12801_v31 = vld [vmem:[%s18564_s1 + $0xc30] ss:$8 sps:$4 sm:$0xff]  }
0x18ae   : > { %11003 = vmatpush3.bf16.msra.mxu0 %v12775_v32  ;;  %11070 = vmatprep.subr.bf16.mxu1 %v12776_v0  ;;  %v12802_v32 = vld [vmem:[%s18564_s1 + $0xe38] ss:$8 sps:$4 sm:$0xff]   ;;  %v12804_v62 = vld [vmem:[%s18564_s1 + $0xea8] ss:$8 sps:$4 sm:$0xff]  }
0x18af   : > { %11004 = vmatprep.subr.bf16.mxu0 %v12777_v3  ;;  %v12803_v0 = vld [vmem:[%s18564_s1 + $0xbb0] ss:$8 sps:$4 sm:$0xff]   ;;  %v12807_v6 = vld [vmem:[%s18564_s1 + $0xba0] ss:$8 sps:$4 sm:$0xff]  }
0x18b0   : > { %v12806_v3 = vld [vmem:[%s18564_s1 + $0xe28] ss:$8 sps:$4 sm:$0xff]   ;;  %v12810_v36 = vld [vmem:[%s18564_s1 + $0xe18] ss:$8 sps:$4 sm:$0xff]  }
0x18b1   : > { %11071 = vmatpush3.bf16.msra.mxu1 %v12778_v41  ;;  %v12809_v41 = vld [vmem:[%s18564_s1 + $0xc10] ss:$8 sps:$4 sm:$0xff]   ;;  %v12813_v23 = vld [vmem:[%s18564_s1 + $0xc00] ss:$8 sps:$4 sm:$0xff]  }
0x18b2   : > { %11005 = vmatpush3.bf16.msra.mxu0 %v12779_v40  ;;  %11072 = vmatprep.subr.bf16.mxu1 %v12780_v12  ;;  %v12811_v40 = vld [vmem:[%s18564_s1 + $0xb90] ss:$8 sps:$4 sm:$0xff]   ;;  %v12815_v63 = vld [vmem:[%s18564_s1 + $0xb80] ss:$8 sps:$4 sm:$0xff]  }
0x18b3   : > { %11006 = vmatprep.subr.bf16.mxu0 %v12781_v47  ;;  %v12812_v12 = vld [vmem:[%s18564_s1 + $0xe88] ss:$8 sps:$4 sm:$0xff]   ;;  %v12816_v13 = vld [vmem:[%s18564_s1 + $0xe78] ss:$8 sps:$4 sm:$0xff]  }
0x18b4   : > { %v12814_v47 = vld [vmem:[%s18564_s1 + $0xe08] ss:$8 sps:$4 sm:$0xff]   ;;  %v12818_v5 = vld [vmem:[%s18564_s1 + $0xdf8] ss:$8 sps:$4 sm:$0xff]  }
0x18b5   : > { %11073 = vmatpush3.bf16.msra.mxu1 %v12782_v8  ;;  %v12819_v8 = vld [vmem:[%s18564_s1 + $0xb70] ss:$8 sps:$4 sm:$0xff]  }
0x18b6   : > { %11007 = vmatpush3.bf16.msra.mxu0 %v12783_v4  ;;  %11074 = vmatprep.subr.bf16.mxu1 %v12784_v45  ;;  %v12821_v48 = vld [vmem:[%s18564_s1 + $0xd78] ss:$8 sps:$4 sm:$0xff]  }
0x18b7   : > { %11008 = vmatprep.subr.bf16.mxu0 %v12785_v56 }
0x18b9   : > { %11075 = vmatpush3.bf16.msra.mxu1 %v12786_v9 }
0x18ba   : > { %11009 = vmatpush3.bf16.msra.mxu0 %v12787_v49  ;;  %11098 = vmatprep.subr.bf16.mxu1 %v12788_v10 }
0x18bb   : > { %11038 = vmatprep.subr.bf16.mxu0 %v12789_v22 }
0x18bc   : > { %7453 = vmatmul.mubr.bf16.vlgmr.msra.gmra.mxu1 %v7242_v24 }
0x18bd   : > { %7330 = vmatmul.mubr.bf16.vlgmr.msra.gmra.mxu0 %v7224_v28  ;;  %11099 = vmatpush3.bf16.msra.mxu1 %v12790_v30 }
0x18be   : > { %11039 = vmatpush3.bf16.msra.mxu0 %v12791_v35  ;;  %7411 = vmatprep.mubr.bf16.mxu0 %v7239_v29 }
0x18bf   : > { %11040 = vmatprep.subr.bf16.mxu0 %v12792_v43  ;;  %11100 = vmatprep.subr.bf16.mxu1 %v12793_v19 }
0x18c1   : > { %11101 = vmatpush3.bf16.msra.mxu1 %v12794_v21 }
0x18c2   : > { %11041 = vmatpush3.bf16.msra.mxu0 %v12795_v57  ;;  %11102 = vmatprep.subr.bf16.mxu1 %v12796_v58 }
0x18c3   : > { %11042 = vmatprep.subr.bf16.mxu0 %v12797_v44 }
0x18c5   : > { %11103 = vmatpush3.bf16.msra.mxu1 %v12798_v54 }
0x18c6   : > { %11043 = vmatpush3.bf16.msra.mxu0 %v12799_v7  ;;  %11104 = vmatprep.subr.bf16.mxu1 %v12800_v52 }
0x18c7   : > { %11044 = vmatprep.subr.bf16.mxu0 %v12801_v31 }
0x18c9   : > { %11105 = vmatpush3.bf16.msra.mxu1 %v12802_v32 }
0x18ca   : > { %11045 = vmatpush3.bf16.msra.mxu0 %v12803_v0  ;;  %11106 = vmatprep.subr.bf16.mxu1 %v12804_v62 }
0x18cb   : > { %11046 = vmatprep.subr.bf16.mxu0 %v12805_v34 }
0x18cd   : > { %11107 = vmatpush3.bf16.msra.mxu1 %v12806_v3 }
0x18ce   : > { %11047 = vmatpush3.bf16.msra.mxu0 %v12807_v6  ;;  %11108 = vmatprep.subr.bf16.mxu1 %v12808_v38 }
0x18cf   : > { %11048 = vmatprep.subr.bf16.mxu0 %v12809_v41 }
0x18d1   : > { %11109 = vmatpush3.bf16.msra.mxu1 %v12810_v36 }
0x18d2   : > { %11049 = vmatpush3.bf16.msra.mxu0 %v12811_v40  ;;  %11110 = vmatprep.subr.bf16.mxu1 %v12812_v12 }
0x18d3   : > { %11050 = vmatprep.subr.bf16.mxu0 %v12813_v23 }
0x18d5   : > { %11111 = vmatpush3.bf16.msra.mxu1 %v12814_v47  ;;  %v12822_v47 = vld [vmem:[%s18564_s1 + $0xd88] ss:$8 sps:$4 sm:$0x3f]  }
0x18d6   : > { %11051 = vmatpush3.bf16.msra.mxu0 %v12815_v63  ;;  %11112 = vmatprep.subr.bf16.mxu1 %v12816_v13  ;;  %v12823_v63 = vld [vmem:[%s18564_s1 + $0xd98] ss:$8 sps:$4 sm:$0xff]   ;;  %v12824_v13 = vld [vmem:[%s18564_s1 + $0xda8] ss:$8 sps:$4 sm:$0x3f]  }
0x18d7   : > { %11052 = vmatprep.subr.bf16.mxu0 %v12817_v1  ;;  %v12825_v1 = vld [vmem:[%s18564_s1 + $0xdb8] ss:$8 sps:$4 sm:$0xff]  }
0x18d9   : > { %11113 = vmatpush3.bf16.msra.mxu1 %v12818_v5  ;;  %v12826_v5 = vld [vmem:[%s18564_s1 + $0xdc8] ss:$8 sps:$4 sm:$0x3f]  }
0x18da   : > { %11053 = vmatpush3.bf16.msra.mxu0 %v12819_v8  ;;  %7971 = vmatprep.subr.bf16.mxu1 %v12820_v33  ;;  %v12827_v8 = vld [vmem:[%s18564_s1 + $0xdd8] ss:$8 sps:$4 sm:$0xff]   ;;  %v12828_v33 = vld [vmem:[%s18564_s1 + $0xfe8] ss:$8 sps:$4 sm:$0xff]  }
0x18dd   : > { %7412 = vmatmul.mubr.bf16.vlgmr.msra.gmra.mxu0 %v16977_v20 }
0x18de   : > { %11564 = vmatprep.mubr.msk.bf16.mxu0 %vm3866_vm11, %v12821_v48  ;;  %v12829_v48 = vld [vmem:[%s18564_s1 + $0xde8] ss:$8 sps:$4 sm:$0x3f]  }
0x195c   : > { %v11032_v56 = vpop.f32.mrf.mxu1 }
0x195d   : > { %v10988_v4 = vpop.f32.mrf.mxu0 }
0x195e   : > { %v11033_v15 = vpop.f32.mrf.mxu1 }
0x195f   : > { %v10989_v45 = vpop.f32.mrf.mxu0  ;;  %v11034_v19 = vadd.f32 %v11033_v15, %v11032_v56  ;;  %v12833_v56 = vld [vmem:[%s18564_s1 + $0xfc8] ss:$8 sps:$4 sm:$0xff]   ;;  %v12835_v15 = vld [vmem:[%s18564_s1 + $0xfb8] ss:$8 sps:$4 sm:$0xff]  }
0x1960   : > { %v11035_v9 = vpop.f32.mrf.mxu1  ;;  %v10990_v61 = vadd.f32 %v10989_v45, %v10988_v4  ;;  %v12830_v4 = vld [vmem:[%s18564_s1 + $0xf68] ss:$8 sps:$4 sm:$0xff]   ;;  %v12831_v45 = vld [vmem:[%s18564_s1 + $0xfd8] ss:$8 sps:$4 sm:$0xff]  }
0x1961   : > { %v10991_v59 = vpop.f32.mrf.mxu0 }
0x1962   : > { %v11036_v50 = vpop.f32.mrf.mxu1  ;;  %v7291_v22 = vadd.f32 %v10990_v61, %v14486_v17  ;;  %v12841_v61 = vld [vmem:[%s18564_s1 + $0xf88] ss:$8 sps:$4 sm:$0xff]  }
0x1963   : > { %v10992_v26 = vpop.f32.mrf.mxu0  ;;  %v11037_v31 = vadd.f32 %v11036_v50, %v11035_v9  ;;  %v12837_v9 = vld [vmem:[%s18564_s1 + $0xfa8] ss:$8 sps:$4 sm:$0xff]   ;;  %v12839_v50 = vld [vmem:[%s18564_s1 + $0xf98] ss:$8 sps:$4 sm:$0xff]  }
0x1964   : > { %v10993_v28 = vadd.f32 %v10992_v26, %v10991_v59  ;;  %v12832_v59 = vld [vmem:[%s18564_s1 + $0xf58] ss:$8 sps:$4 sm:$0xff]   ;;  %v12834_v26 = vld [vmem:[%s18564_s1 + $0xf48] ss:$8 sps:$4 sm:$0xff]  }
0x1966   : > { %v7294_v21 = vadd.f32 %v10993_v28, %v14486_v17  ;;  %v17248_v28 = vld [vmem:[%s13398_s16 + $0x60] sm:$0xff] }
0x197c   : > { %v11076_v10 = vpop.f32.mrf.mxu1 }
0x197d   : > { %v11010_v18 = vpop.f32.mrf.mxu0 }
0x197e   : > { %v11077_v29 = vpop.f32.mrf.mxu1 }
0x197f   : > { %v11011_v14 = vpop.f32.mrf.mxu0  ;;  %v11078_v32 = vadd.f32 %v11077_v29, %v11076_v10  ;;  %v12842_v10 = vld [vmem:[%s18564_s1 + $0xf08] ss:$8 sps:$4 sm:$0xff]  }
0x1980   : > { %v11012_v20 = vadd.f32 %v11011_v14, %v11010_v18  ;;  %v11079_v57 = vpop.f32.mrf.mxu1  ;;  %v12836_v18 = vld [vmem:[%s18564_s1 + $0xf38] ss:$8 sps:$4 sm:$0xff]   ;;  %v12838_v14 = vld [vmem:[%s18564_s1 + $0xf28] ss:$8 sps:$4 sm:$0xff]  }
0x1981   : > { %v11013_v49 = vpop.f32.mrf.mxu0  ;;  %v17251_v29 = vld [vmem:[%s13398_s16 + $0x68] sm:$0xff] }
0x1982   : > { %v7332_v30 = vadd.f32 %v11012_v20, %v7291_v22  ;;  %v11080_v62 = vpop.f32.mrf.mxu1  ;;  %v12843_v20 = vld [vmem:[%s18564_s1 + $0xf78] ss:$8 sps:$4 sm:$0xff]   ;;  %v12845_v22 = vld [vmem:[%s18564_s1 + $0x174] ss:$8 sps:$4 sm:$0xff]  }
0x1983   : > { %v11014_v24 = vpop.f32.mrf.mxu0  ;;  %v11081_v41 = vadd.f32 %v11080_v62, %v11079_v57 }
0x1984   : > { %v11015_v35 = vadd.f32 %v11014_v24, %v11013_v49  ;;  %v7373_v54 = vadd.f32 %v11034_v19, %v7332_v30  ;;  %v12840_v49 = vld [vmem:[%s18564_s1 + $0xf18] ss:$8 sps:$4 sm:$0xff]   ;;  %v17254_v30 = vld [vmem:[%s13398_s16 + $0x70] sm:$0xff] }
0x1985   : > { %v12844_v24 = vld [vmem:[%s18564_s1 + $0xef8] ss:$8 sps:$4 sm:$0xff]   ;;  %v7931_v19 = vrot.slane %v17254_v30, 2 }
0x1986   : > { %v7335_v44 = vadd.f32 %v11015_v35, %v7294_v21  ;;  %v7928_v35 = vrot.slane %v17248_v28, 2 }
0x1988   : > { %v7376_v6 = vadd.f32 %v11037_v31, %v7335_v44  ;;  %v7950_v44 = vrot.slane %v17248_v28, 4 }
0x199d   : > { %v11054_v43 = vpop.f32.mrf.mxu0 }
0x199f   : > { %v11055_v58 = vpop.f32.mrf.mxu0 }
0x19a0   : > { %v11056_v7 = vadd.f32 %v11055_v58, %v11054_v43  ;;  %v7929_v43 = vrot.slane %v17251_v29, 2 }
0x19a1   : > { %v11057_v52 = vpop.f32.mrf.mxu0 }
0x19a2   : > { %v7414_v0 = vadd.f32 %v11056_v7, %v7373_v54  ;;  %v17260_v21 = vsel %vm948_vm2, %v7928_v35, %v7929_v43  ;;  %v17265_v57 = vsel %vm948_vm2, %v7929_v43, %v7931_v19  ;;  %v7951_v54 = vrot.slane %v17251_v29, 4  ;;  %v12853_v35 = vld [vmem:[%s18564_s1 + $0x34] ss:$8 sps:$4 sm:$0xff]  }
0x19a3   : > { %v11058_v34 = vpop.f32.mrf.mxu0  ;;  %v7963_v58 = vpack.c.bf16 %v17265_v57, %v17260_v21  ;;  %v7953_v7 = vrot.slane %v17254_v30, 4  ;;  %v12920_v21 = vld [vmem:[%s18564_s1 + $0x2f8] ss:$8 sps:$4 sm:$0xff]   ;;  %v12921_v57 = vld [vmem:[%s18564_s1 + $0x368] ss:$8 sps:$4 sm:$0xff]  }
0x19a4   : > { %v7455_v3 = vadd.f32 %v11078_v32, %v7414_v0  ;;  %v11059_v38 = vadd.f32 %v11058_v34, %v11057_v52  ;;  %v17273_v52 = vsel %vm972_vm3, %v7950_v44, %v7951_v54  ;;  %v7939_v44 = vrot.slane %v17248_v28, 3 }
0x19a5   : > { %v17278_v31 = vsel %vm972_vm3, %v7951_v54, %v7953_v7  ;;  %v7940_v54 = vrot.slane %v17251_v29, 3 }
0x19a6   : > { %v7461_v36 = vmax.f32 %v7455_v3, 0.0  ;;  %v7417_v40 = vadd.f32 %v11059_v38, %v7376_v6  ;;  %v7965_v32 = vpack.c.bf16 %v17278_v31, %v17273_v52  ;;  %v12935_v52 = vld [vmem:[%s18564_s1 + $0x2a8] ss:$8 sps:$4 sm:$0xff]  }
0x19a7   : > { %v12938_v31 = vld [vmem:[%s18564_s1 + $0x308] ss:$8 sps:$4 sm:$0xff]  }
0x19a8   : > { %10338 = vst [vmem:[%s14495_s28 + $0x20] sm:$0xff] %v7461_v36  ;;  %v7458_v12 = vadd.f32 %v11081_v41, %v7417_v40 }
0x19aa   : > { %v7462_v23 = vmax.f32 %v7458_v12, 0.0 }
0x19ac   : > { %10339 = vst [vmem:[%s14495_s28 + $0x28] sm:$0x3f] %v7462_v23  ;;  %11560 = vmatprep.subr.msk.mxu0 %vm948_vm2, %v7462_v23 }
0x19ad   : > { %11561 = vmatpush3.msk.msra.mxu0 %vm948_vm2, %v7462_v23 }
0x19ae   : > { %11562 = vmatprep.subr.mxu0 %v7461_v36 }
0x19af   : > { %11563 = vmatpush3.msra.mxu0 %v7461_v36 }
0x19b0   : > { %11565 = vmatmul.mubr.msk.bf16.vlgmr.msra.gmra.mxu0 %vm3866_vm11, %v12822_v47  ;;  %11568 = vmatprep.subr.msk.mxu0 %vm948_vm2, %v7462_v23  ;;  %v7917_v47 = vrot.slane %v17248_v28, 1 }
0x19b1   : > { %11569 = vmatpush3.msk.msra.mxu0 %vm948_vm2, %v7462_v23  ;;  %11572 = vmatprep.mubr.msk.bf16.mxu0 %vm3866_vm11, %v12823_v63  ;;  %v7918_v63 = vrot.slane %v17251_v29, 1 }
0x19b2   : > { %11570 = vmatprep.subr.mxu0 %v7461_v36 }
0x19b3   : > { %11571 = vmatpush3.msra.mxu0 %v7461_v36 }
0x19b4   : > { %11576 = vmatprep.subr.msk.mxu0 %vm948_vm2, %v7462_v23 }
0x19b8   : > { %11573 = vmatmul.mubr.msk.bf16.vlgmr.msra.gmra.mxu0 %vm3866_vm11, %v12824_v13  ;;  %v7920_v13 = vrot.slane %v17254_v30, 1 }
0x19b9   : > { %11577 = vmatpush3.msk.msra.mxu0 %vm948_vm2, %v7462_v23  ;;  %11580 = vmatprep.mubr.msk.bf16.mxu0 %vm3866_vm11, %v12825_v1 }
0x19ba   : > { %11578 = vmatprep.subr.mxu0 %v7461_v36 }
0x19bb   : > { %11579 = vmatpush3.msra.mxu0 %v7461_v36 }
0x19bc   : > { %11584 = vmatprep.subr.msk.mxu0 %vm948_vm2, %v7462_v23 }
0x19c0   : > { %11581 = vmatmul.mubr.msk.bf16.vlgmr.msra.gmra.mxu0 %vm3866_vm11, %v12826_v5 }
0x19c1   : > { %11585 = vmatpush3.msk.msra.mxu0 %vm948_vm2, %v7462_v23  ;;  %11588 = vmatprep.mubr.msk.bf16.mxu0 %vm3866_vm11, %v12827_v8  ;;  %v12846_v8 = vld [vmem:[%s18564_s1 + $0x70] ss:$8 sps:$4 sm:$0xff]  }
0x19c2   : > { %11586 = vmatprep.subr.mxu0 %v7461_v36 }
0x19c3   : > { %11587 = vmatpush3.msra.mxu0 %v7461_v36 }
0x19c4   : > { %11126 = vmatprep.subr.bf16.mxu0 %v12828_v33 }
0x19c8   : > { %11589 = vmatmul.mubr.msk.bf16.vlgmr.msra.gmra.mxu0 %vm3866_vm11, %v12829_v48  ;;  %v12847_v48 = vld [vmem:[%s18564_s1 + $0x64] ss:$8 sps:$4 sm:$0xff]  }
0x19c9   : > { %11127 = vmatpush3.bf16.msra.mxu0 %v12830_v4  ;;  %v7919_v4 = vsel %vm936_vm0, %v7917_v47, %v7918_v63  ;;  %v12860_v47 = vld [vmem:[%s18564_s1 + $0x14] ss:$8 sps:$4 sm:$0xff]  }
0x19ca   : > { %11128 = vmatprep.subr.bf16.mxu0 %v12831_v45  ;;  %v7921_v45 = vsel %vm936_vm0, %v7918_v63, %v7920_v13  ;;  %v12861_v63 = vld [vmem:[%s18564_s1 + $0x154] ss:$8 sps:$4 sm:$0xff]  }
0x19cd   : > { %11129 = vmatpush3.bf16.msra.mxu0 %v12832_v59 }
0x19ce   : > { %11130 = vmatprep.subr.bf16.mxu0 %v12833_v56  ;;  %v12848_v56 = vld [vmem:[%s18564_s1 + $0x60] ss:$8 sps:$4 sm:$0xff]  }
0x19d1   : > { %11131 = vmatpush3.bf16.msra.mxu0 %v12834_v26  ;;  %v7962_v26 = vpack.c.bf16 %v7921_v45, %v7919_v4  ;;  %v12867_v4 = vld [vmem:[%s18564_s1 + $0x140] ss:$8 sps:$4 sm:$0xff]   ;;  %v12868_v45 = vld [vmem:[%s18564_s1 + $0xf4] ss:$8 sps:$4 sm:$0xff]  }
0x19d2   : > { %11132 = vmatprep.subr.bf16.mxu0 %v12835_v15 }
0x19d5   : > { %11133 = vmatpush3.bf16.msra.mxu0 %v12836_v18 }
0x19d6   : > { %11134 = vmatprep.subr.bf16.mxu0 %v12837_v9  ;;  %v12849_v9 = vld [vmem:[%s18564_s1 + $0x54] ss:$8 sps:$4 sm:$0xff]  }
0x19d9   : > { %11135 = vmatpush3.bf16.msra.mxu0 %v12838_v14 }
0x19da   : > { %11136 = vmatprep.subr.bf16.mxu0 %v12839_v50  ;;  %v12850_v50 = vld [vmem:[%s18564_s1 + $0x50] ss:$8 sps:$4 sm:$0xff]  }
0x19dd   : > { %11137 = vmatpush3.bf16.msra.mxu0 %v12840_v49 }
0x19de   : > { %11138 = vmatprep.subr.bf16.mxu0 %v12841_v61  ;;  %v12851_v61 = vld [vmem:[%s18564_s1 + $0x44] ss:$8 sps:$4 sm:$0xff]  }
0x19e1   : > { %11139 = vmatpush3.bf16.msra.mxu0 %v12842_v10 }
0x19e2   : > { %11140 = vmatprep.subr.bf16.mxu0 %v12843_v20 }
0x19e5   : > { %11141 = vmatpush3.bf16.msra.mxu0 %v12844_v24 }
0x19e6   : > { %8024 = vmatprep.subr.bf16.mxu0 %v12845_v22  ;;  %v12852_v22 = vld [vmem:[%s18564_s1 + $0x40] ss:$8 sps:$4 sm:$0xff]  }
0x1a70   : > { %v11566_v0 = vpop.f32.mrf.mxu0 }
0x1a72   : > { %v7535_v62 = vpop.f32.mrf.mxu0 }
0x1a74   : > { %v11567_v34 = vpop.f32.mrf.mxu0 }
0x1a75   : > { %v7797_v15 = vpack.c.bf16 %v11567_v34, %v11566_v0  ;;  %v7942_v0 = vrot.slane %v17254_v30, 3  ;;  %v12855_v34 = vld [vmem:[%s18564_s1 + $0x170] ss:$8 sps:$4 sm:$0xff]  }
0x1a76   : > { %v7538_v3 = vpop.f32.mrf.mxu0 }
0x1a77   : > { %v7793_v12 = vpack.c.bf16 %v7538_v3, %v7535_v62  ;;  %v12854_v62 = vld [vmem:[%s18564_s1 + $0x30] ss:$8 sps:$4 sm:$0xff]   ;;  %v12856_v3 = vld [vmem:[%s18564_s1 + $0x24] ss:$8 sps:$4 sm:$0xff]  }
0x1a78   : > { %v11574_v6 = vpop.f32.mrf.mxu0 }
0x1a7a   : > { %v7616_v38 = vpop.f32.mrf.mxu0 }
0x1a7c   : > { %v11575_v41 = vpop.f32.mrf.mxu0 }
0x1a7d   : > { %v7798_v1 = vpack.c.bf16 %v11575_v41, %v11574_v6  ;;  %v12857_v6 = vld [vmem:[%s18564_s1 + $0x164] ss:$8 sps:$4 sm:$0xff]   ;;  %v7943_v41 = vsel %vm960_vm1, %v7940_v54, %v7942_v0 }
0x1a7e   : > { %v7619_v36 = vpop.f32.mrf.mxu0 }
0x1a7f   : > { %v7794_v40 = vpack.c.bf16 %v7619_v36, %v7616_v38  ;;  %v7941_v38 = vsel %vm960_vm1, %v7939_v44, %v7940_v54  ;;  %v12858_v36 = vld [vmem:[%s18564_s1 + $0x20] ss:$8 sps:$4 sm:$0xff]   ;;  %v12885_v44 = vld [vmem:[%s18564_s1 + $0x1f4] ss:$8 sps:$4 sm:$0xff]   ;;  %v12886_v54 = vld [vmem:[%s18564_s1 + $0xb0] ss:$8 sps:$4 sm:$0xff]  }
0x1a80   : > { %v17282_v23 = vpop.f32.mrf.mxu0 }
0x1a81   : > { %7833 = vmatprep.mubr.bf16.mxu1 %v7794_v40  ;;  %v12859_v40 = vld [vmem:[%s18564_s1 + $0x160] ss:$8 sps:$4 sm:$0xff]  }
0x1a82   : > { %v7697_v5 = vpop.f32.mrf.mxu0  ;;  %7834 = vmatmul.mubr.bf16.vlgmr.msra.gmra.mxu1 %v7793_v12 }
0x1a83   : > { %7972 = vmatpush1.bf16.msra.mxu1 %v12846_v8  ;;  %7841 = vmatprep.mubr.bf16.mxu1 %v7798_v1  ;;  %v7964_v1 = vpack.c.bf16 %v7943_v41, %v7941_v38  ;;  %v12864_v8 = vld [vmem:[%s18564_s1 + $0x4] ss:$8 sps:$4 sm:$0xff]   ;;  %v12891_v38 = vld [vmem:[%s18564_s1 + $0x1e0] ss:$8 sps:$4 sm:$0xff]   ;;  %v17438_v41 = vld [vmem:[%s13398_s16 + $0x78] sm:$0xff] }
0x1a84   : > { %v11583_v33 = vpop.f32.mrf.mxu0  ;;  %7973 = vmatprep.subr.bf16.mxu1 %v12847_v48  ;;  %v12866_v48 = vld [vmem:[%s18564_s1] ss:$8 sps:$4 sm:$0xff]  }
0x1a85   : > { %v7799_v12 = vpack.c.bf16 %v11583_v33, %v17282_v23  ;;  %v12863_v23 = vld [vmem:[%s18564_s1 + $0x150] ss:$8 sps:$4 sm:$0xff]   ;;  %v12865_v33 = vld [vmem:[%s18564_s1 + $0x144] ss:$8 sps:$4 sm:$0xff]  }
0x1a86   : > { %v7700_v59 = vpop.f32.mrf.mxu0 }
0x1a87   : > { %7974 = vmatpush1.bf16.msra.mxu1 %v12848_v56  ;;  %v7795_v10 = vpack.c.bf16 %v7700_v59, %v7697_v5  ;;  %v12862_v5 = vld [vmem:[%s18564_s1 + $0x10] ss:$8 sps:$4 sm:$0xff]   ;;  %v12869_v59 = vld [vmem:[%s18564_s1 + $0x134] ss:$8 sps:$4 sm:$0xff]  }
0x1a88   : > { %v11590_v18 = vpop.f32.mrf.mxu0  ;;  %7975 = vmatprep.subr.bf16.mxu1 %v12849_v9  ;;  %v12870_v56 = vld [vmem:[%s18564_s1 + $0xf0] ss:$8 sps:$4 sm:$0xff]   ;;  %v12874_v9 = vld [vmem:[%s18564_s1 + $0xe0] ss:$8 sps:$4 sm:$0xff]  }
0x1a8a   : > { %v7778_v14 = vpop.f32.mrf.mxu0  ;;  %7842 = vmatmul.mubr.bf16.gmra.mxu1 %v7797_v15  ;;  %v12872_v15 = vld [vmem:[%s18564_s1 + $0xe4] ss:$8 sps:$4 sm:$0xff]  }
0x1a8b   : > { %7976 = vmatpush1.bf16.msra.mxu1 %v12850_v50  ;;  %8003 = vmatprep.mubr.bf16.mxu1 %v7962_v26  ;;  %v12871_v26 = vld [vmem:[%s18564_s1 + $0x130] ss:$8 sps:$4 sm:$0xff]   ;;  %v12876_v50 = vld [vmem:[%s18564_s1 + $0xd4] ss:$8 sps:$4 sm:$0xff]  }
0x1a8c   : > { %v11591_v49 = vpop.f32.mrf.mxu0  ;;  %7977 = vmatprep.subr.bf16.mxu1 %v12851_v61  ;;  %v12878_v61 = vld [vmem:[%s18564_s1 + $0xd0] ss:$8 sps:$4 sm:$0xff]  }
0x1a8d   : > { %v7800_v43 = vpack.c.bf16 %v11591_v49, %v11590_v18  ;;  %v12873_v18 = vld [vmem:[%s18564_s1 + $0x124] ss:$8 sps:$4 sm:$0xff]   ;;  %v12877_v49 = vld [vmem:[%s18564_s1 + $0x114] ss:$8 sps:$4 sm:$0xff]  }
0x1a8e   : > { %v7781_v20 = vpop.f32.mrf.mxu0 }
0x1a8f   : > { %v7796_v24 = vpack.c.bf16 %v7781_v20, %v7778_v14  ;;  %7978 = vmatpush1.bf16.msra.mxu1 %v12852_v22  ;;  %v12875_v14 = vld [vmem:[%s18564_s1 + $0x120] ss:$8 sps:$4 sm:$0xff]   ;;  %v12880_v20 = vld [vmem:[%s18564_s1 + $0xc4] ss:$8 sps:$4 sm:$0xff]  }
0x1a90   : > { %7979 = vmatprep.subr.bf16.mxu1 %v12853_v35  ;;  %v12882_v22 = vld [vmem:[%s18564_s1 + $0xc0] ss:$8 sps:$4 sm:$0xff]  }
0x1a91   : > { %7882 = vmatprep.mubr.bf16.mxu0 %v7796_v24  ;;  %v12881_v24 = vld [vmem:[%s18564_s1 + $0x104] ss:$8 sps:$4 sm:$0xff]   ;;  %v12883_v35 = vld [vmem:[%s18564_s1 + $0x100] ss:$8 sps:$4 sm:$0xff]  }
0x1a92   : > { %7883 = vmatmul.mubr.bf16.vlgmr.msra.gmra.mxu0 %v7795_v10  ;;  %v12879_v10 = vld [vmem:[%s18564_s1 + $0x110] ss:$8 sps:$4 sm:$0xff]  }
0x1a93   : > { %7980 = vmatpush1.bf16.msra.mxu1 %v12854_v62  ;;  %8025 = vmatpush1.bf16.msra.mxu0 %v12855_v34  ;;  %v12887_v62 = vld [vmem:[%s18564_s1 + $0x1f0] ss:$8 sps:$4 sm:$0xff]   ;;  %v12888_v34 = vld [vmem:[%s18564_s1 + $0xa4] ss:$8 sps:$4 sm:$0xff]  }
0x1a94   : > { %7981 = vmatprep.subr.bf16.mxu1 %v12856_v3  ;;  %8026 = vmatprep.subr.bf16.mxu0 %v12857_v6  ;;  %v12889_v3 = vld [vmem:[%s18564_s1 + $0x1e4] ss:$8 sps:$4 sm:$0xff]   ;;  %v12890_v6 = vld [vmem:[%s18564_s1 + $0xa0] ss:$8 sps:$4 sm:$0xff]  }
0x1a95   : > { %7890 = vmatprep.mubr.bf16.mxu0 %v7800_v43  ;;  %v12884_v43 = vld [vmem:[%s18564_s1 + $0xb4] ss:$8 sps:$4 sm:$0xff]  }
0x1a97   : > { %7982 = vmatpush1.bf16.msra.mxu1 %v12858_v36  ;;  %8027 = vmatpush1.bf16.msra.mxu0 %v12859_v40  ;;  %v12892_v36 = vld [vmem:[%s18564_s1 + $0x94] ss:$8 sps:$4 sm:$0xff]  }
0x1a98   : > { %7983 = vmatprep.subr.bf16.mxu1 %v12860_v47  ;;  %8028 = vmatprep.subr.bf16.mxu0 %v12861_v63  ;;  %v12893_v40 = vld [vmem:[%s18564_s1 + $0x1d4] ss:$8 sps:$4 sm:$0xff]   ;;  %v12894_v47 = vld [vmem:[%s18564_s1 + $0x90] ss:$8 sps:$4 sm:$0xff]  }
0x1a99   : > { %v12895_v63 = vld [vmem:[%s18564_s1 + $0x1d0] ss:$8 sps:$4 sm:$0xff]  }
0x1a9a   : > { %7891 = vmatmul.mubr.bf16.gmra.mxu0 %v7799_v12  ;;  %v7922_v12 = vrot.slane %v17438_v41, 1 }
0x1a9b   : > { %7984 = vmatpush1.bf16.msra.mxu1 %v12862_v5  ;;  %8029 = vmatpush1.bf16.msra.mxu0 %v12863_v23  ;;  %v12897_v5 = vld [vmem:[%s18564_s1 + $0x1c4] ss:$8 sps:$4 sm:$0xff]   ;;  %v7961_v23 = vpack.c.bf16 %v17251_v29, %v17248_v28  ;;  %v12901_v28 = vld [vmem:[%s18564_s1 + $0x274] ss:$8 sps:$4 sm:$0xff]  }
0x1a9c   : > { %7985 = vmatprep.subr.bf16.mxu1 %v12864_v8  ;;  %8030 = vmatprep.subr.bf16.mxu0 %v12865_v33  ;;  %v7923_v8 = vsel %vm936_vm0, %v7920_v13, %v7922_v12  ;;  %v12898_v33 = vld [vmem:[%s18564_s1 + $0x80] ss:$8 sps:$4 sm:$0xff]   ;;  %v12902_v13 = vld [vmem:[%s18564_s1 + $0x1b0] ss:$8 sps:$4 sm:$0xff]  }
0x1a9d   : > { %8056 = vmatprep.mubr.bf16.mxu0 %v7964_v1  ;;  %v12896_v1 = vld [vmem:[%s18564_s1 + $0x84] ss:$8 sps:$4 sm:$0xff]   ;;  %v7967_v29 = vpack.c.bf16 %v7922_v12, %v7923_v8  ;;  %v12932_v8 = vld [vmem:[%s18564_s1 + $0x338] ss:$8 sps:$4 sm:$0xff]  }
0x1a9e   : > { %v12927_v12 = vld [vmem:[%s18564_s1 + $0x204] ss:$8 sps:$4 sm:$0xff]  }
0x1a9f   : > { %7986 = vmatpush1.bf16.msra.mxu1 %v12866_v48  ;;  %8031 = vmatpush1.bf16.msra.mxu0 %v12867_v4  ;;  %v12899_v48 = vld [vmem:[%s18564_s1 + $0x1c0] ss:$8 sps:$4 sm:$0xff]   ;;  %v12900_v4 = vld [vmem:[%s18564_s1 + $0x1b4] ss:$8 sps:$4 sm:$0xff]  }
0x1aa0   : > { %7987 = vmatprep.subr.bf16.mxu1 %v12868_v45  ;;  %8032 = vmatprep.subr.bf16.mxu0 %v12869_v59  ;;  %v12903_v45 = vld [vmem:[%s18564_s1 + $0x270] ss:$8 sps:$4 sm:$0xff]   ;;  %v12904_v59 = vld [vmem:[%s18564_s1 + $0x1a4] ss:$8 sps:$4 sm:$0xff]  }
0x1aa3   : > { %7988 = vmatpush2.bf16.msra.mxu1 %v12870_v56  ;;  %8033 = vmatpush1.bf16.msra.mxu0 %v12871_v26  ;;  %v12905_v56 = vld [vmem:[%s18564_s1 + $0x264] ss:$8 sps:$4 sm:$0xff]   ;;  %v7966_v26 = vpack.c.bf16 %v17438_v41, %v17254_v30  ;;  %v12936_v30 = vld [vmem:[%s18564_s1 + $0x318] ss:$8 sps:$4 sm:$0xff]  }
0x1aa4   : > { %7989 = vmatprep.subr.bf16.mxu1 %v12872_v15  ;;  %8034 = vmatprep.subr.bf16.mxu0 %v12873_v18  ;;  %v12906_v15 = vld [vmem:[%s18564_s1 + $0x1a0] ss:$8 sps:$4 sm:$0xff]  }
0x1aa5   : > { %v12907_v18 = vld [vmem:[%s18564_s1 + $0x260] ss:$8 sps:$4 sm:$0xff]  }
0x1aa7   : > { %7990 = vmatpush2.bf16.msra.mxu1 %v12874_v9  ;;  %8035 = vmatpush1.bf16.msra.mxu0 %v12875_v14  ;;  %v12908_v9 = vld [vmem:[%s18564_s1 + $0x194] ss:$8 sps:$4 sm:$0xff]  }
0x1aa8   : > { %7991 = vmatprep.subr.bf16.mxu1 %v12876_v50  ;;  %8036 = vmatprep.subr.bf16.mxu0 %v12877_v49  ;;  %v12909_v14 = vld [vmem:[%s18564_s1 + $0x254] ss:$8 sps:$4 sm:$0xff]   ;;  %v7944_v50 = vrot.slane %v17438_v41, 3  ;;  %v12910_v49 = vld [vmem:[%s18564_s1 + $0x190] ss:$8 sps:$4 sm:$0xff]  }
0x1aab   : > { %7992 = vmatpush2.bf16.msra.mxu1 %v12878_v61  ;;  %8037 = vmatpush1.bf16.msra.mxu0 %v12879_v10  ;;  %v12911_v61 = vld [vmem:[%s18564_s1 + $0x250] ss:$8 sps:$4 sm:$0xff]   ;;  %v12912_v10 = vld [vmem:[%s18564_s1 + $0x184] ss:$8 sps:$4 sm:$0xff]  }
0x1aac   : > { %7993 = vmatprep.subr.bf16.mxu1 %v12880_v20  ;;  %8038 = vmatprep.subr.bf16.mxu0 %v12881_v24  ;;  %v12913_v20 = vld [vmem:[%s18564_s1 + $0x244] ss:$8 sps:$4 sm:$0xff]   ;;  %v7945_v24 = vsel %vm960_vm1, %v7942_v0, %v7944_v50  ;;  %v12917_v0 = vld [vmem:[%s18564_s1 + $0x378] ss:$8 sps:$4 sm:$0xff]  }
0x1aaf   : > { %7994 = vmatpush2.bf16.msra.mxu1 %v12882_v22  ;;  %8039 = vmatpush1.bf16.msra.mxu0 %v12883_v35  ;;  %v12914_v22 = vld [vmem:[%s18564_s1 + $0x180] ss:$8 sps:$4 sm:$0xff]  }
0x1ab0   : > { %7995 = vmatprep.subr.bf16.mxu1 %v12884_v43  ;;  %8040 = vmatprep.subr.bf16.mxu0 %v12885_v44  ;;  %v12915_v35 = vld [vmem:[%s18564_s1 + $0x240] ss:$8 sps:$4 sm:$0xff]   ;;  %v7969_v43 = vpack.c.bf16 %v7944_v50, %v7945_v24  ;;  %v7933_v44 = vrot.slane %v17438_v41, 2 }
0x1ab3   : > { %7996 = vmatpush2.bf16.msra.mxu1 %v12886_v54  ;;  %8041 = vmatpush2.bf16.msra.mxu0 %v12887_v62  ;;  %v12916_v54 = vld [vmem:[%s18564_s1 + $0x234] ss:$8 sps:$4 sm:$0xff]   ;;  %v12918_v62 = vld [vmem:[%s18564_s1 + $0x230] ss:$8 sps:$4 sm:$0xff]  }
0x1ab4   : > { %7997 = vmatprep.subr.bf16.mxu1 %v12888_v34  ;;  %8042 = vmatprep.subr.bf16.mxu0 %v12889_v3  ;;  %v7934_v34 = vsel %vm948_vm2, %v7931_v19, %v7933_v44  ;;  %v12919_v3 = vld [vmem:[%s18564_s1 + $0x224] ss:$8 sps:$4 sm:$0xff]   ;;  %v12922_v19 = vld [vmem:[%s18564_s1 + $0x220] ss:$8 sps:$4 sm:$0xff]  }
0x1ab7   : > { %7998 = vmatpush2.bf16.msra.mxu1 %v12890_v6  ;;  %8043 = vmatpush2.bf16.msra.mxu0 %v12891_v38  ;;  %v12923_v6 = vld [vmem:[%s18564_s1 + $0x214] ss:$8 sps:$4 sm:$0xff]   ;;  %v12924_v38 = vld [vmem:[%s18564_s1 + $0x2e8] ss:$8 sps:$4 sm:$0xff]  }
0x1ab8   : > { %7999 = vmatprep.subr.bf16.mxu1 %v12892_v36  ;;  %8044 = vmatprep.subr.bf16.mxu0 %v12893_v40  ;;  %v12925_v36 = vld [vmem:[%s18564_s1 + $0x358] ss:$8 sps:$4 sm:$0xff]  }
0x1ab9   : > { %v12926_v40 = vld [vmem:[%s18564_s1 + $0x210] ss:$8 sps:$4 sm:$0xff]  }
0x1abb   : > { %8000 = vmatpush2.bf16.msra.mxu1 %v12894_v47  ;;  %8045 = vmatpush2.bf16.msra.mxu0 %v12895_v63  ;;  %v12928_v47 = vld [vmem:[%s18564_s1 + $0x2d8] ss:$8 sps:$4 sm:$0xff]   ;;  %v12929_v63 = vld [vmem:[%s18564_s1 + $0x348] ss:$8 sps:$4 sm:$0xff]  }
0x1abc   : > { %8001 = vmatprep.subr.bf16.mxu1 %v12896_v1  ;;  %8046 = vmatprep.subr.bf16.mxu0 %v12897_v5  ;;  %v12930_v1 = vld [vmem:[%s18564_s1 + $0x200] ss:$8 sps:$4 sm:$0xff]   ;;  %v7955_v5 = vrot.slane %v17438_v41, 4 }
0x1abe   : > { %v7956_v41 = vsel %vm972_vm3, %v7953_v7, %v7955_v5  ;;  %v12937_v7 = vld [vmem:[%s18564_s1 + $0x298] ss:$8 sps:$4 sm:$0xff]  }
0x1abf   : > { %8002 = vmatpush2.bf16.msra.mxu1 %v12898_v33  ;;  %8047 = vmatpush2.bf16.msra.mxu0 %v12899_v48  ;;  %v12933_v33 = vld [vmem:[%s18564_s1 + $0x2b8] ss:$8 sps:$4 sm:$0xff]   ;;  %v12934_v48 = vld [vmem:[%s18564_s1 + $0x328] ss:$8 sps:$4 sm:$0xff]  }
0x1ac0   : > { %8048 = vmatprep.subr.bf16.mxu0 %v12900_v4  ;;  %8077 = vmatprep.subr.bf16.mxu1 %v12901_v28  ;;  %v7970_v4 = vpack.c.bf16 %v7955_v5, %v7956_v41  ;;  %v12940_v28 = vld [vmem:[%s18564_s1 + $0x40c] ss:$8 sps:$4 sm:$0xff]  }
0x1ac2   : > { %8004 = vmatmul.mubr.bf16.vlgmr.msra.gmra.mxu1 %v7961_v23  ;;  %v12931_v23 = vld [vmem:[%s18564_s1 + $0x2c8] ss:$8 sps:$4 sm:$0xff]  }
0x1ac3   : > { %8049 = vmatpush2.bf16.msra.mxu0 %v12902_v13  ;;  %8078 = vmatpush1.bf16.msra.mxu1 %v12903_v45 }
0x1ac4   : > { %8050 = vmatprep.subr.bf16.mxu0 %v12904_v59  ;;  %8079 = vmatprep.subr.bf16.mxu1 %v12905_v56 }
0x1ac5   : > { %8013 = vmatprep.mubr.bf16.mxu1 %v7967_v29 }
0x1ac7   : > { %8051 = vmatpush2.bf16.msra.mxu0 %v12906_v15  ;;  %8080 = vmatpush1.bf16.msra.mxu1 %v12907_v18 }
0x1ac8   : > { %8052 = vmatprep.subr.bf16.mxu0 %v12908_v9  ;;  %8081 = vmatprep.subr.bf16.mxu1 %v12909_v14 }
0x1aca   : > { %8014 = vmatmul.mubr.bf16.gmra.mxu1 %v7966_v26 }
0x1acb   : > { %8053 = vmatpush2.bf16.msra.mxu0 %v12910_v49  ;;  %8082 = vmatpush1.bf16.msra.mxu1 %v12911_v61 }
0x1acc   : > { %8054 = vmatprep.subr.bf16.mxu0 %v12912_v10  ;;  %8083 = vmatprep.subr.bf16.mxu1 %v12913_v20 }
0x1acd   : > { %8109 = vmatprep.mubr.bf16.mxu1 %v13202_v42 }
0x1acf   : > { %8055 = vmatpush2.bf16.msra.mxu0 %v12914_v22  ;;  %8084 = vmatpush1.bf16.msra.mxu1 %v12915_v35 }
0x1ad0   : > { %8085 = vmatprep.subr.bf16.mxu1 %v12916_v54  ;;  %11154 = vmatprep.subr.bf16.mxu0 %v12917_v0 }
0x1ad2   : > { %8057 = vmatmul.mubr.bf16.vlgmr.msra.gmra.mxu0 %v7963_v58  ;;  %v7968_v58 = vpack.c.bf16 %v7933_v44, %v7934_v34 }
0x1ad3   : > { %8086 = vmatpush1.bf16.msra.mxu1 %v12918_v62  ;;  %8066 = vmatprep.mubr.bf16.mxu0 %v7969_v43 }
0x1ad4   : > { %8087 = vmatprep.subr.bf16.mxu1 %v12919_v3  ;;  %11155 = vmatpush3.bf16.msra.mxu0 %v12920_v21 }
0x1ad5   : > { %11156 = vmatprep.subr.bf16.mxu0 %v12921_v57 }
0x1ad7   : > { %8088 = vmatpush1.bf16.msra.mxu1 %v12922_v19 }
0x1ad8   : > { %8089 = vmatprep.subr.bf16.mxu1 %v12923_v6  ;;  %11157 = vmatpush3.bf16.msra.mxu0 %v12924_v38 }
0x1ad9   : > { %11158 = vmatprep.subr.bf16.mxu0 %v12925_v36 }
0x1ada   : > { %8067 = vmatmul.mubr.bf16.gmra.mxu0 %v7968_v58 }
0x1adb   : > { %8090 = vmatpush1.bf16.msra.mxu1 %v12926_v40 }
0x1adc   : > { %8091 = vmatprep.subr.bf16.mxu1 %v12927_v12  ;;  %11159 = vmatpush3.bf16.msra.mxu0 %v12928_v47 }
0x1add   : > { %11160 = vmatprep.subr.bf16.mxu0 %v12929_v63 }
0x1adf   : > { %8092 = vmatpush1.bf16.msra.mxu1 %v12930_v1 }
0x1ae0   : > { %11161 = vmatpush3.bf16.msra.mxu0 %v12931_v23  ;;  %11592 = vmatprep.subr.mxu1 %v13203_v16 }
0x1ae1   : > { %11162 = vmatprep.subr.bf16.mxu0 %v12932_v8 }
0x1ae2   : > { %8110 = vmatmul.mubr.bf16.vlgmr.msra.gmra.mxu1 %v7965_v32  ;;  %v12939_v32 = vld [vmem:[%s18564_s1 + $0x288] ss:$8 sps:$4 sm:$0xff]  }
0x1ae3   : > { %8119 = vmatprep.mubr.bf16.mxu1 %v13202_v42 }
0x1ae4   : > { %11163 = vmatpush3.bf16.msra.mxu0 %v12933_v33 }
0x1ae5   : > { %11164 = vmatprep.subr.bf16.mxu0 %v12934_v48 }
0x1ae8   : > { %11165 = vmatpush3.bf16.msra.mxu0 %v12935_v52 }
0x1ae9   : > { %11166 = vmatprep.subr.bf16.mxu0 %v12936_v30 }
0x1aea   : > { %8120 = vmatmul.mubr.bf16.gmra.mxu1 %v7970_v4 }
0x1aeb   : > { %11600 = vmatprep.mubr.msk.bf16.mxu1 %vm13204_vm4, %v13203_v16 }
0x1aec   : > { %11167 = vmatpush3.bf16.msra.mxu0 %v12937_v7 }
0x1aed   : > { %11168 = vmatprep.subr.bf16.mxu0 %v12938_v31 }
0x1af0   : > { %11169 = vmatpush3.bf16.msra.mxu0 %v12939_v32 }
0x1af1   : > { %8306 = vmatprep.subr.bf16.mxu0 %v12940_v28 }
0x1b42   : > { %v11114_v29 = vpop.f32.mrf.mxu1 }
0x1b44   : > { %v11115_v13 = vpop.f32.mrf.mxu1 }
0x1b45   : > { %v11116_v26 = vadd.f32 %v11115_v13, %v11114_v29 }
0x1b46   : > { %v11117_v45 = vpop.f32.mrf.mxu1 }
0x1b47   : > { %v7836_v14 = vadd.f32 %v11116_v26, %v14988_v11 }
0x1b48   : > { %v11118_v59 = vpop.f32.mrf.mxu1 }
0x1b49   : > { %v11119_v50 = vadd.f32 %v11118_v59, %v11117_v45 }
0x1b4a   : > { %v11120_v56 = vpop.f32.mrf.mxu1 }
0x1b4b   : > { %v7839_v22 = vadd.f32 %v11119_v50, %v14988_v11 }
0x1b4c   : > { %v11121_v15 = vpop.f32.mrf.mxu1 }
0x1b4d   : > { %v11122_v35 = vadd.f32 %v11121_v15, %v11120_v56 }
0x1b4e   : > { %v11123_v61 = vpop.f32.mrf.mxu1 }
0x1b4f   : > { %v7844_v34 = vadd.f32 %v11122_v35, %v14988_v11 }
0x1b50   : > { %v11124_v44 = vpop.f32.mrf.mxu1 }
0x1b51   : > { %v11125_v3 = vadd.f32 %v11124_v44, %v11123_v61 }
0x1b52   : > { %v11142_v18 = vpop.f32.mrf.mxu0 }
0x1b53   : > { %v7847_v6 = vadd.f32 %v11125_v3, %v14988_v11 }
0x1b54   : > { %v11143_v9 = vpop.f32.mrf.mxu0 }
0x1b55   : > { %v11144_v49 = vadd.f32 %v11143_v9, %v11142_v18 }
0x1b56   : > { %v11145_v10 = vpop.f32.mrf.mxu0 }
0x1b57   : > { %v7885_v20 = vadd.f32 %v11144_v49, %v7836_v14 }
0x1b58   : > { %v11146_v24 = vpop.f32.mrf.mxu0 }
0x1b59   : > { %12128 = vtanh.f32 %v7885_v20  ;;  %v11147_v43 = vadd.f32 %v11146_v24, %v11145_v10 }
0x1b5a   : > { %v11148_v54 = vpop.f32.mrf.mxu0 }
0x1b5b   : > { %v7888_v0 = vadd.f32 %v11147_v43, %v7839_v22 }
0x1b5c   : > { %v11149_v62 = vpop.f32.mrf.mxu0 }
0x1b5d   : > { %12130 = vtanh.f32 %v7888_v0  ;;  %v11150_v21 = vadd.f32 %v11149_v62, %v11148_v54 }
0x1b5e   : > { %v11151_v57 = vpop.f32.mrf.mxu0 }
0x1b5f   : > { %v7893_v58 = vadd.f32 %v11150_v21, %v7844_v34 }
0x1b60   : > { %v11152_v19 = vpop.f32.mrf.mxu0 }
0x1b61   : > { %12132 = vtanh.f32 %v7893_v58  ;;  %v11153_v38 = vadd.f32 %v11152_v19, %v11151_v57 }
0x1b63   : > { %v7896_v36 = vadd.f32 %v11153_v38, %v7847_v6 }
0x1b65   : > { %12134 = vtanh.f32 %v7896_v36 }
0x1b66   : > { %v12129_v40 = vpop.eup %12128 }
0x1b67   : > { %10352 = vst [vmem:[%s14998_s14 + $0x40] sm:$0xff] %v12129_v40 }
0x1b6a   : > { %v12131_v12 = vpop.eup %12130 }
0x1b6b   : > { %10353 = vst [vmem:[%s14998_s14 + $0x48] sm:$0xff] %v12131_v12 }
0x1b6e   : > { %v12133_v47 = vpop.eup %12132 }
0x1b6f   : > { %10354 = vst [vmem:[%s14998_s14 + $0x50] sm:$0xff] %v12133_v47 }
0x1b72   : > { %v12135_v63 = vpop.eup %12134 }
0x1b73   : > { %10355 = vst [vmem:[%s14998_s14 + $0x58] sm:$0xf] %v12135_v63 }
0x1b82   : > { %v8005_v1 = vpop.f32.mrf.mxu1 }
0x1b83   : > { %v8006_v31 = vadd.f32 %v8005_v1, %v13611_v25 }
0x1b84   : > { %v8007_v5 = vpop.f32.mrf.mxu1 }
0x1b85   : > { %v8008_v29 = vadd.f32 %v8007_v5, %v13614_v27 }
0x1b86   : > { %v8009_v23 = vpop.f32.mrf.mxu1 }
0x1b87   : > { %v8010_v59 = vadd.f32 %v8009_v23, %v13611_v25 }
0x1b88   : > { %v8011_v8 = vpop.f32.mrf.mxu1 }
0x1b89   : > { %v8012_v15 = vadd.f32 %v8011_v8, %v13614_v27 }
0x1b8a   : > { %v8015_v33 = vpop.f32.mrf.mxu1 }
0x1b8b   : > { %v8016_v14 = vadd.f32 %v8015_v33, %v13611_v25  ;;  %v12941_v33 = vld [vmem:[%s18564_s1 + $0x408] ss:$8 sps:$4 sm:$0xff]  }
0x1b8c   : > { %v8017_v4 = vpop.f32.mrf.mxu1 }
0x1b8d   : > { %v8018_v20 = vadd.f32 %v8017_v4, %v13614_v27 }
0x1b8e   : > { %v8019_v30 = vpop.f32.mrf.mxu1 }
0x1b8f   : > { %v8020_v3 = vadd.f32 %v8019_v30, %v13611_v25  ;;  %v12943_v30 = vld [vmem:[%s18564_s1 + $0x3f8] ss:$8 sps:$4 sm:$0xff]  }
0x1b90   : > { %v8021_v32 = vpop.f32.mrf.mxu1 }
0x1b91   : > { %v8022_v19 = vadd.f32 %v8021_v32, %v13614_v27  ;;  %v12945_v32 = vld [vmem:[%s18564_s1 + $0x3e8] ss:$8 sps:$4 sm:$0xff]  }
0x1b92   : > { %v8058_v41 = vpop.f32.mrf.mxu0 }
0x1b93   : > { %v8059_v13 = vadd.f32 %v8058_v41, %v8006_v31  ;;  %v12944_v31 = vld [vmem:[%s18564_s1 + $0x3ec] ss:$8 sps:$4 sm:$0xff]  }
0x1b94   : > { %v8060_v48 = vpop.f32.mrf.mxu0 }
0x1b95   : > { %v8061_v56 = vadd.f32 %v8060_v48, %v8008_v29  ;;  %v12942_v48 = vld [vmem:[%s18564_s1 + $0x3fc] ss:$8 sps:$4 sm:$0xff]   ;;  %v12947_v29 = vld [vmem:[%s18564_s1 + $0x3d8] ss:$8 sps:$4 sm:$0xff]  }
0x1b96   : > { %v8062_v52 = vpop.f32.mrf.mxu0 }
0x1b97   : > { %v8063_v50 = vadd.f32 %v8062_v52, %v8010_v59  ;;  %v12950_v59 = vld [vmem:[%s18564_s1 + $0x3bc] ss:$8 sps:$4 sm:$0xff]  }
0x1b98   : > { %v8064_v7 = vpop.f32.mrf.mxu0 }
0x1b99   : > { %v8065_v24 = vadd.f32 %v8064_v7, %v8012_v15  ;;  %v12953_v15 = vld [vmem:[%s18564_s1 + $0x3a8] ss:$8 sps:$4 sm:$0xff]  }
0x1b9a   : > { %v8068_v28 = vpop.f32.mrf.mxu0 }
0x1b9b   : > { %v8069_v54 = vadd.f32 %v8068_v28, %v8016_v14  ;;  %v12946_v28 = vld [vmem:[%s18564_s1 + $0x3dc] ss:$8 sps:$4 sm:$0xff]   ;;  %v12956_v14 = vld [vmem:[%s18564_s1 + $0x48c] ss:$8 sps:$4 sm:$0xff]  }
0x1b9c   : > { %v8070_v18 = vpop.f32.mrf.mxu0 }
0x1b9d   : > { %v8071_v21 = vadd.f32 %v8070_v18, %v8018_v20  ;;  %v12954_v18 = vld [vmem:[%s18564_s1 + $0x39c] ss:$8 sps:$4 sm:$0xff]   ;;  %v12961_v20 = vld [vmem:[%s18564_s1 + $0x468] ss:$8 sps:$4 sm:$0xff]  }
0x1b9e   : > { %v8072_v43 = vpop.f32.mrf.mxu0 }
0x1b9f   : > { %v8073_v36 = vadd.f32 %v8072_v43, %v8020_v3  ;;  %v12965_v43 = vld [vmem:[%s18564_s1 + $0x448] ss:$8 sps:$4 sm:$0xff]   ;;  %v12971_v3 = vld [vmem:[%s18564_s1 + $0x418] ss:$8 sps:$4 sm:$0xff]  }
0x1ba0   : > { %v8074_v6 = vpop.f32.mrf.mxu0 }
0x1ba1   : > { %v8075_v5 = vadd.f32 %v8074_v6, %v8022_v19 }
0x1ba2   : > { %v8111_v45 = vpop.f32.mrf.mxu1 }
0x1ba3   : > { %v8112_v26 = vadd.f32 %v8111_v45, %v8059_v13  ;;  %v12948_v13 = vld [vmem:[%s18564_s1 + $0x3cc] ss:$8 sps:$4 sm:$0xff]   ;;  %v12949_v45 = vld [vmem:[%s18564_s1 + $0x3c8] ss:$8 sps:$4 sm:$0xff]  }
0x1ba4   : > { %v8113_v9 = vpop.f32.mrf.mxu1 }
0x1ba5   : > { %v8130_v49 = vmax.f32 %v8112_v26, 0.0  ;;  %v8114_v61 = vadd.f32 %v8113_v9, %v8061_v56  ;;  %v12951_v56 = vld [vmem:[%s18564_s1 + $0x3b8] ss:$8 sps:$4 sm:$0xff]   ;;  %v12952_v26 = vld [vmem:[%s18564_s1 + $0x3ac] ss:$8 sps:$4 sm:$0xff]  }
0x1ba6   : > { %v8115_v10 = vpop.f32.mrf.mxu1  ;;  %v12955_v9 = vld [vmem:[%s18564_s1 + $0x398] ss:$8 sps:$4 sm:$0xff]  }
0x1ba7   : > { %10360 = vst [vmem:[%s13624_s20 + $0xc0] sm:$0xff] %v8130_v49  ;;  %v8131_v22 = vmax.f32 %v8114_v61, 0.0  ;;  %v8116_v35 = vadd.f32 %v8115_v10, %v8063_v50  ;;  %v12957_v50 = vld [vmem:[%s18564_s1 + $0x488] ss:$8 sps:$4 sm:$0xff]   ;;  %v12959_v61 = vld [vmem:[%s18564_s1 + $0x478] ss:$8 sps:$4 sm:$0xff]  }
0x1ba8   : > { %v8117_v44 = vpop.f32.mrf.mxu1  ;;  %v12960_v10 = vld [vmem:[%s18564_s1 + $0x46c] ss:$8 sps:$4 sm:$0xff]  }
0x1ba9   : > { %10361 = vst [vmem:[%s13624_s20 + $0xc8] sm:$0xff] %v8131_v22  ;;  %v8132_v0 = vmax.f32 %v8116_v35, 0.0  ;;  %v8118_v62 = vadd.f32 %v8117_v44, %v8065_v24  ;;  %v12962_v24 = vld [vmem:[%s18564_s1 + $0x45c] ss:$8 sps:$4 sm:$0xff]   ;;  %v12964_v35 = vld [vmem:[%s18564_s1 + $0x44c] ss:$8 sps:$4 sm:$0xff]  }
0x1baa   : > { %v8121_v34 = vpop.f32.mrf.mxu1  ;;  %v12966_v44 = vld [vmem:[%s18564_s1 + $0x43c] ss:$8 sps:$4 sm:$0xff]  }
0x1bab   : > { %10362 = vst [vmem:[%s13624_s20 + $0xd0] sm:$0xff] %v8132_v0  ;;  %v8133_v57 = vmax.f32 %v8118_v62, 0.0  ;;  %v8122_v58 = vadd.f32 %v8121_v34, %v8069_v54  ;;  %v8147_v63 = vpack.c.bf16 %v8132_v0, %v8130_v49  ;;  %v12958_v49 = vld [vmem:[%s18564_s1 + $0x47c] ss:$8 sps:$4 sm:$0xff]   ;;  %v12967_v54 = vld [vmem:[%s18564_s1 + $0x438] ss:$8 sps:$4 sm:$0xff]  }
0x1bac   : > { %v8123_v38 = vpop.f32.mrf.mxu1  ;;  %v12968_v0 = vld [vmem:[%s18564_s1 + $0x42c] ss:$8 sps:$4 sm:$0xff]   ;;  %v12969_v62 = vld [vmem:[%s18564_s1 + $0x428] ss:$8 sps:$4 sm:$0xff]   ;;  %v12970_v34 = vld [vmem:[%s18564_s1 + $0x41c] ss:$8 sps:$4 sm:$0xff]  }
0x1bad   : > { %10363 = vst [vmem:[%s13624_s20 + $0xd8] sm:$0xff] %v8133_v57  ;;  %v8148_v40 = vpack.c.bf16 %v8133_v57, %v8131_v22  ;;  %v8134_v12 = vmax.f32 %v8122_v58, 0.0  ;;  %v8124_v47 = vadd.f32 %v8123_v38, %v8071_v21  ;;  %v12963_v22 = vld [vmem:[%s18564_s1 + $0x458] ss:$8 sps:$4 sm:$0xff]   ;;  %v12972_v21 = vld [vmem:[%s18564_s1 + $0x60c] ss:$8 sps:$4 sm:$0xff]  }
0x1bae   : > { %v8125_v1 = vpop.f32.mrf.mxu1 }
0x1baf   : > { %10364 = vst [vmem:[%s13624_s20 + $0xe0] sm:$0xff] %v8134_v12  ;;  %v8135_v25 = vmax.f32 %v8124_v47, 0.0  ;;  %v8126_v23 = vadd.f32 %v8125_v1, %v8073_v36  ;;  %8183 = vmatprep.mubr.bf16.mxu0 %v8148_v40 }
0x1bb0   : > { %v8127_v8 = vpop.f32.mrf.mxu1  ;;  %8184 = vmatmul.mubr.bf16.vlgmr.msra.gmra.mxu0 %v8147_v63 }
0x1bb1   : > { %10365 = vst [vmem:[%s13624_s20 + $0xe8] sm:$0xff] %v8135_v25  ;;  %v8136_v27 = vmax.f32 %v8126_v23, 0.0  ;;  %v8128_v41 = vadd.f32 %v8127_v8, %v8075_v5  ;;  %8307 = vmatpush1.bf16.msra.mxu0 %v12941_v33  ;;  %v12974_v23 = vld [vmem:[%s18564_s1 + $0x50c] ss:$8 sps:$4 sm:$0xff]   ;;  %v12975_v8 = vld [vmem:[%s18564_s1 + $0x508] ss:$8 sps:$4 sm:$0xff]  }
0x1bb2   : > { %8308 = vmatprep.subr.bf16.mxu0 %v12942_v48  ;;  %v12978_v33 = vld [vmem:[%s18564_s1 + $0x4ec] ss:$8 sps:$4 sm:$0xff]   ;;  %v12979_v48 = vld [vmem:[%s18564_s1 + $0x4e8] ss:$8 sps:$4 sm:$0xff]  }
0x1bb3   : > { %10366 = vst [vmem:[%s13624_s20 + $0xf0] sm:$0xf] %v8136_v27  ;;  %v8137_v4 = vmax.f32 %v8128_v41, 0.0  ;;  %v8149_v7 = vpack.c.bf16 %v8136_v27, %v8134_v12  ;;  %v12976_v27 = vld [vmem:[%s18564_s1 + $0x4fc] ss:$8 sps:$4 sm:$0xff]  }
0x1bb4   : > { %v12977_v41 = vld [vmem:[%s18564_s1 + $0x4f8] ss:$8 sps:$4 sm:$0xff]  }
0x1bb5   : > { %10367 = vst [vmem:[%s13624_s20 + $0xf8] sm:$0xf] %v8137_v4  ;;  %v8150_v52 = vpack.c.bf16 %v8137_v4, %v8135_v25  ;;  %8309 = vmatpush1.bf16.msra.mxu0 %v12943_v30  ;;  %v12973_v25 = vld [vmem:[%s18564_s1 + $0x388] ss:$8 sps:$4 sm:$0x7f]  }
0x1bb6   : > { %8310 = vmatprep.subr.bf16.mxu0 %v12944_v31  ;;  %v12980_v4 = vld [vmem:[%s18564_s1 + $0x4dc] ss:$8 sps:$4 sm:$0xff]   ;;  %v12982_v30 = vld [vmem:[%s18564_s1 + $0x4cc] ss:$8 sps:$4 sm:$0xff]  }
0x1bb7   : > { %8191 = vmatprep.mubr.bf16.mxu0 %v8150_v52  ;;  %v12981_v52 = vld [vmem:[%s18564_s1 + $0x4d8] ss:$8 sps:$4 sm:$0xff]   ;;  %v12984_v31 = vld [vmem:[%s18564_s1 + $0x4bc] ss:$8 sps:$4 sm:$0xff]  }
0x1bb8   : > { %8192 = vmatmul.mubr.bf16.gmra.mxu0 %v8149_v7  ;;  %v12983_v7 = vld [vmem:[%s18564_s1 + $0x4c8] ss:$8 sps:$4 sm:$0xff]  }
0x1bb9   : > { %8311 = vmatpush1.bf16.msra.mxu0 %v12945_v32  ;;  %v12985_v32 = vld [vmem:[%s18564_s1 + $0x4b8] ss:$8 sps:$4 sm:$0xff]  }
0x1bba   : > { %8312 = vmatprep.subr.bf16.mxu0 %v12946_v28  ;;  %v12986_v28 = vld [vmem:[%s18564_s1 + $0x4ac] ss:$8 sps:$4 sm:$0xff]  }
0x1bbd   : > { %8313 = vmatpush1.bf16.msra.mxu0 %v12947_v29  ;;  %v12987_v29 = vld [vmem:[%s18564_s1 + $0x4a8] ss:$8 sps:$4 sm:$0xff]  }
0x1bbe   : > { %8314 = vmatprep.subr.bf16.mxu0 %v12948_v13  ;;  %v12988_v13 = vld [vmem:[%s18564_s1 + $0x49c] ss:$8 sps:$4 sm:$0xff]  }
0x1bc1   : > { %8315 = vmatpush1.bf16.msra.mxu0 %v12949_v45  ;;  %v12989_v45 = vld [vmem:[%s18564_s1 + $0x498] ss:$8 sps:$4 sm:$0xff]  }
0x1bc2   : > { %8316 = vmatprep.subr.bf16.mxu0 %v12950_v59  ;;  %v12990_v59 = vld [vmem:[%s18564_s1 + $0x58c] ss:$8 sps:$4 sm:$0xff]  }
0x1bc5   : > { %8317 = vmatpush1.bf16.msra.mxu0 %v12951_v56  ;;  %v12991_v56 = vld [vmem:[%s18564_s1 + $0x588] ss:$8 sps:$4 sm:$0xff]  }
0x1bc6   : > { %8318 = vmatprep.subr.bf16.mxu0 %v12952_v26  ;;  %v12992_v26 = vld [vmem:[%s18564_s1 + $0x57c] ss:$8 sps:$4 sm:$0xff]  }
0x1bc9   : > { %8319 = vmatpush1.bf16.msra.mxu0 %v12953_v15  ;;  %v12993_v15 = vld [vmem:[%s18564_s1 + $0x578] ss:$8 sps:$4 sm:$0xff]  }
0x1bca   : > { %8320 = vmatprep.subr.bf16.mxu0 %v12954_v18  ;;  %v12994_v18 = vld [vmem:[%s18564_s1 + $0x56c] ss:$8 sps:$4 sm:$0xff]  }
0x1bcd   : > { %8321 = vmatpush1.bf16.msra.mxu0 %v12955_v9  ;;  %v12995_v9 = vld [vmem:[%s18564_s1 + $0x568] ss:$8 sps:$4 sm:$0xff]  }
0x1bce   : > { %8322 = vmatprep.subr.bf16.mxu0 %v12956_v14  ;;  %v12996_v14 = vld [vmem:[%s18564_s1 + $0x55c] ss:$8 sps:$4 sm:$0xff]  }
0x1bd1   : > { %8323 = vmatpush2.bf16.msra.mxu0 %v12957_v50  ;;  %v12997_v50 = vld [vmem:[%s18564_s1 + $0x558] ss:$8 sps:$4 sm:$0xff]  }
0x1bd2   : > { %8324 = vmatprep.subr.bf16.mxu0 %v12958_v49  ;;  %v12998_v49 = vld [vmem:[%s18564_s1 + $0x54c] ss:$8 sps:$4 sm:$0xff]  }
0x1bd5   : > { %8325 = vmatpush2.bf16.msra.mxu0 %v12959_v61  ;;  %v12999_v61 = vld [vmem:[%s18564_s1 + $0x548] ss:$8 sps:$4 sm:$0xff]  }
0x1bd6   : > { %8326 = vmatprep.subr.bf16.mxu0 %v12960_v10  ;;  %v13000_v10 = vld [vmem:[%s18564_s1 + $0x53c] ss:$8 sps:$4 sm:$0xff]  }
0x1bd9   : > { %8327 = vmatpush2.bf16.msra.mxu0 %v12961_v20  ;;  %v13001_v20 = vld [vmem:[%s18564_s1 + $0x538] ss:$8 sps:$4 sm:$0xff]  }
0x1bda   : > { %8328 = vmatprep.subr.bf16.mxu0 %v12962_v24  ;;  %v13002_v24 = vld [vmem:[%s18564_s1 + $0x52c] ss:$8 sps:$4 sm:$0xff]  }
0x1bdd   : > { %8329 = vmatpush2.bf16.msra.mxu0 %v12963_v22  ;;  %v13003_v22 = vld [vmem:[%s18564_s1 + $0x528] ss:$8 sps:$4 sm:$0xff]  }
0x1bde   : > { %8330 = vmatprep.subr.bf16.mxu0 %v12964_v35  ;;  %v13004_v35 = vld [vmem:[%s18564_s1 + $0x51c] ss:$8 sps:$4 sm:$0xff]  }
0x1be1   : > { %8331 = vmatpush2.bf16.msra.mxu0 %v12965_v43  ;;  %v13005_v43 = vld [vmem:[%s18564_s1 + $0x518] ss:$8 sps:$4 sm:$0xff]  }
0x1be2   : > { %8332 = vmatprep.subr.bf16.mxu0 %v12966_v44  ;;  %v13006_v44 = vld [vmem:[%s18564_s1 + $0x710] ss:$8 sps:$4 sm:$0xff]  }
0x1be5   : > { %8333 = vmatpush2.bf16.msra.mxu0 %v12967_v54 }
0x1be6   : > { %8334 = vmatprep.subr.bf16.mxu0 %v12968_v0 }
0x1be9   : > { %8335 = vmatpush2.bf16.msra.mxu0 %v12969_v62 }
0x1bea   : > { %8336 = vmatprep.subr.bf16.mxu0 %v12970_v34 }
0x1bed   : > { %8337 = vmatpush2.bf16.msra.mxu0 %v12971_v3 }
0x1bee   : > { %8392 = vmatprep.subr.bf16.mxu0 %v12972_v21 }
0x1c70   : > { %v11170_v57 = vpop.f32.mrf.mxu0 }
0x1c72   : > { %v11171_v58 = vpop.f32.mrf.mxu0 }
0x1c73   : > { %v11172_v5 = vadd.f32 %v11171_v58, %v11170_v57 }
0x1c74   : > { %v11173_v19 = vpop.f32.mrf.mxu0 }
0x1c76   : > { %v11174_v6 = vpop.f32.mrf.mxu0 }
0x1c77   : > { %v11175_v1 = vadd.f32 %v11174_v6, %v11173_v19 }
0x1c78   : > { %v11176_v38 = vpop.f32.mrf.mxu0 }
0x1c7a   : > { %v11177_v36 = vpop.f32.mrf.mxu0 }
0x1c7b   : > { %v11178_v63 = vadd.f32 %v11177_v36, %v11176_v38 }
0x1c7c   : > { %v11179_v40 = vpop.f32.mrf.mxu0 }
0x1c7e   : > { %v11180_v12 = vpop.f32.mrf.mxu0 }
0x1c7f   : > { %v11181_v47 = vadd.f32 %v11180_v12, %v11179_v40 }
0x1c81   : > { %11593 = vmatpush3.msk.msra.mxu1 %vm972_vm3, %v11181_v47 }
0x1c82   : > { %11594 = vmatprep.subr.mxu1 %v13203_v16 }
0x1c83   : > { %11595 = vmatpush3.msra.mxu1 %v11178_v63 }
0x1c84   : > { %11596 = vmatprep.subr.mxu1 %v13203_v16 }
0x1c85   : > { %11597 = vmatpush3.msra.mxu1 %v11175_v1 }
0x1c86   : > { %11598 = vmatprep.subr.mxu1 %v13203_v16 }
0x1c87   : > { %11599 = vmatpush3.msra.mxu1 %v11172_v5  ;;  %v13007_v5 = vld [vmem:[%s18564_s1 + $0x608] ss:$8 sps:$4 sm:$0xff]  }
0x1c88   : > { %11601 = vmatmul.mubr.msk.bf16.vlgmr.msra.gmra.mxu1 %vm1731_vm5, %v12973_v25  ;;  %8349 = vmatprep.subr.bf16.mxu1 %v12974_v23  ;;  %v13008_v25 = vld [vmem:[%s18564_s1 + $0x5fc] ss:$8 sps:$4 sm:$0xff]   ;;  %v13009_v23 = vld [vmem:[%s18564_s1 + $0x690] ss:$8 sps:$4 sm:$0xff]  }
0x1c89   : > { %8350 = vmatpush1.bf16.msra.mxu1 %v12975_v8  ;;  %v13010_v8 = vld [vmem:[%s18564_s1 + $0x700] ss:$8 sps:$4 sm:$0xff]  }
0x1c8a   : > { %8351 = vmatprep.subr.bf16.mxu1 %v12976_v27  ;;  %v13011_v27 = vld [vmem:[%s18564_s1 + $0x5f8] ss:$8 sps:$4 sm:$0xff]  }
0x1c8d   : > { %8352 = vmatpush1.bf16.msra.mxu1 %v12977_v41  ;;  %v13012_v41 = vld [vmem:[%s18564_s1 + $0x5ec] ss:$8 sps:$4 sm:$0xff]  }
0x1c8e   : > { %8353 = vmatprep.subr.bf16.mxu1 %v12978_v33  ;;  %v13014_v33 = vld [vmem:[%s18564_s1 + $0x6f0] ss:$8 sps:$4 sm:$0xff]  }
0x1c91   : > { %8354 = vmatpush1.bf16.msra.mxu1 %v12979_v48  ;;  %v13015_v48 = vld [vmem:[%s18564_s1 + $0x5e8] ss:$8 sps:$4 sm:$0xff]  }
0x1c92   : > { %8355 = vmatprep.subr.bf16.mxu1 %v12980_v4  ;;  %v13016_v4 = vld [vmem:[%s18564_s1 + $0x5dc] ss:$8 sps:$4 sm:$0xff]  }
0x1c95   : > { %8356 = vmatpush1.bf16.msra.mxu1 %v12981_v52  ;;  %v13017_v52 = vld [vmem:[%s18564_s1 + $0x670] ss:$8 sps:$4 sm:$0xff]  }
0x1c96   : > { %8357 = vmatprep.subr.bf16.mxu1 %v12982_v30  ;;  %v13018_v30 = vld [vmem:[%s18564_s1 + $0x6e0] ss:$8 sps:$4 sm:$0xff]  }
0x1c99   : > { %8358 = vmatpush1.bf16.msra.mxu1 %v12983_v7  ;;  %v13019_v7 = vld [vmem:[%s18564_s1 + $0x5d8] ss:$8 sps:$4 sm:$0xff]  }
0x1c9a   : > { %8359 = vmatprep.subr.bf16.mxu1 %v12984_v31  ;;  %v13020_v31 = vld [vmem:[%s18564_s1 + $0x5cc] ss:$8 sps:$4 sm:$0xff]  }
0x1c9d   : > { %8360 = vmatpush1.bf16.msra.mxu1 %v12985_v32  ;;  %v13021_v32 = vld [vmem:[%s18564_s1 + $0x660] ss:$8 sps:$4 sm:$0xff]  }
0x1c9e   : > { %8361 = vmatprep.subr.bf16.mxu1 %v12986_v28  ;;  %v13022_v28 = vld [vmem:[%s18564_s1 + $0x6d0] ss:$8 sps:$4 sm:$0xff]  }
0x1ca1   : > { %8362 = vmatpush1.bf16.msra.mxu1 %v12987_v29  ;;  %v13023_v29 = vld [vmem:[%s18564_s1 + $0x5c8] ss:$8 sps:$4 sm:$0xff]  }
0x1ca2   : > { %8363 = vmatprep.subr.bf16.mxu1 %v12988_v13  ;;  %v13024_v13 = vld [vmem:[%s18564_s1 + $0x5bc] ss:$8 sps:$4 sm:$0xff]  }
0x1ca5   : > { %8364 = vmatpush1.bf16.msra.mxu1 %v12989_v45  ;;  %v13025_v45 = vld [vmem:[%s18564_s1 + $0x650] ss:$8 sps:$4 sm:$0xff]  }
0x1ca6   : > { %8365 = vmatprep.subr.bf16.mxu1 %v12990_v59  ;;  %v13026_v59 = vld [vmem:[%s18564_s1 + $0x6c0] ss:$8 sps:$4 sm:$0xff]  }
0x1ca9   : > { %8366 = vmatpush2.bf16.msra.mxu1 %v12991_v56  ;;  %v13027_v56 = vld [vmem:[%s18564_s1 + $0x5b8] ss:$8 sps:$4 sm:$0xff]  }
0x1caa   : > { %8367 = vmatprep.subr.bf16.mxu1 %v12992_v26  ;;  %v13028_v26 = vld [vmem:[%s18564_s1 + $0x5ac] ss:$8 sps:$4 sm:$0xff]  }
0x1cad   : > { %8368 = vmatpush2.bf16.msra.mxu1 %v12993_v15 }
0x1cae   : > { %8369 = vmatprep.subr.bf16.mxu1 %v12994_v18  ;;  %v13029_v18 = vld [vmem:[%s18564_s1 + $0x640] ss:$8 sps:$4 sm:$0xff]  }
0x1cb1   : > { %8370 = vmatpush2.bf16.msra.mxu1 %v12995_v9  ;;  %v13030_v9 = vld [vmem:[%s18564_s1 + $0x6b0] ss:$8 sps:$4 sm:$0xff]  }
0x1cb2   : > { %8371 = vmatprep.subr.bf16.mxu1 %v12996_v14 }
0x1cb5   : > { %8372 = vmatpush2.bf16.msra.mxu1 %v12997_v50  ;;  %v13031_v50 = vld [vmem:[%s18564_s1 + $0x5a8] ss:$8 sps:$4 sm:$0xff]  }
0x1cb6   : > { %8373 = vmatprep.subr.bf16.mxu1 %v12998_v49  ;;  %v13032_v49 = vld [vmem:[%s18564_s1 + $0x59c] ss:$8 sps:$4 sm:$0xff]  }
0x1cb9   : > { %8374 = vmatpush2.bf16.msra.mxu1 %v12999_v61 }
0x1cba   : > { %8375 = vmatprep.subr.bf16.mxu1 %v13000_v10  ;;  %v13033_v10 = vld [vmem:[%s18564_s1 + $0x630] ss:$8 sps:$4 sm:$0xff]  }
0x1cbd   : > { %8376 = vmatpush2.bf16.msra.mxu1 %v13001_v20  ;;  %v13034_v20 = vld [vmem:[%s18564_s1 + $0x6a0] ss:$8 sps:$4 sm:$0xff]  }
0x1cbe   : > { %8377 = vmatprep.subr.bf16.mxu1 %v13002_v24  ;;  %v13035_v24 = vld [vmem:[%s18564_s1 + $0x598] ss:$8 sps:$4 sm:$0xff]  }
0x1cc1   : > { %8378 = vmatpush2.bf16.msra.mxu1 %v13003_v22 }
0x1cc2   : > { %8379 = vmatprep.subr.bf16.mxu1 %v13004_v35  ;;  %v13036_v35 = vld [vmem:[%s18564_s1 + $0x620] ss:$8 sps:$4 sm:$0xff]  }
0x1cc5   : > { %8380 = vmatpush2.bf16.msra.mxu1 %v13005_v43 }
0x1cc6   : > { %11187 = vmatprep.subr.bf16.mxu1 %v13006_v44 }
0x1d48   : > { %v17845_v54 = vpop.f32.mrf.mxu1 }
0x1d49   : > { %10370 = vst [vmem:[%s13850_s19 + $0x30] sm:$0xff] %v17845_v54  ;;  %v8286_v34 = vrot.slane %v17845_v54, 2  ;;  %v8281_v21 = vrot.slane %v17845_v54, 1  ;;  %v8291_v19 = vrot.slane %v17845_v54, 3  ;;  %v8296_v14 = vrot.slane %v17845_v54, 4 }
0x1d4a   : > { %v11602_v0 = vpop.f32.mrf.mxu1 }
0x1d4c   : > { %v17849_v62 = vpop.f32.mrf.mxu1 }
0x1d4d   : > { %10371 = vst [vmem:[%s13850_s19 + $0x38] sm:$0x3f] %v17849_v62  ;;  %v8287_v3 = vrot.slane %v17849_v62, 2  ;;  %v8282_v57 = vrot.slane %v17849_v62, 1  ;;  %v8292_v6 = vrot.slane %v17849_v62, 3  ;;  %v8301_v63 = vpack.c.bf16 %v17849_v62, %v17845_v54 }
0x1d4e   : > { %v11603_v58 = vpop.f32.mrf.mxu1  ;;  %v8297_v15 = vrot.slane %v17849_v62, 4 }
0x1d4f   : > { %v8283_v38 = vsel %vm936_vm0, %v8281_v21, %v8282_v57  ;;  %v8288_v36 = vsel %vm948_vm2, %v8286_v34, %v8287_v3  ;;  %v8293_v12 = vsel %vm960_vm1, %v8291_v19, %v8292_v6 }
0x1d50   : > { %v8302_v40 = vpack.c.bf16 %v8282_v57, %v8283_v38  ;;  %v8303_v47 = vpack.c.bf16 %v8287_v3, %v8288_v36  ;;  %v8304_v1 = vpack.c.bf16 %v8292_v6, %v8293_v12  ;;  %v8298_v61 = vsel %vm972_vm3, %v8296_v14, %v8297_v15  ;;  %v13045_v14 = vld [vmem:[%s18564_s1 + $0x8e0] ss:$8 sps:$4 sm:$0xff]  }
0x1d51   : > { %v8305_v22 = vpack.c.bf16 %v8297_v15, %v8298_v61  ;;  %v13042_v15 = vld [vmem:[%s18564_s1 + $0x7cc] ss:$8 sps:$4 sm:$0xff]   ;;  %v13047_v61 = vld [vmem:[%s18564_s1 + $0x950] ss:$8 sps:$4 sm:$0xff]  }
0x1d52   : > { %8338 = vmatprep.mubr.bf16.mxu0 %v8302_v40  ;;  %8381 = vmatprep.mubr.bf16.mxu1 %v8304_v1 }
0x1d53   : > { %8339 = vmatmul.mubr.bf16.vlgmr.msra.gmra.mxu0 %v8301_v63  ;;  %8382 = vmatmul.mubr.bf16.vlgmr.msra.gmra.mxu1 %v8303_v47 }
0x1d54   : > { %8393 = vmatpush1.bf16.msra.mxu0 %v13007_v5  ;;  %8424 = vmatprep.mubr.bf16.mxu0 %v13202_v42  ;;  %v13013_v42 = vld [vmem:[%s18564_s1 + $0x680] ss:$8 sps:$4 sm:$0xff]  }
0x1d55   : > { %8394 = vmatprep.subr.bf16.mxu0 %v13008_v25  ;;  %11188 = vmatpush3.bf16.msra.mxu1 %v13009_v23 }
0x1d56   : > { %11189 = vmatprep.subr.bf16.mxu1 %v13010_v8 }
0x1d58   : > { %8395 = vmatpush1.bf16.msra.mxu0 %v13011_v27 }
0x1d59   : > { %8396 = vmatprep.subr.bf16.mxu0 %v13012_v41  ;;  %11190 = vmatpush3.bf16.msra.mxu1 %v13013_v42 }
0x1d5a   : > { %11191 = vmatprep.subr.bf16.mxu1 %v13014_v33 }
0x1d5c   : > { %8397 = vmatpush1.bf16.msra.mxu0 %v13015_v48 }
0x1d5d   : > { %8398 = vmatprep.subr.bf16.mxu0 %v13016_v4  ;;  %11192 = vmatpush3.bf16.msra.mxu1 %v13017_v52  ;;  %v13037_v4 = vld [vmem:[%s18564_s1 + $0x740] ss:$8 sps:$4 sm:$0xff]  }
0x1d5e   : > { %11193 = vmatprep.subr.bf16.mxu1 %v13018_v30 }
0x1d60   : > { %8399 = vmatpush1.bf16.msra.mxu0 %v13019_v7 }
0x1d61   : > { %8400 = vmatprep.subr.bf16.mxu0 %v13020_v31  ;;  %11194 = vmatpush3.bf16.msra.mxu1 %v13021_v32 }
0x1d62   : > { %11195 = vmatprep.subr.bf16.mxu1 %v13022_v28 }
0x1d64   : > { %8401 = vmatpush1.bf16.msra.mxu0 %v13023_v29  ;;  %v13038_v29 = vld [vmem:[%s18564_s1 + $0x720] sm:$0x7] }
0x1d65   : > { %8402 = vmatprep.subr.bf16.mxu0 %v13024_v13  ;;  %11196 = vmatpush3.bf16.msra.mxu1 %v13025_v45  ;;  %v13039_v13 = vld [vmem:[%s18564_s1 + $0x728] ss:$8 sps:$4 sm:$0xff]  }
0x1d66   : > { %11197 = vmatprep.subr.bf16.mxu1 %v13026_v59  ;;  %v13040_v59 = vld [vmem:[%s18564_s1 + $0x738] ss:$0 sps:$4 sm:$0x11]  }
0x1d68   : > { %8403 = vmatpush1.bf16.msra.mxu0 %v13027_v56  ;;  %v13041_v56 = vld [vmem:[%s18564_s1 + $0x750] ss:$0 sps:$4 sm:$0x11]  }
0x1d69   : > { %8404 = vmatprep.subr.bf16.mxu0 %v13028_v26  ;;  %11198 = vmatpush3.bf16.msra.mxu1 %v13029_v18  ;;  %v13043_v18 = vld [vmem:[%s18564_s1 + $0x960] ss:$8 sps:$4 sm:$0xff]  }
0x1d6a   : > { %11199 = vmatprep.subr.bf16.mxu1 %v13030_v9  ;;  %v13044_v9 = vld [vmem:[%s18564_s1 + $0x7c8] ss:$8 sps:$4 sm:$0xff]  }
0x1d6c   : > { %8405 = vmatpush1.bf16.msra.mxu0 %v13031_v50 }
0x1d6d   : > { %8406 = vmatprep.subr.bf16.mxu0 %v13032_v49  ;;  %11200 = vmatpush3.bf16.msra.mxu1 %v13033_v10  ;;  %v13046_v49 = vld [vmem:[%s18564_s1 + $0x7bc] ss:$8 sps:$4 sm:$0xff]   ;;  %v13048_v10 = vld [vmem:[%s18564_s1 + $0x7b8] ss:$8 sps:$4 sm:$0xff]  }
0x1d6e   : > { %11201 = vmatprep.subr.bf16.mxu1 %v13034_v20  ;;  %v13049_v20 = vld [vmem:[%s18564_s1 + $0x8d0] ss:$8 sps:$4 sm:$0xff]  }
0x1d70   : > { %8407 = vmatpush1.bf16.msra.mxu0 %v13035_v24  ;;  %v13050_v24 = vld [vmem:[%s18564_s1 + $0x7ac] ss:$8 sps:$4 sm:$0xff]  }
0x1d71   : > { %11604 = vmatprep.subr.mxu0 %v13203_v16  ;;  %11202 = vmatpush3.bf16.msra.mxu1 %v13036_v35  ;;  %v13052_v35 = vld [vmem:[%s18564_s1 + $0x7a8] ss:$8 sps:$4 sm:$0xff]  }
0x1d73   : > { %8425 = vmatmul.mubr.bf16.vlgmr.msra.gmra.mxu0 %v8305_v22  ;;  %v13051_v22 = vld [vmem:[%s18564_s1 + $0x940] ss:$8 sps:$4 sm:$0xff]  }
0x1d74   : > { %11608 = vmatprep.mubr.msk.bf16.mxu0 %vm13204_vm4, %v13203_v16 }
0x1e13   : > { %v8340_v43 = vpop.f32.mrf.mxu0  ;;  %v8383_v54 = vpop.f32.mrf.mxu1 }
0x1e14   : > { %v8341_v62 = vadd.f32 %v8340_v43, %v13959_v37  ;;  %v13053_v43 = vld [vmem:[%s18564_s1 + $0x8c0] ss:$8 sps:$4 sm:$0xff]  }
0x1e15   : > { %v8342_v44 = vpop.f32.mrf.mxu0  ;;  %v8385_v34 = vpop.f32.mrf.mxu1 }
0x1e16   : > { %v8343_v3 = vadd.f32 %v8342_v44, %v13962_v39  ;;  %v8384_v57 = vadd.f32 %v8383_v54, %v8341_v62  ;;  %v13054_v44 = vld [vmem:[%s18564_s1 + $0x79c] ss:$8 sps:$4 sm:$0xff]   ;;  %v13055_v54 = vld [vmem:[%s18564_s1 + $0x930] ss:$8 sps:$4 sm:$0xff]  }
0x1e17   : > { %v8344_v0 = vpop.f32.mrf.mxu0  ;;  %v8387_v19 = vpop.f32.mrf.mxu1  ;;  %v13057_v62 = vld [vmem:[%s18564_s1 + $0x8b0] ss:$8 sps:$4 sm:$0xff]  }
0x1e18   : > { %v8345_v58 = vadd.f32 %v8344_v0, %v13959_v37  ;;  %v8386_v38 = vadd.f32 %v8385_v34, %v8343_v3  ;;  %v13056_v0 = vld [vmem:[%s18564_s1 + $0x798] ss:$8 sps:$4 sm:$0xff]   ;;  %v13058_v34 = vld [vmem:[%s18564_s1 + $0x78c] ss:$8 sps:$4 sm:$0xff]  }
0x1e19   : > { %v8346_v21 = vpop.f32.mrf.mxu0  ;;  %v8389_v5 = vpop.f32.mrf.mxu1  ;;  %v13059_v3 = vld [vmem:[%s18564_s1 + $0x920] ss:$8 sps:$4 sm:$0xff]  }
0x1e1a   : > { %v8347_v36 = vadd.f32 %v8346_v21, %v13962_v39  ;;  %v8388_v47 = vadd.f32 %v8387_v19, %v8345_v58  ;;  %v13060_v21 = vld [vmem:[%s18564_s1 + $0x788] ss:$8 sps:$4 sm:$0xff]   ;;  %v13062_v58 = vld [vmem:[%s18564_s1 + $0x77c] ss:$8 sps:$4 sm:$0xff]  }
0x1e1b   : > { %v13063_v19 = vld [vmem:[%s18564_s1 + $0x910] ss:$8 sps:$4 sm:$0xff]  }
0x1e1c   : > { %v8390_v23 = vadd.f32 %v8389_v5, %v8347_v36  ;;  %v13066_v36 = vld [vmem:[%s18564_s1 + $0x76c] ss:$8 sps:$4 sm:$0xff]   ;;  %v13072_v5 = vld [vmem:[%s18564_s1 + $0x758] ss:$8 sps:$4 sm:$0xff]  }
0x1e33   : > { %v8426_v6 = vpop.f32.mrf.mxu0 }
0x1e34   : > { %v8427_v40 = vadd.f32 %v8426_v6, %v8384_v57  ;;  %v13061_v57 = vld [vmem:[%s18564_s1 + $0x8a0] ss:$8 sps:$4 sm:$0xff]  }
0x1e35   : > { %v8428_v12 = vpop.f32.mrf.mxu0  ;;  %v13064_v6 = vld [vmem:[%s18564_s1 + $0x778] ss:$8 sps:$4 sm:$0xff]  }
0x1e36   : > { %v8435_v63 = vmax.f32 %v8427_v40, 0.0  ;;  %v8429_v1 = vadd.f32 %v8428_v12, %v8386_v38  ;;  %v13065_v38 = vld [vmem:[%s18564_s1 + $0x890] ss:$8 sps:$4 sm:$0xff]   ;;  %v13067_v40 = vld [vmem:[%s18564_s1 + $0x900] ss:$8 sps:$4 sm:$0xff]  }
0x1e37   : > { %v8430_v25 = vpop.f32.mrf.mxu0  ;;  %v13068_v12 = vld [vmem:[%s18564_s1 + $0x768] ss:$8 sps:$4 sm:$0xff]  }
0x1e38   : > { %10372 = vst [vmem:[%s13972_s9 + $0x60] sm:$0xff] %v8435_v63  ;;  %v8436_v8 = vmax.f32 %v8429_v1, 0.0  ;;  %v8431_v27 = vadd.f32 %v8430_v25, %v8388_v47  ;;  %v13069_v47 = vld [vmem:[%s18564_s1 + $0x880] ss:$8 sps:$4 sm:$0xff]   ;;  %v13071_v1 = vld [vmem:[%s18564_s1 + $0x8f0] ss:$8 sps:$4 sm:$0xff]  }
0x1e39   : > { %v8432_v37 = vpop.f32.mrf.mxu0  ;;  %v13073_v25 = vld [vmem:[%s18564_s1 + $0x870] ss:$8 sps:$4 sm:$0xff]  }
0x1e3a   : > { %10373 = vst [vmem:[%s13972_s9 + $0x68] sm:$0xff] %v8436_v8  ;;  %v8437_v41 = vmax.f32 %v8431_v27, 0.0  ;;  %v8433_v42 = vadd.f32 %v8432_v37, %v8390_v23  ;;  %v13074_v23 = vld [vmem:[%s18564_s1 + $0x84c] ss:$8 sps:$4 sm:$0xff]   ;;  %v13076_v27 = vld [vmem:[%s18564_s1 + $0x848] ss:$8 sps:$4 sm:$0xff]  }
0x1e3b   : > { %v13077_v37 = vld [vmem:[%s18564_s1 + $0x83c] ss:$8 sps:$4 sm:$0xff]  }
0x1e3c   : > { %10374 = vst [vmem:[%s13972_s9 + $0x70] sm:$0x3] %v8437_v41  ;;  %v8438_v33 = vmax.f32 %v8433_v42, 0.0  ;;  %v8444_v48 = vpack.c.bf16 %v8437_v41, %v8435_v63  ;;  %v13070_v63 = vld [vmem:[%s18564_s1 + $0x75c] ss:$8 sps:$4 sm:$0xff]  }
0x1e3d   : > { %v13078_v41 = vld [vmem:[%s18564_s1 + $0x838] ss:$8 sps:$4 sm:$0xff]   ;;  %v13079_v42 = vld [vmem:[%s18564_s1 + $0x82c] ss:$8 sps:$4 sm:$0xff]  }
0x1e3e   : > { %10375 = vst [vmem:[%s13972_s9 + $0x78] sm:$0x3] %v8438_v33  ;;  %v8445_v39 = vpack.c.bf16 %v8438_v33, %v8436_v8  ;;  %v13075_v8 = vld [vmem:[%s18564_s1 + $0xa60] ss:$8 sps:$4 sm:$0xff]  }
0x1e3f   : > { %v13080_v33 = vld [vmem:[%s18564_s1 + $0x828] ss:$8 sps:$4 sm:$0xff]  }
0x1e40   : > { %8478 = vmatprep.mubr.bf16.mxu1 %v8445_v39  ;;  %v13081_v39 = vld [vmem:[%s18564_s1 + $0x81c] ss:$8 sps:$4 sm:$0xff]  }
0x1e41   : > { %8479 = vmatmul.mubr.bf16.vlgmr.msra.gmra.mxu1 %v8444_v48  ;;  %v13082_v48 = vld [vmem:[%s18564_s1 + $0x818] ss:$8 sps:$4 sm:$0xff]  }
0x1e42   : > { %11620 = vmatprep.mubr.msk.bf16.mxu1 %vm2613_vm8, %v13037_v4  ;;  %v13083_v4 = vld [vmem:[%s18564_s1 + $0x80c] ss:$8 sps:$4 sm:$0xff]  }
0x1f01   : > { %v11203_v52 = vpop.f32.mrf.mxu1 }
0x1f03   : > { %v11204_v30 = vpop.f32.mrf.mxu1 }
0x1f04   : > { %v11205_v28 = vadd.f32 %v11204_v30, %v11203_v52  ;;  %v13084_v52 = vld [vmem:[%s18564_s1 + $0x808] ss:$8 sps:$4 sm:$0xff]   ;;  %v13085_v30 = vld [vmem:[%s18564_s1 + $0x7fc] ss:$8 sps:$4 sm:$0xff]  }
0x1f05   : > { %v11206_v7 = vpop.f32.mrf.mxu1 }
0x1f07   : > { %v11207_v31 = vpop.f32.mrf.mxu1 }
0x1f08   : > { %v11208_v32 = vadd.f32 %v11207_v31, %v11206_v7  ;;  %v13086_v7 = vld [vmem:[%s18564_s1 + $0x7f8] ss:$8 sps:$4 sm:$0xff]   ;;  %v13087_v31 = vld [vmem:[%s18564_s1 + $0x7ec] ss:$8 sps:$4 sm:$0xff]  }
0x1f0a   : > { %11605 = vmatpush3.msk.msra.mxu0 %vm2528_vm6, %v11208_v32  ;;  %v13088_v32 = vld [vmem:[%s18564_s1 + $0x7e8] ss:$8 sps:$4 sm:$0xff]  }
0x1f0b   : > { %11606 = vmatprep.subr.mxu0 %v13203_v16 }
0x1f0c   : > { %11607 = vmatpush3.msra.mxu0 %v11205_v28  ;;  %v13089_v28 = vld [vmem:[%s18564_s1 + $0x7dc] ss:$8 sps:$4 sm:$0xff]  }
0x1f0d   : > { %11609 = vmatmul.mubr.msk.bf16.vlgmr.msra.gmra.mxu0 %vm2524_vm7, %v13038_v29  ;;  %v13090_v29 = vld [vmem:[%s18564_s1 + $0x7d8] ss:$8 sps:$4 sm:$0xff]  }
0x1f0e   : > { %11614 = vmatprep.mubr.msk.bf16.mxu0 %vm2613_vm8, %v13039_v13  ;;  %v13091_v13 = vld [vmem:[%s18564_s1 + $0xb60] ss:$8 sps:$4 sm:$0xff]  }
0x1fcd   : > { %v8556_v45 = vpop.f32.mrf.mxu0 }
0x1fce   : > { %10378 = vst [vmem:[%s13996_s22 + $0x18] sm:$0x1f] %v8556_v45  ;;  %11612 = vmatprep.subr.msk.mxu0 %vm960_vm1, %v8556_v45  ;;  %11618 = vmatprep.subr.msk.mxu1 %vm960_vm1, %v8556_v45 }
0x1fcf   : > { %v11610_v16 = vpop.f32.mrf.mxu0  ;;  %11613 = vmatpush3.msk.msra.mxu0 %vm960_vm1, %v8556_v45  ;;  %11619 = vmatpush3.msk.msra.mxu1 %vm960_vm1, %v8556_v45 }
0x1fd0   : > { %11615 = vmatmul.mubr.msk.bf16.vlgmr.msra.gmra.mxu0 %vm2613_vm8, %v13040_v59  ;;  %11621 = vmatmul.mubr.msk.bf16.vlgmr.msra.gmra.mxu1 %vm2613_vm8, %v13041_v56 }
0x1fd1   : > { %v8559_v26 = vpop.f32.mrf.mxu0  ;;  %8731 = vmatprep.subr.bf16.mxu0 %v13042_v15  ;;  %11218 = vmatprep.subr.bf16.mxu1 %v13043_v18 }
0x1fd2   : > { %8732 = vmatpush1.bf16.msra.mxu0 %v13044_v9  ;;  %11219 = vmatpush3.bf16.msra.mxu1 %v13045_v14 }
0x1fd3   : > { %v11611_v50 = vpop.f32.mrf.mxu0  ;;  %8733 = vmatprep.subr.bf16.mxu0 %v13046_v49  ;;  %11220 = vmatprep.subr.bf16.mxu1 %v13047_v61  ;;  %v13092_v61 = vld [vmem:[%s18564_s1 + $0xae0] ss:$8 sps:$4 sm:$0xff]  }
0x1fd6   : > { %8734 = vmatpush1.bf16.msra.mxu0 %v13048_v10  ;;  %11221 = vmatpush3.bf16.msra.mxu1 %v13049_v20  ;;  %v13093_v10 = vld [vmem:[%s18564_s1 + $0xb50] ss:$8 sps:$4 sm:$0xff]  }
0x1fd7   : > { %8735 = vmatprep.subr.bf16.mxu0 %v13050_v24  ;;  %11222 = vmatprep.subr.bf16.mxu1 %v13051_v22  ;;  %v13094_v20 = vld [vmem:[%s18564_s1 + $0xad0] ss:$8 sps:$4 sm:$0xff]   ;;  %v13095_v22 = vld [vmem:[%s18564_s1 + $0xb40] ss:$8 sps:$4 sm:$0xff]  }
0x1fda   : > { %8736 = vmatpush1.bf16.msra.mxu0 %v13052_v35  ;;  %11223 = vmatpush3.bf16.msra.mxu1 %v13053_v43  ;;  %v13096_v35 = vld [vmem:[%s18564_s1 + $0xac0] ss:$8 sps:$4 sm:$0xff]   ;;  %v13097_v43 = vld [vmem:[%s18564_s1 + $0xb30] ss:$8 sps:$4 sm:$0xff]  }
0x1fdb   : > { %8737 = vmatprep.subr.bf16.mxu0 %v13054_v44  ;;  %11224 = vmatprep.subr.bf16.mxu1 %v13055_v54  ;;  %v13098_v44 = vld [vmem:[%s18564_s1 + $0xab0] ss:$8 sps:$4 sm:$0xff]   ;;  %v13099_v54 = vld [vmem:[%s18564_s1 + $0xb20] ss:$8 sps:$4 sm:$0xff]  }
0x1fde   : > { %8738 = vmatpush1.bf16.msra.mxu0 %v13056_v0  ;;  %11225 = vmatpush3.bf16.msra.mxu1 %v13057_v62  ;;  %v13100_v0 = vld [vmem:[%s18564_s1 + $0xaa0] ss:$8 sps:$4 sm:$0xff]   ;;  %v13101_v62 = vld [vmem:[%s18564_s1 + $0xb10] ss:$8 sps:$4 sm:$0xff]  }
0x1fdf   : > { %8739 = vmatprep.subr.bf16.mxu0 %v13058_v34  ;;  %11226 = vmatprep.subr.bf16.mxu1 %v13059_v3  ;;  %v13102_v34 = vld [vmem:[%s18564_s1 + $0xa90] ss:$8 sps:$4 sm:$0xff]   ;;  %v13103_v3 = vld [vmem:[%s18564_s1 + $0xb00] ss:$8 sps:$4 sm:$0xff]  }
0x1fe2   : > { %8740 = vmatpush1.bf16.msra.mxu0 %v13060_v21  ;;  %11227 = vmatpush3.bf16.msra.mxu1 %v13061_v57  ;;  %v13104_v21 = vld [vmem:[%s18564_s1 + $0xa80] ss:$8 sps:$4 sm:$0xff]   ;;  %v13105_v57 = vld [vmem:[%s18564_s1 + $0xaf0] ss:$8 sps:$4 sm:$0xff]  }
0x1fe3   : > { %8741 = vmatprep.subr.bf16.mxu0 %v13062_v58  ;;  %11228 = vmatprep.subr.bf16.mxu1 %v13063_v19  ;;  %v13106_v58 = vld [vmem:[%s18564_s1 + $0xa70] ss:$8 sps:$4 sm:$0xff]   ;;  %v13107_v19 = vld [vmem:[%s18564_s1 + $0xd60] ss:$8 sps:$4 sm:$0xff]  }
0x1fe6   : > { %8742 = vmatpush1.bf16.msra.mxu0 %v13064_v6  ;;  %11229 = vmatpush3.bf16.msra.mxu1 %v13065_v38 }
0x1fe7   : > { %8743 = vmatprep.subr.bf16.mxu0 %v13066_v36  ;;  %11230 = vmatprep.subr.bf16.mxu1 %v13067_v40 }
0x1fea   : > { %8744 = vmatpush1.bf16.msra.mxu0 %v13068_v12  ;;  %11231 = vmatpush3.bf16.msra.mxu1 %v13069_v47 }
0x1feb   : > { %8745 = vmatprep.subr.bf16.mxu0 %v13070_v63  ;;  %11232 = vmatprep.subr.bf16.mxu1 %v13071_v1 }
0x1fee   : > { %8746 = vmatpush1.bf16.msra.mxu0 %v13072_v5  ;;  %11233 = vmatpush3.bf16.msra.mxu1 %v13073_v25 }
0x1fef   : > { %8747 = vmatprep.subr.bf16.mxu0 %v13074_v23  ;;  %11240 = vmatprep.subr.bf16.mxu1 %v13075_v8 }
0x1ff2   : > { %8748 = vmatpush2.bf16.msra.mxu0 %v13076_v27 }
0x1ff3   : > { %8749 = vmatprep.subr.bf16.mxu0 %v13077_v37 }
0x1ff6   : > { %8750 = vmatpush2.bf16.msra.mxu0 %v13078_v41 }
0x1ff7   : > { %8751 = vmatprep.subr.bf16.mxu0 %v13079_v42 }
0x1ffa   : > { %8752 = vmatpush2.bf16.msra.mxu0 %v13080_v33 }
0x1ffb   : > { %8753 = vmatprep.subr.bf16.mxu0 %v13081_v39 }
0x1ffe   : > { %8754 = vmatpush2.bf16.msra.mxu0 %v13082_v48 }
0x1fff   : > { %8755 = vmatprep.subr.bf16.mxu0 %v13083_v4 }
0x2002   : > { %8756 = vmatpush2.bf16.msra.mxu0 %v13084_v52 }
0x2003   : > { %8757 = vmatprep.subr.bf16.mxu0 %v13085_v30 }
0x2006   : > { %8758 = vmatpush2.bf16.msra.mxu0 %v13086_v7 }
0x2007   : > { %8759 = vmatprep.subr.bf16.mxu0 %v13087_v31 }
0x200a   : > { %8760 = vmatpush2.bf16.msra.mxu0 %v13088_v32 }
0x200b   : > { %8761 = vmatprep.subr.bf16.mxu0 %v13089_v28 }
0x200e   : > { %8762 = vmatpush2.bf16.msra.mxu0 %v13090_v29 }
0x200f   : > { %11262 = vmatprep.subr.bf16.mxu0 %v13091_v13 }
0x2090   : > { %v11616_v45 = vpop.f32.mrf.mxu0  ;;  %v11622_v16 = vpop.f32.mrf.mxu1 }
0x2091   : > { %v8730_v49 = vpack.c.bf16 %v11622_v16, %v11622_v16  ;;  %v8729_v24 = vpack.c.bf16 %v11616_v45, %v11616_v45 }
0x2092   : > { %v8633_v59 = vpop.f32.mrf.mxu0  ;;  %v8713_v56 = vpop.f32.mrf.mxu1 }
0x2094   : > { %v11617_v26 = vpop.f32.mrf.mxu0  ;;  %v11623_v15 = vpop.f32.mrf.mxu1 }
0x2096   : > { %v8636_v18 = vpop.f32.mrf.mxu0  ;;  %v8716_v9 = vpop.f32.mrf.mxu1 }
0x2097   : > { %v8727_v14 = vpack.c.bf16 %v8636_v18, %v8633_v59  ;;  %v8728_v50 = vpack.c.bf16 %v8716_v9, %v8713_v56 }
0x2099   : > { %8763 = vmatprep.mubr.bf16.mxu0 %v8728_v50 }
0x209a   : > { %8764 = vmatmul.mubr.bf16.vlgmr.msra.gmra.mxu0 %v8727_v14 }
0x209b   : > { %8773 = vmatprep.mubr.bf16.mxu0 %v8730_v49  ;;  %11263 = vmatpush3.bf16.msra.mxu0 %v13092_v61 }
0x209c   : > { %11264 = vmatprep.subr.bf16.mxu0 %v13093_v10 }
0x209f   : > { %11265 = vmatpush3.bf16.msra.mxu0 %v13094_v20 }
0x20a0   : > { %11266 = vmatprep.subr.bf16.mxu0 %v13095_v22 }
0x20a2   : > { %8774 = vmatmul.mubr.bf16.gmra.mxu0 %v8729_v24 }
0x20a3   : > { %11267 = vmatpush3.bf16.msra.mxu0 %v13096_v35 }
0x20a4   : > { %11268 = vmatprep.subr.bf16.mxu0 %v13097_v43 }
0x20a7   : > { %11269 = vmatpush3.bf16.msra.mxu0 %v13098_v44 }
0x20a8   : > { %11270 = vmatprep.subr.bf16.mxu0 %v13099_v54 }
0x20ab   : > { %11271 = vmatpush3.bf16.msra.mxu0 %v13100_v0 }
0x20ac   : > { %11272 = vmatprep.subr.bf16.mxu0 %v13101_v62 }
0x20af   : > { %11273 = vmatpush3.bf16.msra.mxu0 %v13102_v34 }
0x20b0   : > { %11274 = vmatprep.subr.bf16.mxu0 %v13103_v3 }
0x20b3   : > { %11275 = vmatpush3.bf16.msra.mxu0 %v13104_v21 }
0x20b4   : > { %11276 = vmatprep.subr.bf16.mxu0 %v13105_v57 }
0x20b7   : > { %11277 = vmatpush3.bf16.msra.mxu0 %v13106_v58  ;;  %v13108_v58 = vld [vmem:[%s18564_s1 + $0xce0] ss:$8 sps:$4 sm:$0xff]  }
0x20b8   : > { %11306 = vmatprep.subr.bf16.mxu0 %v13107_v19 }
0x215a   : > { %v8765_v6 = vpop.f32.mrf.mxu0 }
0x215b   : > { %v8766_v38 = vadd.f32 %v8765_v6, %v14212_v51 }
0x215c   : > { %v8767_v36 = vpop.f32.mrf.mxu0 }
0x215d   : > { %v8768_v40 = vadd.f32 %v8767_v36, %v14217_v53  ;;  %v18197_v63 = vmax.f32 %v8766_v38, 0.0  ;;  %v13109_v38 = vld [vmem:[%s18564_s1 + $0x9e0] ss:$8 sps:$4 sm:$0xff]  }
0x215e   : > { %v8769_v12 = vpop.f32.mrf.mxu0 }
0x215f   : > { %v8770_v47 = vadd.f32 %v8769_v12, %v14219_v55  ;;  %v18199_v1 = vmax.f32 %v8768_v40, 0.0  ;;  %v8825_v55 = vrot.slane %v18197_v63, 6  ;;  %v8792_v30 = vrot.slane %v18197_v63, 4 }
0x2160   : > { %v8771_v5 = vpop.f32.mrf.mxu0 }
0x2161   : > { %v18201_v25 = vmax.f32 %v8770_v47, 0.0  ;;  %v8772_v23 = vadd.f32 %v8771_v5, %v14226_v46  ;;  %v8826_v42 = vrot.slane %v18199_v1, 6  ;;  %v8795_v26 = vrot.slane %v18199_v1, 4  ;;  %v13110_v47 = vld [vmem:[%s18564_s1 + $0xd50] ss:$8 sps:$4 sm:$0xff]  }
0x2162   : > { %v8775_v8 = vpop.f32.mrf.mxu0  ;;  %v8810_v15 = vrot.slane %v18199_v1, 7  ;;  %v8837_v5 = vrot.slane %v18197_v63, 5 }
0x2163   : > { %v18205_v27 = vrot.slane %v18201_v25, 4  ;;  %v8827_v51 = vrot.slane %v18201_v25, 6  ;;  %v18208_v53 = vmax.f32 %v8772_v23, 0.0  ;;  %v8776_v37 = vadd.f32 %v8775_v8, %v14229_v60  ;;  %v13111_v23 = vld [vmem:[%s18564_s1 + $0xa50] ss:$8 sps:$4 sm:$0xff]  }
0x2164   : > { %v8777_v41 = vpop.f32.mrf.mxu0  ;;  %v8851_v16 = vpack.c.bf16 %v18201_v25, %v18197_v63  ;;  %v8839_v57 = vrot.slane %v18201_v25, 5 }
0x2165   : > { %10387 = vst [vmem:[%s14248_s24 + $0x70] sm:$0x3] %v18205_v27  ;;  %v18215_v33 = vmax.f32 %v8776_v37, 0.0  ;;  %v8778_v46 = vadd.f32 %v8777_v41, %v14238_v2  ;;  %v8829_v39 = vrot.slane %v18208_v53, 6  ;;  %v8852_v48 = vpack.c.bf16 %v18208_v53, %v18199_v1 }
0x2166   : > { %v8779_v4 = vpop.f32.mrf.mxu0  ;;  %v8828_v60 = vsel %vm2528_vm6, %v8825_v55, %v8827_v51  ;;  %v8796_v52 = vrot.slane %v18208_v53, 4  ;;  %v8865_v2 = vpack.c.bf16 %v8827_v51, %v8827_v51  ;;  %v8891_v22 = vrot.slane %v8851_v16, 2  ;;  %v13123_v16 = vld [vmem:[%s18564_s1 + $0xa20] ss:$8 sps:$4 sm:$0xff]  }
0x2167   : > { %v8861_v7 = vpack.c.bf16 %v18215_v33, %v18215_v33  ;;  %v8787_v31 = vmax.f32 %v8778_v46, 0.0  ;;  %v8830_v32 = vsel %vm2528_vm6, %v8826_v42, %v8829_v39  ;;  %v8866_v13 = vpack.c.bf16 %v8829_v39, %v8829_v39  ;;  %v13113_v46 = vld [vmem:[%s18564_s1 + $0x9d0] ss:$8 sps:$4 sm:$0xff]   ;;  %v13114_v39 = vld [vmem:[%s18564_s1 + $0xd40] ss:$8 sps:$4 sm:$0xff]  }
0x2168   : > { %v8780_v28 = vpop.f32.mrf.mxu0  ;;  %v8856_v29 = vpack.c.bf16 %v8830_v32, %v8826_v42  ;;  %v8855_v45 = vpack.c.bf16 %v8828_v60, %v8825_v55  ;;  %10388 = vst [vmem:[%s14248_s24 + $0x78] sm:$0x3] %v8796_v52  ;;  %v8894_v56 = vrot.slane %v8852_v48, 2  ;;  %v8904_v10 = vrot.slane %v8865_v2, 2  ;;  %v13112_v55 = vld [vmem:[%s18564_s1 + $0xcd0] ss:$8 sps:$4 sm:$0xff]  }
0x2169   : > { %v8862_v59 = vpack.c.bf16 %v8787_v31, %v8787_v31  ;;  %v8892_v18 = vrot.slane %v8861_v7, 2  ;;  %v8907_v14 = vrot.slane %v8866_v13, 2  ;;  %v8817_v49 = vrot.slane %v8787_v31, 7  ;;  %v13115_v4 = vld [vmem:[%s18564_s1 + $0xa40] ss:$8 sps:$4 sm:$0xff]  }
0x216a   : > { %v8906_v9 = vrot.slane %v8856_v29, 2  ;;  %v8903_v50 = vrot.slane %v8855_v45, 2  ;;  %v8797_v20 = vsel %vm972_vm3, %v8795_v26, %v8796_v52  ;;  %v8870_v43 = vpack.c.bf16 %v8796_v52, %v8796_v52  ;;  %v13116_v7 = vld [vmem:[%s18564_s1 + $0xcc0] ss:$8 sps:$4 sm:$0xff]   ;;  %v13118_v32 = vld [vmem:[%s18564_s1 + $0xd30] ss:$8 sps:$4 sm:$0xff]  }
0x216b   : > { %v8895_v61 = vrot.slane %v8862_v59, 2  ;;  %10386 = vst [vmem:[%s14248_s24 + $0x68] sm:$0xff] %v8797_v20  ;;  %v8860_v35 = vpack.c.bf16 %v8797_v20, %v8795_v26  ;;  %v8813_v0 = vrot.slane %v18208_v53, 7  ;;  %v18242_v62 = vsel %vm972_vm3, %v8792_v30, %v18205_v27  ;;  %v13117_v31 = vld [vmem:[%s18564_s1 + $0x9c0] ss:$8 sps:$4 sm:$0xff]  }
0x216c   : > { %v8908_v24 = vsel %vm948_vm2, %v8906_v9, %v8907_v14  ;;  %v8905_v54 = vsel %vm948_vm2, %v8903_v50, %v8904_v10  ;;  %v8893_v34 = vsel %vm948_vm2, %v8891_v22, %v8892_v18  ;;  %v8919_v21 = vrot.slane %v8870_v43, 2  ;;  %10385 = vst [vmem:[%s14248_s24 + $0x60] sm:$0xff] %v18242_v62  ;;  %v13119_v28 = vld [vmem:[%s18564_s1 + $0xa30] ss:$8 sps:$4 sm:$0xff]   ;;  %v13122_v45 = vld [vmem:[%s18564_s1 + $0xd20] ss:$8 sps:$4 sm:$0xff]  }
0x216d   : > { %9045 = vmatprep.mubr.bf16.mxu0 %v8908_v24  ;;  %v8896_v44 = vsel %vm948_vm2, %v8894_v56, %v8895_v61  ;;  %v8918_v3 = vrot.slane %v8860_v35, 2  ;;  %v8814_v19 = vsel %vm3038_vm9, %v8810_v15, %v8813_v0  ;;  %v8818_v6 = vsel %vm3038_vm9, %v8813_v0, %v8817_v49  ;;  %v13120_v29 = vld [vmem:[%s18564_s1 + $0xcb0] ss:$8 sps:$4 sm:$0xff]   ;;  %v13124_v56 = vld [vmem:[%s18564_s1 + $0xca0] ss:$8 sps:$4 sm:$0xff]  }
0x216e   : > { %8963 = vmatprep.mubr.bf16.mxu1 %v8896_v44  ;;  %9046 = vmatmul.mubr.bf16.vlgmr.msra.gmra.mxu0 %v8905_v54  ;;  %v8854_v40 = vpack.c.bf16 %v8814_v19, %v8810_v15  ;;  %v8864_v12 = vpack.c.bf16 %v8818_v6, %v8818_v6  ;;  %v8840_v37 = vsel %vm3067_vm10, %v8837_v5, %v8839_v57  ;;  %v13121_v13 = vld [vmem:[%s18564_s1 + $0x9b0] ss:$8 sps:$4 sm:$0xff]   ;;  %v8815_v59 = vrot.slane %v18215_v33, 7  ;;  %v13125_v26 = vld [vmem:[%s18564_s1 + $0x9a0] ss:$8 sps:$4 sm:$0xff]  }
0x216f   : > { %11307 = vmatpush3.bf16.msra.mxu0 %v13108_v58  ;;  %8964 = vmatmul.mubr.bf16.vlgmr.msra.gmra.mxu1 %v8893_v34  ;;  %v8920_v36 = vsel %vm948_vm2, %v8918_v3, %v8919_v21  ;;  %v8857_v41 = vpack.c.bf16 %v8840_v37, %v8837_v5  ;;  %v8867_v48 = vpack.c.bf16 %v8839_v57, %v8839_v57  ;;  %v13126_v15 = vld [vmem:[%s18564_s1 + $0xd10] ss:$8 sps:$4 sm:$0xff]   ;;  %v8841_v18 = vrot.slane %v18208_v53, 5  ;;  %v13130_v53 = vld [vmem:[%s18564_s1 + $0xd00] ss:$8 sps:$4 sm:$0xff]  }
0x2170   : > { %11241 = vmatpush3.bf16.msra.mxu1 %v13109_v38  ;;  %11308 = vmatprep.subr.bf16.mxu0 %v13110_v47  ;;  %v8900_v8 = vrot.slane %v8854_v40, 2  ;;  %v8901_v51 = vrot.slane %v8864_v12, 2  ;;  %v8811_v9 = vrot.slane %v18201_v25, 7  ;;  %v13127_v33 = vld [vmem:[%s18564_s1 + $0xa10] ss:$8 sps:$4 sm:$0xff]   ;;  %v8838_v14 = vrot.slane %v18199_v1, 5 }
0x2171   : > { %9127 = vmatprep.mubr.bf16.mxu0 %v8920_v36  ;;  %11242 = vmatprep.subr.bf16.mxu1 %v13111_v23  ;;  %v8909_v60 = vrot.slane %v8857_v41, 2  ;;  %v8910_v52 = vrot.slane %v8867_v48, 2  ;;  %v13128_v49 = vld [vmem:[%s18564_s1 + $0xc90] ss:$8 sps:$4 sm:$0xff]   ;;  %v8809_v61 = vrot.slane %v18197_v63, 7  ;;  %v8859_v20 = vpack.c.bf16 %v18242_v62, %v8792_v30 }
0x2172   : > { %v8902_v42 = vsel %vm948_vm2, %v8900_v8, %v8901_v51  ;;  %v8816_v50 = vsel %vm3038_vm9, %v8811_v9, %v8815_v59  ;;  %v13129_v25 = vld [vmem:[%s18564_s1 + $0x990] ss:$8 sps:$4 sm:$0xff]   ;;  %v8842_v1 = vsel %vm3067_vm10, %v8838_v14, %v8841_v18  ;;  %v13131_v10 = vld [vmem:[%s18564_s1 + $0xa00] ss:$8 sps:$4 sm:$0xff]   ;;  %v8869_v24 = vpack.c.bf16 %v18205_v27, %v18205_v27 }
0x2173   : > { %11309 = vmatpush3.bf16.msra.mxu0 %v13112_v55  ;;  %9004 = vmatprep.mubr.bf16.mxu1 %v8902_v42  ;;  %v18288_v2 = vsel %vm948_vm2, %v8909_v60, %v8910_v52  ;;  %v8812_v22 = vsel %vm3038_vm9, %v8809_v61, %v8811_v9  ;;  %v8863_v35 = vpack.c.bf16 %v8816_v50, %v8816_v50  ;;  %v13132_v43 = vld [vmem:[%s18564_s1 + $0xc80] ss:$8 sps:$4 sm:$0xff]   ;;  %v13134_v63 = vld [vmem:[%s18564_s1 + $0xcf0] ss:$8 sps:$4 sm:$0xff]   ;;  %v8915_v62 = vrot.slane %v8859_v20, 2 }
0x2174   : > { %11243 = vmatpush3.bf16.msra.mxu1 %v13113_v46  ;;  %11310 = vmatprep.subr.bf16.mxu0 %v13114_v39  ;;  %v8858_v44 = vpack.c.bf16 %v8842_v1, %v8838_v14  ;;  %v8868_v54 = vpack.c.bf16 %v8841_v18, %v8841_v18  ;;  %v13133_v0 = vld [vmem:[%s18564_s1 + $0x980] ss:$8 sps:$4 sm:$0xff]   ;;  %v8853_v27 = vpack.c.bf16 %v8812_v22, %v8809_v61  ;;  %v13135_v30 = vld [vmem:[%s18564_s1 + $0x9f0] ss:$8 sps:$4 sm:$0xff]   ;;  %v8916_v34 = vrot.slane %v8869_v24, 2 }
0x2175   : > { %11244 = vmatprep.subr.bf16.mxu1 %v13115_v4  ;;  %v8898_v3 = vrot.slane %v8863_v35, 2  ;;  %v13136_v21 = vld [vmem:[%s18564_s1 + $0xc70] ss:$8 sps:$4 sm:$0xff]   ;;  %v13139_v40 = vld [vmem:[%s18564_s1 + $0xc60] ss:$8 sps:$4 sm:$0xff]  }
0x2176   : > { %v8912_v57 = vrot.slane %v8858_v44, 2  ;;  %v8913_v58 = vrot.slane %v8868_v54, 2  ;;  %v13137_v19 = vld [vmem:[%s18564_s1 + $0x970] ss:$8 sps:$4 sm:$0xff]   ;;  %v8897_v6 = vrot.slane %v8853_v27, 2  ;;  %v8917_v36 = vsel %vm948_vm2, %v8915_v62, %v8916_v34 }
0x2177   : > { %11311 = vmatpush3.bf16.msra.mxu0 %v13116_v7  ;;  %v13138_v38 = vld [vmem:[%s18564_s1 + $0xee8] ss:$8 sps:$4 sm:$0xff]   ;;  %v13143_v51 = vld [vmem:[%s18564_s1 + $0xed8] ss:$8 sps:$4 sm:$0xff]  }
0x2178   : > { %11245 = vmatpush3.bf16.msra.mxu1 %v13117_v31  ;;  %11312 = vmatprep.subr.bf16.mxu0 %v13118_v32  ;;  %v8899_v12 = vsel %vm948_vm2, %v8897_v6, %v8898_v3  ;;  %v8914_v47 = vsel %vm948_vm2, %v8912_v57, %v8913_v58  ;;  %v13140_v5 = vld [vmem:[%s18564_s1 + $0xe68] ss:$8 sps:$4 sm:$0xff]   ;;  %v13144_v37 = vld [vmem:[%s18564_s1 + $0xe58] ss:$8 sps:$4 sm:$0xff]  }
0x2179   : > { %11246 = vmatprep.subr.bf16.mxu1 %v13119_v28  ;;  %v13141_v23 = vld [vmem:[%s18564_s1 + $0xbe0] ss:$8 sps:$4 sm:$0xff]   ;;  %v13142_v8 = vld [vmem:[%s18564_s1 + $0xc50] ss:$8 sps:$4 sm:$0xff]  }
0x217a   : > { %v13145_v55 = vld [vmem:[%s18564_s1 + $0xbd0] ss:$8 sps:$4 sm:$0xff]   ;;  %v13147_v42 = vld [vmem:[%s18564_s1 + $0xc40] ss:$8 sps:$4 sm:$0xff]  }
0x217b   : > { %11313 = vmatpush3.bf16.msra.mxu0 %v13120_v29  ;;  %v13146_v41 = vld [vmem:[%s18564_s1 + $0xec8] ss:$8 sps:$4 sm:$0xff]   ;;  %v13150_v48 = vld [vmem:[%s18564_s1 + $0xeb8] ss:$8 sps:$4 sm:$0xff]  }
0x217c   : > { %11247 = vmatpush3.bf16.msra.mxu1 %v13121_v13  ;;  %11314 = vmatprep.subr.bf16.mxu0 %v13122_v45  ;;  %v13148_v46 = vld [vmem:[%s18564_s1 + $0xe48] ss:$8 sps:$4 sm:$0xff]   ;;  %v13152_v60 = vld [vmem:[%s18564_s1 + $0xe38] ss:$8 sps:$4 sm:$0xff]  }
0x217d   : > { %11248 = vmatprep.subr.bf16.mxu1 %v13123_v16  ;;  %v13149_v39 = vld [vmem:[%s18564_s1 + $0xbc0] ss:$8 sps:$4 sm:$0xff]   ;;  %v13151_v4 = vld [vmem:[%s18564_s1 + $0xc30] ss:$8 sps:$4 sm:$0xff]  }
0x217e   : > { %v13153_v52 = vld [vmem:[%s18564_s1 + $0xbb0] ss:$8 sps:$4 sm:$0xff]   ;;  %v13155_v31 = vld [vmem:[%s18564_s1 + $0xc20] ss:$8 sps:$4 sm:$0xff]  }
0x217f   : > { %11315 = vmatpush3.bf16.msra.mxu0 %v13124_v56  ;;  %v13154_v7 = vld [vmem:[%s18564_s1 + $0xea8] ss:$8 sps:$4 sm:$0xff]   ;;  %v13158_v29 = vld [vmem:[%s18564_s1 + $0xe98] ss:$8 sps:$4 sm:$0xff]  }
0x2180   : > { %11249 = vmatpush3.bf16.msra.mxu1 %v13125_v26  ;;  %11316 = vmatprep.subr.bf16.mxu0 %v13126_v15  ;;  %v13156_v32 = vld [vmem:[%s18564_s1 + $0xe28] ss:$8 sps:$4 sm:$0xff]   ;;  %v13160_v45 = vld [vmem:[%s18564_s1 + $0xe18] ss:$8 sps:$4 sm:$0xff]  }
0x2181   : > { %11250 = vmatprep.subr.bf16.mxu1 %v13127_v33  ;;  %v13157_v28 = vld [vmem:[%s18564_s1 + $0xba0] ss:$8 sps:$4 sm:$0xff]   ;;  %v13159_v13 = vld [vmem:[%s18564_s1 + $0xc10] ss:$8 sps:$4 sm:$0xff]  }
0x2182   : > { %v13161_v16 = vld [vmem:[%s18564_s1 + $0xb90] ss:$8 sps:$4 sm:$0xff]   ;;  %v13163_v56 = vld [vmem:[%s18564_s1 + $0xc00] ss:$8 sps:$4 sm:$0xff]  }
0x2183   : > { %11317 = vmatpush3.bf16.msra.mxu0 %v13128_v49  ;;  %v13162_v59 = vld [vmem:[%s18564_s1 + $0xe88] ss:$8 sps:$4 sm:$0xff]   ;;  %v13166_v18 = vld [vmem:[%s18564_s1 + $0xe78] ss:$8 sps:$4 sm:$0xff]  }
0x2184   : > { %11251 = vmatpush3.bf16.msra.mxu1 %v13129_v25  ;;  %11318 = vmatprep.subr.bf16.mxu0 %v13130_v53  ;;  %v13164_v26 = vld [vmem:[%s18564_s1 + $0xe08] ss:$8 sps:$4 sm:$0xff]   ;;  %v13168_v33 = vld [vmem:[%s18564_s1 + $0xdf8] ss:$8 sps:$4 sm:$0xff]  }
0x2185   : > { %11252 = vmatprep.subr.bf16.mxu1 %v13131_v10  ;;  %v13165_v15 = vld [vmem:[%s18564_s1 + $0xb80] ss:$8 sps:$4 sm:$0xff]   ;;  %v13167_v9 = vld [vmem:[%s18564_s1 + $0xbf0] ss:$8 sps:$4 sm:$0xff]  }
0x2186   : > { %v13169_v14 = vld [vmem:[%s18564_s1 + $0xb70] ss:$8 sps:$4 sm:$0xff]  }
0x2187   : > { %11319 = vmatpush3.bf16.msra.mxu0 %v13132_v43  ;;  %v13170_v50 = vld [vmem:[%s18564_s1 + $0xd78] ss:$8 sps:$4 sm:$0xff]  }
0x2188   : > { %11253 = vmatpush3.bf16.msra.mxu1 %v13133_v0  ;;  %11320 = vmatprep.subr.bf16.mxu0 %v13134_v63 }
0x2189   : > { %11254 = vmatprep.subr.bf16.mxu1 %v13135_v30 }
0x218b   : > { %11321 = vmatpush3.bf16.msra.mxu0 %v13136_v21 }
0x218c   : > { %11255 = vmatpush3.bf16.msra.mxu1 %v13137_v19  ;;  %11344 = vmatprep.subr.bf16.mxu0 %v13138_v38 }
0x218d   : > { %11284 = vmatprep.subr.bf16.mxu1 %v13139_v40 }
0x218e   : > { %9128 = vmatmul.mubr.bf16.vlgmr.msra.gmra.mxu0 %v8917_v36 }
0x218f   : > { %9005 = vmatmul.mubr.bf16.vlgmr.msra.gmra.mxu1 %v8899_v12  ;;  %11345 = vmatpush3.bf16.msra.mxu0 %v13140_v5 }
0x2190   : > { %11285 = vmatpush3.bf16.msra.mxu1 %v13141_v23  ;;  %9086 = vmatprep.mubr.bf16.mxu1 %v8914_v47 }
0x2191   : > { %11286 = vmatprep.subr.bf16.mxu1 %v13142_v8  ;;  %11346 = vmatprep.subr.bf16.mxu0 %v13143_v51 }
0x2193   : > { %11347 = vmatpush3.bf16.msra.mxu0 %v13144_v37 }
0x2194   : > { %11287 = vmatpush3.bf16.msra.mxu1 %v13145_v55  ;;  %11348 = vmatprep.subr.bf16.mxu0 %v13146_v41 }
0x2195   : > { %11288 = vmatprep.subr.bf16.mxu1 %v13147_v42 }
0x2197   : > { %11349 = vmatpush3.bf16.msra.mxu0 %v13148_v46 }
0x2198   : > { %11289 = vmatpush3.bf16.msra.mxu1 %v13149_v39  ;;  %11350 = vmatprep.subr.bf16.mxu0 %v13150_v48  ;;  %v13171_v48 = vld [vmem:[%s18564_s1 + $0xd88] ss:$8 sps:$4 sm:$0x3f]  }
0x2199   : > { %11290 = vmatprep.subr.bf16.mxu1 %v13151_v4  ;;  %v13172_v4 = vld [vmem:[%s18564_s1 + $0xd98] ss:$8 sps:$4 sm:$0xff]  }
0x219b   : > { %11351 = vmatpush3.bf16.msra.mxu0 %v13152_v60  ;;  %v13173_v60 = vld [vmem:[%s18564_s1 + $0xda8] ss:$8 sps:$4 sm:$0x3f]  }
0x219c   : > { %11291 = vmatpush3.bf16.msra.mxu1 %v13153_v52  ;;  %11352 = vmatprep.subr.bf16.mxu0 %v13154_v7  ;;  %v13174_v52 = vld [vmem:[%s18564_s1 + $0xdb8] ss:$8 sps:$4 sm:$0xff]   ;;  %v13175_v7 = vld [vmem:[%s18564_s1 + $0xdc8] ss:$8 sps:$4 sm:$0x3f]  }
0x219d   : > { %11292 = vmatprep.subr.bf16.mxu1 %v13155_v31  ;;  %v13176_v31 = vld [vmem:[%s18564_s1 + $0xdd8] ss:$8 sps:$4 sm:$0xff]  }
0x219f   : > { %11353 = vmatpush3.bf16.msra.mxu0 %v13156_v32  ;;  %v13177_v32 = vld [vmem:[%s18564_s1 + $0xfe8] ss:$8 sps:$4 sm:$0xff]  }
0x21a0   : > { %11293 = vmatpush3.bf16.msra.mxu1 %v13157_v28  ;;  %11354 = vmatprep.subr.bf16.mxu0 %v13158_v29  ;;  %v13178_v28 = vld [vmem:[%s18564_s1 + $0xde8] ss:$8 sps:$4 sm:$0x3f]  }
0x21a1   : > { %11294 = vmatprep.subr.bf16.mxu1 %v13159_v13  ;;  %v13179_v29 = vld [vmem:[%s18564_s1 + $0xf68] ss:$8 sps:$4 sm:$0xff]   ;;  %v13180_v13 = vld [vmem:[%s18564_s1 + $0xfd8] ss:$8 sps:$4 sm:$0xff]  }
0x21a3   : > { %11355 = vmatpush3.bf16.msra.mxu0 %v13160_v45  ;;  %v13181_v45 = vld [vmem:[%s18564_s1 + $0xf58] ss:$8 sps:$4 sm:$0xff]  }
0x21a4   : > { %11295 = vmatpush3.bf16.msra.mxu1 %v13161_v16  ;;  %11356 = vmatprep.subr.bf16.mxu0 %v13162_v59  ;;  %v13182_v16 = vld [vmem:[%s18564_s1 + $0xfc8] ss:$8 sps:$4 sm:$0xff]  }
0x21a5   : > { %11296 = vmatprep.subr.bf16.mxu1 %v13163_v56  ;;  %v13183_v59 = vld [vmem:[%s18564_s1 + $0xf48] ss:$8 sps:$4 sm:$0xff]   ;;  %v13184_v56 = vld [vmem:[%s18564_s1 + $0xfb8] ss:$8 sps:$4 sm:$0xff]  }
0x21a7   : > { %11357 = vmatpush3.bf16.msra.mxu0 %v13164_v26  ;;  %v13185_v26 = vld [vmem:[%s18564_s1 + $0xf38] ss:$8 sps:$4 sm:$0xff]  }
0x21a8   : > { %11297 = vmatpush3.bf16.msra.mxu1 %v13165_v15  ;;  %11358 = vmatprep.subr.bf16.mxu0 %v13166_v18  ;;  %v13186_v15 = vld [vmem:[%s18564_s1 + $0xfa8] ss:$8 sps:$4 sm:$0xff]  }
0x21a9   : > { %11298 = vmatprep.subr.bf16.mxu1 %v13167_v9  ;;  %v13187_v18 = vld [vmem:[%s18564_s1 + $0xf28] ss:$8 sps:$4 sm:$0xff]   ;;  %v13188_v9 = vld [vmem:[%s18564_s1 + $0xf98] ss:$8 sps:$4 sm:$0xff]  }
0x21ab   : > { %11359 = vmatpush3.bf16.msra.mxu0 %v13168_v33  ;;  %v13189_v33 = vld [vmem:[%s18564_s1 + $0xf18] ss:$8 sps:$4 sm:$0xff]  }
0x21ac   : > { %11299 = vmatpush3.bf16.msra.mxu1 %v13169_v14  ;;  %v13190_v14 = vld [vmem:[%s18564_s1 + $0xf88] ss:$8 sps:$4 sm:$0xff]  }
0x21af   : > { %9087 = vmatmul.mubr.bf16.vlgmr.msra.gmra.mxu1 %v18288_v2 }
0x21b0   : > { %11628 = vmatprep.mubr.msk.bf16.mxu1 %vm3866_vm11, %v13170_v50  ;;  %v13191_v50 = vld [vmem:[%s18564_s1 + $0xf08] ss:$8 sps:$4 sm:$0xff]  }
0x222e   : > { %v11278_v53 = vpop.f32.mrf.mxu0 }
0x222f   : > { %v11234_v49 = vpop.f32.mrf.mxu1 }
0x2230   : > { %v11279_v10 = vpop.f32.mrf.mxu0 }
0x2231   : > { %v11235_v61 = vpop.f32.mrf.mxu1  ;;  %v11280_v21 = vadd.f32 %v11279_v10, %v11278_v53 }
0x2232   : > { %v11281_v24 = vpop.f32.mrf.mxu0  ;;  %v11236_v44 = vadd.f32 %v11235_v61, %v11234_v49  ;;  %v13192_v49 = vld [vmem:[%s18564_s1 + $0xf78] ss:$8 sps:$4 sm:$0xff]  }
0x2233   : > { %v11237_v25 = vpop.f32.mrf.mxu1  ;;  %v13193_v61 = vld [vmem:[%s18564_s1 + $0xef8] ss:$8 sps:$4 sm:$0xff]  }
0x2234   : > { %v11282_v35 = vpop.f32.mrf.mxu0  ;;  %v8966_v63 = vadd.f32 %v11236_v44, %v14486_v17 }
0x2235   : > { %v11238_v1 = vpop.f32.mrf.mxu1  ;;  %v11283_v12 = vadd.f32 %v11282_v35, %v11281_v24 }
0x2236   : > { %v11239_v27 = vadd.f32 %v11238_v1, %v11237_v25 }
0x2238   : > { %v8969_v57 = vadd.f32 %v11239_v27, %v14486_v17 }
0x224e   : > { %v11322_v54 = vpop.f32.mrf.mxu0 }
0x224f   : > { %v11256_v20 = vpop.f32.mrf.mxu1 }
0x2250   : > { %v11323_v30 = vpop.f32.mrf.mxu0 }
0x2251   : > { %v11257_v22 = vpop.f32.mrf.mxu1  ;;  %v11324_v47 = vadd.f32 %v11323_v30, %v11322_v54 }
0x2252   : > { %v11258_v2 = vadd.f32 %v11257_v22, %v11256_v20  ;;  %v11325_v58 = vpop.f32.mrf.mxu0 }
0x2253   : > { %v11259_v43 = vpop.f32.mrf.mxu1 }
0x2254   : > { %v9007_v62 = vadd.f32 %v11258_v2, %v8966_v63  ;;  %v11326_v23 = vpop.f32.mrf.mxu0 }
0x2255   : > { %v11260_v0 = vpop.f32.mrf.mxu1  ;;  %v11327_v41 = vadd.f32 %v11326_v23, %v11325_v58 }
0x2256   : > { %v11261_v34 = vadd.f32 %v11260_v0, %v11259_v43  ;;  %v9048_v38 = vadd.f32 %v11280_v21, %v9007_v62 }
0x2258   : > { %v9010_v6 = vadd.f32 %v11261_v34, %v8969_v57 }
0x225a   : > { %v9051_v37 = vadd.f32 %v11283_v12, %v9010_v6 }
0x226f   : > { %v11300_v3 = vpop.f32.mrf.mxu1 }
0x2271   : > { %v11301_v19 = vpop.f32.mrf.mxu1 }
0x2272   : > { %v11302_v36 = vadd.f32 %v11301_v19, %v11300_v3 }
0x2273   : > { %v11303_v40 = vpop.f32.mrf.mxu1 }
0x2274   : > { %v9089_v5 = vadd.f32 %v11302_v36, %v9048_v38 }
0x2275   : > { %v11304_v8 = vpop.f32.mrf.mxu1 }
0x2276   : > { %v9130_v51 = vadd.f32 %v11324_v47, %v9089_v5  ;;  %v11305_v55 = vadd.f32 %v11304_v8, %v11303_v40 }
0x2278   : > { %v9136_v42 = vmax.f32 %v9130_v51, 0.0  ;;  %v9092_v46 = vadd.f32 %v11305_v55, %v9051_v37 }
0x227a   : > { %10389 = vst [vmem:[%s14495_s28 + $0x30] sm:$0xff] %v9136_v42  ;;  %v9133_v17 = vadd.f32 %v11327_v41, %v9092_v46 }
0x227c   : > { %v9137_v39 = vmax.f32 %v9133_v17, 0.0 }
0x227e   : > { %10390 = vst [vmem:[%s14495_s28 + $0x38] sm:$0x3f] %v9137_v39  ;;  %11624 = vmatprep.subr.msk.mxu1 %vm948_vm2, %v9137_v39 }
0x227f   : > { %11625 = vmatpush3.msk.msra.mxu1 %vm948_vm2, %v9137_v39 }
0x2280   : > { %11626 = vmatprep.subr.mxu1 %v9136_v42 }
0x2281   : > { %11627 = vmatpush3.msra.mxu1 %v9136_v42 }
0x2282   : > { %11629 = vmatmul.mubr.msk.bf16.vlgmr.msra.gmra.mxu1 %vm3866_vm11, %v13171_v48  ;;  %11632 = vmatprep.subr.msk.mxu1 %vm948_vm2, %v9137_v39 }
0x2283   : > { %11633 = vmatpush3.msk.msra.mxu1 %vm948_vm2, %v9137_v39  ;;  %11636 = vmatprep.mubr.msk.bf16.mxu1 %vm3866_vm11, %v13172_v4 }
0x2284   : > { %11634 = vmatprep.subr.mxu1 %v9136_v42 }
0x2285   : > { %11635 = vmatpush3.msra.mxu1 %v9136_v42 }
0x2286   : > { %11640 = vmatprep.subr.msk.mxu1 %vm948_vm2, %v9137_v39 }
0x228a   : > { %11637 = vmatmul.mubr.msk.bf16.vlgmr.msra.gmra.mxu1 %vm3866_vm11, %v13173_v60 }
0x228b   : > { %11641 = vmatpush3.msk.msra.mxu1 %vm948_vm2, %v9137_v39  ;;  %11644 = vmatprep.mubr.msk.bf16.mxu1 %vm3866_vm11, %v13174_v52 }
0x228c   : > { %11642 = vmatprep.subr.mxu1 %v9136_v42 }
0x228d   : > { %11643 = vmatpush3.msra.mxu1 %v9136_v42 }
0x228e   : > { %11648 = vmatprep.subr.msk.mxu1 %vm948_vm2, %v9137_v39 }
0x2292   : > { %11645 = vmatmul.mubr.msk.bf16.vlgmr.msra.gmra.mxu1 %vm3866_vm11, %v13175_v7 }
0x2293   : > { %11649 = vmatpush3.msk.msra.mxu1 %vm948_vm2, %v9137_v39  ;;  %11652 = vmatprep.mubr.msk.bf16.mxu1 %vm3866_vm11, %v13176_v31 }
0x2294   : > { %11650 = vmatprep.subr.mxu1 %v9136_v42 }
0x2295   : > { %11651 = vmatpush3.msra.mxu1 %v9136_v42 }
0x2296   : > { %11372 = vmatprep.subr.bf16.mxu1 %v13177_v32 }
0x229a   : > { %11653 = vmatmul.mubr.msk.bf16.vlgmr.msra.gmra.mxu1 %vm3866_vm11, %v13178_v28 }
0x229b   : > { %11373 = vmatpush3.bf16.msra.mxu1 %v13179_v29 }
0x229c   : > { %11374 = vmatprep.subr.bf16.mxu1 %v13180_v13 }
0x229f   : > { %11375 = vmatpush3.bf16.msra.mxu1 %v13181_v45 }
0x22a0   : > { %11376 = vmatprep.subr.bf16.mxu1 %v13182_v16 }
0x22a3   : > { %11377 = vmatpush3.bf16.msra.mxu1 %v13183_v59 }
0x22a4   : > { %11378 = vmatprep.subr.bf16.mxu1 %v13184_v56 }
0x22a7   : > { %11379 = vmatpush3.bf16.msra.mxu1 %v13185_v26 }
0x22a8   : > { %11380 = vmatprep.subr.bf16.mxu1 %v13186_v15 }
0x22ab   : > { %11381 = vmatpush3.bf16.msra.mxu1 %v13187_v18 }
0x22ac   : > { %11382 = vmatprep.subr.bf16.mxu1 %v13188_v9 }
0x22af   : > { %11383 = vmatpush3.bf16.msra.mxu1 %v13189_v33 }
0x22b0   : > { %11384 = vmatprep.subr.bf16.mxu1 %v13190_v14 }
0x22b3   : > { %11385 = vmatpush3.bf16.msra.mxu1 %v13191_v50 }
0x22b4   : > { %11386 = vmatprep.subr.bf16.mxu1 %v13192_v49 }
0x22b7   : > { %11387 = vmatpush3.bf16.msra.mxu1 %v13193_v61 }
0x2342   : > { %v11630_v25 = vpop.f32.mrf.mxu1 }
0x2344   : > { %v9210_v53 = vpop.f32.mrf.mxu1 }
0x2346   : > { %v11631_v1 = vpop.f32.mrf.mxu1 }
0x2347   : > { %v9472_v30 = vpack.c.bf16 %v11631_v1, %v11630_v25 }
0x2348   : > { %v9213_v10 = vpop.f32.mrf.mxu1 }
0x2349   : > { %v9468_v44 = vpack.c.bf16 %v9213_v10, %v9210_v53 }
0x234a   : > { %v11638_v20 = vpop.f32.mrf.mxu1 }
0x234c   : > { %v9291_v24 = vpop.f32.mrf.mxu1 }
0x234e   : > { %v11639_v22 = vpop.f32.mrf.mxu1 }
0x234f   : > { %v9473_v2 = vpack.c.bf16 %v11639_v22, %v11638_v20 }
0x2350   : > { %v9294_v35 = vpop.f32.mrf.mxu1 }
0x2351   : > { %v9469_v43 = vpack.c.bf16 %v9294_v35, %v9291_v24 }
0x2352   : > { %v11646_v54 = vpop.f32.mrf.mxu1 }
0x2353   : > { %9508 = vmatprep.mubr.bf16.mxu0 %v9469_v43 }
0x2354   : > { %v9372_v0 = vpop.f32.mrf.mxu1  ;;  %9509 = vmatmul.mubr.bf16.vlgmr.msra.gmra.mxu0 %v9468_v44 }
0x2355   : > { %9516 = vmatprep.mubr.bf16.mxu0 %v9473_v2 }
0x2356   : > { %v11647_v63 = vpop.f32.mrf.mxu1 }
0x2357   : > { %v9474_v6 = vpack.c.bf16 %v11647_v63, %v11646_v54 }
0x2358   : > { %v9375_v27 = vpop.f32.mrf.mxu1 }
0x2359   : > { %v9470_v58 = vpack.c.bf16 %v9375_v27, %v9372_v0 }
0x235a   : > { %v11654_v62 = vpop.f32.mrf.mxu1 }
0x235c   : > { %v9453_v34 = vpop.f32.mrf.mxu1  ;;  %9517 = vmatmul.mubr.bf16.gmra.mxu0 %v9472_v30 }
0x235e   : > { %v11655_v3 = vpop.f32.mrf.mxu1 }
0x235f   : > { %v9475_v19 = vpack.c.bf16 %v11655_v3, %v11654_v62 }
0x2360   : > { %v9456_v21 = vpop.f32.mrf.mxu1 }
0x2361   : > { %v9471_v57 = vpack.c.bf16 %v9456_v21, %v9453_v34 }
0x2363   : > { %9557 = vmatprep.mubr.bf16.mxu1 %v9471_v57 }
0x2364   : > { %9558 = vmatmul.mubr.bf16.vlgmr.msra.gmra.mxu1 %v9470_v58 }
0x2365   : > { %9565 = vmatprep.mubr.bf16.mxu1 %v9475_v19 }
0x236c   : > { %9566 = vmatmul.mubr.bf16.gmra.mxu1 %v9474_v6 }
0x2414   : > { %v11360_v38 = vpop.f32.mrf.mxu0 }
0x2416   : > { %v11361_v36 = vpop.f32.mrf.mxu0 }
0x2417   : > { %v11362_v5 = vadd.f32 %v11361_v36, %v11360_v38 }
0x2418   : > { %v11363_v40 = vpop.f32.mrf.mxu0 }
0x2419   : > { %v9511_v37 = vadd.f32 %v11362_v5, %v14988_v11 }
0x241a   : > { %v11364_v12 = vpop.f32.mrf.mxu0 }
0x241b   : > { %v11365_v55 = vadd.f32 %v11364_v12, %v11363_v40 }
0x241c   : > { %v11366_v47 = vpop.f32.mrf.mxu0 }
0x241d   : > { %v9514_v48 = vadd.f32 %v11365_v55, %v14988_v11 }
0x241e   : > { %v11367_v23 = vpop.f32.mrf.mxu0 }
0x241f   : > { %v11368_v4 = vadd.f32 %v11367_v23, %v11366_v47 }
0x2420   : > { %v11369_v42 = vpop.f32.mrf.mxu0 }
0x2421   : > { %v9519_v28 = vadd.f32 %v11368_v4, %v14988_v11 }
0x2422   : > { %v11370_v52 = vpop.f32.mrf.mxu0 }
0x2423   : > { %v11371_v29 = vadd.f32 %v11370_v52, %v11369_v42 }
0x2424   : > { %v11388_v8 = vpop.f32.mrf.mxu1 }
0x2425   : > { %v9522_v56 = vadd.f32 %v11371_v29, %v14988_v11 }
0x2426   : > { %v11389_v51 = vpop.f32.mrf.mxu1 }
0x2427   : > { %v11390_v41 = vadd.f32 %v11389_v51, %v11388_v8 }
0x2428   : > { %v11391_v46 = vpop.f32.mrf.mxu1 }
0x2429   : > { %v9560_v17 = vadd.f32 %v11390_v41, %v9511_v37 }
0x242a   : > { %v11392_v39 = vpop.f32.mrf.mxu1 }
0x242b   : > { %12136 = vtanh.f32 %v9560_v17  ;;  %v11393_v60 = vadd.f32 %v11392_v39, %v11391_v46 }
0x242c   : > { %v11394_v7 = vpop.f32.mrf.mxu1 }
0x242d   : > { %v9563_v31 = vadd.f32 %v11393_v60, %v9514_v48 }
0x242e   : > { %v11395_v32 = vpop.f32.mrf.mxu1 }
0x242f   : > { %12138 = vtanh.f32 %v9563_v31  ;;  %v11396_v13 = vadd.f32 %v11395_v32, %v11394_v7 }
0x2430   : > { %v11397_v45 = vpop.f32.mrf.mxu1 }
0x2431   : > { %v9568_v16 = vadd.f32 %v11396_v13, %v9519_v28 }
0x2432   : > { %v11398_v59 = vpop.f32.mrf.mxu1 }
0x2433   : > { %12140 = vtanh.f32 %v9568_v16  ;;  %v11399_v26 = vadd.f32 %v11398_v59, %v11397_v45 }
0x2435   : > { %v9571_v15 = vadd.f32 %v11399_v26, %v9522_v56 }
0x2437   : > { %12142 = vtanh.f32 %v9571_v15 }
0x2438   : > { %v12137_v18 = vpop.eup %12136 }
0x2439   : > { %10403 = vst [vmem:[%s14998_s14 + $0x60] sm:$0xff] %v12137_v18 }
0x243c   : > { %v12139_v9 = vpop.eup %12138 }
0x243d   : > { %10404 = vst [vmem:[%s14998_s14 + $0x68] sm:$0xff] %v12139_v9 }
0x2440   : > { %v12141_v33 = vpop.eup %12140 }
0x2441   : > { %10405 = vst [vmem:[%s14998_s14 + $0x70] sm:$0xff] %v12141_v33 }
0x2444   : > { %v12143_v14 = vpop.eup %12142 }
0x2445   : > { %10406 = vst [vmem:[%s14998_s14 + $0x78] sm:$0xf] %v12143_v14 }
0x2446 PF: > { %s19_s27 = sadd.s32 1, %s13200_s27  }
0x2447   : > { %p16_p4 = scmp.ge.s32.totalorder %s19_s27, 4  }
0x2449   :  { %18 = sbr.rel (!%p16_p4) target bundleno = 1 (0x1), region = 154 }

</bundles_post_ra>
